<compile_context>
chip_gen: v7x
topology: tpu7x:2x2x1
jax: 0.10.0
libtpu: 0.0.40
codegen_flags: <defaults>
</compile_context>

<pallas_src>
import jax
import jax.numpy as jnp
from jax.experimental import pallas as pl
from jax.experimental.pallas import tpu as pltpu

EXPANSION = 4


# --------------------------------------------------------------------------- #
# Kernel                                                                       #
# --------------------------------------------------------------------------- #
def make_bottleneck_kernel(TB, H, W, has_proj):
    """Kernel specialized for block-batch TB, spatial size (H, W) and shortcut type."""

    def kernel(*refs):
        if has_proj:
            (x_ref, w1_ref, s1_ref, b1_ref,
             w2_ref, s2_ref, b2_ref,
             w3_ref, s3_ref, b3_ref,
             ws_ref, ss_ref, bs_ref,
             out_ref, pad_ref) = refs
        else:
            (x_ref, w1_ref, s1_ref, b1_ref,
             w2_ref, s2_ref, b2_ref,
             w3_ref, s3_ref, b3_ref,
             out_ref, pad_ref) = refs

        Cin = x_ref.shape[-1]
        P = w1_ref.shape[-1]
        Cout = w3_ref.shape[-1]
        M = TB * H * W
        f32 = jnp.float32
        bf16 = jnp.bfloat16

        # ---- load TB samples, channels on lanes ------------------------------ #
        x2 = x_ref[...].reshape(M, Cin)                        # (M, Cin) bf16

        # ---- conv1 (1x1) + bn1 + relu ----------------------------------------- #
        h1 = jnp.dot(x2, w1_ref[...], preferred_element_type=f32)
        h1 = jnp.maximum(h1 * s1_ref[...] + b1_ref[...], 0.0)  # (M, P) f32

        # ---- conv2 (3x3, stride=1, pad=1) + bn2 + relu ------------------------- #
        # bf16 zero-padded activation (halo of 1) in VMEM.  The interior is fully
        # rewritten every grid step, so only the halo needs zeroing; it is zeroed
        # every step (not just on program_id==0) so the kernel remains correct
        # when the grid is split across TensorCores.
        zrow = jnp.zeros((TB, 1, W + 2, P), pad_ref.dtype)
        zcol = jnp.zeros((TB, H, 1, P), pad_ref.dtype)
        pad_ref[:, pl.ds(0, 1), :, :] = zrow
        pad_ref[:, pl.ds(H + 1, 1), :, :] = zrow
        pad_ref[:, pl.ds(1, H), pl.ds(0, 1), :] = zcol
        pad_ref[:, pl.ds(1, H), pl.ds(W + 1, 1), :] = zcol
        pad_ref[:, pl.ds(1, H), pl.ds(1, W), :] = (
            h1.astype(bf16).reshape(TB, H, W, P))

        # im2col: concatenate the 9 shifted windows along the lane axis and do a
        # single K = 9*P matmul (fills the MXU contraction depth, removes the
        # per-tap accumulation chain).
        cols = jnp.concatenate(
            [pad_ref[:, pl.ds(dy, H), pl.ds(dx, W), :].reshape(M, P)
             for dy in range(3) for dx in range(3)],
            axis=-1)                                           # (M, 9*P) bf16
        h2 = jnp.dot(cols, w2_ref[...], preferred_element_type=f32)
        h2 = jnp.maximum(h2 * s2_ref[...] + b2_ref[...], 0.0).astype(bf16)

        # ---- conv3 (1x1) + bn3 -------------------------------------------------- #
        h3 = jnp.dot(h2, w3_ref[...], preferred_element_type=f32)
        h3 = h3 * s3_ref[...] + b3_ref[...]                    # (M, Cout) f32

        # ---- shortcut ------------------------------------------------------------ #
        if has_proj:
            sc = jnp.dot(x2, ws_ref[...], preferred_element_type=f32)
            sc = sc * ss_ref[...] + bs_ref[...]
        else:
            # Identity path: activations travel as bf16 between blocks, so the
            # residual add uses the same bf16 values conv1 saw.
            sc = x2.astype(f32)

        out_ref[...] = (jnp.maximum(h3 + sc, 0.0)
                        .astype(out_ref.dtype)
                        .reshape(TB, H, W, Cout))

    return kernel


# --------------------------------------------------------------------------- #
# Wrapper                                                                      #
# --------------------------------------------------------------------------- #
def _pick_block_batch(B, max_tb=4):
    """Largest divisor of B that is <= max_tb while keeping >= 2 grid blocks."""
    if B < 2:
        return 1
    best = 1
    for tb in range(1, min(B // 2, max_tb) + 1):
        if B % tb == 0:
            best = tb
    return best


def bottleneck_forward(x_nhwc, params, stride=1, eps=1e-5, block_batch=None,
                       out_dtype=jnp.bfloat16):
    """Fused Bottleneck forward.

    x_nhwc: [B, H, W, Cin] activations (bf16 preferred; cast if not).
    Returns NHWC activations in `out_dtype` (bf16 by default).
    """
    if stride != 1:
        # TODO(synk): strided conv2 / strided shortcut not implemented in-kernel.
        raise NotImplementedError("stride != 1 not supported by this kernel")

    B, H, W, Cin = x_nhwc.shape
    P = params["w1"].shape[0]
    Cout = params["w3"].shape[0]
    has_proj = params["ws"] is not None
    if not has_proj and Cin != Cout:
        raise ValueError("identity shortcut requires Cin == expansion * planes")
    bf16 = jnp.bfloat16

    TB = block_batch if block_batch is not None else _pick_block_batch(B)
    assert B % TB == 0, (B, TB)

    def fold_bn(p):
        g, b, m, v = p
        s = g / jnp.sqrt(v + eps)
        return (s.reshape(1, -1).astype(jnp.float32),
                (b - m * s).reshape(1, -1).astype(jnp.float32))

    x = x_nhwc.astype(bf16)                                              # (B,H,W,Cin)
    w1_t = jnp.transpose(params["w1"][:, :, 0, 0], (1, 0)).astype(bf16)  # (Cin, P)
    # (O,I,3,3) -> (3,3,I,O) -> (9*I, O): rows ordered (dy, dx, cin) to match the
    # in-kernel window concatenation order.
    w2_t = jnp.transpose(params["w2"], (2, 3, 1, 0)).reshape(9 * P, P).astype(bf16)
    w3_t = jnp.transpose(params["w3"][:, :, 0, 0], (1, 0)).astype(bf16)  # (P, Cout)
    s1, b1 = fold_bn(params["bn1"])
    s2, b2 = fold_bn(params["bn2"])
    s3, b3 = fold_bn(params["bn3"])

    # Weights / BN params never change block index -> constant index_map, DMA'd once.
    # TODO(synk): pipeline_mode=pl.Buffered(1) would drop the unused second pipeline
    # buffer for these pinned blocks (VMEM headroom on v7x's 64 MiB).
    def pinned_spec(shape):
        nd = len(shape)
        return pl.BlockSpec(shape, lambda b, _nd=nd: (0,) * _nd)

    args = [x, w1_t, s1, b1, w2_t, s2, b2, w3_t, s3, b3]
    in_specs = [
        pl.BlockSpec((TB, H, W, Cin), lambda b: (b, 0, 0, 0)),
        pinned_spec(w1_t.shape), pinned_spec(s1.shape), pinned_spec(b1.shape),
        pinned_spec(w2_t.shape), pinned_spec(s2.shape), pinned_spec(b2.shape),
        pinned_spec(w3_t.shape), pinned_spec(s3.shape), pinned_spec(b3.shape),
    ]
    if has_proj:
        ws_t = jnp.transpose(params["ws"][:, :, 0, 0], (1, 0)).astype(bf16)  # (Cin, Cout)
        ss, bs = fold_bn(params["bns"])
        args += [ws_t, ss, bs]
        in_specs += [pinned_spec(ws_t.shape), pinned_spec(ss.shape), pinned_spec(bs.shape)]

    grid_spec = pltpu.PrefetchScalarGridSpec(
        num_scalar_prefetch=0,
        grid=(B // TB,),
        in_specs=in_specs,
        out_specs=pl.BlockSpec((TB, H, W, Cout), lambda b: (b, 0, 0, 0)),
        scratch_shapes=[pltpu.VMEM((TB, H + 2, W + 2, P), bf16)],
    )

    return pl.pallas_call(
        make_bottleneck_kernel(TB, H, W, has_proj),
        out_shape=jax.ShapeDtypeStruct((B, H, W, Cout), out_dtype),
        grid_spec=grid_spec,
        compiler_params=pltpu.CompilerParams(dimension_semantics=("parallel",)),
    )(*args)


# --------------------------------------------------------------------------- #
# Parameters & pure-JAX reference                                             #
# --------------------------------------------------------------------------- #
def init_params(key, in_planes, planes, stride=1, expansion=EXPANSION):
    out_planes = expansion * planes
    ks = jax.random.split(key, 8)

    def conv_w(k, cout, cin, kh, kw):
        fan_in = cin * kh * kw
        return jax.random.normal(k, (cout, cin, kh, kw), jnp.float32) * (2.0 / fan_in) ** 0.5

    def bn_p(k, c):
        k1, k2, k3, k4 = jax.random.split(k, 4)
        return (jax.random.uniform(k1, (c,), jnp.float32, 0.5, 1.5),   # gamma
                0.1 * jax.random.normal(k2, (c,), jnp.float32),        # beta
                0.1 * jax.random.normal(k3, (c,), jnp.float32),        # running_mean
                jax.random.uniform(k4, (c,), jnp.float32, 0.5, 1.5))   # running_var

    params = {
        "w1": conv_w(ks[0], planes, in_planes, 1, 1), "bn1": bn_p(ks[1], planes),
        "w2": conv_w(ks[2], planes, planes, 3, 3),    "bn2": bn_p(ks[3], planes),
        "w3": conv_w(ks[4], out_planes, planes, 1, 1), "bn3": bn_p(ks[5], out_planes),
        "ws": None, "bns": None,
    }
    if stride != 1 or in_planes != out_planes:
        params["ws"] = conv_w(ks[6], out_planes, in_planes, 1, 1)
        params["bns"] = bn_p(ks[7], out_planes)
    return params


def bottleneck_reference(x_nchw, params, stride=1, eps=1e-5):
    """Pure-JAX NCHW reference of the PyTorch forward (eval-mode BN, bf16 conv I/O)."""
    bf16 = jnp.bfloat16

    def conv(x, w, stride=1, pad=0):
        return jax.lax.conv_general_dilated(
            x.astype(bf16), w.astype(bf16),
            window_strides=(stride, stride),
            padding=[(pad, pad), (pad, pad)],
            dimension_numbers=("NCHW", "OIHW", "NCHW"),
            preferred_element_type=jnp.float32)

    def bn(x, p):
        g, b, m, v = p
        s = (g / jnp.sqrt(v + eps))[None, :, None, None]
        return (x - m[None, :, None, None]) * s + b[None, :, None, None]

    out = jax.nn.relu(bn(conv(x_nchw, params["w1"]), params["bn1"]))
    out = jax.nn.relu(bn(conv(out, params["w2"], stride, 1), params["bn2"]))
    out = bn(conv(out, params["w3"]), params["bn3"])
    if params["ws"] is not None:
        sc = bn(conv(x_nchw, params["ws"], stride), params["bns"])
    else:
        sc = x_nchw.astype(jnp.float32)
    return jax.nn.relu(out + sc)


# --------------------------------------------------------------------------- #
# Demo / correctness check                                                     #
# --------------------------------------------------------------------------- #
if __name__ == "__main__":
    key = jax.random.PRNGKey(0)
    k_x, k_p = jax.random.split(key)

    # planes=128 keeps the im2col window pieces lane-aligned (128 lanes each);
    # in_planes != expansion*planes exercises the projection shortcut.
    batch, in_planes, planes, spatial, stride = 8, 64, 128, 8, 1
    out_planes = EXPANSION * planes  # 512

    x_nhwc = jax.random.normal(
        k_x, (batch, spatial, spatial, in_planes), jnp.float32).astype(jnp.bfloat16)
    params = init_params(k_p, in_planes, planes, stride)

    out = bottleneck_forward(x_nhwc, params, stride)          # NHWC bf16
    out = jax.block_until_ready(out)

    # Reference in NCHW f32 on the same (bf16-rounded) input values.
    x_nchw = jnp.transpose(x_nhwc.astype(jnp.float32), (0, 3, 1, 2))
    ref = bottleneck_reference(x_nchw, params, stride)        # NCHW f32
    ref_nhwc = jnp.transpose(ref, (0, 2, 3, 1))

    assert out.shape == (batch, spatial, spatial, out_planes)
    out_f32 = out.astype(jnp.float32)
    max_err = float(jnp.max(jnp.abs(out_f32 - ref_nhwc)))
    assert jnp.allclose(out_f32, ref_nhwc, atol=5e-2, rtol=5e-2), max_err

    print("KERNEL_OK")
</pallas_src>

<mosaic_0001>
module attributes {stable_mosaic.version = 11 : i64} {
  func.func @kernel(%arg0: i32, %arg1: memref<4x8x8x64xbf16, #tpu.memory_space<vmem>>, %arg2: memref<64x128xbf16, #tpu.memory_space<vmem>>, %arg3: memref<1x128xf32, #tpu.memory_space<vmem>>, %arg4: memref<1x128xf32, #tpu.memory_space<vmem>>, %arg5: memref<1152x128xbf16, #tpu.memory_space<vmem>>, %arg6: memref<1x128xf32, #tpu.memory_space<vmem>>, %arg7: memref<1x128xf32, #tpu.memory_space<vmem>>, %arg8: memref<128x512xbf16, #tpu.memory_space<vmem>>, %arg9: memref<1x512xf32, #tpu.memory_space<vmem>>, %arg10: memref<1x512xf32, #tpu.memory_space<vmem>>, %arg11: memref<64x512xbf16, #tpu.memory_space<vmem>>, %arg12: memref<1x512xf32, #tpu.memory_space<vmem>>, %arg13: memref<1x512xf32, #tpu.memory_space<vmem>>, %arg14: memref<4x8x8x512xbf16, #tpu.memory_space<vmem>>, %arg15: memref<4x10x10x128xbf16, #tpu.memory_space<vmem>>) attributes {dimension_semantics = [#tpu.dimension_semantics<parallel>], iteration_bounds = array<i64: 2>, scalar_prefetch = 0 : i64, scratch_operands = 1 : i64, tpu.core_type = #tpu.core_type<tc>, window_params = [{transform_indices = @transform_0, window_bounds = array<i64: 4, 8, 8, 64>}, {pipeline_mode = #tpu.pipeline_mode<synchronous>, transform_indices = @transform_1, window_bounds = array<i64: 64, 128>}, {pipeline_mode = #tpu.pipeline_mode<synchronous>, transform_indices = @transform_2, window_bounds = array<i64: 1, 128>}, {pipeline_mode = #tpu.pipeline_mode<synchronous>, transform_indices = @transform_3, window_bounds = array<i64: 1, 128>}, {pipeline_mode = #tpu.pipeline_mode<synchronous>, transform_indices = @transform_4, window_bounds = array<i64: 1152, 128>}, {pipeline_mode = #tpu.pipeline_mode<synchronous>, transform_indices = @transform_5, window_bounds = array<i64: 1, 128>}, {pipeline_mode = #tpu.pipeline_mode<synchronous>, transform_indices = @transform_6, window_bounds = array<i64: 1, 128>}, {pipeline_mode = #tpu.pipeline_mode<synchronous>, transform_indices = @transform_7, window_bounds = array<i64: 128, 512>}, {pipeline_mode = #tpu.pipeline_mode<synchronous>, transform_indices = @transform_8, window_bounds = array<i64: 1, 512>}, {pipeline_mode = #tpu.pipeline_mode<synchronous>, transform_indices = @transform_9, window_bounds = array<i64: 1, 512>}, {pipeline_mode = #tpu.pipeline_mode<synchronous>, transform_indices = @transform_10, window_bounds = array<i64: 64, 512>}, {pipeline_mode = #tpu.pipeline_mode<synchronous>, transform_indices = @transform_11, window_bounds = array<i64: 1, 512>}, {pipeline_mode = #tpu.pipeline_mode<synchronous>, transform_indices = @transform_12, window_bounds = array<i64: 1, 512>}, {transform_indices = @transform_13, window_bounds = array<i64: 4, 8, 8, 512>}]} {
    %c0 = arith.constant 0 : index
    %c0_0 = arith.constant 0 : index
    %c0_1 = arith.constant 0 : index
    %c0_2 = arith.constant 0 : index
    %0 = vector.load %arg1[%c0, %c0_0, %c0_1, %c0_2] : memref<4x8x8x64xbf16, #tpu.memory_space<vmem>>, vector<4x8x8x64xbf16>
    %1 = vector.shape_cast %0 : vector<4x8x8x64xbf16> to vector<256x64xbf16>
    %c0_3 = arith.constant 0 : index
    %c0_4 = arith.constant 0 : index
    %2 = vector.load %arg2[%c0_3, %c0_4] : memref<64x128xbf16, #tpu.memory_space<vmem>>, vector<64x128xbf16>
    %cst = arith.constant dense<0.000000e+00> : vector<256x128xf32>
    %3 = tpu.matmul %1, %2, %cst {dimension_numbers = #tpu.dot_dimension_numbers<[1], [0], [0], [1], [0, 0, 1, 1], [], []>} : vector<256x64xbf16>, vector<64x128xbf16>, vector<256x128xf32> -> vector<256x128xf32>
    %c0_5 = arith.constant 0 : index
    %c0_6 = arith.constant 0 : index
    %4 = vector.load %arg3[%c0_5, %c0_6] : memref<1x128xf32, #tpu.memory_space<vmem>>, vector<1x128xf32>
    %5 = vector.broadcast %4 : vector<1x128xf32> to vector<256x128xf32>
    %6 = arith.mulf %3, %5 : vector<256x128xf32>
    %c0_7 = arith.constant 0 : index
    %c0_8 = arith.constant 0 : index
    %7 = vector.load %arg4[%c0_7, %c0_8] : memref<1x128xf32, #tpu.memory_space<vmem>>, vector<1x128xf32>
    %8 = vector.broadcast %7 : vector<1x128xf32> to vector<256x128xf32>
    %9 = arith.addf %6, %8 : vector<256x128xf32>
    %cst_9 = arith.constant 0.000000e+00 : f32
    %10 = vector.broadcast %cst_9 : f32 to vector<256x128xf32>
    %11 = arith.maximumf %9, %10 : vector<256x128xf32>
    %cst_10 = arith.constant 0.000000e+00 : bf16
    %12 = vector.broadcast %cst_10 : bf16 to vector<4x1x10x128xbf16>
    %cst_11 = arith.constant 0.000000e+00 : bf16
    %13 = vector.broadcast %cst_11 : bf16 to vector<4x8x1x128xbf16>
    %c0_12 = arith.constant 0 : index
    %c0_13 = arith.constant 0 : index
    %c0_14 = arith.constant 0 : index
    %c0_15 = arith.constant 0 : index
    %14 = vector.load %arg15[%c0_12, %c0_13, %c0_14, %c0_15] : memref<4x10x10x128xbf16, #tpu.memory_space<vmem>>, vector<4x1x10x128xbf16>
    tpu.vector_store %arg15[%c0_12, %c0_13, %c0_14, %c0_15], %12 {strides = array<i32>} : memref<4x10x10x128xbf16, #tpu.memory_space<vmem>>, vector<4x1x10x128xbf16>,
    %c0_16 = arith.constant 0 : index
    %c9 = arith.constant 9 : index
    %c0_17 = arith.constant 0 : index
    %c0_18 = arith.constant 0 : index
    %15 = vector.load %arg15[%c0_16, %c9, %c0_17, %c0_18] : memref<4x10x10x128xbf16, #tpu.memory_space<vmem>>, vector<4x1x10x128xbf16>
    tpu.vector_store %arg15[%c0_16, %c9, %c0_17, %c0_18], %12 {strides = array<i32>} : memref<4x10x10x128xbf16, #tpu.memory_space<vmem>>, vector<4x1x10x128xbf16>,
    %c0_19 = arith.constant 0 : index
    %c1 = arith.constant 1 : index
    %c0_20 = arith.constant 0 : index
    %c0_21 = arith.constant 0 : index
    %16 = vector.load %arg15[%c0_19, %c1, %c0_20, %c0_21] : memref<4x10x10x128xbf16, #tpu.memory_space<vmem>>, vector<4x8x1x128xbf16>
    tpu.vector_store %arg15[%c0_19, %c1, %c0_20, %c0_21], %13 {strides = array<i32>} : memref<4x10x10x128xbf16, #tpu.memory_space<vmem>>, vector<4x8x1x128xbf16>,
    %c0_22 = arith.constant 0 : index
    %c1_23 = arith.constant 1 : index
    %c9_24 = arith.constant 9 : index
    %c0_25 = arith.constant 0 : index
    %17 = vector.load %arg15[%c0_22, %c1_23, %c9_24, %c0_25] : memref<4x10x10x128xbf16, #tpu.memory_space<vmem>>, vector<4x8x1x128xbf16>
    tpu.vector_store %arg15[%c0_22, %c1_23, %c9_24, %c0_25], %13 {strides = array<i32>} : memref<4x10x10x128xbf16, #tpu.memory_space<vmem>>, vector<4x8x1x128xbf16>,
    %18 = arith.truncf %11 : vector<256x128xf32> to vector<256x128xbf16>
    %19 = vector.shape_cast %18 : vector<256x128xbf16> to vector<4x8x8x128xbf16>
    %c0_26 = arith.constant 0 : index
    %c1_27 = arith.constant 1 : index
    %c1_28 = arith.constant 1 : index
    %c0_29 = arith.constant 0 : index
    %20 = vector.load %arg15[%c0_26, %c1_27, %c1_28, %c0_29] : memref<4x10x10x128xbf16, #tpu.memory_space<vmem>>, vector<4x8x8x128xbf16>
    tpu.vector_store %arg15[%c0_26, %c1_27, %c1_28, %c0_29], %19 {strides = array<i32>} : memref<4x10x10x128xbf16, #tpu.memory_space<vmem>>, vector<4x8x8x128xbf16>,
    %c0_30 = arith.constant 0 : index
    %c0_31 = arith.constant 0 : index
    %c0_32 = arith.constant 0 : index
    %c0_33 = arith.constant 0 : index
    %21 = vector.load %arg15[%c0_30, %c0_31, %c0_32, %c0_33] : memref<4x10x10x128xbf16, #tpu.memory_space<vmem>>, vector<4x8x8x128xbf16>
    %22 = vector.shape_cast %21 : vector<4x8x8x128xbf16> to vector<256x128xbf16>
    %c0_34 = arith.constant 0 : index
    %c0_35 = arith.constant 0 : index
    %c1_36 = arith.constant 1 : index
    %c0_37 = arith.constant 0 : index
    %23 = vector.load %arg15[%c0_34, %c0_35, %c1_36, %c0_37] : memref<4x10x10x128xbf16, #tpu.memory_space<vmem>>, vector<4x8x8x128xbf16>
    %24 = vector.shape_cast %23 : vector<4x8x8x128xbf16> to vector<256x128xbf16>
    %c0_38 = arith.constant 0 : index
    %c0_39 = arith.constant 0 : index
    %c2 = arith.constant 2 : index
    %c0_40 = arith.constant 0 : index
    %25 = vector.load %arg15[%c0_38, %c0_39, %c2, %c0_40] : memref<4x10x10x128xbf16, #tpu.memory_space<vmem>>, vector<4x8x8x128xbf16>
    %26 = vector.shape_cast %25 : vector<4x8x8x128xbf16> to vector<256x128xbf16>
    %c0_41 = arith.constant 0 : index
    %c1_42 = arith.constant 1 : index
    %c0_43 = arith.constant 0 : index
    %c0_44 = arith.constant 0 : index
    %27 = vector.load %arg15[%c0_41, %c1_42, %c0_43, %c0_44] : memref<4x10x10x128xbf16, #tpu.memory_space<vmem>>, vector<4x8x8x128xbf16>
    %28 = vector.shape_cast %27 : vector<4x8x8x128xbf16> to vector<256x128xbf16>
    %c0_45 = arith.constant 0 : index
    %c1_46 = arith.constant 1 : index
    %c1_47 = arith.constant 1 : index
    %c0_48 = arith.constant 0 : index
    %29 = vector.load %arg15[%c0_45, %c1_46, %c1_47, %c0_48] : memref<4x10x10x128xbf16, #tpu.memory_space<vmem>>, vector<4x8x8x128xbf16>
    %30 = vector.shape_cast %29 : vector<4x8x8x128xbf16> to vector<256x128xbf16>
    %c0_49 = arith.constant 0 : index
    %c1_50 = arith.constant 1 : index
    %c2_51 = arith.constant 2 : index
    %c0_52 = arith.constant 0 : index
    %31 = vector.load %arg15[%c0_49, %c1_50, %c2_51, %c0_52] : memref<4x10x10x128xbf16, #tpu.memory_space<vmem>>, vector<4x8x8x128xbf16>
    %32 = vector.shape_cast %31 : vector<4x8x8x128xbf16> to vector<256x128xbf16>
    %c0_53 = arith.constant 0 : index
    %c2_54 = arith.constant 2 : index
    %c0_55 = arith.constant 0 : index
    %c0_56 = arith.constant 0 : index
    %33 = vector.load %arg15[%c0_53, %c2_54, %c0_55, %c0_56] : memref<4x10x10x128xbf16, #tpu.memory_space<vmem>>, vector<4x8x8x128xbf16>
    %34 = vector.shape_cast %33 : vector<4x8x8x128xbf16> to vector<256x128xbf16>
    %c0_57 = arith.constant 0 : index
    %c2_58 = arith.constant 2 : index
    %c1_59 = arith.constant 1 : index
    %c0_60 = arith.constant 0 : index
    %35 = vector.load %arg15[%c0_57, %c2_58, %c1_59, %c0_60] : memref<4x10x10x128xbf16, #tpu.memory_space<vmem>>, vector<4x8x8x128xbf16>
    %36 = vector.shape_cast %35 : vector<4x8x8x128xbf16> to vector<256x128xbf16>
    %c0_61 = arith.constant 0 : index
    %c2_62 = arith.constant 2 : index
    %c2_63 = arith.constant 2 : index
    %c0_64 = arith.constant 0 : index
    %37 = vector.load %arg15[%c0_61, %c2_62, %c2_63, %c0_64] : memref<4x10x10x128xbf16, #tpu.memory_space<vmem>>, vector<4x8x8x128xbf16>
    %38 = vector.shape_cast %37 : vector<4x8x8x128xbf16> to vector<256x128xbf16>
    %39 = tpu.concatenate %22, %24, %26, %28, %30, %32, %34, %36, %38 in 1 : vector<256x128xbf16>, vector<256x128xbf16>, vector<256x128xbf16>, vector<256x128xbf16>, vector<256x128xbf16>, vector<256x128xbf16>, vector<256x128xbf16>, vector<256x128xbf16>, vector<256x128xbf16> -> vector<256x1152xbf16>
    %c0_65 = arith.constant 0 : index
    %c0_66 = arith.constant 0 : index
    %40 = vector.load %arg5[%c0_65, %c0_66] : memref<1152x128xbf16, #tpu.memory_space<vmem>>, vector<1152x128xbf16>
    %cst_67 = arith.constant dense<0.000000e+00> : vector<256x128xf32>
    %41 = tpu.matmul %39, %40, %cst_67 {dimension_numbers = #tpu.dot_dimension_numbers<[1], [0], [0], [1], [0, 0, 1, 1], [], []>} : vector<256x1152xbf16>, vector<1152x128xbf16>, vector<256x128xf32> -> vector<256x128xf32>
    %c0_68 = arith.constant 0 : index
    %c0_69 = arith.constant 0 : index
    %42 = vector.load %arg6[%c0_68, %c0_69] : memref<1x128xf32, #tpu.memory_space<vmem>>, vector<1x128xf32>
    %43 = vector.broadcast %42 : vector<1x128xf32> to vector<256x128xf32>
    %44 = arith.mulf %41, %43 : vector<256x128xf32>
    %c0_70 = arith.constant 0 : index
    %c0_71 = arith.constant 0 : index
    %45 = vector.load %arg7[%c0_70, %c0_71] : memref<1x128xf32, #tpu.memory_space<vmem>>, vector<1x128xf32>
    %46 = vector.broadcast %45 : vector<1x128xf32> to vector<256x128xf32>
    %47 = arith.addf %44, %46 : vector<256x128xf32>
    %cst_72 = arith.constant 0.000000e+00 : f32
    %48 = vector.broadcast %cst_72 : f32 to vector<256x128xf32>
    %49 = arith.maximumf %47, %48 : vector<256x128xf32>
    %50 = arith.truncf %49 : vector<256x128xf32> to vector<256x128xbf16>
    %c0_73 = arith.constant 0 : index
    %c0_74 = arith.constant 0 : index
    %51 = vector.load %arg8[%c0_73, %c0_74] : memref<128x512xbf16, #tpu.memory_space<vmem>>, vector<128x512xbf16>
    %cst_75 = arith.constant dense<0.000000e+00> : vector<256x512xf32>
    %52 = tpu.matmul %50, %51, %cst_75 {dimension_numbers = #tpu.dot_dimension_numbers<[1], [0], [0], [1], [0, 0, 1, 1], [], []>} : vector<256x128xbf16>, vector<128x512xbf16>, vector<256x512xf32> -> vector<256x512xf32>
    %c0_76 = arith.constant 0 : index
    %c0_77 = arith.constant 0 : index
    %53 = vector.load %arg9[%c0_76, %c0_77] : memref<1x512xf32, #tpu.memory_space<vmem>>, vector<1x512xf32>
    %54 = vector.broadcast %53 : vector<1x512xf32> to vector<256x512xf32>
    %55 = arith.mulf %52, %54 : vector<256x512xf32>
    %c0_78 = arith.constant 0 : index
    %c0_79 = arith.constant 0 : index
    %56 = vector.load %arg10[%c0_78, %c0_79] : memref<1x512xf32, #tpu.memory_space<vmem>>, vector<1x512xf32>
    %57 = vector.broadcast %56 : vector<1x512xf32> to vector<256x512xf32>
    %58 = arith.addf %55, %57 : vector<256x512xf32>
    %c0_80 = arith.constant 0 : index
    %c0_81 = arith.constant 0 : index
    %59 = vector.load %arg11[%c0_80, %c0_81] : memref<64x512xbf16, #tpu.memory_space<vmem>>, vector<64x512xbf16>
    %cst_82 = arith.constant dense<0.000000e+00> : vector<256x512xf32>
    %60 = tpu.matmul %1, %59, %cst_82 {dimension_numbers = #tpu.dot_dimension_numbers<[1], [0], [0], [1], [0, 0, 1, 1], [], []>} : vector<256x64xbf16>, vector<64x512xbf16>, vector<256x512xf32> -> vector<256x512xf32>
    %c0_83 = arith.constant 0 : index
    %c0_84 = arith.constant 0 : index
    %61 = vector.load %arg12[%c0_83, %c0_84] : memref<1x512xf32, #tpu.memory_space<vmem>>, vector<1x512xf32>
    %62 = vector.broadcast %61 : vector<1x512xf32> to vector<256x512xf32>
    %63 = arith.mulf %60, %62 : vector<256x512xf32>
    %c0_85 = arith.constant 0 : index
    %c0_86 = arith.constant 0 : index
    %64 = vector.load %arg13[%c0_85, %c0_86] : memref<1x512xf32, #tpu.memory_space<vmem>>, vector<1x512xf32>
    %65 = vector.broadcast %64 : vector<1x512xf32> to vector<256x512xf32>
    %66 = arith.addf %63, %65 : vector<256x512xf32>
    %67 = arith.addf %58, %66 : vector<256x512xf32>
    %cst_87 = arith.constant 0.000000e+00 : f32
    %68 = vector.broadcast %cst_87 : f32 to vector<256x512xf32>
    %69 = arith.maximumf %67, %68 : vector<256x512xf32>
    %70 = arith.truncf %69 : vector<256x512xf32> to vector<256x512xbf16>
    %71 = vector.shape_cast %70 : vector<256x512xbf16> to vector<4x8x8x512xbf16>
    %c0_88 = arith.constant 0 : index
    %c0_89 = arith.constant 0 : index
    %c0_90 = arith.constant 0 : index
    %c0_91 = arith.constant 0 : index
    %72 = vector.load %arg14[%c0_88, %c0_89, %c0_90, %c0_91] : memref<4x8x8x512xbf16, #tpu.memory_space<vmem>>, vector<4x8x8x512xbf16>
    tpu.vector_store %arg14[%c0_88, %c0_89, %c0_90, %c0_91], %71 {strides = array<i32>} : memref<4x8x8x512xbf16, #tpu.memory_space<vmem>>, vector<4x8x8x512xbf16>,
    return
  }
  func.func @transform_0(%arg0: i32) -> (i32, i32, i32, i32) {
    %c0_i32 = arith.constant 0 : i32
    %c0_i32_0 = arith.constant 0 : i32
    %c0_i32_1 = arith.constant 0 : i32
    %c0_i32_2 = arith.constant 0 : i32
    return %arg0, %c0_i32, %c0_i32_0, %c0_i32_1 : i32, i32, i32, i32
  }
  func.func @transform_1(%arg0: i32) -> (i32, i32) {
    %c0_i32 = arith.constant 0 : i32
    %c0_i32_0 = arith.constant 0 : i32
    %c0_i32_1 = arith.constant 0 : i32
    return %c0_i32, %c0_i32_0 : i32, i32
  }
  func.func @transform_2(%arg0: i32) -> (i32, i32) {
    %c0_i32 = arith.constant 0 : i32
    %c0_i32_0 = arith.constant 0 : i32
    %c0_i32_1 = arith.constant 0 : i32
    return %c0_i32, %c0_i32_0 : i32, i32
  }
  func.func @transform_3(%arg0: i32) -> (i32, i32) {
    %c0_i32 = arith.constant 0 : i32
    %c0_i32_0 = arith.constant 0 : i32
    %c0_i32_1 = arith.constant 0 : i32
    return %c0_i32, %c0_i32_0 : i32, i32
  }
  func.func @transform_4(%arg0: i32) -> (i32, i32) {
    %c0_i32 = arith.constant 0 : i32
    %c0_i32_0 = arith.constant 0 : i32
    %c0_i32_1 = arith.constant 0 : i32
    return %c0_i32, %c0_i32_0 : i32, i32
  }
  func.func @transform_5(%arg0: i32) -> (i32, i32) {
    %c0_i32 = arith.constant 0 : i32
    %c0_i32_0 = arith.constant 0 : i32
    %c0_i32_1 = arith.constant 0 : i32
    return %c0_i32, %c0_i32_0 : i32, i32
  }
  func.func @transform_6(%arg0: i32) -> (i32, i32) {
    %c0_i32 = arith.constant 0 : i32
    %c0_i32_0 = arith.constant 0 : i32
    %c0_i32_1 = arith.constant 0 : i32
    return %c0_i32, %c0_i32_0 : i32, i32
  }
  func.func @transform_7(%arg0: i32) -> (i32, i32) {
    %c0_i32 = arith.constant 0 : i32
    %c0_i32_0 = arith.constant 0 : i32
    %c0_i32_1 = arith.constant 0 : i32
    return %c0_i32, %c0_i32_0 : i32, i32
  }
  func.func @transform_8(%arg0: i32) -> (i32, i32) {
    %c0_i32 = arith.constant 0 : i32
    %c0_i32_0 = arith.constant 0 : i32
    %c0_i32_1 = arith.constant 0 : i32
    return %c0_i32, %c0_i32_0 : i32, i32
  }
  func.func @transform_9(%arg0: i32) -> (i32, i32) {
    %c0_i32 = arith.constant 0 : i32
    %c0_i32_0 = arith.constant 0 : i32
    %c0_i32_1 = arith.constant 0 : i32
    return %c0_i32, %c0_i32_0 : i32, i32
  }
  func.func @transform_10(%arg0: i32) -> (i32, i32) {
    %c0_i32 = arith.constant 0 : i32
    %c0_i32_0 = arith.constant 0 : i32
    %c0_i32_1 = arith.constant 0 : i32
    return %c0_i32, %c0_i32_0 : i32, i32
  }
  func.func @transform_11(%arg0: i32) -> (i32, i32) {
    %c0_i32 = arith.constant 0 : i32
    %c0_i32_0 = arith.constant 0 : i32
    %c0_i32_1 = arith.constant 0 : i32
    return %c0_i32, %c0_i32_0 : i32, i32
  }
  func.func @transform_12(%arg0: i32) -> (i32, i32) {
    %c0_i32 = arith.constant 0 : i32
    %c0_i32_0 = arith.constant 0 : i32
    %c0_i32_1 = arith.constant 0 : i32
    return %c0_i32, %c0_i32_0 : i32, i32
  }
  func.func @transform_13(%arg0: i32) -> (i32, i32, i32, i32) {
    %c0_i32 = arith.constant 0 : i32
    %c0_i32_0 = arith.constant 0 : i32
    %c0_i32_1 = arith.constant 0 : i32
    %c0_i32_2 = arith.constant 0 : i32
    return %arg0, %c0_i32, %c0_i32_0, %c0_i32_1 : i32, i32, i32, i32
  }
}

</mosaic_0001>

<bundles_post_ra>
// kernel: tpu_custom_call.1
= control target key start
LH: loop header
LB: loop body
LE: loop exit
PB: predicated region body
PF: predicated region fallthrough
CT: control target
= control target key end

     0   :  { %s14823_s0 = inlined_call_operand.hbm [shape: bf16[8,8,8,64], index: 0, kind: input, shape index: {}]   ;;  %s14824_s1 = inlined_call_operand.hbm [shape: bf16[64,128], index: 1, kind: input, shape index: {}]   ;;  %s14825_s2 = inlined_call_operand.vmem [shape: f32[1,128], index: 2, kind: input, shape index: {}]   ;;  %s14826_s3 = inlined_call_operand.vmem [shape: f32[1,128], index: 3, kind: input, shape index: {}]   ;;  %s14827_s4 = inlined_call_operand.hbm [shape: bf16[1152,128], index: 4, kind: input, shape index: {}]   ;;  %s14828_s5 = inlined_call_operand.hbm [shape: f32[1,128], index: 5, kind: input, shape index: {}]   ;;  %s14829_s6 = inlined_call_operand.vmem [shape: f32[1,128], index: 6, kind: input, shape index: {}]   ;;  %s14830_s7 = inlined_call_operand.hbm [shape: bf16[128,512], index: 7, kind: input, shape index: {}]   ;;  %s14831_s8 = inlined_call_operand.vmem [shape: f32[1,512], index: 8, kind: input, shape index: {}]   ;;  %s14832_s9 = inlined_call_operand.vmem [shape: f32[1,512], index: 9, kind: input, shape index: {}]   ;;  %s14833_s10 = inlined_call_operand.hbm [shape: bf16[64,512], index: 10, kind: input, shape index: {}]   ;;  %s14834_s11 = inlined_call_operand.vmem [shape: f32[1,512], index: 11, kind: input, shape index: {}]   ;;  %s14835_s12 = inlined_call_operand.vmem [shape: f32[1,512], index: 12, kind: input, shape index: {}]   ;;  %s14836_s13 = inlined_call_operand.hbm [shape: bf16[8,8,8,512], index: 13, kind: output, shape index: {}]  }
   0x1   :  { %14856 = sst [smem:[#allocation128_spill]] %s14831_s8 }
   0x2   :  { %14857 = sst [smem:[#allocation129_spill]] %s14832_s9 }
   0x3   :  { %14858 = sst [smem:[#allocation130_spill]] %s14834_s11 }
   0x4   :  { %14859 = sst [smem:[#allocation131_spill]] %s14835_s12 }
   0x5   :  { %14860 = sst [smem:[#allocation132_spill]] %s14836_s13 }
   0x6   :  { %18 = vsyncpa [#allocation4], 0 }
   0x7   :  { %20 = vsyncpa [#allocation4 + $0x1], 0 }
   0x8   :  { %21 = vsyncpa [#allocation7], 0 }
   0x9   :  { %22 = vsyncpa [#allocation10], 0 }
   0xa   :  { %23 = vsyncpa [#allocation13], 0 }
   0xb   :  { %24 = vsyncpa [#allocation5], 0 }
   0xc   :  { %26 = vsyncpa [#allocation5 + $0x1], 0  ;;  %s10653_s25 = smov 0   ;;  %s10655_s26 = smov 0  }
   0xd   :  { %s10657_s27 = smov 0   ;;  %s10659_s28 = smov 0  }
   0xe LB: > { %s10569_s29 = smov [#allocation6]   ;;  %s10674_s14 = sadd.s32 4294967295, %s10567_s28   ;;  %s10567_s28 = sphi %s10659_s28, %s15333_s28   ;;  %s10563_s27 = sphi %s10657_s27, %s15332_s27   ;;  %s10559_s26 = sphi %s10655_s26, %s15331_s26   ;;  %s10555_s25 = sphi %s10653_s25, %s15330_s25  }
   0xf   : > { %s353_s30 = sshll.u32 %s10569_s29, 4  ;;  %p8718_p0 = scmp.ge.s32.totalorder %s10567_s28, 1  ;;  %s10679_s30 = int_to_ptr.vmem [resolvable:$true] %s353_s30 }
  0x10   : > { %p14838_p1 = scmp.eq.s32.totalorder %s10674_s14, 0  ;;  %p341_p2 = scmp.lt.s32.totalorder %s10567_s28, 3 }
  0x11   : > { %s10570_s16 = smov [#allocation9]   ;;  %s10571_s19 = smov [#allocation8]  }
  0x12   : > { %p10681_p3 = pnand %p8718_p0, %p341_p2  ;;  %s386_s17 = sshll.u32 %s10570_s16, 4  ;;  %s10694_s17 = int_to_ptr.vmem [resolvable:$true] %s386_s17 }
  0x13   : > { %s372_s20 = sshll.u32 %s10571_s19, 4  ;;  %s10319_s23 = scalar_lea.hbm %s14824_s1, 512  ;;  %s10696_s20 = int_to_ptr.vmem [resolvable:$true] %s372_s20 }
  0x14   : > { %s14861_s15 = scalar_select %p10681_p3, 1, 0 }
  0x15   : > { %p9983_p5 = pneg %p10681_p3  ;;  %p10320_p7 = scmp.ne.s32.totalorder %s14824_s1, %s10319_s23 }
  0x16   : > { %p10326_p11 = scmp.lt.u32.totalorder %s10319_s23, %s14824_s1 }
  0x17   : > { %p10690_p6 = pnand %p9983_p5, %p14838_p1 }
  0x19   : > { %p10706_p8 = pneg %p10690_p6 }
  0x1b   : > { %p10322_p9 = pnand %p10706_p8, %p10320_p7 }
  0x1d   : > { %p10323_p10 = pneg %p10322_p9 }
  0x1f   : > { %p10328_p12 = pnand %p10326_p11, %p10323_p10 }
  0x21   : > { %10331 = shalt.err (!%p10328_p12)
}
  0x22   : > { %s10332_s21 = scalar_lea.vmem %s10679_s30, 512  ;;  %p10340_p5 = scmp.lt.s32.totalorder %s10679_s30, %s10679_s30 }
  0x23   : > { %p10333_p13 = scmp.ne.s32.totalorder %s10679_s30, %s10332_s21  ;;  %p10341_p4 = scmp.lt.s32.totalorder %s10332_s21, %s10332_s21 }
  0x25   : > { %p10335_p0 = pnand %p10333_p13, %p10706_p8  ;;  %p10342_p7 = por %p10341_p4, %p10340_p5 }
  0x27   : > { %p10336_p2 = pneg %p10335_p0 }
  0x29   : > { %p10343_p9 = pnand %p10342_p7, %p10336_p2 }
  0x2b   : > { %10346 = shalt.err (!%p10343_p9)
}
  0x2c   : > { %s14840_s22 = smov 64   ;;  %s14841_s13 = smov 4  }
  0x2d   : > { %9986 = dma.hbm_to_vmem [thread:$0]  (!%p10690_p6), %s14824_s1, 512, %s10679_s30, [#allocation7], %s14840_s22, %s14840_s22, %s14841_s13  }
  0x2e   : > { %s10347_s21 = scalar_lea.hbm %s14828_s5, 16 }
  0x2f   : > { %p10348_p4 = scmp.ne.s32.totalorder %s14828_s5, %s10347_s21  ;;  %p10354_p12 = scmp.lt.u32.totalorder %s10347_s21, %s14828_s5 }
  0x31   : > { %p10350_p10 = pnand %p10348_p4, %p10706_p8 }
  0x33   : > { %p10351_p11 = pneg %p10350_p10 }
  0x35   : > { %p10356_p13 = pnand %p10354_p12, %p10351_p11 }
  0x37   : > { %10359 = shalt.err (!%p10356_p13)
}
  0x38   : > { %s10360_s30 = scalar_lea.vmem %s10694_s17, 16  ;;  %s10367_s11 = scalar_lea.vmem %s10694_s17, 32 }
  0x39   : > { %p10361_p0 = scmp.ne.s32.totalorder %s10694_s17, %s10360_s30  ;;  %p10368_p7 = scmp.lt.s32.totalorder %s10694_s17, %s10694_s17 }
  0x3a   : > { %p10369_p9 = scmp.lt.s32.totalorder %s10367_s11, %s10360_s30 }
  0x3b   : > { %p10363_p2 = pnand %p10361_p0, %p10706_p8 }
  0x3c   : > { %p10370_p4 = por %p10369_p9, %p10368_p7 }
  0x3d   : > { %p10364_p5 = pneg %p10363_p2 }
  0x3f   : > { %p10371_p10 = pnand %p10370_p4, %p10364_p5 }
  0x41   : > { %10374 = shalt.err (!%p10371_p10)
}
  0x42   : > { %9992 = dma.hbm_to_vmem [thread:$0]  (!%p10690_p6), %s14828_s5, 16, %s10694_s17, [#allocation10]  }
  0x43   : > { %s10375_s24 = scalar_lea.hbm %s14827_s4, 9216 }
  0x44   : > { %p10376_p11 = scmp.ne.s32.totalorder %s14827_s4, %s10375_s24  ;;  %p10382_p0 = scmp.lt.u32.totalorder %s10375_s24, %s14827_s4 }
  0x46   : > { %p10378_p12 = pnand %p10376_p11, %p10706_p8 }
  0x48   : > { %p10379_p13 = pneg %p10378_p12 }
  0x4a   : > { %p10384_p2 = pnand %p10382_p0, %p10379_p13 }
  0x4c   : > { %10387 = shalt.err (!%p10384_p2)
}
  0x4d   : > { %s10388_s17 = scalar_lea.vmem %s10696_s20, 9216  ;;  %p10396_p4 = scmp.lt.s32.totalorder %s10696_s20, %s10696_s20 }
  0x4e   : > { %p10389_p5 = scmp.ne.s32.totalorder %s10696_s20, %s10388_s17  ;;  %p10397_p10 = scmp.lt.s32.totalorder %s10388_s17, %s10388_s17 }
  0x50   : > { %p10391_p7 = pnand %p10389_p5, %p10706_p8  ;;  %p10398_p11 = por %p10397_p10, %p10396_p4 }
  0x52   : > { %p10392_p9 = pneg %p10391_p7 }
  0x54   : > { %p10399_p12 = pnand %p10398_p11, %p10392_p9 }
  0x56   : > { %10402 = shalt.err (!%p10399_p12)
}
  0x57   : > { %9989 = dma.hbm_to_vmem [thread:$0]  (!%p10690_p6), %s14827_s4, 9216, %s10696_s20, [#allocation7], %s14840_s22, %s14840_s22, %s14841_s13  }
  0x58   : > { %s10574_s9 = smov [#allocation11]   ;;  %s10403_s29 = scalar_lea.hbm %s14830_s7, 4096 }
  0x59   : > { %s399_s12 = sshll.u32 %s10574_s9, 4  ;;  %p10404_p13 = scmp.ne.s32.totalorder %s14830_s7, %s10403_s29  ;;  %s400_s12 = int_to_ptr.vmem [resolvable:$true] %s399_s12 }
  0x5a   : > { %p10410_p5 = scmp.lt.u32.totalorder %s10403_s29, %s14830_s7 }
  0x5b   : > { %p10406_p0 = pnand %p10404_p13, %p10706_p8 }
  0x5d   : > { %p10407_p2 = pneg %p10406_p0 }
  0x5f   : > { %p10412_p7 = pnand %p10410_p5, %p10407_p2 }
  0x61   : > { %10415 = shalt.err (!%p10412_p7)
}
  0x62   : > { %s10416_s20 = scalar_lea.vmem %s400_s12, 4096  ;;  %p10424_p11 = scmp.lt.s32.totalorder %s400_s12, %s400_s12 }
  0x63   : > { %p10417_p9 = scmp.ne.s32.totalorder %s400_s12, %s10416_s20  ;;  %p10425_p12 = scmp.lt.s32.totalorder %s10416_s20, %s10416_s20 }
  0x65   : > { %p10419_p4 = pnand %p10417_p9, %p10706_p8  ;;  %p10426_p1 = por %p10425_p12, %p10424_p11 }
  0x67   : > { %p10420_p10 = pneg %p10419_p4 }
  0x69   : > { %p10427_p3 = pnand %p10426_p1, %p10420_p10 }
  0x6b   : > { %10430 = shalt.err (!%p10427_p3)
}
  0x6c   : > { %s10575_s11 = smov 256   ;;  %s10576_s8 = smov 16  }
  0x6d   : > { %9995 = dma.hbm_to_vmem [thread:$0]  (!%p10690_p6), %s14830_s7, 4096, %s400_s12, [#allocation10], %s10575_s11, %s10575_s11, %s10576_s8  }
  0x6e   : > { %s10577_s24 = smov [#allocation12]   ;;  %s10431_s30 = scalar_lea.hbm %s14833_s10, 2048 }
  0x6f   : > { %s418_s29 = sshll.u32 %s10577_s24, 4  ;;  %p10432_p1 = scmp.ne.s32.totalorder %s14833_s10, %s10431_s30  ;;  %s419_s29 = int_to_ptr.vmem [resolvable:$true] %s418_s29 }
  0x70   : > { %p10438_p0 = scmp.lt.u32.totalorder %s10431_s30, %s14833_s10 }
  0x71   : > { %p10434_p3 = pnand %p10432_p1, %p10706_p8 }
  0x73   : > { %p10435_p13 = pneg %p10434_p3 }
  0x75   : > { %p10440_p2 = pnand %p10438_p0, %p10435_p13 }
  0x77   : > { %10443 = shalt.err (!%p10440_p2)
}
  0x78   : > { %s10444_s12 = scalar_lea.vmem %s419_s29, 2048  ;;  %p10452_p4 = scmp.lt.s32.totalorder %s419_s29, %s419_s29 }
  0x79   : > { %p10445_p5 = scmp.ne.s32.totalorder %s419_s29, %s10444_s12  ;;  %p10453_p10 = scmp.lt.s32.totalorder %s10444_s12, %s10444_s12 }
  0x7b   : > { %p10447_p7 = pnand %p10445_p5, %p10706_p8  ;;  %p10454_p11 = por %p10453_p10, %p10452_p4 }
  0x7d   : > { %p10448_p9 = pneg %p10447_p7 }
  0x7f   : > { %p10455_p12 = pnand %p10454_p11, %p10448_p9 }
  0x81   : > { %10458 = shalt.err (!%p10455_p12)
}
  0x82   : > { %9998 = dma.hbm_to_vmem [thread:$0]  (!%p10690_p6), %s14833_s10, 2048, %s419_s29, [#allocation13], %s10575_s11, %s10575_s11, %s10576_s8  }
  0x83   : > { %s8717_s16 = sadd.s32 4294967294, %s10567_s28   ;;  %s10818_s18 = sadd.s32 1, %s10567_s28  }
  0x84   : > { %s39_s22 = sadd.s32 1, %s10563_s27  ;;  %s36_s13 = ssub.s32 %s10567_s28, %s10818_s18 }
  0x85   : > { %p46_p8 = scmp.ne.s32.totalorder %s10563_s27, %s10559_s26  ;;  %p37_p1 = scmp.eq.s32.totalorder %s36_s13, 0 }
  0x86   : > { %p47_p3 = scmp.eq.s32.totalorder %s10567_s28, 0  ;;  %p52_p13 = scmp.ne.s32.totalorder %s10559_s26, %s10555_s25 }
  0x87   : > { %p328_p0 = scmp.eq.s32.totalorder %s10674_s14, 1  ;;  %p14864_p5 = scmp.eq.s32.totalorder %s10674_s14, 0 }
  0x88   : > { %s10830_s24 = scalar_select %p37_p1, %s10563_s27, %s39_s22  }
  0x89   : > { %p48_p2 = por %p47_p3, %p46_p8  ;;  %p10834_p7 = por %p14864_p5, %p52_p13 }
  0x8a   : > { %p10838_p6 = por %p328_p0, %p46_p8  ;;  %p334_p9 = scmp.eq.s32.totalorder %s8717_s16, 1 }
  0x8b   : > { %p10012_p4 = scmp.lt.s32.totalorder %s10567_s28, 2  ;;  %s438_s8 = sand.u32 1, %s10563_s27  }
  0x8c   : > { %s14866_s11 = scalar_select %p10838_p6, 1, 0 }
  0x8d   : > { %p10844_p10 = por %p334_p9, %p52_p13  ;;  %s8725_s21 = sshll.u32 %s438_s8, 7 }
  0x8e   : > { %s9272_s30 = sshll.u32 %s10567_s28, 11  ;;  %s442_s9 = scalar_lea.vmem [#allocation3], %s8725_s21 }
  0x8f   : > { %s14867_s29 = scalar_select %p10844_p10, 1, 0 }
  0x90   : > { %s10852_s12 = scalar_lea.hbm %s14823_s0, %s9272_s30  ;;  %s450_s23 = sshll.u32 %s442_s9, 4  ;;  %s10858_s23 = int_to_ptr.vmem [resolvable:$true] %s450_s23 }
  0x91   : > { %p10854_p11 = pnand %p10012_p4, %p48_p2  ;;  %s10860_s22 = scalar_lea.sflag [#allocation4], %s438_s8 }
  0x92   : > { %s10459_s13 = scalar_lea.hbm %s10852_s12, 2048  ;;  %s10464_s17 = scalar_lea.hbm %s14823_s0, 4096 }
  0x93   : > { %p10460_p12 = scmp.ne.s32.totalorder %s10852_s12, %s10459_s13  ;;  %p10461_p8 = pneg %p10854_p11 }
  0x94   : > { %p10465_p13 = scmp.lt.u32.totalorder %s10852_s12, %s14823_s0  ;;  %p10466_p0 = scmp.lt.u32.totalorder %s10464_s17, %s10459_s13 }
  0x95   : > { %p10462_p1 = pnand %p10461_p8, %p10460_p12  ;;  %p10468_p5 = scmp.lt.u32.totalorder %s10459_s13, %s10852_s12 }
  0x96   : > { %p10467_p2 = por %p10466_p0, %p10465_p13 }
  0x97   : > { %p10463_p3 = pneg %p10462_p1 }
  0x98   : > { %p10469_p9 = por %p10468_p5, %p10467_p2 }
  0x9a   : > { %p10470_p4 = pnand %p10469_p9, %p10463_p3 }
  0x9c   : > { %10473 = shalt.err (!%p10470_p4)
}
  0x9d   : > { %s10474_s8 = scalar_lea.vmem %s10858_s23, 2048  ;;  %s10578_s21 = smov [#allocation3]  }
  0x9e   : > { %p10475_p12 = scmp.ne.s32.totalorder %s10858_s23, %s10474_s8  ;;  %s10479_s30 = sshll.u32 %s10578_s21, 4  ;;  %s10480_s30 = int_to_ptr.vmem [resolvable:$false] %s10479_s30 }
  0x9f   : > { %s10481_s20 = scalar_lea.vmem %s10480_s30, 4096  ;;  %p10482_p6 = scmp.lt.s32.totalorder %s10858_s23, %s10480_s30 }
  0xa0   : > { %p10477_p1 = pnand %p10475_p12, %p10461_p8  ;;  %p10483_p13 = scmp.lt.s32.totalorder %s10481_s20, %s10474_s8 }
  0xa2   : > { %p10478_p10 = pneg %p10477_p1  ;;  %p10484_p0 = por %p10483_p13, %p10482_p6 }
  0xa4   : > { %p10485_p2 = pnand %p10484_p0, %p10478_p10 }
  0xa6   : > { %10488 = shalt.err (!%p10485_p2)
}
  0xa7   : > { %s14869_s13 = smov 4   ;;  %s14870_s17 = smov 64  }
  0xa8   : > { %10002 = dma.hbm_to_vmem [thread:$0]  (!%p10854_p11), %s10852_s12, 2048, %s10858_s23, %s10860_s22, %s14870_s17, %s14870_s17, %s14869_s13  }
  0xa9   : > { %p14871_p8 = scmp.ne.s32.totalorder %s14861_s15, 0 }
  0xab   : > { %462 = sbr.rel (%p14871_p8) target bundleno = 1577 (0x629), region = 72 }
  0xb2   : > { %s10894_s9 = sand.u32 1, %s10559_s26  }
  0xb3   : > { %s8730_s8 = sshll.u32 %s10894_s9, 7  ;;  %s465_s21 = scalar_lea.sflag [#allocation4], %s10894_s9 }
  0xb4   : > { %s10898_s30 = scalar_lea.vmem [#allocation3], %s8730_s8 }
  0xb5   : > { %10534 = dma.done.wait (%p10834_p7), %s465_s21, 2048  }
  0xb6   : > { %10536 = vsyncadd (%p10834_p7), %s465_s21, 4294965248  ;;  %p14872_p6 = scmp.eq.s32.totalorder %s10674_s14, 0 }
  0xb8   : > { %10538 = dma.done.wait (%p14872_p6), [#allocation7], 9728   ;;  %p14873_p10 = pmov %p14872_p6 }
  0xb9   : > { %p14874_p11 = pmov %p14872_p6 }
  0xba   : > { %10540 = vsyncadd (%p14873_p10), [#allocation7], 4294957568 }
  0xbb   : > { %10542 = dma.done.wait (%p14874_p11), [#allocation10], 4112   ;;  %p14875_p3 = pmov %p14872_p6 }
  0xbd   : > { %10544 = vsyncadd (%p14875_p3), [#allocation10], 4294963184  ;;  %p14876_p5 = pmov %p14875_p3 }
  0xbe   : > { %p14877_p9 = pmov %p14875_p3 }
  0xbf   : > { %10546 = dma.done.wait (%p14876_p5), [#allocation13], 2048  }
  0xc0   : > { %10548 = vsyncadd (%p14877_p9), [#allocation13], 4294965248  ;;  %v10063_v0 = vld [vmem:[#allocation6] sm:$0xff]   ;;  %v10064_v1 = vld [vmem:[#allocation6 + $0x8] sm:$0xff]   ;;  %vm678_vm0 = vcmask 523264   ;;  %vm1016_vm1 = vcmask 1040384  }
  0xc1   : > { %9863 = vmatprep.subr.bf16.mxu0 %v10063_v0  ;;  %v10065_v2 = vld [vmem:[#allocation6 + $0x10] sm:$0xff]   ;;  %v10067_v3 = vld [vmem:[%s10898_s30] sm:$0xff]   ;;  %v10066_v4 = vld [vmem:[#allocation6 + $0x18] sm:$0xff]   ;;  %vm1017_vm2 = vsmask.f32 256  ;;  %vm2434_vm6 = vcmask 1042432  }
  0xc2   : > { %9864 = vmatpush3.bf16.msra.mxu0 %v10063_v0  ;;  %9871 = vmatprep.mubr.msk.bf16.mxu0 %vm678_vm0, %v10067_v3  ;;  %v10068_v5 = vld [vmem:[%s10898_s30 + $0x8] sm:$0xff]   ;;  %v10069_v6 = vld [vmem:[%s10898_s30 + $0x10] sm:$0xff]   ;;  %v10070_v7 = vld [vmem:[%s10898_s30 + $0x18] sm:$0xff]   ;;  %vm1115_vm3 = vsmask.f32 7938  ;;  %vm2435_vm7 = vcmask 1046532  }
  0xc3   : > { %9865 = vmatprep.subr.bf16.mxu0 %v10064_v1  ;;  %v10083_v8 = vld [vmem:[#allocation8 + $0xc0] sm:$0xff]   ;;  %v10072_v11 = vld [vmem:[%s10898_s30 + $0x28] sm:$0xff]   ;;  %v10073_v12 = vld [vmem:[%s10898_s30 + $0x30] sm:$0xff]   ;;  %vm1887_vm8 = vsmask.f32 3328  ;;  %vm1629_vm12 = vcmask 1043456  }
  0xc4   : > { %v10071_v9 = vld [vmem:[%s10898_s30 + $0x20] sm:$0xff]   ;;  %v10074_v13 = vld [vmem:[%s10898_s30 + $0x38] sm:$0xff]   ;;  %v10076_v15 = vld [vmem:[%s10898_s30 + $0x48] sm:$0xff]   ;;  %vm1888_vm9 = vsmask.f32 7440  ;;  %s15067_s16 = sld [smem:[#allocation128_spill]] }
  0xc5   : > { %v10084_v10 = vld [vmem:[#allocation8 + $0x80] sm:$0xff]   ;;  %v10077_v16 = vld [vmem:[%s10898_s30 + $0x50] sm:$0xff]   ;;  %v10078_v17 = vld [vmem:[%s10898_s30 + $0x58] sm:$0xff]   ;;  %s15074_s13 = sld [smem:[#allocation129_spill]]  ;;  %s15078_s21 = sld [smem:[#allocation130_spill]] }
  0xc6   : > { %9866 = vmatpush3.bf16.msra.mxu0 %v10064_v1  ;;  %v10075_v14 = vld [vmem:[%s10898_s30 + $0x40] sm:$0xff]   ;;  %v10080_v19 = vld [vmem:[%s10898_s30 + $0x68] sm:$0xff]   ;;  %v10081_v20 = vld [vmem:[%s10898_s30 + $0x70] sm:$0xff]   ;;  %s15079_s12 = sld [smem:[#allocation131_spill]]  ;;  %s15326_s17 = sld [smem:[#allocation132_spill]] }
  0xc7   : > { %9867 = vmatprep.subr.bf16.mxu0 %v10065_v2  ;;  %v10079_v18 = vld [vmem:[%s10898_s30 + $0x60] sm:$0xff]   ;;  %v10082_v21 = vld [vmem:[%s10898_s30 + $0x78] sm:$0xff]   ;;  %v10085_v22 = vld [vmem:[#allocation8 + $0xc8] sm:$0xff]   ;;  %p15327_p4 = scmp.ne.s32.totalorder %s14866_s11, 0 }
  0xc8   : > { %v10086_v23 = vld [vmem:[#allocation8 + $0x88] sm:$0xff]   ;;  %v10087_v24 = vld [vmem:[#allocation8 + $0x40] sm:$0xff]   ;;  %vm10948_vm4 = vmand %vm1016_vm1, %vm1017_vm2 }
  0xc9   : > { %v10088_v25 = vld [vmem:[#allocation8] sm:$0xff]   ;;  %v1025_v27 = vld [vmem:[#allocation2 + $0x18] sm:$0x1]  ;;  %v1123_v28 = vld [vmem:[#allocation2 + $0x1c] sm:$0x1]  ;;  %9391 = vmatprep.subr.bf16.mxu1 %v10087_v24  ;;  %v14843_v24 = vmov 0  }
  0xca   : > { %9868 = vmatpush3.bf16.msra.mxu0 %v10065_v2  ;;  %v1026_v29 = vsel %vm10948_vm4, 0, %v1025_v27  ;;  %vm10955_vm5 = vmand %vm1016_vm1, %vm1115_vm3  ;;  %v1019_v31 = vld [vmem:[#allocation2 + $0x8] sm:$0x1]  ;;  %v1117_v32 = vld [vmem:[#allocation2 + $0xc] sm:$0x1]  ;;  %9392 = vmatpush3.bf16.msra.mxu1 %v10088_v25 }
  0xcb   : > { %9869 = vmatprep.subr.bf16.mxu0 %v10066_v4  ;;  %1027 = vst [vmem:[#allocation2 + $0x18] sm:$0x1] %v1026_v29  ;;  %v1124_v33 = vsel %vm10955_vm5, 0, %v1123_v28  ;;  %v1020_v34 = vsel %vm10948_vm4, 0, %v1019_v31  ;;  %v1118_v35 = vsel %vm10955_vm5, 0, %v1117_v32  ;;  %v10089_v37 = vld [vmem:[#allocation8 + $0xd0] sm:$0xff]   ;;  %vm11089_vm10 = vmor %vm2434_vm6, %vm2435_vm7 }
  0xcc   : > { %v1028_v36 = vld [vmem:[#allocation2 + $0x20] sm:$0x1]  ;;  %1125 = vst [vmem:[#allocation2 + $0x1c] sm:$0x1] %v1124_v33  ;;  %1021 = vst [vmem:[#allocation2 + $0x8] sm:$0x1] %v1020_v34 }
  0xcd   : > { %1119 = vst [vmem:[#allocation2 + $0xc] sm:$0x1] %v1118_v35  ;;  %v1029_v38 = vsel %vm10948_vm4, 0, %v1028_v36  ;;  %v1126_v39 = vld [vmem:[#allocation2 + $0x24] sm:$0x1]  ;;  %v10090_v41 = vld [vmem:[#allocation8 + $0x90] sm:$0xff]   ;;  %vm11099_vm11 = vmor %vm1887_vm8, %vm1888_vm9 }
  0xce   : > { %9870 = vmatpush3.bf16.msra.mxu0 %v10066_v4  ;;  %v1022_v40 = vld [vmem:[#allocation2 + $0x10] sm:$0x1]  ;;  %1030 = vst [vmem:[#allocation2 + $0x20] sm:$0x1] %v1029_v38  ;;  %v1127_v42 = vsel %vm10955_vm5, 0, %v1126_v39  ;;  %v10091_v45 = vld [vmem:[#allocation8 + $0x48] sm:$0xff]   ;;  %vm11132_vm13 = vmand %vm1629_vm12, %vm1115_vm3 }
  0xcf   : > { %9503 = vmatprep.subr.bf16.mxu0 %v10083_v8  ;;  %v1023_v43 = vsel %vm10948_vm4, 0, %v1022_v40  ;;  %v1120_v44 = vld [vmem:[#allocation2 + $0x14] sm:$0x1]  ;;  %v10092_v46 = vld [vmem:[#allocation8 + $0x8] sm:$0xff]   ;;  %1128 = vst [vmem:[#allocation2 + $0x24] sm:$0x1] %v1127_v42  ;;  %9393 = vmatprep.subr.bf16.mxu1 %v10091_v45 }
  0xd0   : > { %1024 = vst [vmem:[#allocation2 + $0x10] sm:$0x1] %v1023_v43  ;;  %v1121_v47 = vsel %vm10955_vm5, 0, %v1120_v44  ;;  %v10093_v48 = vld [vmem:[#allocation8 + $0xd8] sm:$0xff]   ;;  %9394 = vmatpush3.bf16.msra.mxu1 %v10092_v46  ;;  %v1031_v49 = vld [vmem:[#allocation2 + $0x28] sm:$0x1] }
  0xd1   : > { %9872 = vmatmul.mubr.msk.bf16.vlgmr.msra.gmra.mrb[0].mxu0 %vm678_vm0, %v10068_v5  ;;  %1122 = vst [vmem:[#allocation2 + $0x14] sm:$0x1] %v1121_v47  ;;  %v1032_v50 = vsel %vm10948_vm4, 0, %v1031_v49  ;;  %v1129_v51 = vld [vmem:[#allocation2 + $0x2c] sm:$0x1]  ;;  %v10094_v52 = vld [vmem:[#allocation8 + $0x98] sm:$0xff]  }
  0xd2   : > { %9875 = vmatprep.mubr.msk.bf16.mxu0 %vm678_vm0, %v10069_v6  ;;  %9504 = vmatpush3.bf16.msra.mxu0 %v10084_v10  ;;  %v1037_v53 = vld [vmem:[#allocation2 + $0x38] sm:$0x1]  ;;  %1033 = vst [vmem:[#allocation2 + $0x28] sm:$0x1] %v1032_v50  ;;  %v1130_v55 = vsel %vm10955_vm5, 0, %v1129_v51  ;;  %v10095_v56 = vld [vmem:[#allocation8 + $0x50] sm:$0xff]  }
  0xd3   : > { %9505 = vmatprep.subr.bf16.mxu0 %v10085_v22  ;;  %v1038_v54 = vsel %vm10948_vm4, 0, %v1037_v53  ;;  %v10096_v57 = vld [vmem:[#allocation8 + $0x10] sm:$0xff]   ;;  %v1135_v58 = vld [vmem:[#allocation2 + $0x3c] sm:$0x1]  ;;  %1131 = vst [vmem:[#allocation2 + $0x2c] sm:$0x1] %v1130_v55  ;;  %9395 = vmatprep.subr.bf16.mxu1 %v10095_v56 }
  0xd4   : > { %1039 = vst [vmem:[#allocation2 + $0x38] sm:$0x1] %v1038_v54  ;;  %v10097_v59 = vld [vmem:[#allocation8 + $0xe0] sm:$0xff]   ;;  %v1136_v61 = vsel %vm10955_vm5, 0, %v1135_v58  ;;  %v10099_v62 = vld [vmem:[#allocation8 + $0x58] sm:$0xff]   ;;  %9396 = vmatpush3.bf16.msra.mxu1 %v10096_v57  ;;  %v10101_v0 = vld [vmem:[#allocation8 + $0xe8] sm:$0xff]  }
  0xd5   : > { %v10098_v60 = vld [vmem:[#allocation8 + $0xa0] sm:$0xff]   ;;  %1137 = vst [vmem:[#allocation2 + $0x3c] sm:$0x1] %v1136_v61  ;;  %v10100_v63 = vld [vmem:[#allocation8 + $0x18] sm:$0xff]   ;;  %v1034_v2 = vld [vmem:[#allocation2 + $0x30] sm:$0x1]  ;;  %9397 = vmatprep.subr.bf16.mxu1 %v10099_v62 }
  0xd6   : > { %9506 = vmatpush3.bf16.msra.mxu0 %v10086_v23  ;;  %v1040_v1 = vld [vmem:[#allocation2 + $0x40] sm:$0x1]  ;;  %v10102_v3 = vld [vmem:[#allocation8 + $0xa8] sm:$0xff]   ;;  %v1035_v5 = vsel %vm10948_vm4, 0, %v1034_v2  ;;  %v1138_v6 = vld [vmem:[#allocation2 + $0x44] sm:$0x1] }
  0xd7   : > { %9507 = vmatprep.subr.bf16.mxu0 %v10089_v37  ;;  %v1041_v4 = vsel %vm10948_vm4, 0, %v1040_v1  ;;  %1036 = vst [vmem:[#allocation2 + $0x30] sm:$0x1] %v1035_v5  ;;  %v1139_v8 = vsel %vm10955_vm5, 0, %v1138_v6  ;;  %v10103_v10 = vld [vmem:[#allocation8 + $0x60] sm:$0xff]   ;;  %v10112_v22 = vld [vmem:[#allocation8 + $0x30] sm:$0xff]  }
  0xd8   : > { %1042 = vst [vmem:[#allocation2 + $0x40] sm:$0x1] %v1041_v4  ;;  %9398 = vmatpush3.bf16.msra.mxu1 %v10100_v63  ;;  %1140 = vst [vmem:[#allocation2 + $0x44] sm:$0x1] %v1139_v8  ;;  %v1043_v25 = vld [vmem:[#allocation2 + $0x58] sm:$0x1] }
  0xd9   : > { %9876 = vmatmul.mubr.msk.bf16.gmra.mrb[4].mxu0 %vm678_vm0, %v10070_v7  ;;  %v1132_v7 = vld [vmem:[#allocation2 + $0x34] sm:$0x1]  ;;  %9399 = vmatprep.subr.bf16.mxu1 %v10103_v10  ;;  %998 = vst [vmem:[#allocation2] sm:$0xf] %v14843_v24  ;;  %999 = vst [vmem:[#allocation2 + $0x4] sm:$0x1] %v14843_v24 }
  0xda   : > { %9879 = vmatprep.mubr.msk.bf16.mxu0 %vm678_vm0, %v10071_v9  ;;  %9508 = vmatpush3.bf16.msra.mxu0 %v10090_v41  ;;  %v1133_v9 = vsel %vm10955_vm5, 0, %v1132_v7  ;;  %1000 = vst [vmem:[#allocation2 + $0x50] sm:$0xf] %v14843_v24  ;;  %1001 = vst [vmem:[#allocation2 + $0x54] sm:$0x1] %v14843_v24  ;;  %v1044_v29 = vsel %vm10948_vm4, 0, %v1043_v25 }
  0xdb   : > { %9509 = vmatprep.subr.bf16.mxu0 %v10093_v48  ;;  %1134 = vst [vmem:[#allocation2 + $0x34] sm:$0x1] %v1133_v9  ;;  %1002 = vst [vmem:[#allocation2 + $0xa0] sm:$0xf] %v14843_v24  ;;  %v1141_v27 = vld [vmem:[#allocation2 + $0x5c] sm:$0x1] }
  0xdc   : > { %1003 = vst [vmem:[#allocation2 + $0xa4] sm:$0x1] %v14843_v24  ;;  %1004 = vst [vmem:[#allocation2 + $0xf0] sm:$0xf] %v14843_v24  ;;  %v1052_v28 = vld [vmem:[#allocation2 + $0x70] sm:$0x1] }
  0xdd   : > { %1005 = vst [vmem:[#allocation2 + $0xf4] sm:$0x1] %v14843_v24  ;;  %1007 = vst [vmem:[#allocation2 + $0x48] sm:$0xf] %v14843_v24  ;;  %v1142_v31 = vsel %vm10955_vm5, 0, %v1141_v27  ;;  %v1053_v32 = vsel %vm10948_vm4, 0, %v1052_v28 }
  0xde   : > { %9510 = vmatpush3.bf16.msra.mxu0 %v10094_v52  ;;  %1008 = vst [vmem:[#allocation2 + $0x4c] sm:$0x1] %v14843_v24  ;;  %1009 = vst [vmem:[#allocation2 + $0x98] sm:$0xf] %v14843_v24  ;;  %v1150_v33 = vld [vmem:[#allocation2 + $0x74] sm:$0x1] }
  0xdf   : > { %9511 = vmatprep.subr.bf16.mxu0 %v10097_v59  ;;  %1010 = vst [vmem:[#allocation2 + $0x9c] sm:$0x1] %v14843_v24  ;;  %1011 = vst [vmem:[#allocation2 + $0xe8] sm:$0xf] %v14843_v24  ;;  %v1151_v34 = vsel %vm10955_vm5, 0, %v1150_v33  ;;  %v10115_v47 = vld [vmem:[#allocation8 + $0x78] sm:$0xff]  }
  0xe0   : > { %1012 = vst [vmem:[#allocation2 + $0xec] sm:$0x1] %v14843_v24  ;;  %1013 = vst [vmem:[#allocation2 + $0x138] sm:$0xf] %v14843_v24  ;;  %v1046_v35 = vld [vmem:[#allocation2 + $0x60] sm:$0x1] }
  0xe1   : > { %9880 = vmatmul.mubr.msk.bf16.gmra.mrb[8].mxu0 %vm678_vm0, %v10072_v11  ;;  %v10104_v11 = vld [vmem:[#allocation8 + $0x20] sm:$0xff]   ;;  %1014 = vst [vmem:[#allocation2 + $0x13c] sm:$0x1] %v14843_v24  ;;  %1045 = vst [vmem:[#allocation2 + $0x58] sm:$0x1] %v1044_v29  ;;  %v1047_v37 = vsel %vm10948_vm4, 0, %v1046_v35 }
  0xe2   : > { %9883 = vmatprep.mubr.msk.bf16.mxu0 %vm678_vm0, %v10073_v12  ;;  %9512 = vmatpush3.bf16.msra.mxu0 %v10098_v60  ;;  %v10105_v12 = vld [vmem:[#allocation8 + $0xf0] sm:$0xff]   ;;  %1143 = vst [vmem:[#allocation2 + $0x5c] sm:$0x1] %v1142_v31  ;;  %1054 = vst [vmem:[#allocation2 + $0x70] sm:$0x1] %v1053_v32  ;;  %v10116_v48 = vld [vmem:[#allocation8 + $0x38] sm:$0xff]  }
  0xe3   : > { %9513 = vmatprep.subr.bf16.mxu0 %v10101_v0  ;;  %9400 = vmatpush3.bf16.msra.mxu1 %v10104_v11  ;;  %v1055_v36 = vld [vmem:[#allocation2 + $0x78] sm:$0x1]  ;;  %1152 = vst [vmem:[#allocation2 + $0x74] sm:$0x1] %v1151_v34  ;;  %1048 = vst [vmem:[#allocation2 + $0x60] sm:$0x1] %v1047_v37 }
  0xe4   : > { %v1056_v38 = vsel %vm10948_vm4, 0, %v1055_v36  ;;  %v1144_v39 = vld [vmem:[#allocation2 + $0x64] sm:$0x1]  ;;  %v1153_v40 = vld [vmem:[#allocation2 + $0x7c] sm:$0x1] }
  0xe5   : > { %1057 = vst [vmem:[#allocation2 + $0x78] sm:$0x1] %v1056_v38  ;;  %v1145_v41 = vsel %vm10955_vm5, 0, %v1144_v39  ;;  %v1154_v42 = vsel %vm10955_vm5, 0, %v1153_v40  ;;  %v1061_v43 = vld [vmem:[#allocation2 + $0x88] sm:$0x1] }
  0xe6   : > { %9514 = vmatpush3.bf16.msra.mxu0 %v10102_v3  ;;  %1146 = vst [vmem:[#allocation2 + $0x64] sm:$0x1] %v1145_v41  ;;  %1155 = vst [vmem:[#allocation2 + $0x7c] sm:$0x1] %v1154_v42  ;;  %v1159_v44 = vld [vmem:[#allocation2 + $0x8c] sm:$0x1] }
  0xe7   : > { %9515 = vmatprep.subr.bf16.mxu0 %v10105_v12  ;;  %v1062_v45 = vsel %vm10948_vm4, 0, %v1061_v43  ;;  %v1160_v46 = vsel %vm10955_vm5, 0, %v1159_v44  ;;  %v10117_v49 = vld [vmem:[#allocation8 + $0x140] sm:$0xff]   ;;  %v1064_v50 = vld [vmem:[#allocation2 + $0x90] sm:$0x1] }
  0xe8   : > { %1063 = vst [vmem:[#allocation2 + $0x88] sm:$0x1] %v1062_v45  ;;  %1161 = vst [vmem:[#allocation2 + $0x8c] sm:$0x1] %v1160_v46  ;;  %v1162_v51 = vld [vmem:[#allocation2 + $0x94] sm:$0x1] }
  0xe9   : > { %9884 = vmatmul.mubr.msk.bf16.gmra.mrb[12].mxu0 %vm678_vm0, %v10074_v13  ;;  %v10106_v13 = vld [vmem:[#allocation8 + $0xb0] sm:$0xff]   ;;  %v1065_v52 = vsel %vm10948_vm4, 0, %v1064_v50  ;;  %v1163_v53 = vsel %vm10955_vm5, 0, %v1162_v51  ;;  %v1058_v54 = vld [vmem:[#allocation2 + $0x80] sm:$0x1] }
  0xea   : > { %9887 = vmatprep.mubr.msk.bf16.mxu0 %vm678_vm0, %v10075_v14  ;;  %v10107_v14 = vld [vmem:[#allocation8 + $0x68] sm:$0xff]   ;;  %9516 = vmatpush3.bf16.msra.mxu0 %v10106_v13  ;;  %1066 = vst [vmem:[#allocation2 + $0x90] sm:$0x1] %v1065_v52  ;;  %1164 = vst [vmem:[#allocation2 + $0x94] sm:$0x1] %v1163_v53  ;;  %v1059_v56 = vsel %vm10948_vm4, 0, %v1058_v54 }
  0xeb   : > { %9401 = vmatprep.subr.bf16.mxu1 %v10107_v14  ;;  %v1156_v55 = vld [vmem:[#allocation2 + $0x84] sm:$0x1]  ;;  %1060 = vst [vmem:[#allocation2 + $0x80] sm:$0x1] %v1059_v56  ;;  %v1073_v58 = vld [vmem:[#allocation2 + $0xb8] sm:$0x1] }
  0xec   : > { %v1157_v57 = vsel %vm10955_vm5, 0, %v1156_v55  ;;  %v1171_v59 = vld [vmem:[#allocation2 + $0xbc] sm:$0x1]  ;;  %v1074_v60 = vsel %vm10948_vm4, 0, %v1073_v58  ;;  %v1067_v62 = vld [vmem:[#allocation2 + $0xa8] sm:$0x1] }
  0xed   : > { %1158 = vst [vmem:[#allocation2 + $0x84] sm:$0x1] %v1157_v57  ;;  %v1172_v61 = vsel %vm10955_vm5, 0, %v1171_v59  ;;  %1075 = vst [vmem:[#allocation2 + $0xb8] sm:$0x1] %v1074_v60  ;;  %v1068_v0 = vsel %vm10948_vm4, 0, %v1067_v62 }
  0xee   : > { %1173 = vst [vmem:[#allocation2 + $0xbc] sm:$0x1] %v1172_v61  ;;  %v1165_v63 = vld [vmem:[#allocation2 + $0xac] sm:$0x1]  ;;  %1069 = vst [vmem:[#allocation2 + $0xa8] sm:$0x1] %v1068_v0 }
  0xef   : > { %v1166_v1 = vsel %vm10955_vm5, 0, %v1165_v63  ;;  %v1076_v2 = vld [vmem:[#allocation2 + $0xc0] sm:$0x1]  ;;  %v1174_v3 = vld [vmem:[#allocation2 + $0xc4] sm:$0x1] }
  0xf0   : > { %1167 = vst [vmem:[#allocation2 + $0xac] sm:$0x1] %v1166_v1  ;;  %v1077_v4 = vsel %vm10948_vm4, 0, %v1076_v2  ;;  %v1175_v5 = vsel %vm10955_vm5, 0, %v1174_v3  ;;  %v1070_v6 = vld [vmem:[#allocation2 + $0xb0] sm:$0x1] }
  0xf1   : > { %9888 = vmatmul.mubr.msk.bf16.gmra.mrb[16].mxu0 %vm678_vm0, %v10076_v15  ;;  %v10108_v15 = vld [vmem:[#allocation8 + $0x28] sm:$0xff]   ;;  %1078 = vst [vmem:[#allocation2 + $0xc0] sm:$0x1] %v1077_v4  ;;  %1176 = vst [vmem:[#allocation2 + $0xc4] sm:$0x1] %v1175_v5  ;;  %v1071_v8 = vsel %vm10948_vm4, 0, %v1070_v6 }
  0xf2   : > { %9891 = vmatprep.mubr.msk.bf16.mxu0 %vm678_vm0, %v10077_v16  ;;  %v10109_v16 = vld [vmem:[#allocation8 + $0xf8] sm:$0xff]   ;;  %9402 = vmatpush3.bf16.msra.mxu1 %v10108_v15  ;;  %v1168_v7 = vld [vmem:[#allocation2 + $0xb4] sm:$0x1]  ;;  %1072 = vst [vmem:[#allocation2 + $0xb0] sm:$0x1] %v1071_v8 }
  0xf3   : > { %9517 = vmatprep.subr.bf16.mxu0 %v10109_v16  ;;  %v1169_v9 = vsel %vm10955_vm5, 0, %v1168_v7  ;;  %v1085_v10 = vld [vmem:[#allocation2 + $0xd8] sm:$0x1]  ;;  %v1183_v11 = vld [vmem:[#allocation2 + $0xdc] sm:$0x1] }
  0xf4   : > { %1170 = vst [vmem:[#allocation2 + $0xb4] sm:$0x1] %v1169_v9  ;;  %v1086_v12 = vsel %vm10948_vm4, 0, %v1085_v10  ;;  %v1184_v13 = vsel %vm10955_vm5, 0, %v1183_v11  ;;  %v1079_v14 = vld [vmem:[#allocation2 + $0xc8] sm:$0x1] }
  0xf5   : > { %v1177_v15 = vld [vmem:[#allocation2 + $0xcc] sm:$0x1]  ;;  %1087 = vst [vmem:[#allocation2 + $0xd8] sm:$0x1] %v1086_v12  ;;  %1185 = vst [vmem:[#allocation2 + $0xdc] sm:$0x1] %v1184_v13 }
  0xf6   : > { %v1080_v16 = vsel %vm10948_vm4, 0, %v1079_v14  ;;  %v1088_v25 = vld [vmem:[#allocation2 + $0xe0] sm:$0x1]  ;;  %v1186_v27 = vld [vmem:[#allocation2 + $0xe4] sm:$0x1] }
  0xf7   : > { %1081 = vst [vmem:[#allocation2 + $0xc8] sm:$0x1] %v1080_v16  ;;  %v1089_v28 = vsel %vm10948_vm4, 0, %v1088_v25  ;;  %v1187_v29 = vsel %vm10955_vm5, 0, %v1186_v27  ;;  %v1855_v35 = vld [vmem:[#allocation2 + $0x4] sm:$0x1] }
  0xf8   : > { %1090 = vst [vmem:[#allocation2 + $0xe0] sm:$0x1] %v1089_v28  ;;  %1188 = vst [vmem:[#allocation2 + $0xe4] sm:$0x1] %v1187_v29  ;;  %v2338_v36 = vld [vmem:[#allocation2] sm:$0xe] }
  0xf9   : > { %9892 = vmatmul.mubr.msk.bf16.gmra.mrb[20].mxu0 %vm678_vm0, %v10078_v17  ;;  %v10110_v17 = vld [vmem:[#allocation8 + $0xb8] sm:$0xff]   ;;  %v11072_v37 = vld [vmem:[%s14825_s2] ss:$0 sm:$0xff]  ;;  %v1900_v39 = vshll.u32 %v1855_v35, 16  ;;  %v1863_v40 = vld [vmem:[#allocation2 + $0x54] sm:$0x1] }
  0xfa   : > { %9895 = vmatprep.mubr.msk.bf16.mxu0 %vm678_vm0, %v10079_v18  ;;  %v10111_v18 = vld [vmem:[#allocation8 + $0x70] sm:$0xff]   ;;  %9518 = vmatpush3.bf16.msra.mxu0 %v10110_v17  ;;  %v1178_v17 = vsel %vm10955_vm5, 0, %v1177_v15  ;;  %v2012_v42 = vshll.u32 %v1863_v40, 16  ;;  %v11077_v44 = vld [vmem:[%s14826_s3] ss:$0 sm:$0xff]  ;;  %v8807_v45 = vrot.slane %v2338_v36, 9 }
  0xfb   : > { %9403 = vmatprep.subr.bf16.mxu1 %v10111_v18  ;;  %1179 = vst [vmem:[#allocation2 + $0xcc] sm:$0x1] %v1178_v17  ;;  %v11061_v18 = vld [vmem:[#allocation2] sm:$0xf]  ;;  %v2346_v41 = vld [vmem:[#allocation2 + $0x50] sm:$0xe] }
  0xfc   : > { %9404 = vmatpush3.bf16.msra.mxu1 %v10112_v22  ;;  %v11083_v53 = vrot.slane %v1900_v39, 5  ;;  %v8815_v54 = vrot.slane %v2346_v41, 9  ;;  %v2471_v59 = vrot.slane %v1863_v40, 5  ;;  %v11093_v60 = vrot.slane %v2012_v42, 5  ;;  %v1082_v61 = vld [vmem:[#allocation2 + $0xd0] sm:$0x1] }
  0xfd   : > { %9405 = vmatprep.subr.bf16.mxu1 %v10115_v47  ;;  %v1083_v2 = vsel %vm10948_vm4, 0, %v1082_v61  ;;  %v1180_v3 = vld [vmem:[#allocation2 + $0xd4] sm:$0x1]  ;;  %v1643_v25 = vld [vmem:[#allocation2 + $0x18] sm:$0xf] }
  0xfe   : > { %1084 = vst [vmem:[#allocation2 + $0xd0] sm:$0x1] %v1083_v2  ;;  %v1181_v6 = vsel %vm10955_vm5, 0, %v1180_v3  ;;  %v11121_v16 = vsel %vm11089_vm10, %v8815_v54, %v2471_v59  ;;  %v1646_v27 = vld [vmem:[#allocation2 + $0x1c] sm:$0x1] }
  0xff   : > { %1182 = vst [vmem:[#allocation2 + $0xd4] sm:$0x1] %v1181_v6 }
 0x100   : > { %9406 = vmatpush3.bf16.msra.mxu1 %v10116_v48 }
 0x101   : > { %9896 = vmatmul.mubr.msk.bf16.gmra.mrb[24].mxu0 %vm678_vm0, %v10080_v19  ;;  %v1049_v19 = vld [vmem:[#allocation2 + $0x68] sm:$0x1]  ;;  %9615 = vmatprep.subr.bf16.mxu1 %v10117_v49  ;;  %v2439_v49 = vrot.slane %v1855_v35, 5 }
 0x102   : > { %9899 = vmatprep.mubr.msk.bf16.mxu0 %vm678_vm0, %v10081_v20  ;;  %v1050_v20 = vsel %vm10948_vm4, 0, %v1049_v19  ;;  %v1831_v19 = vld [vmem:[#allocation2 + $0x50] sm:$0xf]  ;;  %v1631_v35 = vld [vmem:[#allocation2 + $0x8] sm:$0xf] }
 0x103   : > { %1051 = vst [vmem:[#allocation2 + $0x68] sm:$0x1] %v1050_v20  ;;  %v1891_v20 = vshrl.u32 %v11061_v18, 16  ;;  %v2003_v22 = vshrl.u32 %v1831_v19, 16  ;;  %v11113_v11 = vsel %vm11089_vm10, %v8807_v45, %v2439_v49 }
 0x105   : > { %v1893_v31 = vrot.slane %v1891_v20, 4  ;;  %v2005_v33 = vrot.slane %v2003_v22, 4 }
 0x109   : > { %9900 = vmatmul.mubr.msk.bf16.gmra.mrb[28].mxu0 %vm678_vm0, %v10082_v21  ;;  %v1147_v21 = vld [vmem:[#allocation2 + $0x6c] sm:$0x1] }
 0x10a   : > { %v1148_v23 = vsel %vm10955_vm5, 0, %v1147_v21  ;;  %v1894_v21 = vshll.u32 %v11061_v18, 16 }
 0x10b   : > { %1149 = vst [vmem:[#allocation2 + $0x6c] sm:$0x1] %v1148_v23  ;;  %v2006_v23 = vshll.u32 %v1831_v19, 16 }
 0x10c   : > { %v1896_v32 = vrot.slane %v1894_v21, 5 }
 0x10d   : > { %v2008_v34 = vrot.slane %v2006_v23, 5 }
 0x10e   : > { %v1897_v38 = vor.u32 %v1896_v32, %v1893_v31 }
 0x10f   : > { %v2009_v46 = vor.u32 %v2008_v34, %v2005_v33 }
 0x110   : > { %v11081_v52 = vrot.slane %v1897_v38, 4 }
 0x111   : > { %v11103_v1 = vrot.slane %v2009_v46, 4 }
 0x1a4   : > { %v9873_v43 = vpop.f32.mrb[0].mxu0 }
 0x1a5   : > { %v897_v47 = vmul.f32 %v9873_v43, %v11072_v37  ;;  %v761_v48 = vpop.f32.mrb[1].mxu0  ;;  %v1634_v43 = vld [vmem:[#allocation2 + $0xc] sm:$0x1] }
 0x1a6   : > { %v895_v50 = vmul.f32 %v11072_v37, %v761_v48  ;;  %v9874_v51 = vpop.f32.mrb[2].mxu0 }
 0x1a7   : > { %v936_v55 = vadd.f32 %v11077_v44, %v897_v47  ;;  %v898_v56 = vmul.f32 %v9874_v51, %v11072_v37  ;;  %v764_v57 = vpop.f32.mrb[3].mxu0  ;;  %v1649_v51 = vld [vmem:[#allocation2 + $0x20] sm:$0xf] }
 0x1a8   : > { %v934_v62 = vadd.f32 %v11077_v44, %v895_v50  ;;  %v896_v63 = vmul.f32 %v11072_v37, %v764_v57  ;;  %v1652_v57 = vld [vmem:[#allocation2 + $0x24] sm:$0x1] }
 0x1a9   : > { %v968_v4 = vmax.f32 %v936_v55, 0.0  ;;  %v937_v5 = vadd.f32 %v11077_v44, %v898_v56 }
 0x1aa   : > { %v966_v7 = vmax.f32 %v934_v62, 0.0  ;;  %v935_v8 = vadd.f32 %v11077_v44, %v896_v63 }
 0x1ab   : > { %v9275_v9 = vpack.c.bf16 %v968_v4, %v968_v4  ;;  %v969_v10 = vmax.f32 %v937_v5, 0.0  ;;  %v1637_v4 = vld [vmem:[#allocation2 + $0x10] sm:$0xf]  ;;  %v1640_v5 = vld [vmem:[#allocation2 + $0x14] sm:$0x1] }
 0x1ac   : > { %v9273_v13 = vpack.c.bf16 %v966_v7, %v966_v7  ;;  %v967_v14 = vmax.f32 %v935_v8, 0.0  ;;  %v9877_v15 = vpop.f32.mrb[4].mxu0 }
 0x1ad   : > { %v1326_v19 = vshrl.u32 %v9275_v9, 16  ;;  %v1329_v20 = vshll.u32 %v9275_v9, 16  ;;  %v9276_v21 = vpack.c.bf16 %v969_v10, %v969_v10  ;;  %v901_v22 = vmul.f32 %v9877_v15, %v11072_v37  ;;  %v777_v23 = vpop.f32.mrb[5].mxu0 }
 0x1ae   : > { %v1310_v28 = vshrl.u32 %v9273_v13, 16  ;;  %v1313_v29 = vshll.u32 %v9273_v13, 16  ;;  %v9274_v31 = vpack.c.bf16 %v967_v14, %v967_v14  ;;  %v899_v32 = vmul.f32 %v11072_v37, %v777_v23  ;;  %v9878_v33 = vpop.f32.mrb[6].mxu0 }
 0x1af   : > { %v1328_v34 = vrot.slane %v1326_v19, 7  ;;  %v1334_v36 = vshrl.u32 %v9276_v21, 16  ;;  %v1337_v38 = vshll.u32 %v9276_v21, 16  ;;  %v940_v39 = vadd.f32 %v11077_v44, %v901_v22  ;;  %v780_v40 = vpop.f32.mrb[7].mxu0 }
 0x1b0   : > { %v1312_v42 = vrot.slane %v1310_v28, 7  ;;  %v1318_v45 = vshrl.u32 %v9274_v31, 16  ;;  %v1321_v46 = vshll.u32 %v9274_v31, 16  ;;  %v938_v47 = vadd.f32 %v11077_v44, %v899_v32 }
 0x1b1   : > { %v1331_v48 = vor.u32 %v1329_v20, %v1328_v34  ;;  %v1332_v49 = vrot.slane %v1328_v34, 4  ;;  %v1336_v50 = vrot.slane %v1334_v36, 7  ;;  %v972_v54 = vmax.f32 %v940_v39, 0.0 }
 0x1b2   : > { %v1315_v55 = vor.u32 %v1313_v29, %v1312_v42  ;;  %v1316_v56 = vrot.slane %v1312_v42, 4  ;;  %v1320_v59 = vrot.slane %v1318_v45, 7  ;;  %v970_v61 = vmax.f32 %v938_v47, 0.0  ;;  %v1670_v47 = vld [vmem:[#allocation2 + $0x3c] sm:$0x1] }
 0x1b3   : > { %v1644_v62 = vsel %vm11132_vm13, %v1331_v48, %v1643_v25  ;;  %v1647_v63 = vsel %vm10948_vm4, %v1332_v49, %v1646_v27  ;;  %v1339_v2 = vor.u32 %v1337_v38, %v1336_v50  ;;  %v1340_v3 = vrot.slane %v1336_v50, 4  ;;  %v1658_v48 = vld [vmem:[#allocation2 + $0x2c] sm:$0x1] }
 0x1b4   : > { %1645 = vst [vmem:[#allocation2 + $0x18] sm:$0xf] %v1644_v62  ;;  %1648 = vst [vmem:[#allocation2 + $0x1c] sm:$0x1] %v1647_v63  ;;  %v1632_v6 = vsel %vm11132_vm13, %v1315_v55, %v1631_v35  ;;  %v1635_v7 = vsel %vm10948_vm4, %v1316_v56, %v1634_v43  ;;  %v1323_v8 = vor.u32 %v1321_v46, %v1320_v59  ;;  %v1324_v9 = vrot.slane %v1320_v59, 4  ;;  %v9881_v10 = vpop.f32.mrb[8].mxu0 }
 0x1b5   : > { %1633 = vst [vmem:[#allocation2 + $0x8] sm:$0xf] %v1632_v6  ;;  %1636 = vst [vmem:[#allocation2 + $0xc] sm:$0x1] %v1635_v7  ;;  %v1650_v13 = vsel %vm11132_vm13, %v1339_v2, %v1649_v51  ;;  %v1653_v14 = vsel %vm10948_vm4, %v1340_v3, %v1652_v57  ;;  %v9279_v15 = vpack.c.bf16 %v972_v54, %v972_v54  ;;  %v793_v20 = vpop.f32.mrb[9].mxu0 }
 0x1b6   : > { %v9277_v19 = vpack.c.bf16 %v970_v61, %v970_v61  ;;  %1651 = vst [vmem:[#allocation2 + $0x20] sm:$0xf] %v1650_v13  ;;  %1654 = vst [vmem:[#allocation2 + $0x24] sm:$0x1] %v1653_v14  ;;  %v1638_v21 = vsel %vm11132_vm13, %v1323_v8, %v1637_v4  ;;  %v1641_v22 = vsel %vm10948_vm4, %v1324_v9, %v1640_v5  ;;  %v9882_v27 = vpop.f32.mrb[10].mxu0 }
 0x1b7   : > { %v902_v23 = vmul.f32 %v9878_v33, %v11072_v37  ;;  %v900_v25 = vmul.f32 %v11072_v37, %v780_v40  ;;  %1639 = vst [vmem:[#allocation2 + $0x10] sm:$0xf] %v1638_v21  ;;  %1642 = vst [vmem:[#allocation2 + $0x14] sm:$0x1] %v1641_v22  ;;  %v1358_v28 = vshrl.u32 %v9279_v15, 16  ;;  %v1361_v29 = vshll.u32 %v9279_v15, 16 }
 0x1b8   : > { %v1342_v31 = vshrl.u32 %v9277_v19, 16  ;;  %v1345_v32 = vshll.u32 %v9277_v19, 16  ;;  %v796_v34 = vpop.f32.mrb[11].mxu0  ;;  %v905_v38 = vmul.f32 %v9881_v10, %v11072_v37  ;;  %v903_v39 = vmul.f32 %v11072_v37, %v793_v20  ;;  %v1667_v33 = vld [vmem:[#allocation2 + $0x38] sm:$0xf] }
 0x1b9   : > { %v941_v35 = vadd.f32 %v11077_v44, %v902_v23  ;;  %v939_v36 = vadd.f32 %v11077_v44, %v900_v25  ;;  %v1360_v42 = vrot.slane %v1358_v28, 7  ;;  %v1655_v40 = vld [vmem:[#allocation2 + $0x28] sm:$0xf]  ;;  %v906_v45 = vmul.f32 %v9882_v27, %v11072_v37  ;;  %v1673_v15 = vld [vmem:[#allocation2 + $0x40] sm:$0xf] }
 0x1ba   : > { %v1344_v43 = vrot.slane %v1342_v31, 7  ;;  %v904_v46 = vmul.f32 %v11072_v37, %v796_v34  ;;  %v944_v51 = vadd.f32 %v11077_v44, %v905_v38  ;;  %v942_v54 = vadd.f32 %v11077_v44, %v903_v39  ;;  %v1676_v25 = vld [vmem:[#allocation2 + $0x44] sm:$0x1]  ;;  %v1661_v28 = vld [vmem:[#allocation2 + $0x30] sm:$0xf] }
 0x1bb   : > { %v973_v49 = vmax.f32 %v941_v35, 0.0  ;;  %v971_v50 = vmax.f32 %v939_v36, 0.0  ;;  %v1363_v55 = vor.u32 %v1361_v29, %v1360_v42  ;;  %v1364_v56 = vrot.slane %v1360_v42, 4 }
 0x1bc   : > { %v1347_v57 = vor.u32 %v1345_v32, %v1344_v43  ;;  %v1348_v59 = vrot.slane %v1344_v43, 4  ;;  %v976_v63 = vmax.f32 %v944_v51, 0.0  ;;  %v974_v2 = vmax.f32 %v942_v54, 0.0  ;;  %v9885_v3 = vpop.f32.mrb[12].mxu0  ;;  %v1664_v32 = vld [vmem:[#allocation2 + $0x34] sm:$0x1] }
 0x1bd   : > { %v9280_v61 = vpack.c.bf16 %v973_v49, %v973_v49  ;;  %v9278_v62 = vpack.c.bf16 %v971_v50, %v971_v50  ;;  %v1668_v4 = vsel %vm11132_vm13, %v1363_v55, %v1667_v33  ;;  %v1671_v5 = vsel %vm10948_vm4, %v1364_v56, %v1670_v47  ;;  %v809_v8 = vpop.f32.mrb[13].mxu0 }
 0x1be   : > { %v1656_v6 = vsel %vm11132_vm13, %v1347_v57, %v1655_v40  ;;  %v1659_v7 = vsel %vm10948_vm4, %v1348_v59, %v1658_v48  ;;  %1669 = vst [vmem:[#allocation2 + $0x38] sm:$0xf] %v1668_v4  ;;  %1672 = vst [vmem:[#allocation2 + $0x3c] sm:$0x1] %v1671_v5  ;;  %v9283_v19 = vpack.c.bf16 %v976_v63, %v976_v63  ;;  %v1691_v40 = vld [vmem:[#allocation2 + $0x68] sm:$0xf] }
 0x1bf   : > { %1657 = vst [vmem:[#allocation2 + $0x28] sm:$0xf] %v1656_v6  ;;  %1660 = vst [vmem:[#allocation2 + $0x2c] sm:$0x1] %v1659_v7  ;;  %v1366_v9 = vshrl.u32 %v9280_v61, 16  ;;  %v1369_v10 = vshll.u32 %v9280_v61, 16  ;;  %v9281_v20 = vpack.c.bf16 %v974_v2, %v974_v2  ;;  %v945_v21 = vadd.f32 %v11077_v44, %v906_v45 }
 0x1c0   : > { %v1350_v13 = vshrl.u32 %v9278_v62, 16  ;;  %v1353_v14 = vshll.u32 %v9278_v62, 16  ;;  %v943_v22 = vadd.f32 %v11077_v44, %v904_v46  ;;  %v909_v29 = vmul.f32 %v9885_v3, %v11072_v37  ;;  %v11175_v45 = vpop.f32.mrb[14].mxu0  ;;  %v1694_v57 = vld [vmem:[#allocation2 + $0x6c] sm:$0x1] }
 0x1c1   : > { %v1368_v23 = vrot.slane %v1366_v9, 7  ;;  %v907_v31 = vmul.f32 %v11072_v37, %v809_v8  ;;  %v1390_v34 = vshrl.u32 %v9283_v19, 16  ;;  %v1393_v35 = vshll.u32 %v9283_v19, 16  ;;  %v11177_v50 = vpop.f32.mrb[15].mxu0  ;;  %v1679_v59 = vld [vmem:[#allocation2 + $0x58] sm:$0xf] }
 0x1c2   : > { %v1352_v27 = vrot.slane %v1350_v13, 7  ;;  %v1374_v36 = vshrl.u32 %v9281_v20, 16  ;;  %v1377_v38 = vshll.u32 %v9281_v20, 16  ;;  %v977_v48 = vmax.f32 %v945_v21, 0.0  ;;  %v1682_v61 = vld [vmem:[#allocation2 + $0x5c] sm:$0x1] }
 0x1c3   : > { %v1371_v39 = vor.u32 %v1369_v10, %v1368_v23  ;;  %v1372_v42 = vrot.slane %v1368_v23, 4  ;;  %v1392_v46 = vrot.slane %v1390_v34, 7  ;;  %v975_v49 = vmax.f32 %v943_v22, 0.0  ;;  %v11189_v8 = vld [vmem:[#allocation2 + $0x8] sm:$0xf] }
 0x1c4   : > { %v1355_v33 = vor.u32 %v1353_v14, %v1352_v27  ;;  %v1356_v43 = vrot.slane %v1352_v27, 4  ;;  %v1376_v47 = vrot.slane %v1374_v36, 7  ;;  %v9284_v4 = vpack.c.bf16 %v977_v48, %v977_v48  ;;  %v11201_v23 = vpop.f32.mrb[16].mxu0  ;;  %v1700_v27 = vld [vmem:[#allocation2 + $0x74] sm:$0x1] }
 0x1c5   : > { %v1674_v51 = vsel %vm11132_vm13, %v1371_v39, %v1673_v15  ;;  %v1677_v54 = vsel %vm10948_vm4, %v1372_v42, %v1676_v25  ;;  %v1395_v62 = vor.u32 %v1393_v35, %v1392_v46  ;;  %v1396_v63 = vrot.slane %v1392_v46, 4  ;;  %v11199_v15 = vld [vmem:[#allocation2 + $0x10] sm:$0xf]  ;;  %v11205_v35 = vpop.f32.mrb[17].mxu0 }
 0x1c6   : > { %v1662_v55 = vsel %vm11132_vm13, %v1355_v33, %v1661_v28  ;;  %v1665_v56 = vsel %vm10948_vm4, %v1356_v43, %v1664_v32  ;;  %1675 = vst [vmem:[#allocation2 + $0x40] sm:$0xf] %v1674_v51  ;;  %1678 = vst [vmem:[#allocation2 + $0x44] sm:$0x1] %v1677_v54  ;;  %v1379_v2 = vor.u32 %v1377_v38, %v1376_v47  ;;  %v1380_v3 = vrot.slane %v1376_v47, 4  ;;  %v11209_v33 = vpop.f32.mrb[18].mxu0 }
 0x1c7   : > { %1663 = vst [vmem:[#allocation2 + $0x30] sm:$0xf] %v1662_v55  ;;  %1666 = vst [vmem:[#allocation2 + $0x34] sm:$0x1] %v1665_v56  ;;  %v9282_v5 = vpack.c.bf16 %v975_v49, %v975_v49  ;;  %v948_v6 = vadd.f32 %v11077_v44, %v909_v29  ;;  %v946_v7 = vadd.f32 %v11077_v44, %v907_v31  ;;  %v1398_v19 = vshrl.u32 %v9284_v4, 16  ;;  %v11211_v49 = vpop.f32.mrb[19].mxu0 }
 0x1c8   : > { %v1692_v9 = vsel %vm11132_vm13, %v1395_v62, %v1691_v40  ;;  %v1695_v10 = vsel %vm10948_vm4, %v1396_v63, %v1694_v57  ;;  %v1680_v13 = vsel %vm11132_vm13, %v1379_v2, %v1679_v59  ;;  %v1683_v14 = vsel %vm10948_vm4, %v1380_v3, %v1682_v61  ;;  %v1697_v25 = vld [vmem:[#allocation2 + $0x70] sm:$0xf]  ;;  %v1685_v28 = vld [vmem:[#allocation2 + $0x60] sm:$0xf]  ;;  %v1688_v43 = vld [vmem:[#allocation2 + $0x64] sm:$0x1] }
 0x1c9   : > { %1693 = vst [vmem:[#allocation2 + $0x68] sm:$0xf] %v1692_v9  ;;  %1696 = vst [vmem:[#allocation2 + $0x6c] sm:$0x1] %v1695_v10  ;;  %v1401_v20 = vshll.u32 %v9284_v4, 16  ;;  %v1382_v21 = vshrl.u32 %v9282_v5, 16 }
 0x1ca   : > { %1681 = vst [vmem:[#allocation2 + $0x58] sm:$0xf] %v1680_v13  ;;  %1684 = vst [vmem:[#allocation2 + $0x5c] sm:$0x1] %v1683_v14  ;;  %v1385_v22 = vshll.u32 %v9282_v5, 16  ;;  %v980_v29 = vmax.f32 %v948_v6, 0.0 }
 0x1cb   : > { %v978_v31 = vmax.f32 %v946_v7, 0.0  ;;  %v2630_v32 = vshrl.u32 %v11189_v8, 16  ;;  %v2633_v34 = vshll.u32 %v11189_v8, 16  ;;  %v1400_v36 = vrot.slane %v1398_v19, 7  ;;  %v11213_v57 = vld [vmem:[#allocation2 + $0xc] sm:$0x1] }
 0x1cc   : > { %v1384_v38 = vrot.slane %v1382_v21, 7  ;;  %v2644_v39 = vshrl.u32 %v11199_v15, 16  ;;  %v2647_v42 = vshll.u32 %v11199_v15, 16  ;;  %v9287_v40 = vpack.c.bf16 %v980_v29, %v980_v29  ;;  %v2339_v2 = vld [vmem:[#allocation2 + $0x8] sm:$0xe]  ;;  %v11223_v13 = vpop.f32.mrb[20].mxu0 }
 0x1cd   : > { %v9285_v46 = vpack.c.bf16 %v978_v31, %v978_v31  ;;  %v2632_v47 = vrot.slane %v2630_v32, 4  ;;  %v2635_v48 = vrot.slane %v2633_v34, 5  ;;  %v1403_v51 = vor.u32 %v1401_v20, %v1400_v36  ;;  %v1715_v7 = vld [vmem:[#allocation2 + $0x88] sm:$0xf]  ;;  %v1703_v9 = vld [vmem:[#allocation2 + $0x78] sm:$0xf] }
 0x1ce   : > { %v1404_v54 = vrot.slane %v1400_v36, 4  ;;  %v1387_v55 = vor.u32 %v1385_v22, %v1384_v38  ;;  %v1388_v56 = vrot.slane %v1384_v38, 4  ;;  %v1422_v59 = vshrl.u32 %v9287_v40, 16  ;;  %v1706_v10 = vld [vmem:[#allocation2 + $0x7c] sm:$0x1] }
 0x1cf   : > { %v1425_v61 = vshll.u32 %v9287_v40, 16  ;;  %v1406_v62 = vshrl.u32 %v9285_v46, 16  ;;  %v1409_v63 = vshll.u32 %v9285_v46, 16  ;;  %v1698_v3 = vsel %vm11132_vm13, %v1403_v51, %v1697_v25  ;;  %v2567_v22 = vld [vmem:[#allocation2 + $0x18] sm:$0xf]  ;;  %v11225_v25 = vpop.f32.mrb[21].mxu0 }
 0x1d0   : > { %v1701_v4 = vsel %vm10948_vm4, %v1404_v54, %v1700_v27  ;;  %v1686_v5 = vsel %vm11132_vm13, %v1387_v55, %v1685_v28  ;;  %v1689_v6 = vsel %vm10948_vm4, %v1388_v56, %v1688_v43  ;;  %1699 = vst [vmem:[#allocation2 + $0x70] sm:$0xf] %v1698_v3  ;;  %v1424_v14 = vrot.slane %v1422_v59, 7  ;;  %v1718_v27 = vld [vmem:[#allocation2 + $0x8c] sm:$0x1]  ;;  %v11230_v34 = vpop.f32.mrb[22].mxu0 }
 0x1d1   : > { %1702 = vst [vmem:[#allocation2 + $0x74] sm:$0x1] %v1701_v4  ;;  %1687 = vst [vmem:[#allocation2 + $0x60] sm:$0xf] %v1686_v5  ;;  %v1408_v19 = vrot.slane %v1406_v62, 7  ;;  %v2636_v20 = vor.u32 %v2635_v48, %v2632_v47  ;;  %v2646_v21 = vrot.slane %v2644_v39, 4  ;;  %v8951_v29 = vcombine.low %v11189_v8, %v11199_v15 }
 0x1d2   : > { %1690 = vst [vmem:[#allocation2 + $0x64] sm:$0x1] %v1689_v6  ;;  %v2649_v28 = vrot.slane %v2647_v42, 5  ;;  %v8808_v31 = vrot.slane %v2339_v2, 9  ;;  %v2443_v32 = vrot.slane %v11213_v57, 5  ;;  %v1427_v36 = vor.u32 %v1425_v61, %v1424_v14  ;;  %v11246_v56 = vpop.f32.mrb[23].mxu0 }
 0x1d3   : > { %v1428_v38 = vrot.slane %v1424_v14, 4  ;;  %v1411_v43 = vor.u32 %v1409_v63, %v1408_v19  ;;  %v1412_v40 = vrot.slane %v1408_v19, 4  ;;  %v11232_v46 = vrot.slane %v2636_v20, 4  ;;  %5479 = vmatprep.mubr.bf16.mxu0 %v8951_v29  ;;  %v2568_v42 = vld [vmem:[#allocation2 + $0x20] sm:$0xf] }
 0x1d4   : > { %v2650_v39 = vor.u32 %v2649_v28, %v2646_v21  ;;  %v2444_v47 = vsel %vm11089_vm10, %v8808_v31, %v2443_v32  ;;  %v2658_v48 = vshrl.u32 %v2567_v22, 16  ;;  %v11236_v51 = vld [vmem:[#allocation2 + $0x8] sm:$0xf]  ;;  %v1716_v8 = vsel %vm11132_vm13, %v1427_v36, %v1715_v7  ;;  %v11253_v2 = vld [vmem:[#allocation2 + $0x10] sm:$0xf]  ;;  %v11257_v4 = vpop.f32.mrb[24].mxu0 }
 0x1d5   : > { %v1719_v15 = vsel %vm10948_vm4, %v1428_v38, %v1718_v27  ;;  %v1704_v54 = vsel %vm11132_vm13, %v1411_v43, %v1703_v9  ;;  %v1707_v55 = vsel %vm10948_vm4, %v1412_v40, %v1706_v10  ;;  %1717 = vst [vmem:[#allocation2 + $0x88] sm:$0xf] %v1716_v8  ;;  %v8935_v61 = vcombine.low %v11113_v11, %v2444_v47  ;;  %v11255_v3 = vld [vmem:[#allocation2 + $0x18] sm:$0xf]  ;;  %v1857_v10 = vld [vmem:[#allocation2 + $0x14] sm:$0x1] }
 0x1d6   : > { %1720 = vst [vmem:[#allocation2 + $0x8c] sm:$0x1] %v1719_v15  ;;  %1705 = vst [vmem:[#allocation2 + $0x78] sm:$0xf] %v1704_v54  ;;  %v11248_v59 = vrot.slane %v2650_v39, 4  ;;  %v11251_v62 = vrot.slane %v2658_v48, 4  ;;  %v8952_v7 = vcombine.low %v2567_v22, %v2568_v42  ;;  %v8903_v21 = vcombine.low %v11061_v18, %v11236_v51 }
 0x1d7   : > { %1708 = vst [vmem:[#allocation2 + $0x7c] sm:$0x1] %v1707_v55  ;;  %v2661_v63 = vshll.u32 %v2567_v22, 16  ;;  %v2672_v5 = vshrl.u32 %v2568_v42, 16  ;;  %v2675_v6 = vshll.u32 %v2568_v42, 16  ;;  %v1905_v9 = vshrl.u32 %v11236_v51, 16  ;;  %5480 = vmatmul.mubr.bf16.vlgmr.msra.gmra.mrb[32].mxu0 %v8935_v61 }
 0x1d8   : > { %v11260_v14 = vpop.f32.mrb[25].mxu0  ;;  %v1908_v11 = vshll.u32 %v11236_v51, 16  ;;  %v1914_v20 = vshll.u32 %v11213_v57, 16  ;;  %v1858_v27 = vld [vmem:[#allocation2 + $0x1c] sm:$0x1]  ;;  %5487 = vmatprep.mubr.bf16.mxu0 %v8952_v7  ;;  %v1919_v32 = vshrl.u32 %v11253_v2, 16 }
 0x1d9   : > { %v11262_v19 = vrot.slane %v2661_v63, 5  ;;  %v11268_v28 = vpop.f32.mrb[26].mxu0  ;;  %v11270_v29 = vrot.slane %v2672_v5, 4  ;;  %v11272_v22 = vrot.slane %v2675_v6, 5  ;;  %v1907_v31 = vrot.slane %v1905_v9, 4 }
 0x1da   : > { %v2340_v36 = vld [vmem:[#allocation2 + $0x10] sm:$0xe]  ;;  %v1910_v38 = vrot.slane %v1908_v11, 5  ;;  %v1916_v43 = vrot.slane %v1914_v20, 5  ;;  %v1922_v40 = vshll.u32 %v11253_v2, 16  ;;  %v1928_v57 = vshll.u32 %v1857_v10, 16 }
 0x1db   : > { %14888 = vst [vmem:[#allocation20_spill] sm:$0xff] %v11262_v19  ;;  %14889 = vst [vmem:[#allocation21_spill] sm:$0xff] %v11270_v29  ;;  %v1921_v39 = vrot.slane %v1919_v32, 4  ;;  %v1933_v18 = vshrl.u32 %v11255_v3, 16  ;;  %v1936_v47 = vshll.u32 %v11255_v3, 16  ;;  %v1942_v42 = vshll.u32 %v1858_v27, 16 }
 0x1dc   : > { %14890 = vst [vmem:[#allocation22_spill] sm:$0xff] %v11272_v22  ;;  %v2341_v48 = vld [vmem:[#allocation2 + $0x18] sm:$0xe]  ;;  %v1911_v51 = vor.u32 %v1910_v38, %v1907_v31  ;;  %v1924_v8 = vrot.slane %v1922_v40, 5  ;;  %v1930_v15 = vrot.slane %v1928_v57, 5  ;;  %v8809_v54 = vrot.slane %v2340_v36, 9 }
 0x1dd   : > { %v2569_v55 = vld [vmem:[#allocation2 + $0x28] sm:$0xf]  ;;  %v11278_v61 = vpop.f32.mrb[27].mxu0  ;;  %v1935_v63 = vrot.slane %v1933_v18, 4  ;;  %v1938_v5 = vrot.slane %v1936_v47, 5  ;;  %v1944_v6 = vrot.slane %v1942_v42, 5 }
 0x1de   : > { %v2447_v7 = vrot.slane %v1857_v10, 5  ;;  %v2570_v9 = vld [vmem:[#allocation2 + $0x30] sm:$0xf]  ;;  %v1912_v11 = vrot.slane %v1911_v51, 4  ;;  %v1925_v20 = vor.u32 %v1924_v8, %v1921_v39  ;;  %v8810_v32 = vrot.slane %v2341_v48, 9  ;;  %v11280_v17 = vpop.f32.mrb[28].mxu0 }
 0x1df   : > { %v2451_v24 = vrot.slane %v1858_v27, 5  ;;  %v1939_v12 = vor.u32 %v1938_v5, %v1935_v63  ;;  %v2686_v38 = vshrl.u32 %v2569_v55, 16  ;;  %v2689_v36 = vshll.u32 %v2569_v55, 16  ;;  %v11288_v47 = vld [vmem:[#allocation2 + $0x20] sm:$0xf] }
 0x1e0   : > { %v2448_v31 = vsel %vm11089_vm10, %v8809_v54, %v2447_v7  ;;  %v1917_v40 = vsel %vm11099_vm11, %v1912_v11, %v1916_v43  ;;  %v1926_v57 = vrot.slane %v1925_v20, 4  ;;  %v2700_v18 = vshrl.u32 %v2570_v9, 16  ;;  %v10119_v42 = vld [vmem:[#allocation8 + $0x100] sm:$0xff]   ;;  %v10123_v54 = vld [vmem:[#allocation8 + $0x148] sm:$0xff]   ;;  %v11303_v11 = vpop.f32.mrb[29].mxu0 }
 0x1e1   : > { %v2452_v10 = vsel %vm11089_vm10, %v8810_v32, %v2451_v24  ;;  %v14891_v27 = vsel %vm11099_vm11, %v11081_v52, %v11083_v53  ;;  %v1940_v48 = vrot.slane %v1939_v12, 4  ;;  %v11295_v8 = vrot.slane %v2686_v38, 4  ;;  %v1859_v7 = vld [vmem:[#allocation2 + $0x24] sm:$0x1]  ;;  %v11309_v20 = vld [vmem:[#allocation2 + $0x28] sm:$0xf] }
 0x1e2   : > { %v8919_v39 = vcombine.low %v14891_v27, %v1917_v40  ;;  %v8936_v51 = vcombine.low %v2448_v31, %v2452_v10  ;;  %v1931_v43 = vsel %vm11099_vm11, %v1926_v57, %v1930_v15  ;;  %v11299_v63 = vrot.slane %v2689_v36, 5  ;;  %v10125_v40 = vld [vmem:[#allocation8 + $0x108] sm:$0xff]  }
 0x1e3   : > { %14892 = vst [vmem:[#allocation23_spill] sm:$0xff] %v11295_v8  ;;  %v11301_v24 = vrot.slane %v2700_v18, 4  ;;  %v2703_v5 = vshll.u32 %v2570_v9, 16  ;;  %v1945_v52 = vsel %vm11099_vm11, %v1940_v48, %v1944_v6  ;;  %v8953_v53 = vcombine.low %v2569_v55, %v2570_v9  ;;  %v2342_v6 = vld [vmem:[#allocation2 + $0x20] sm:$0xe]  ;;  %v11318_v55 = vpop.f32.mrb[30].mxu0 }
 0x1e4   : > { %14893 = vst [vmem:[#allocation24_spill] sm:$0xff] %v11299_v63  ;;  %5318 = vmatprep.mubr.bf16.mxu1 %v8919_v39  ;;  %5488 = vmatmul.mubr.bf16.gmra.mrb[36].mxu0 %v8936_v51  ;;  %v910_v12 = vmul.f32 %v11175_v45, %v11072_v37  ;;  %v1947_v15 = vshrl.u32 %v11288_v47, 16  ;;  %v8920_v32 = vcombine.low %v1931_v43, %v1945_v52  ;;  %v1860_v9 = vld [vmem:[#allocation2 + $0x2c] sm:$0x1]  ;;  %v1956_v10 = vshll.u32 %v1859_v7, 16  ;;  %v11322_v18 = vpop.f32.mrb[31].mxu0 }
 0x1e5   : > { %14894 = vst [vmem:[#allocation25_spill] sm:$0xff] %v11301_v24  ;;  %5319 = vmatmul.mubr.bf16.vlgmr.msra.gmra.mrb[0].mxu1 %v8903_v21  ;;  %v11312_v31 = vrot.slane %v2703_v5, 5  ;;  %v908_v38 = vmul.f32 %v11072_v37, %v11177_v50  ;;  %v8904_v36 = vcombine.low %v11253_v2, %v11255_v3  ;;  %5495 = vmatprep.mubr.bf16.mxu0 %v8953_v53  ;;  %v1950_v21 = vshll.u32 %v11288_v47, 16  ;;  %v2343_v39 = vld [vmem:[#allocation2 + $0x28] sm:$0xe]  ;;  %v10131_v8 = vld [vmem:[#allocation8 + $0x110] sm:$0xff]  }
 0x1e6   : > { %9616 = vmatpush3.bf16.msra.mxu1 %v10119_v42  ;;  %v949_v45 = vadd.f32 %v11077_v44, %v910_v12  ;;  %v1949_v57 = vrot.slane %v1947_v15, 4  ;;  %5326 = vmatprep.mubr.bf16.mxu1 %v8920_v32  ;;  %v1961_v2 = vshrl.u32 %v11309_v20, 16  ;;  %v1964_v3 = vshll.u32 %v11309_v20, 16  ;;  %v10129_v42 = vld [vmem:[#allocation8 + $0x150] sm:$0xff]   ;;  %v11327_v52 = vld [vmem:[#allocation2 + $0x38] sm:$0xf] }
 0x1e7   : > { %14895 = vst [vmem:[#allocation26_spill] sm:$0xff] %v11312_v31  ;;  %v947_v50 = vadd.f32 %v11077_v44, %v908_v38  ;;  %v1970_v27 = vshll.u32 %v1860_v9, 16  ;;  %9617 = vmatprep.subr.bf16.mxu1 %v10123_v54  ;;  %v1952_v51 = vrot.slane %v1950_v21, 5  ;;  %v1958_v43 = vrot.slane %v1956_v10, 5  ;;  %v10135_v21 = vld [vmem:[#allocation8 + $0x158] sm:$0xff]  }
 0x1e8   : > { %v981_v48 = vmax.f32 %v949_v45, 0.0  ;;  %v8811_v5 = vrot.slane %v2342_v6, 9  ;;  %v1963_v12 = vrot.slane %v1961_v2, 4  ;;  %v1966_v15 = vrot.slane %v1964_v3, 5  ;;  %v2572_v2 = vld [vmem:[#allocation2 + $0x40] sm:$0xf] }
 0x1e9   : > { %v979_v53 = vmax.f32 %v947_v50, 0.0  ;;  %v1972_v32 = vrot.slane %v1970_v27, 5  ;;  %v1953_v38 = vor.u32 %v1952_v51, %v1949_v57  ;;  %v2455_v24 = vrot.slane %v1859_v7, 5  ;;  %v1721_v3 = vld [vmem:[#allocation2 + $0x90] sm:$0xf]  ;;  %v10137_v51 = vld [vmem:[#allocation8 + $0x118] sm:$0xff]  }
 0x1ea   : > { %v9288_v31 = vpack.c.bf16 %v981_v48, %v981_v48  ;;  %v8812_v63 = vrot.slane %v2343_v39, 9  ;;  %9618 = vmatpush3.bf16.msra.mxu1 %v10125_v40  ;;  %v1967_v29 = vor.u32 %v1966_v15, %v1963_v12  ;;  %v2459_v54 = vrot.slane %v1860_v9, 5  ;;  %v1724_v39 = vld [vmem:[#allocation2 + $0x94] sm:$0x1]  ;;  %v1712_v15 = vld [vmem:[#allocation2 + $0x84] sm:$0x1] }
 0x1eb   : > { %v9286_v22 = vpack.c.bf16 %v979_v53, %v979_v53  ;;  %v2714_v45 = vshrl.u32 %v11327_v52, 16  ;;  %9619 = vmatprep.subr.bf16.mxu1 %v10129_v42  ;;  %v1954_v19 = vrot.slane %v1953_v38, 4  ;;  %v2456_v50 = vsel %vm11089_vm10, %v8811_v5, %v2455_v24  ;;  %v1709_v5 = vld [vmem:[#allocation2 + $0x80] sm:$0xf] }
 0x1ec   : > { %v1430_v6 = vshrl.u32 %v9288_v31, 16  ;;  %v1433_v10 = vshll.u32 %v9288_v31, 16  ;;  %v1968_v40 = vrot.slane %v1967_v29, 4  ;;  %v2460_v27 = vsel %vm11089_vm10, %v8812_v63, %v2459_v54  ;;  %v10141_v63 = vld [vmem:[#allocation8 + $0x160] sm:$0xff]  }
 0x1ed   : > { %v1414_v57 = vshrl.u32 %v9286_v22, 16  ;;  %v1417_v7 = vshll.u32 %v9286_v22, 16  ;;  %5327 = vmatmul.mubr.bf16.gmra.mrb[4].mxu1 %v8904_v36  ;;  %v1959_v42 = vsel %vm11099_vm11, %v1954_v19, %v1958_v43  ;;  %v8937_v48 = vcombine.low %v2456_v50, %v2460_v27  ;;  %v11341_v43 = vld [vmem:[#allocation2 + $0x30] sm:$0xf]  ;;  %v10143_v27 = vld [vmem:[#allocation8 + $0x120] sm:$0xff]  }
 0x1ee   : > { %v1432_v9 = vrot.slane %v1430_v6, 7  ;;  %v11336_v31 = vrot.slane %v2714_v45, 4  ;;  %9620 = vmatpush3.bf16.msra.mxu1 %v10131_v8  ;;  %v1973_v22 = vsel %vm11099_vm11, %v1968_v40, %v1972_v32  ;;  %v2717_v29 = vshll.u32 %v11327_v52, 16  ;;  %v11347_v32 = vld [vmem:[#allocation2 + $0x38] sm:$0xf] }
 0x1ef   : > { %v1416_v24 = vrot.slane %v1414_v57, 7  ;;  %v2728_v36 = vshrl.u32 %v2572_v2, 16  ;;  %9621 = vmatprep.subr.bf16.mxu1 %v10135_v21  ;;  %v8921_v38 = vcombine.low %v1959_v42, %v1973_v22  ;;  %5496 = vmatmul.mubr.bf16.gmra.mrb[40].mxu0 %v8937_v48  ;;  %v2731_v19 = vshll.u32 %v2572_v2, 16  ;;  %v1861_v40 = vld [vmem:[#allocation2 + $0x34] sm:$0x1] }
 0x1f0   : > { %v1435_v53 = vor.u32 %v1433_v10, %v1432_v9  ;;  %v1436_v12 = vrot.slane %v1432_v9, 4  ;;  %v11343_v45 = vrot.slane %v2717_v29, 5  ;;  %v8954_v57 = vcombine.low %v11327_v52, %v2572_v2  ;;  %v1862_v42 = vld [vmem:[#allocation2 + $0x3c] sm:$0x1]  ;;  %v10147_v52 = vld [vmem:[#allocation8 + $0x168] sm:$0xff]  }
 0x1f1   : > { %v1419_v8 = vor.u32 %v1417_v7, %v1416_v24  ;;  %v1420_v54 = vrot.slane %v1416_v24, 4  ;;  %v11345_v6 = vrot.slane %v2728_v36, 4  ;;  %5334 = vmatprep.mubr.bf16.mxu1 %v8921_v38  ;;  %v11353_v50 = vrot.slane %v2731_v19, 5  ;;  %v2344_v7 = vld [vmem:[#allocation2 + $0x30] sm:$0xe] }
 0x1f2   : > { %v1722_v21 = vsel %vm11132_vm13, %v1435_v53, %v1721_v3  ;;  %v1725_v10 = vsel %vm10948_vm4, %v1436_v12, %v1724_v39  ;;  %9622 = vmatpush3.bf16.msra.mxu1 %v10137_v51  ;;  %v8905_v39 = vcombine.low %v11288_v47, %v11309_v20  ;;  %v1975_v48 = vshrl.u32 %v11341_v43, 16  ;;  %v2345_v24 = vld [vmem:[#allocation2 + $0x38] sm:$0xe]  ;;  %5503 = vmatprep.mubr.bf16.mxu0 %v8954_v57  ;;  %v2574_v12 = vld [vmem:[#allocation2 + $0x60] sm:$0xf] }
 0x1f3   : > { %1723 = vst [vmem:[#allocation2 + $0x90] sm:$0xf] %v1722_v21  ;;  %1726 = vst [vmem:[#allocation2 + $0x94] sm:$0x1] %v1725_v10  ;;  %v1710_v9 = vsel %vm11132_vm13, %v1419_v8, %v1709_v5  ;;  %v1713_v3 = vsel %vm10948_vm4, %v1420_v54, %v1712_v15  ;;  %9623 = vmatprep.subr.bf16.mxu1 %v10141_v63  ;;  %v1978_v2 = vshll.u32 %v11341_v43, 16  ;;  %v1984_v51 = vshll.u32 %v1861_v40, 16 }
 0x1f4   : > { %1711 = vst [vmem:[#allocation2 + $0x80] sm:$0xf] %v1710_v9  ;;  %1714 = vst [vmem:[#allocation2 + $0x84] sm:$0x1] %v1713_v3  ;;  %v1989_v5 = vshrl.u32 %v11347_v32, 16  ;;  %v1992_v22 = vshll.u32 %v11347_v32, 16 }
 0x1f5   : > { %v2573_v29 = vld [vmem:[#allocation2 + $0x58] sm:$0xf]  ;;  %5335 = vmatmul.mubr.bf16.gmra.mrb[8].mxu1 %v8905_v39  ;;  %v1977_v36 = vrot.slane %v1975_v48, 4  ;;  %v1998_v47 = vshll.u32 %v1862_v42, 16  ;;  %v8813_v20 = vrot.slane %v2344_v7, 9  ;;  %v2463_v53 = vrot.slane %v1861_v40, 5 }
 0x1f6   : > { %v1980_v15 = vrot.slane %v1978_v2, 5  ;;  %v1986_v63 = vrot.slane %v1984_v51, 5  ;;  %v1991_v38 = vrot.slane %v1989_v5, 4  ;;  %v1994_v19 = vrot.slane %v1992_v22, 5  ;;  %9624 = vmatpush3.bf16.msra.mxu1 %v10143_v27  ;;  %v10149_v8 = vld [vmem:[#allocation8 + $0x128] sm:$0xff]   ;;  %v10152_v51 = vld [vmem:[#allocation8 + $0x1c0] sm:$0xff]  }
 0x1f7   : > { %v2000_v54 = vrot.slane %v1998_v47, 5  ;;  %v2464_v21 = vsel %vm11089_vm10, %v8813_v20, %v2463_v53  ;;  %v8814_v10 = vrot.slane %v2345_v24, 9  ;;  %v2467_v57 = vrot.slane %v1862_v42, 5  ;;  %9625 = vmatprep.subr.bf16.mxu1 %v10147_v52  ;;  %9727 = vmatprep.subr.bf16.mxu0 %v10152_v51  ;;  %v10159_v51 = vld [vmem:[#allocation8 + $0x130] sm:$0xff]  }
 0x1f8   : > { %v1981_v9 = vor.u32 %v1980_v15, %v1977_v36  ;;  %v1995_v3 = vor.u32 %v1994_v19, %v1991_v38  ;;  %v913_v7 = vmul.f32 %v11201_v23, %v11072_v37  ;;  %v911_v40 = vmul.f32 %v11072_v37, %v11205_v35  ;;  %v11386_v15 = vld [vmem:[#allocation2 + $0x58] sm:$0xe] }
 0x1f9   : > { %v2468_v39 = vsel %vm11089_vm10, %v8814_v10, %v2467_v57  ;;  %v2742_v27 = vshrl.u32 %v2573_v29, 16  ;;  %v2745_v48 = vshll.u32 %v2573_v29, 16  ;;  %v2756_v2 = vshrl.u32 %v2574_v12, 16 }
 0x1fa   : > { %v1982_v5 = vrot.slane %v1981_v9, 4  ;;  %v1996_v22 = vrot.slane %v1995_v3, 4  ;;  %v8938_v24 = vcombine.low %v2464_v21, %v2468_v39  ;;  %v952_v42 = vadd.f32 %v11077_v44, %v913_v7  ;;  %9626 = vmatpush3.bf16.msra.mxu1 %v10149_v8  ;;  %v11391_v8 = vld [vmem:[%s14825_s2] ss:$0 sm:$0xff] }
 0x1fb   : > { %v950_v52 = vadd.f32 %v11077_v44, %v911_v40  ;;  %v11376_v36 = vrot.slane %v2742_v27, 4  ;;  %v11378_v23 = vrot.slane %v2745_v48, 5  ;;  %v11380_v37 = vrot.slane %v2756_v2, 4  ;;  %v10154_v7 = vld [vmem:[#allocation8 + $0x180] sm:$0xff]   ;;  %v11412_v48 = vld [vmem:[#allocation2 + $0x5c] sm:$0x1] }
 0x1fc   : > { %v1987_v35 = vsel %vm11099_vm11, %v1982_v5, %v1986_v63  ;;  %v2001_v47 = vsel %vm11099_vm11, %v1996_v22, %v2000_v54  ;;  %5504 = vmatmul.mubr.bf16.gmra.mrb[44].mxu0 %v8938_v24  ;;  %v984_v20 = vmax.f32 %v952_v42, 0.0  ;;  %v2759_v53 = vshll.u32 %v2574_v12, 16  ;;  %v10157_v2 = vld [vmem:[#allocation8 + $0x170] sm:$0xff]  }
 0x1fd   : > { %v8922_v38 = vcombine.low %v1987_v35, %v2001_v47  ;;  %v982_v44 = vmax.f32 %v950_v52, 0.0  ;;  %v8955_v19 = vcombine.low %v2573_v29, %v2574_v12  ;;  %v914_v21 = vmul.f32 %v11391_v8, %v11209_v33  ;;  %v11404_v29 = vld [vmem:[%s14826_s3] ss:$0 sm:$0xff]  ;;  %9728 = vmatpush3.bf16.msra.mxu0 %v10154_v7  ;;  %v1739_v35 = vld [vmem:[#allocation2 + $0xb8] sm:$0xf]  ;;  %9627 = vmatprep.subr.bf16.mxu1 %v10157_v2 }
 0x1fe   : > { %v9291_v63 = vpack.c.bf16 %v984_v20, %v984_v20  ;;  %v11395_v10 = vrot.slane %v2759_v53, 5  ;;  %v912_v54 = vmul.f32 %v11391_v8, %v11211_v49  ;;  %v917_v57 = vmul.f32 %v11391_v8, %v11223_v13  ;;  %v10155_v49 = vld [vmem:[#allocation8 + $0x1c8] sm:$0xff]   ;;  %9628 = vmatpush3.bf16.msra.mxu1 %v10159_v51  ;;  %v1745_v2 = vld [vmem:[#allocation2 + $0xc0] sm:$0xf] }
 0x1ff   : > { %5342 = vmatprep.mubr.bf16.mxu1 %v8922_v38  ;;  %v9289_v9 = vpack.c.bf16 %v982_v44, %v982_v44  ;;  %5511 = vmatprep.mubr.bf16.mxu0 %v8955_v19  ;;  %v953_v12 = vadd.f32 %v11404_v29, %v914_v21  ;;  %v915_v33 = vmul.f32 %v11391_v8, %v11225_v25  ;;  %v8816_v3 = vrot.slane %v11386_v15, 9  ;;  %v10156_v25 = vld [vmem:[#allocation8 + $0x188] sm:$0xff]   ;;  %v1742_v38 = vld [vmem:[#allocation2 + $0xbc] sm:$0x1] }
 0x200   : > { %v1454_v40 = vshrl.u32 %v9291_v63, 16  ;;  %v1457_v39 = vshll.u32 %v9291_v63, 16  ;;  %v951_v13 = vadd.f32 %v11404_v29, %v912_v54  ;;  %v956_v27 = vadd.f32 %v11404_v29, %v917_v57  ;;  %9729 = vmatprep.subr.bf16.mxu0 %v10155_v49 }
 0x201   : > { %v1438_v5 = vshrl.u32 %v9289_v9, 16  ;;  %v1441_v22 = vshll.u32 %v9289_v9, 16  ;;  %v985_v24 = vmax.f32 %v953_v12, 0.0  ;;  %v954_v42 = vadd.f32 %v11404_v29, %v915_v33  ;;  %v1727_v9 = vld [vmem:[#allocation2 + $0xa8] sm:$0xf]  ;;  %9730 = vmatpush3.bf16.msra.mxu0 %v10156_v25 }
 0x202   : > { %v1456_v52 = vrot.slane %v1454_v40, 7  ;;  %v983_v47 = vmax.f32 %v951_v13, 0.0  ;;  %v988_v20 = vmax.f32 %v956_v27, 0.0  ;;  %v8906_v53 = vcombine.low %v11341_v43, %v11347_v32  ;;  %v1730_v12 = vld [vmem:[#allocation2 + $0xac] sm:$0x1] }
 0x203   : > { %v1440_v44 = vrot.slane %v1438_v5, 7  ;;  %v9292_v19 = vpack.c.bf16 %v985_v24, %v985_v24  ;;  %v986_v21 = vmax.f32 %v954_v42, 0.0  ;;  %v2475_v63 = vrot.slane %v11412_v48, 5  ;;  %v10160_v5 = vld [vmem:[#allocation8 + $0x1d0] sm:$0xff]   ;;  %v10163_v42 = vld [vmem:[#allocation8 + $0x1d8] sm:$0xff]  }
 0x204   : > { %v1459_v54 = vor.u32 %v1457_v39, %v1456_v52  ;;  %v1460_v57 = vrot.slane %v1456_v52, 4  ;;  %v9290_v33 = vpack.c.bf16 %v983_v47, %v983_v47  ;;  %v9295_v7 = vpack.c.bf16 %v988_v20, %v988_v20  ;;  %5343 = vmatmul.mubr.bf16.gmra.mrb[12].mxu1 %v8906_v53  ;;  %v10161_v24 = vld [vmem:[#allocation8 + $0x190] sm:$0xff]   ;;  %v1748_v47 = vld [vmem:[#allocation2 + $0xc4] sm:$0x1]  ;;  %9731 = vmatprep.subr.bf16.mxu0 %v10160_v5 }
 0x205   : > { %v1443_v40 = vor.u32 %v1441_v22, %v1440_v44  ;;  %v1444_v13 = vrot.slane %v1440_v44, 4  ;;  %v1462_v27 = vshrl.u32 %v9292_v19, 16  ;;  %v1465_v43 = vshll.u32 %v9292_v19, 16  ;;  %v1763_v19 = vld [vmem:[#allocation2 + $0xd8] sm:$0xf]  ;;  %9732 = vmatpush3.bf16.msra.mxu0 %v10161_v24 }
 0x206   : > { %v1740_v32 = vsel %vm11132_vm13, %v1459_v54, %v1739_v35  ;;  %v1743_v49 = vsel %vm10948_vm4, %v1460_v57, %v1742_v38  ;;  %v1446_v51 = vshrl.u32 %v9290_v33, 16  ;;  %v1449_v39 = vshll.u32 %v9290_v33, 16  ;;  %v1733_v35 = vld [vmem:[#allocation2 + $0xb0] sm:$0xf]  ;;  %v1736_v38 = vld [vmem:[#allocation2 + $0xb4] sm:$0x1]  ;;  %9733 = vmatprep.subr.bf16.mxu0 %v10163_v42 }
 0x207   : > { %1741 = vst [vmem:[#allocation2 + $0xb8] sm:$0xf] %v1740_v32  ;;  %1744 = vst [vmem:[#allocation2 + $0xbc] sm:$0x1] %v1743_v49  ;;  %v1728_v22 = vsel %vm11132_vm13, %v1443_v40, %v1727_v9  ;;  %v1731_v25 = vsel %vm10948_vm4, %v1444_v13, %v1730_v12  ;;  %v1464_v52 = vrot.slane %v1462_v27, 7  ;;  %v1486_v20 = vshrl.u32 %v9295_v7, 16 }
 0x208   : > { %1729 = vst [vmem:[#allocation2 + $0xa8] sm:$0xf] %v1728_v22  ;;  %1732 = vst [vmem:[#allocation2 + $0xac] sm:$0x1] %v1731_v25  ;;  %v1448_v53 = vrot.slane %v1446_v51, 7  ;;  %v1489_v44 = vshll.u32 %v9295_v7, 16  ;;  %v9293_v54 = vpack.c.bf16 %v986_v21, %v986_v21  ;;  %v2476_v57 = vsel %vm11089_vm10, %v8816_v3, %v2475_v63 }
 0x209   : > { %v1467_v9 = vor.u32 %v1465_v43, %v1464_v52  ;;  %v1468_v33 = vrot.slane %v1464_v52, 4  ;;  %v1488_v12 = vrot.slane %v1486_v20, 7  ;;  %v8939_v40 = vcombine.low %v11121_v16, %v2476_v57  ;;  %v11431_v13 = vld [vmem:[#allocation2 + $0x58] sm:$0xf]  ;;  %v1766_v7 = vld [vmem:[#allocation2 + $0xdc] sm:$0x1] }
 0x20a   : > { %v10164_v27 = vld [vmem:[#allocation8 + $0x198] sm:$0xff]   ;;  %v1451_v32 = vor.u32 %v1449_v39, %v1448_v53  ;;  %v1452_v49 = vrot.slane %v1448_v53, 4  ;;  %v1470_v51 = vshrl.u32 %v9293_v54, 16  ;;  %v1473_v21 = vshll.u32 %v9293_v54, 16  ;;  %v2575_v16 = vld [vmem:[#allocation2 + $0x68] sm:$0xf] }
 0x20b   : > { %v1746_v15 = vsel %vm11132_vm13, %v1467_v9, %v1745_v2  ;;  %v1749_v3 = vsel %vm10948_vm4, %v1468_v33, %v1748_v47  ;;  %v1491_v63 = vor.u32 %v1489_v44, %v1488_v12  ;;  %v1492_v43 = vrot.slane %v1488_v12, 4  ;;  %5512 = vmatmul.mubr.bf16.gmra.mrb[48].mxu0 %v8939_v40  ;;  %v2576_v22 = vld [vmem:[#allocation2 + $0x70] sm:$0xf]  ;;  %v1751_v52 = vld [vmem:[#allocation2 + $0xc8] sm:$0xf] }
 0x20c   : > { %1747 = vst [vmem:[#allocation2 + $0xc0] sm:$0xf] %v1746_v15  ;;  %1750 = vst [vmem:[#allocation2 + $0xc4] sm:$0x1] %v1749_v3  ;;  %v1734_v39 = vsel %vm11132_vm13, %v1451_v32, %v1733_v35  ;;  %v1737_v5 = vsel %vm10948_vm4, %v1452_v49, %v1736_v38  ;;  %v1472_v24 = vrot.slane %v1470_v51, 7  ;;  %v2017_v42 = vshrl.u32 %v11431_v13, 16  ;;  %9734 = vmatpush3.bf16.msra.mxu0 %v10164_v27 }
 0x20d   : > { %1735 = vst [vmem:[#allocation2 + $0xb0] sm:$0xf] %v1734_v39  ;;  %1738 = vst [vmem:[#allocation2 + $0xb4] sm:$0x1] %v1737_v5  ;;  %v1764_v2 = vsel %vm11132_vm13, %v1491_v63, %v1763_v19  ;;  %v1767_v25 = vsel %vm10948_vm4, %v1492_v43, %v1766_v7  ;;  %v1754_v47 = vld [vmem:[#allocation2 + $0xcc] sm:$0x1]  ;;  %v8956_v15 = vcombine.low %v2575_v16, %v2576_v22 }
 0x20e   : > { %v2020_v20 = vshll.u32 %v11431_v13, 16  ;;  %v2026_v35 = vshll.u32 %v11412_v48, 16  ;;  %1765 = vst [vmem:[#allocation2 + $0xd8] sm:$0xf] %v1764_v2  ;;  %1768 = vst [vmem:[#allocation2 + $0xdc] sm:$0x1] %v1767_v25  ;;  %v1475_v53 = vor.u32 %v1473_v21, %v1472_v24 }
 0x20f   : > { %v1476_v38 = vrot.slane %v1472_v24, 4  ;;  %v2019_v44 = vrot.slane %v2017_v42, 4  ;;  %v2770_v54 = vshrl.u32 %v2575_v16, 16  ;;  %v2773_v33 = vshll.u32 %v2575_v16, 16  ;;  %v11448_v12 = vld [vmem:[#allocation2 + $0x60] sm:$0xf]  ;;  %5519 = vmatprep.mubr.bf16.mxu0 %v8956_v15 }
 0x210   : > { %v2022_v57 = vrot.slane %v2020_v20, 5  ;;  %v2028_v9 = vrot.slane %v2026_v35, 5  ;;  %v2784_v19 = vshrl.u32 %v2576_v22, 16  ;;  %v1752_v40 = vsel %vm11132_vm13, %v1475_v53, %v1751_v52  ;;  %v11456_v49 = vld [vmem:[#allocation2 + $0x68] sm:$0xf]  ;;  %v10166_v25 = vld [vmem:[#allocation8 + $0x1e0] sm:$0xff]  }
 0x211   : > { %v1755_v32 = vsel %vm10948_vm4, %v1476_v38, %v1754_v47  ;;  %v11454_v48 = vrot.slane %v2770_v54, 4  ;;  %v2787_v27 = vshll.u32 %v2576_v22, 16  ;;  %1753 = vst [vmem:[#allocation2 + $0xc8] sm:$0xf] %v1752_v40  ;;  %v11458_v51 = vrot.slane %v2773_v33, 5  ;;  %9735 = vmatprep.subr.bf16.mxu0 %v10166_v25 }
 0x212   : > { %1756 = vst [vmem:[#allocation2 + $0xcc] sm:$0x1] %v1755_v32  ;;  %v2023_v7 = vor.u32 %v2022_v57, %v2019_v44  ;;  %v11460_v21 = vrot.slane %v2784_v19, 4  ;;  %v1866_v3 = vld [vmem:[#allocation2 + $0x6c] sm:$0x1]  ;;  %v2031_v42 = vshrl.u32 %v11448_v12, 16 }
 0x213   : > { %v2348_v63 = vld [vmem:[#allocation2 + $0x60] sm:$0xe]  ;;  %v11462_v43 = vrot.slane %v2787_v27, 5  ;;  %v10277_v39 = vld [vmem:[#allocation2 + $0x50] sm:$0xf]  ;;  %v2034_v2 = vshll.u32 %v11448_v12, 16  ;;  %v14898_v27 = vsel %vm11099_vm11, %v11103_v1, %v11093_v60 }
 0x214   : > { %14896 = vst [vmem:[#allocation27_spill] sm:$0xff] %v11460_v21  ;;  %v8907_v5 = vcombine.low %v10277_v39, %v11431_v13  ;;  %v1865_v24 = vld [vmem:[#allocation2 + $0x64] sm:$0x1]  ;;  %v2024_v52 = vrot.slane %v2023_v7, 4  ;;  %v2045_v20 = vshrl.u32 %v11456_v49, 16  ;;  %v2048_v16 = vshll.u32 %v11456_v49, 16 }
 0x215   : > { %14897 = vst [vmem:[#allocation28_spill] sm:$0xff] %v11462_v43  ;;  %v2040_v47 = vshll.u32 %v1865_v24, 16  ;;  %v2349_v22 = vld [vmem:[#allocation2 + $0x68] sm:$0xe]  ;;  %v2033_v35 = vrot.slane %v2031_v42, 4  ;;  %v2036_v53 = vrot.slane %v2034_v2, 5 }
 0x216   : > { %v2054_v38 = vshll.u32 %v1866_v3, 16  ;;  %v8817_v44 = vrot.slane %v2348_v63, 9  ;;  %v2577_v54 = vld [vmem:[#allocation2 + $0x78] sm:$0xf]  ;;  %v2029_v13 = vsel %vm11099_vm11, %v2024_v52, %v2028_v9  ;;  %v2047_v33 = vrot.slane %v2045_v20, 4  ;;  %v10168_v32 = vld [vmem:[#allocation8 + $0x1a0] sm:$0xff]  }
 0x217   : > { %v2042_v57 = vrot.slane %v2040_v47, 5  ;;  %v2050_v19 = vrot.slane %v2048_v16, 5  ;;  %v2578_v40 = vld [vmem:[#allocation2 + $0x80] sm:$0xf]  ;;  %v8923_v7 = vcombine.low %v14898_v27, %v2029_v13  ;;  %v2037_v15 = vor.u32 %v2036_v53, %v2033_v35  ;;  %9736 = vmatpush3.bf16.msra.mxu0 %v10168_v32  ;;  %v10169_v9 = vld [vmem:[#allocation8 + $0x1e8] sm:$0xff]   ;;  %v10171_v35 = vld [vmem:[#allocation8 + $0x178] sm:$0xff]  }
 0x218   : > { %v2056_v39 = vrot.slane %v2054_v38, 5  ;;  %v2479_v42 = vrot.slane %v1865_v24, 5  ;;  %v8818_v2 = vrot.slane %v2349_v22, 9  ;;  %v2483_v25 = vrot.slane %v1866_v3, 5  ;;  %v10170_v21 = vld [vmem:[#allocation8 + $0x1a8] sm:$0xff]   ;;  %9737 = vmatprep.subr.bf16.mxu0 %v10169_v9  ;;  %9629 = vmatprep.subr.bf16.mxu1 %v10171_v35  ;;  %v10173_v27 = vld [vmem:[#allocation8 + $0x138] sm:$0xff]  }
 0x219   : > { %v2051_v63 = vor.u32 %v2050_v19, %v2047_v33  ;;  %v2798_v43 = vshrl.u32 %v2577_v54, 16  ;;  %5350 = vmatprep.mubr.bf16.mxu1 %v8923_v7  ;;  %v2038_v52 = vrot.slane %v2037_v15, 4  ;;  %v2801_v20 = vshll.u32 %v2577_v54, 16  ;;  %v11482_v3 = vld [vmem:[#allocation2 + $0x70] sm:$0xf]  ;;  %9630 = vmatpush3.bf16.msra.mxu1 %v10173_v27 }
 0x21a   : > { %v2480_v47 = vsel %vm11089_vm10, %v8817_v44, %v2479_v42  ;;  %v2812_v16 = vshrl.u32 %v2578_v40, 16  ;;  %5351 = vmatmul.mubr.bf16.gmra.mrb[16].mxu1 %v8907_v5  ;;  %v2484_v1 = vsel %vm11089_vm10, %v8818_v2, %v2483_v25  ;;  %v2815_v22 = vshll.u32 %v2578_v40, 16  ;;  %v11490_v5 = vld [vmem:[#allocation2 + $0x78] sm:$0xf]  ;;  %v1867_v42 = vld [vmem:[#allocation2 + $0x74] sm:$0x1] }
 0x21b   : > { %v2052_v60 = vrot.slane %v2051_v63, 4  ;;  %v11480_v24 = vrot.slane %v2798_v43, 4  ;;  %v2043_v53 = vsel %vm11099_vm11, %v2038_v52, %v2042_v57  ;;  %v8940_v38 = vcombine.low %v2480_v47, %v2484_v1  ;;  %9738 = vmatpush3.bf16.msra.mxu0 %v10170_v21  ;;  %v1868_v63 = vld [vmem:[#allocation2 + $0x7c] sm:$0x1]  ;;  %v10174_v2 = vld [vmem:[#allocation8 + $0x1f0] sm:$0xff]  }
 0x21c   : > { %v11486_v44 = vrot.slane %v2801_v20, 5  ;;  %v11488_v13 = vrot.slane %v2812_v16, 4  ;;  %v11494_v43 = vrot.slane %v2815_v22, 5  ;;  %v8957_v19 = vcombine.low %v2577_v54, %v2578_v40  ;;  %v2350_v25 = vld [vmem:[#allocation2 + $0x70] sm:$0xe]  ;;  %9739 = vmatprep.subr.bf16.mxu0 %v10174_v2 }
 0x21d   : > { %v2057_v33 = vsel %vm11099_vm11, %v2052_v60, %v2056_v39  ;;  %v918_v32 = vmul.f32 %v11391_v8, %v11230_v34  ;;  %5520 = vmatmul.mubr.bf16.gmra.mrb[52].mxu0 %v8940_v38  ;;  %v916_v7 = vmul.f32 %v11391_v8, %v11246_v56  ;;  %v8908_v15 = vcombine.low %v11448_v12, %v11456_v49  ;;  %v10175_v9 = vld [vmem:[#allocation8 + $0x1b0] sm:$0xff]   ;;  %v2351_v47 = vld [vmem:[#allocation2 + $0x78] sm:$0xe]  ;;  %v11508_v22 = vld [vmem:[#allocation2 + $0x88] sm:$0xf] }
 0x21e   : > { %14899 = vst [vmem:[#allocation29_spill] sm:$0xff] %v11494_v43  ;;  %v8924_v57 = vcombine.low %v2043_v53, %v2057_v33  ;;  %v2059_v39 = vshrl.u32 %v11482_v3, 16  ;;  %5527 = vmatprep.mubr.bf16.mxu0 %v8957_v19  ;;  %v2062_v34 = vshll.u32 %v11482_v3, 16  ;;  %v2068_v21 = vshll.u32 %v1867_v42, 16  ;;  %v10176_v19 = vld [vmem:[#allocation8 + $0x1f8] sm:$0xff]  }
 0x21f   : > { %v957_v54 = vadd.f32 %v11404_v29, %v918_v32  ;;  %v2073_v40 = vshrl.u32 %v11490_v5, 16  ;;  %v955_v56 = vadd.f32 %v11404_v29, %v916_v7  ;;  %v2076_v49 = vshll.u32 %v11490_v5, 16  ;;  %9740 = vmatpush3.bf16.msra.mxu0 %v10175_v9  ;;  %v10177_v32 = vld [vmem:[#allocation8 + $0x1b8] sm:$0xff]  }
 0x220   : > { %5358 = vmatprep.mubr.bf16.mxu1 %v8924_v57  ;;  %v2061_v12 = vrot.slane %v2059_v39, 4  ;;  %v2082_v52 = vshll.u32 %v1868_v63, 16  ;;  %v2064_v16 = vrot.slane %v2062_v34, 5  ;;  %v2070_v60 = vrot.slane %v2068_v21, 5  ;;  %9741 = vmatprep.subr.bf16.mxu0 %v10176_v19 }
 0x221   : > { %v989_v20 = vmax.f32 %v957_v54, 0.0  ;;  %v2075_v1 = vrot.slane %v2073_v40, 4  ;;  %v987_v35 = vmax.f32 %v955_v56, 0.0  ;;  %v2078_v53 = vrot.slane %v2076_v49, 5 }
 0x222   : > { %v2084_v38 = vrot.slane %v2082_v52, 5  ;;  %v8819_v33 = vrot.slane %v2350_v25, 9  ;;  %5359 = vmatmul.mubr.bf16.gmra.mrb[20].mxu1 %v8908_v15  ;;  %v2065_v57 = vor.u32 %v2064_v16, %v2061_v12  ;;  %v2487_v7 = vrot.slane %v1867_v42, 5  ;;  %v2580_v25 = vld [vmem:[#allocation2 + $0x90] sm:$0xf] }
 0x223   : > { %v9296_v27 = vpack.c.bf16 %v989_v20, %v989_v20  ;;  %v8820_v39 = vrot.slane %v2351_v47, 9  ;;  %v9294_v43 = vpack.c.bf16 %v987_v35, %v987_v35  ;;  %v2079_v2 = vor.u32 %v2078_v53, %v2075_v1  ;;  %9742 = vmatpush3.bf16.msra.mxu0 %v10177_v32  ;;  %v1769_v47 = vld [vmem:[#allocation2 + $0xe0] sm:$0xf]  ;;  %v1757_v53 = vld [vmem:[#allocation2 + $0xd0] sm:$0xf] }
 0x224   : > { %v2491_v54 = vrot.slane %v1868_v63, 5  ;;  %v2826_v34 = vshrl.u32 %v11508_v22, 16  ;;  %v2066_v9 = vrot.slane %v2065_v57, 4  ;;  %v2488_v56 = vsel %vm11089_vm10, %v8819_v33, %v2487_v7  ;;  %v1772_v63 = vld [vmem:[#allocation2 + $0xe4] sm:$0x1] }
 0x225   : > { %v1494_v21 = vshrl.u32 %v9296_v27, 16  ;;  %v1497_v40 = vshll.u32 %v9296_v27, 16  ;;  %v1478_v49 = vshrl.u32 %v9294_v43, 16  ;;  %v1481_v52 = vshll.u32 %v9294_v43, 16  ;;  %v10180_v32 = vld [vmem:[#allocation8 + $0x200] sm:$0xff]  }
 0x226   : > { %v2080_v15 = vrot.slane %v2079_v2, 4  ;;  %v2492_v42 = vsel %vm11089_vm10, %v8820_v39, %v2491_v54  ;;  %v2071_v20 = vsel %vm11099_vm11, %v2066_v9, %v2070_v60  ;;  %v11517_v1 = vrot.slane %v2826_v34, 4  ;;  %v1760_v7 = vld [vmem:[#allocation2 + $0xd4] sm:$0x1]  ;;  %v11522_v54 = vld [vmem:[#allocation2 + $0x80] sm:$0xf]  ;;  %9903 = vmatprep.subr.bf16.mxu1 %v10180_v32 }
 0x227   : > { %v1496_v12 = vrot.slane %v1494_v21, 7  ;;  %v8941_v16 = vcombine.low %v2488_v56, %v2492_v42  ;;  %v1480_v35 = vrot.slane %v1478_v49, 7  ;;  %v2829_v43 = vshll.u32 %v11508_v22, 16  ;;  %v11528_v56 = vld [vmem:[#allocation2 + $0x88] sm:$0xf] }
 0x228   : > { %v2085_v33 = vsel %vm11099_vm11, %v2080_v15, %v2084_v38  ;;  %v2840_v19 = vshrl.u32 %v2580_v25, 16  ;;  %v2843_v2 = vshll.u32 %v2580_v25, 16  ;;  %v8958_v15 = vcombine.low %v11508_v22, %v2580_v25  ;;  %v2352_v42 = vld [vmem:[#allocation2 + $0x80] sm:$0xe] }
 0x229   : > { %v1499_v27 = vor.u32 %v1497_v40, %v1496_v12  ;;  %v1500_v57 = vrot.slane %v1496_v12, 4  ;;  %v8925_v39 = vcombine.low %v2071_v20, %v2085_v33  ;;  %5528 = vmatmul.mubr.bf16.gmra.mrb[56].mxu0 %v8941_v16  ;;  %v1483_v60 = vor.u32 %v1481_v52, %v1480_v35  ;;  %v1869_v52 = vld [vmem:[#allocation2 + $0x84] sm:$0x1]  ;;  %v1870_v16 = vld [vmem:[#allocation2 + $0x8c] sm:$0x1] }
 0x22a   : > { %v1484_v34 = vrot.slane %v1480_v35, 4  ;;  %v11524_v21 = vrot.slane %v2829_v43, 5  ;;  %v11526_v9 = vrot.slane %v2840_v19, 4  ;;  %v11534_v49 = vrot.slane %v2843_v2, 5  ;;  %v1097_v35 = vld [vmem:[#allocation2 + $0x108] sm:$0x1]  ;;  %5535 = vmatprep.mubr.bf16.mxu0 %v8958_v15 }
 0x22b   : > { %v1770_v38 = vsel %vm11132_vm13, %v1499_v27, %v1769_v47  ;;  %v1773_v40 = vsel %vm10948_vm4, %v1500_v57, %v1772_v63  ;;  %5366 = vmatprep.mubr.bf16.mxu1 %v8925_v39  ;;  %v1758_v12 = vsel %vm11132_vm13, %v1483_v60, %v1757_v53  ;;  %v8909_v47 = vcombine.low %v11482_v3, %v11490_v5  ;;  %v2353_v43 = vld [vmem:[#allocation2 + $0x88] sm:$0xe]  ;;  %v1195_v5 = vld [vmem:[#allocation2 + $0x10c] sm:$0x1]  ;;  %v1091_v60 = vld [vmem:[#allocation2 + $0xf8] sm:$0x1] }
 0x22c   : > { %1771 = vst [vmem:[#allocation2 + $0xe0] sm:$0xf] %v1770_v38  ;;  %1774 = vst [vmem:[#allocation2 + $0xe4] sm:$0x1] %v1773_v40  ;;  %v1761_v20 = vsel %vm10948_vm4, %v1484_v34, %v1760_v7  ;;  %v2087_v63 = vshrl.u32 %v11522_v54, 16  ;;  %v2090_v22 = vshll.u32 %v11522_v54, 16 }
 0x22d   : > { %1759 = vst [vmem:[#allocation2 + $0xd0] sm:$0xf] %v1758_v12  ;;  %1762 = vst [vmem:[#allocation2 + $0xd4] sm:$0x1] %v1761_v20  ;;  %v2096_v25 = vshll.u32 %v1869_v52, 16  ;;  %v2101_v33 = vshrl.u32 %v11528_v56, 16  ;;  %5367 = vmatmul.mubr.bf16.gmra.mrb[24].mxu1 %v8909_v47  ;;  %v921_v47 = vmul.f32 %v11391_v8, %v11257_v4 }
 0x22e   : > { %v2104_v53 = vshll.u32 %v11528_v56, 16  ;;  %v2089_v19 = vrot.slane %v2087_v63, 4  ;;  %v2110_v32 = vshll.u32 %v1870_v16, 16  ;;  %v8821_v27 = vrot.slane %v2352_v42, 9  ;;  %v1189_v42 = vld [vmem:[#allocation2 + $0xfc] sm:$0x1] }
 0x22f   : > { %v2495_v3 = vrot.slane %v1869_v52, 5  ;;  %v2092_v57 = vrot.slane %v2090_v22, 5  ;;  %v2098_v7 = vrot.slane %v2096_v25, 5  ;;  %v2103_v39 = vrot.slane %v2101_v33, 4  ;;  %v2581_v63 = vld [vmem:[#allocation2 + $0xa8] sm:$0xf] }
 0x230   : > { %v2106_v2 = vrot.slane %v2104_v53, 5  ;;  %v2112_v34 = vrot.slane %v2110_v32, 5  ;;  %v8822_v40 = vrot.slane %v2353_v43, 9  ;;  %v2499_v15 = vrot.slane %v1870_v16, 5  ;;  %v2582_v53 = vld [vmem:[#allocation2 + $0xb0] sm:$0xf] }
 0x231   : > { %v2496_v38 = vsel %vm11089_vm10, %v8821_v27, %v2495_v3  ;;  %v2093_v12 = vor.u32 %v2092_v57, %v2089_v19  ;;  %v1098_v52 = vsel %vm10948_vm4, 0, %v1097_v35  ;;  %v1196_v25 = vsel %vm10955_vm5, 0, %v1195_v5 }
 0x232   : > { %v2107_v20 = vor.u32 %v2106_v2, %v2103_v39  ;;  %v2500_v22 = vsel %vm11089_vm10, %v8822_v40, %v2499_v15  ;;  %1099 = vst [vmem:[#allocation2 + $0x108] sm:$0x1] %v1098_v52  ;;  %v919_v16 = vmul.f32 %v11391_v8, %v11260_v14  ;;  %v1092_v33 = vsel %vm10948_vm4, 0, %v1091_v60  ;;  %1197 = vst [vmem:[#allocation2 + $0x10c] sm:$0x1] %v1196_v25 }
 0x233   : > { %v2094_v4 = vrot.slane %v2093_v12, 4  ;;  %v8942_v19 = vcombine.low %v2496_v38, %v2500_v22  ;;  %v960_v35 = vadd.f32 %v11404_v29, %v921_v47  ;;  %1093 = vst [vmem:[#allocation2 + $0xf8] sm:$0x1] %v1092_v33  ;;  %v1190_v27 = vsel %vm10955_vm5, 0, %v1189_v42  ;;  %v1100_v60 = vld [vmem:[#allocation2 + $0x110] sm:$0x1] }
 0x234   : > { %v2108_v43 = vrot.slane %v2107_v20, 4  ;;  %v958_v32 = vadd.f32 %v11404_v29, %v919_v16  ;;  %v2854_v3 = vshrl.u32 %v2581_v63, 16  ;;  %v2857_v5 = vshll.u32 %v2581_v63, 16  ;;  %1191 = vst [vmem:[#allocation2 + $0xfc] sm:$0x1] %v1190_v27 }
 0x235   : > { %v2099_v14 = vsel %vm11099_vm11, %v2094_v4, %v2098_v7  ;;  %5536 = vmatmul.mubr.bf16.gmra.mrb[60].mxu0 %v8942_v19  ;;  %v992_v39 = vmax.f32 %v960_v35, 0.0  ;;  %v2868_v2 = vshrl.u32 %v2582_v53, 16  ;;  %v1198_v38 = vld [vmem:[#allocation2 + $0x114] sm:$0x1]  ;;  %v2871_v42 = vshll.u32 %v2582_v53, 16 }
 0x236   : > { %v2113_v57 = vsel %vm11099_vm11, %v2108_v43, %v2112_v34  ;;  %v990_v15 = vmax.f32 %v958_v32, 0.0  ;;  %v11569_v12 = vrot.slane %v2854_v3, 4  ;;  %v11571_v20 = vrot.slane %v2857_v5, 5  ;;  %v1094_v33 = vld [vmem:[#allocation2 + $0x100] sm:$0x1] }
 0x237   : > { %v8926_v40 = vcombine.low %v2099_v14, %v2113_v57  ;;  %v9299_v47 = vpack.c.bf16 %v992_v39, %v992_v39  ;;  %v11573_v52 = vrot.slane %v2868_v2, 4  ;;  %v8959_v7 = vcombine.low %v2581_v63, %v2582_v53  ;;  %v1192_v4 = vld [vmem:[#allocation2 + $0x104] sm:$0x1]  ;;  %v1109_v53 = vld [vmem:[#allocation2 + $0x128] sm:$0x1] }
 0x238   : > { %v9297_v22 = vpack.c.bf16 %v990_v15, %v990_v15  ;;  %v922_v34 = vmul.f32 %v11391_v8, %v11268_v28  ;;  %v1101_v25 = vsel %vm10948_vm4, 0, %v1100_v60  ;;  %v1199_v16 = vsel %vm10955_vm5, 0, %v1198_v38  ;;  %v1207_v14 = vld [vmem:[#allocation2 + $0x12c] sm:$0x1] }
 0x239   : > { %5374 = vmatprep.mubr.bf16.mxu1 %v8926_v40  ;;  %v1518_v43 = vshrl.u32 %v9299_v47, 16  ;;  %v1521_v19 = vshll.u32 %v9299_v47, 16  ;;  %v11581_v35 = vrot.slane %v2871_v42, 5  ;;  %5543 = vmatprep.mubr.bf16.mxu0 %v8959_v7  ;;  %1102 = vst [vmem:[#allocation2 + $0x110] sm:$0x1] %v1101_v25  ;;  %v920_v63 = vmul.f32 %v11391_v8, %v11278_v61 }
 0x23a   : > { %1200 = vst [vmem:[#allocation2 + $0x114] sm:$0x1] %v1199_v16  ;;  %v1787_v28 = vld [vmem:[#allocation2 + $0x108] sm:$0xf]  ;;  %v1502_v32 = vshrl.u32 %v9297_v22, 16  ;;  %v1505_v27 = vshll.u32 %v9297_v22, 16  ;;  %v961_v3 = vadd.f32 %v11404_v29, %v922_v34  ;;  %v925_v5 = vmul.f32 %v11391_v8, %v11280_v17 }
 0x23b   : > { %14900 = vst [vmem:[#allocation30_spill] sm:$0xff] %v11581_v35  ;;  %v1520_v57 = vrot.slane %v1518_v43, 7  ;;  %v1790_v39 = vld [vmem:[#allocation2 + $0x10c] sm:$0x1]  ;;  %v959_v2 = vadd.f32 %v11404_v29, %v920_v63  ;;  %v1095_v60 = vsel %vm10948_vm4, 0, %v1094_v33  ;;  %v1193_v61 = vsel %vm10955_vm5, 0, %v1192_v4 }
 0x23c   : > { %v1504_v38 = vrot.slane %v1502_v32, 7  ;;  %v1775_v40 = vld [vmem:[#allocation2 + $0xf8] sm:$0xf]  ;;  %v993_v15 = vmax.f32 %v961_v3, 0.0  ;;  %1096 = vst [vmem:[#allocation2 + $0x100] sm:$0x1] %v1095_v60  ;;  %v964_v47 = vadd.f32 %v11404_v29, %v925_v5 }
 0x23d   : > { %1194 = vst [vmem:[#allocation2 + $0x104] sm:$0x1] %v1193_v61  ;;  %v1110_v17 = vsel %vm10948_vm4, 0, %v1109_v53  ;;  %v1523_v42 = vor.u32 %v1521_v19, %v1520_v57  ;;  %v1524_v7 = vrot.slane %v1520_v57, 4  ;;  %v1778_v22 = vld [vmem:[#allocation2 + $0xfc] sm:$0x1]  ;;  %v923_v19 = vmul.f32 %v11391_v8, %v11303_v11 }
 0x23e   : > { %v991_v34 = vmax.f32 %v959_v2, 0.0  ;;  %1111 = vst [vmem:[#allocation2 + $0x128] sm:$0x1] %v1110_v17  ;;  %v1208_v25 = vsel %vm10955_vm5, 0, %v1207_v14  ;;  %v1507_v16 = vor.u32 %v1505_v27, %v1504_v38  ;;  %v1508_v33 = vrot.slane %v1504_v38, 4 }
 0x23f   : > { %v9300_v4 = vpack.c.bf16 %v993_v15, %v993_v15  ;;  %v996_v43 = vmax.f32 %v964_v47, 0.0  ;;  %1209 = vst [vmem:[#allocation2 + $0x12c] sm:$0x1] %v1208_v25  ;;  %v1788_v63 = vsel %vm11132_vm13, %v1523_v42, %v1787_v28  ;;  %v1791_v32 = vsel %vm10948_vm4, %v1524_v7, %v1790_v39  ;;  %v1103_v3 = vld [vmem:[#allocation2 + $0x118] sm:$0x1] }
 0x240   : > { %v9298_v53 = vpack.c.bf16 %v991_v34, %v991_v34  ;;  %v1201_v5 = vld [vmem:[#allocation2 + $0x11c] sm:$0x1]  ;;  %1789 = vst [vmem:[#allocation2 + $0x108] sm:$0xf] %v1788_v63  ;;  %1792 = vst [vmem:[#allocation2 + $0x10c] sm:$0x1] %v1791_v32  ;;  %v1776_v27 = vsel %vm11132_vm13, %v1507_v16, %v1775_v40  ;;  %v1779_v14 = vsel %vm10948_vm4, %v1508_v33, %v1778_v22 }
 0x241   : > { %v1526_v57 = vshrl.u32 %v9300_v4, 16  ;;  %v1529_v2 = vshll.u32 %v9300_v4, 16  ;;  %v2354_v28 = vld [vmem:[#allocation2 + $0xa0] sm:$0xe]  ;;  %v11610_v39 = vld [vmem:[#allocation2 + $0xb8] sm:$0xf]  ;;  %v9303_v38 = vpack.c.bf16 %v996_v43, %v996_v43  ;;  %v962_v15 = vadd.f32 %v11404_v29, %v923_v19 }
 0x242   : > { %v11608_v60 = vld [vmem:[#allocation2 + $0xa0] sm:$0xf]  ;;  %1777 = vst [vmem:[#allocation2 + $0xf8] sm:$0xf] %v1776_v27  ;;  %1780 = vst [vmem:[#allocation2 + $0xfc] sm:$0x1] %v1779_v14  ;;  %v8910_v25 = vcombine.low %v11522_v54, %v11528_v56 }
 0x243   : > { %v1510_v11 = vshrl.u32 %v9298_v53, 16  ;;  %v1513_v61 = vshll.u32 %v9298_v53, 16  ;;  %v11613_v47 = vld [vmem:[#allocation2 + $0xa4] sm:$0x1]  ;;  %v11615_v40 = vld [vmem:[#allocation2 + $0xa8] sm:$0xf] }
 0x244   : > { %v11617_v17 = vld [vmem:[#allocation2 + $0xc0] sm:$0xf]  ;;  %v1528_v42 = vrot.slane %v1526_v57, 7  ;;  %v1793_v7 = vld [vmem:[#allocation2 + $0x110] sm:$0xf]  ;;  %v1104_v22 = vsel %vm10948_vm4, 0, %v1103_v3  ;;  %5375 = vmatmul.mubr.bf16.gmra.mrb[28].mxu1 %v8910_v25 }
 0x245   : > { %v1202_v34 = vsel %vm10955_vm5, 0, %v1201_v5  ;;  %v1796_v16 = vld [vmem:[#allocation2 + $0x114] sm:$0x1]  ;;  %v1512_v33 = vrot.slane %v1510_v11, 7  ;;  %v1781_v29 = vld [vmem:[#allocation2 + $0x100] sm:$0xf] }
 0x246   : > { %v1550_v4 = vshrl.u32 %v9303_v38, 16  ;;  %1105 = vst [vmem:[#allocation2 + $0x118] sm:$0x1] %v1104_v22  ;;  %1203 = vst [vmem:[#allocation2 + $0x11c] sm:$0x1] %v1202_v34  ;;  %v1531_v32 = vor.u32 %v1529_v2, %v1528_v42  ;;  %v1532_v53 = vrot.slane %v1528_v42, 4 }
 0x247   : > { %v1784_v19 = vld [vmem:[#allocation2 + $0x104] sm:$0x1]  ;;  %v1553_v3 = vshll.u32 %v9303_v38, 16  ;;  %v994_v5 = vmax.f32 %v962_v15, 0.0  ;;  %v1872_v27 = vld [vmem:[#allocation2 + $0xac] sm:$0x1]  ;;  %v1515_v54 = vor.u32 %v1513_v61, %v1512_v33 }
 0x248   : > { %v1516_v56 = vrot.slane %v1512_v33, 4  ;;  %v1552_v14 = vrot.slane %v1550_v4, 7  ;;  %v2355_v57 = vld [vmem:[#allocation2 + $0xa8] sm:$0xe]  ;;  %v8823_v11 = vrot.slane %v2354_v28, 9  ;;  %v1794_v22 = vsel %vm11132_vm13, %v1531_v32, %v1793_v7 }
 0x249   : > { %v1797_v34 = vsel %vm10948_vm4, %v1532_v53, %v1796_v16  ;;  %v1811_v43 = vld [vmem:[#allocation2 + $0x128] sm:$0xf]  ;;  %v1814_v63 = vld [vmem:[#allocation2 + $0x12c] sm:$0x1]  ;;  %v9301_v2 = vpack.c.bf16 %v994_v5, %v994_v5  ;;  %v2503_v42 = vrot.slane %v11613_v47, 5  ;;  %v1782_v61 = vsel %vm11132_vm13, %v1515_v54, %v1781_v29 }
 0x24a   : > { %1795 = vst [vmem:[#allocation2 + $0x110] sm:$0xf] %v1794_v22  ;;  %1798 = vst [vmem:[#allocation2 + $0x114] sm:$0x1] %v1797_v34  ;;  %v1785_v38 = vsel %vm10948_vm4, %v1516_v56, %v1784_v19  ;;  %v1555_v28 = vor.u32 %v1553_v3, %v1552_v14  ;;  %v1556_v15 = vrot.slane %v1552_v14, 4  ;;  %v8824_v33 = vrot.slane %v2355_v57, 9 }
 0x24b   : > { %1783 = vst [vmem:[#allocation2 + $0x100] sm:$0xf] %v1782_v61  ;;  %1786 = vst [vmem:[#allocation2 + $0x104] sm:$0x1] %v1785_v38  ;;  %v1534_v7 = vshrl.u32 %v9301_v2, 16  ;;  %v1537_v25 = vshll.u32 %v9301_v2, 16  ;;  %v2504_v16 = vsel %vm11089_vm10, %v8823_v11, %v2503_v42 }
 0x24c   : > { %v1812_v4 = vsel %vm11132_vm13, %v1555_v28, %v1811_v43  ;;  %v1815_v32 = vsel %vm10948_vm4, %v1556_v15, %v1814_v63  ;;  %v2507_v29 = vrot.slane %v1872_v27, 5  ;;  %v2115_v53 = vshrl.u32 %v11608_v60, 16  ;;  %v11645_v19 = vld [vmem:[#allocation2 + $0xc8] sm:$0xf]  ;;  %v11647_v3 = vld [vmem:[#allocation2 + $0xd0] sm:$0xf] }
 0x24d   : > { %1813 = vst [vmem:[#allocation2 + $0x128] sm:$0xf] %v1812_v4  ;;  %1816 = vst [vmem:[#allocation2 + $0x12c] sm:$0x1] %v1815_v32  ;;  %v1536_v5 = vrot.slane %v1534_v7, 7  ;;  %v2118_v56 = vshll.u32 %v11608_v60, 16  ;;  %v11654_v43 = vmul.f32 %v11391_v8, %v11318_v55 }
 0x24e   : > { %v1799_v54 = vld [vmem:[#allocation2 + $0x118] sm:$0xf]  ;;  %v1802_v63 = vld [vmem:[#allocation2 + $0x11c] sm:$0x1]  ;;  %v2508_v57 = vsel %vm11089_vm10, %v8824_v33, %v2507_v29  ;;  %v2117_v11 = vrot.slane %v2115_v53, 4  ;;  %v2124_v22 = vshll.u32 %v11613_v47, 16  ;;  %v14901_v53 = vcombine.low %v11610_v39, %v11617_v17 }
 0x24f   : > { %v2129_v34 = vshrl.u32 %v11615_v40, 16  ;;  %v1539_v2 = vor.u32 %v1537_v25, %v1536_v5  ;;  %v1540_v42 = vrot.slane %v1536_v5, 4  ;;  %v8943_v61 = vcombine.low %v2504_v16, %v2508_v57  ;;  %v11661_v55 = vld [vmem:[#allocation2 + $0xb0] sm:$0xf]  ;;  %v11673_v5 = vld [vmem:[#allocation2 + $0xb8] sm:$0xf] }
 0x250   : > { %v2120_v38 = vrot.slane %v2118_v56, 5  ;;  %v2126_v28 = vrot.slane %v2124_v22, 5  ;;  %v2132_v7 = vshll.u32 %v11615_v40, 16  ;;  %v2138_v4 = vshll.u32 %v1872_v27, 16  ;;  %v1873_v57 = vld [vmem:[#allocation2 + $0xb4] sm:$0x1] }
 0x251   : > { %v2131_v15 = vrot.slane %v2129_v34, 4  ;;  %v1800_v8 = vsel %vm11132_vm13, %v1539_v2, %v1799_v54  ;;  %v1803_v33 = vsel %vm10948_vm4, %v1540_v42, %v1802_v63  ;;  %5544 = vmatmul.mubr.bf16.gmra.mrb[64].mxu0 %v8943_v61  ;;  %v2882_v25 = vshrl.u32 %v11610_v39, 16  ;;  %v2356_v61 = vld [vmem:[#allocation2 + $0xb0] sm:$0xe]  ;;  %v1112_v35 = vld [vmem:[#allocation2 + $0x130] sm:$0x1] }
 0x252   : > { %v2121_v47 = vor.u32 %v2120_v38, %v2117_v11  ;;  %1801 = vst [vmem:[#allocation2 + $0x118] sm:$0xf] %v1800_v8  ;;  %1804 = vst [vmem:[#allocation2 + $0x11c] sm:$0x1] %v1803_v33  ;;  %v2134_v16 = vrot.slane %v2132_v7, 5  ;;  %v2140_v32 = vrot.slane %v2138_v4, 5  ;;  %5551 = vmatprep.mubr.bf16.mxu0 %v14901_v53 }
 0x253   : > { %v2885_v29 = vshll.u32 %v11610_v39, 16  ;;  %v2896_v27 = vshrl.u32 %v11617_v17, 16  ;;  %v11675_v56 = vrot.slane %v2882_v25, 4  ;;  %v2899_v63 = vshll.u32 %v11617_v17, 16  ;;  %v1874_v7 = vld [vmem:[#allocation2 + $0xbc] sm:$0x1] }
 0x254   : > { %v2122_v54 = vrot.slane %v2121_v47, 4  ;;  %v2143_v11 = vshrl.u32 %v11661_v55, 16  ;;  %v2135_v22 = vor.u32 %v2134_v16, %v2131_v15  ;;  %v2146_v42 = vshll.u32 %v11661_v55, 16  ;;  %v2357_v25 = vld [vmem:[#allocation2 + $0xb8] sm:$0xe] }
 0x255   : > { %14902 = vst [vmem:[#allocation31_spill] sm:$0xff] %v11675_v56  ;;  %v11679_v34 = vrot.slane %v2885_v29, 5  ;;  %v11681_v2 = vrot.slane %v2896_v27, 4  ;;  %v11686_v38 = vrot.slane %v2899_v63, 5  ;;  %v2152_v8 = vshll.u32 %v1873_v57, 16 }
 0x256   : > { %v2127_v39 = vsel %vm11099_vm11, %v2122_v54, %v2126_v28  ;;  %v2145_v4 = vrot.slane %v2143_v11, 4  ;;  %v2136_v17 = vrot.slane %v2135_v22, 4  ;;  %v2148_v33 = vrot.slane %v2146_v42, 5 }
 0x257   : > { %14903 = vst [vmem:[#allocation32_spill] sm:$0xff] %v11679_v34  ;;  %14904 = vst [vmem:[#allocation33_spill] sm:$0xff] %v11681_v2  ;;  %v2157_v47 = vshrl.u32 %v11673_v5, 16  ;;  %v2160_v15 = vshll.u32 %v11673_v5, 16  ;;  %v2154_v16 = vrot.slane %v2152_v8, 5  ;;  %v2166_v29 = vshll.u32 %v1874_v7, 16 }
 0x258   : > { %14905 = vst [vmem:[#allocation34_spill] sm:$0xff] %v11686_v38  ;;  %v8825_v27 = vrot.slane %v2356_v61, 9  ;;  %v2511_v53 = vrot.slane %v1873_v57, 5  ;;  %v2141_v14 = vsel %vm11099_vm11, %v2136_v17, %v2140_v32  ;;  %v2149_v28 = vor.u32 %v2148_v33, %v2145_v4  ;;  %v1210_v4 = vld [vmem:[#allocation2 + $0x134] sm:$0x1] }
 0x259   : > { %v2159_v54 = vrot.slane %v2157_v47, 4  ;;  %v2162_v63 = vrot.slane %v2160_v15, 5  ;;  %v8927_v38 = vcombine.low %v2127_v39, %v2141_v14  ;;  %v2168_v11 = vrot.slane %v2166_v29, 5  ;;  %v10278_v14 = vld [vmem:[%s14826_s3] ss:$0 sm:$0xff] }
 0x25a   : > { %v2512_v22 = vsel %vm11089_vm10, %v8825_v27, %v2511_v53  ;;  %v8826_v42 = vrot.slane %v2357_v25, 9  ;;  %v2150_v2 = vrot.slane %v2149_v28, 4  ;;  %v2515_v56 = vrot.slane %v1874_v7, 5  ;;  %v1106_v15 = vld [vmem:[#allocation2 + $0x120] sm:$0x1] }
 0x25b   : > { %v2163_v34 = vor.u32 %v2162_v63, %v2159_v54  ;;  %v2910_v8 = vshrl.u32 %v11645_v19, 16  ;;  %5382 = vmatprep.mubr.bf16.mxu1 %v8927_v38  ;;  %v2913_v57 = vshll.u32 %v11645_v19, 16  ;;  %v2924_v32 = vshrl.u32 %v11647_v3, 16  ;;  %v1204_v25 = vld [vmem:[#allocation2 + $0x124] sm:$0x1] }
 0x25c   : > { %v2927_v61 = vshll.u32 %v11647_v3, 16  ;;  %v965_v39 = vadd.f32 %v10278_v14, %v11654_v43  ;;  %v14906_v7 = vcombine.low %v11608_v60, %v11615_v40  ;;  %v2155_v38 = vsel %vm11099_vm11, %v2150_v2, %v2154_v16  ;;  %v11717_v60 = vld [vmem:[#allocation2 + $0xc0] sm:$0xf]  ;;  %v11725_v16 = vld [vmem:[#allocation2 + $0xc8] sm:$0xf] }
 0x25d   : > { %v2164_v17 = vrot.slane %v2163_v34, 4  ;;  %v2516_v33 = vsel %vm11089_vm10, %v8826_v42, %v2515_v56  ;;  %v11709_v47 = vrot.slane %v2910_v8, 4  ;;  %v11711_v27 = vrot.slane %v2913_v57, 5  ;;  %v10279_v54 = vld [vmem:[%s14825_s2] ss:$0 sm:$0xff] }
 0x25e   : > { %5383 = vmatmul.mubr.bf16.gmra.mrb[32].mxu1 %v14906_v7  ;;  %v8944_v29 = vcombine.low %v2512_v22, %v2516_v33  ;;  %v11713_v43 = vrot.slane %v2924_v32, 4  ;;  %v11715_v53 = vrot.slane %v2927_v61, 5  ;;  %v997_v34 = vmax.f32 %v965_v39, 0.0  ;;  %v1875_v57 = vld [vmem:[#allocation2 + $0xc4] sm:$0x1] }
 0x25f   : > { %v2169_v40 = vsel %vm11099_vm11, %v2164_v17, %v2168_v11  ;;  %v1113_v56 = vsel %vm10948_vm4, 0, %v1112_v35  ;;  %v1211_v2 = vsel %vm10955_vm5, 0, %v1210_v4  ;;  %v924_v63 = vmul.f32 %v10279_v54, %v11322_v18  ;;  %v2359_v33 = vld [vmem:[#allocation2 + $0xc8] sm:$0xe] }
 0x260   : > { %14907 = vst [vmem:[#allocation35_spill] sm:$0xff] %v11715_v53  ;;  %v8928_v28 = vcombine.low %v2155_v38, %v2169_v40  ;;  %5552 = vmatmul.mubr.bf16.gmra.mrb[68].mxu0 %v8944_v29  ;;  %1114 = vst [vmem:[#allocation2 + $0x130] sm:$0x1] %v1113_v56  ;;  %v1107_v11 = vsel %vm10948_vm4, 0, %v1106_v15  ;;  %v1205_v35 = vsel %vm10955_vm5, 0, %v1204_v25  ;;  %v14908_v22 = vcombine.low %v11645_v19, %v11647_v3 }
 0x261   : > { %1212 = vst [vmem:[#allocation2 + $0x134] sm:$0x1] %v1211_v2  ;;  %v9304_v42 = vpack.c.bf16 %v997_v34, %v997_v34  ;;  %1108 = vst [vmem:[#allocation2 + $0x120] sm:$0x1] %v1107_v11  ;;  %v8912_v8 = vcombine.low %v11661_v55, %v11673_v5  ;;  %v2171_v32 = vshrl.u32 %v11717_v60, 16  ;;  %v2174_v18 = vshll.u32 %v11717_v60, 16 }
 0x262   : > { %5559 = vmatprep.mubr.bf16.mxu0 %v14908_v22  ;;  %1206 = vst [vmem:[#allocation2 + $0x124] sm:$0x1] %v1205_v35  ;;  %5390 = vmatprep.mubr.bf16.mxu1 %v8928_v28  ;;  %v963_v61 = vadd.f32 %v10278_v14, %v924_v63  ;;  %v2180_v39 = vshll.u32 %v1875_v57, 16  ;;  %v2185_v30 = vshrl.u32 %v11725_v16, 16  ;;  %v2188_v4 = vshll.u32 %v11725_v16, 16 }
 0x263   : > { %v2358_v19 = vld [vmem:[#allocation2 + $0xc0] sm:$0xe]  ;;  %v1558_v3 = vshrl.u32 %v9304_v42, 16  ;;  %v1561_v7 = vshll.u32 %v9304_v42, 16  ;;  %v2173_v38 = vrot.slane %v2171_v32, 4  ;;  %v2176_v17 = vrot.slane %v2174_v18, 5 }
 0x264   : > { %v995_v15 = vmax.f32 %v963_v61, 0.0  ;;  %v1876_v55 = vld [vmem:[#allocation2 + $0xcc] sm:$0x1]  ;;  %v2182_v5 = vrot.slane %v2180_v39, 5  ;;  %v2187_v25 = vrot.slane %v2185_v30, 4  ;;  %v2190_v29 = vrot.slane %v2188_v4, 5 }
 0x265   : > { %v1560_v40 = vrot.slane %v1558_v3, 7  ;;  %v2177_v34 = vor.u32 %v2176_v17, %v2173_v38  ;;  %v2194_v14 = vshll.u32 %v1876_v55, 16  ;;  %v8827_v56 = vrot.slane %v2358_v19, 9  ;;  %v2587_v11 = vld [vmem:[#allocation2 + $0xd8] sm:$0xf] }
 0x266   : > { %5391 = vmatmul.mubr.bf16.gmra.mrb[36].mxu1 %v8912_v8  ;;  %v9302_v2 = vpack.c.bf16 %v995_v15, %v995_v15  ;;  %v2191_v28 = vor.u32 %v2190_v29, %v2187_v25  ;;  %v2519_v54 = vrot.slane %v1875_v57, 5  ;;  %v8828_v63 = vrot.slane %v2359_v33, 9  ;;  %v2588_v35 = vld [vmem:[#allocation2 + $0xe0] sm:$0xf]  ;;  %v11748_v19 = vld [vmem:[#allocation2 + $0xd0] sm:$0xf] }
 0x267   : > { %v1563_v22 = vor.u32 %v1561_v7, %v1560_v40  ;;  %v1564_v42 = vrot.slane %v1560_v40, 4  ;;  %v1817_v32 = vld [vmem:[#allocation2 + $0x130] sm:$0xf]  ;;  %v2178_v61 = vrot.slane %v2177_v34, 4  ;;  %v8962_v53 = vcombine.low %v2587_v11, %v2588_v35 }
 0x268   : > { %v1820_v18 = vld [vmem:[#allocation2 + $0x134] sm:$0x1]  ;;  %v1542_v39 = vshrl.u32 %v9302_v2, 16  ;;  %v1545_v30 = vshll.u32 %v9302_v2, 16  ;;  %v2520_v8 = vsel %vm11089_vm10, %v8827_v56, %v2519_v54  ;;  %v8913_v4 = vcombine.low %v11717_v60, %v11725_v16  ;;  %v1805_v33 = vld [vmem:[#allocation2 + $0x120] sm:$0xf] }
 0x269   : > { %v1818_v57 = vsel %vm11132_vm13, %v1563_v22, %v1817_v32  ;;  %v1821_v3 = vsel %vm10948_vm4, %v1564_v42, %v1820_v18  ;;  %v2183_v7 = vsel %vm11099_vm11, %v2178_v61, %v2182_v5  ;;  %v2192_v38 = vrot.slane %v2191_v28, 4  ;;  %v1808_v60 = vld [vmem:[#allocation2 + $0x124] sm:$0x1]  ;;  %v11761_v28 = vld [vmem:[#allocation2 + $0xd8] sm:$0xf] }
 0x26a   : > { %1819 = vst [vmem:[#allocation2 + $0x130] sm:$0xf] %v1818_v57  ;;  %1822 = vst [vmem:[#allocation2 + $0x134] sm:$0x1] %v1821_v3  ;;  %v1544_v17 = vrot.slane %v1542_v39, 7  ;;  %v2196_v15 = vrot.slane %v2194_v14, 5 }
 0x26b   : > { %v2523_v25 = vrot.slane %v1876_v55, 5  ;;  %v2938_v29 = vshrl.u32 %v2587_v11, 16  ;;  %v2941_v16 = vshll.u32 %v2587_v11, 16  ;;  %v2952_v40 = vshrl.u32 %v2588_v35, 16  ;;  %v1877_v11 = vld [vmem:[#allocation2 + $0xd4] sm:$0x1] }
 0x26c   : > { %v2955_v34 = vshll.u32 %v2588_v35, 16  ;;  %v2199_v56 = vshrl.u32 %v11748_v19, 16  ;;  %v1547_v2 = vor.u32 %v1545_v30, %v1544_v17  ;;  %v1548_v54 = vrot.slane %v1544_v17, 4  ;;  %v2360_v35 = vld [vmem:[#allocation2 + $0xd0] sm:$0xe] }
 0x26d   : > { %v2197_v22 = vsel %vm11099_vm11, %v2192_v38, %v2196_v15  ;;  %v2524_v5 = vsel %vm11089_vm10, %v8828_v63, %v2523_v25  ;;  %v11763_v55 = vrot.slane %v2938_v29, 4  ;;  %v11765_v32 = vrot.slane %v2941_v16, 5  ;;  %v1878_v63 = vld [vmem:[#allocation2 + $0xdc] sm:$0x1]  ;;  %v2361_v57 = vld [vmem:[#allocation2 + $0xd8] sm:$0xe] }
 0x26e   : > { %v8929_v42 = vcombine.low %v2183_v7, %v2197_v22  ;;  %v8945_v14 = vcombine.low %v2520_v8, %v2524_v5  ;;  %v1806_v18 = vsel %vm11132_vm13, %v1547_v2, %v1805_v33  ;;  %v1809_v61 = vsel %vm10948_vm4, %v1548_v54, %v1808_v60  ;;  %v2589_v38 = vld [vmem:[#allocation2 + $0xf8] sm:$0xf]  ;;  %v2590_v25 = vld [vmem:[#allocation2 + $0x100] sm:$0xf]  ;;  %v1879_v22 = vld [vmem:[#allocation2 + $0xf4] sm:$0x1] }
 0x26f   : > { %14909 = vst [vmem:[#allocation36_spill] sm:$0xff] %v11765_v32  ;;  %v11771_v39 = vrot.slane %v2952_v40, 4  ;;  %v11773_v30 = vrot.slane %v2955_v34, 5  ;;  %1807 = vst [vmem:[#allocation2 + $0x120] sm:$0xf] %v1806_v18  ;;  %v2201_v8 = vrot.slane %v2199_v56, 4 }
 0x270   : > { %1810 = vst [vmem:[#allocation2 + $0x124] sm:$0x1] %v1809_v61  ;;  %5398 = vmatprep.mubr.bf16.mxu1 %v8929_v42  ;;  %5560 = vmatmul.mubr.bf16.gmra.mrb[72].mxu0 %v8945_v14  ;;  %v2202_v3 = vshll.u32 %v11748_v19, 16  ;;  %v2208_v7 = vshll.u32 %v1877_v11, 16  ;;  %v2213_v41 = vshrl.u32 %v11761_v28, 16  ;;  %v2216_v26 = vshll.u32 %v11761_v28, 16 }
 0x271   : > { %14910 = vst [vmem:[#allocation37_spill] sm:$0xff] %v11771_v39  ;;  %14911 = vst [vmem:[#allocation38_spill] sm:$0xff] %v11773_v30  ;;  %5567 = vmatprep.mubr.bf16.mxu0 %v8962_v53  ;;  %5399 = vmatmul.mubr.bf16.gmra.mrb[40].mxu1 %v8913_v4  ;;  %v2222_v17 = vshll.u32 %v1878_v63, 16  ;;  %v8829_v33 = vrot.slane %v2360_v35, 9  ;;  %v2527_v15 = vrot.slane %v1877_v11, 5  ;;  %v8830_v40 = vrot.slane %v2361_v57, 9 }
 0x272   : > { %v2204_v29 = vrot.slane %v2202_v3, 5  ;;  %v2210_v60 = vrot.slane %v2208_v7, 5  ;;  %v2215_v16 = vrot.slane %v2213_v41, 4  ;;  %v2218_v34 = vrot.slane %v2216_v26, 5  ;;  %v2362_v14 = vld [vmem:[#allocation2 + $0xf0] sm:$0xe] }
 0x273   : > { %v2224_v56 = vrot.slane %v2222_v17, 5  ;;  %v2528_v2 = vsel %vm11089_vm10, %v8829_v33, %v2527_v15  ;;  %v2531_v54 = vrot.slane %v1878_v63, 5  ;;  %v2966_v53 = vshrl.u32 %v2589_v38, 16  ;;  %v2363_v3 = vld [vmem:[#allocation2 + $0xf8] sm:$0xe] }
 0x274   : > { %v2205_v5 = vor.u32 %v2204_v29, %v2201_v8  ;;  %v2969_v4 = vshll.u32 %v2589_v38, 16  ;;  %v2980_v42 = vshrl.u32 %v2590_v25, 16  ;;  %v2219_v18 = vor.u32 %v2218_v34, %v2215_v16  ;;  %v11782_v57 = vld [vmem:[#allocation2 + $0xf0] sm:$0xf]  ;;  %v1880_v8 = vld [vmem:[#allocation2 + $0xfc] sm:$0x1] }
 0x275   : > { %v2532_v11 = vsel %vm11089_vm10, %v8830_v40, %v2531_v54  ;;  %v2983_v35 = vshll.u32 %v2590_v25, 16  ;;  %v8963_v61 = vcombine.low %v2589_v38, %v2590_v25  ;;  %v11784_v26 = vrot.slane %v2966_v53, 4  ;;  %v11794_v16 = vld [vmem:[#allocation2 + $0xf8] sm:$0xf] }
 0x276   : > { %v2206_v7 = vrot.slane %v2205_v5, 4  ;;  %v8946_v41 = vcombine.low %v2528_v2, %v2532_v11  ;;  %v11786_v63 = vrot.slane %v2969_v4, 5  ;;  %v2220_v17 = vrot.slane %v2219_v18, 4 }
 0x277   : > { %14912 = vst [vmem:[#allocation39_spill] sm:$0xff] %v11784_v26  ;;  %v11788_v33 = vrot.slane %v2980_v42, 4  ;;  %v11790_v15 = vrot.slane %v2983_v35, 5  ;;  %v8914_v29 = vcombine.low %v11748_v19, %v11761_v28  ;;  %v8831_v25 = vrot.slane %v2362_v14, 9  ;;  %v2591_v42 = vld [vmem:[#allocation2 + $0x108] sm:$0xf] }
 0x278   : > { %14913 = vst [vmem:[#allocation40_spill] sm:$0xff] %v11786_v63  ;;  %v2211_v38 = vsel %vm11099_vm11, %v2206_v7, %v2210_v60  ;;  %5568 = vmatmul.mubr.bf16.gmra.mrb[76].mxu0 %v8946_v41  ;;  %v2535_v40 = vrot.slane %v1879_v22, 5  ;;  %v8832_v34 = vrot.slane %v2363_v3, 9  ;;  %v2225_v2 = vsel %vm11099_vm11, %v2220_v17, %v2224_v56  ;;  %v2592_v35 = vld [vmem:[#allocation2 + $0x110] sm:$0xf] }
 0x279   : > { %14914 = vst [vmem:[#allocation41_spill] sm:$0xff] %v11788_v33  ;;  %14915 = vst [vmem:[#allocation42_spill] sm:$0xff] %v11790_v15  ;;  %5575 = vmatprep.mubr.bf16.mxu0 %v8963_v61  ;;  %v2539_v54 = vrot.slane %v1880_v8, 5  ;;  %v2227_v5 = vshrl.u32 %v11782_v57, 16  ;;  %v2230_v53 = vshll.u32 %v11782_v57, 16  ;;  %v8930_v4 = vcombine.low %v2211_v38, %v2225_v2 }
 0x27a   : > { %v2536_v19 = vsel %vm11089_vm10, %v8831_v25, %v2535_v40  ;;  %v2236_v28 = vshll.u32 %v1879_v22, 16  ;;  %v2241_v60 = vshrl.u32 %v11794_v16, 16  ;;  %v2244_v56 = vshll.u32 %v11794_v16, 16  ;;  %v11808_v40 = vld [vmem:[#allocation2 + $0x100] sm:$0xf] }
 0x27b   : > { %v2540_v14 = vsel %vm11089_vm10, %v8832_v34, %v2539_v54  ;;  %v2229_v18 = vrot.slane %v2227_v5, 4  ;;  %v2232_v11 = vrot.slane %v2230_v53, 5  ;;  %5406 = vmatprep.mubr.bf16.mxu1 %v8930_v4  ;;  %v2250_v41 = vshll.u32 %v1880_v8, 16  ;;  %v11810_v5 = vld [vmem:[#allocation2 + $0x108] sm:$0xf] }
 0x27c   : > { %v8947_v61 = vcombine.low %v2536_v19, %v2540_v14  ;;  %v2238_v3 = vrot.slane %v2236_v28, 5  ;;  %v2243_v7 = vrot.slane %v2241_v60, 4  ;;  %5407 = vmatmul.mubr.bf16.gmra.mrb[44].mxu1 %v8914_v29  ;;  %v2246_v38 = vrot.slane %v2244_v56, 5  ;;  %v1881_v8 = vld [vmem:[#allocation2 + $0x104] sm:$0x1] }
 0x27d   : > { %v2233_v17 = vor.u32 %v2232_v11, %v2229_v18  ;;  %v2994_v22 = vshrl.u32 %v2591_v42, 16  ;;  %v2997_v25 = vshll.u32 %v2591_v42, 16  ;;  %v2252_v2 = vrot.slane %v2250_v41, 5  ;;  %v1882_v29 = vld [vmem:[#allocation2 + $0x10c] sm:$0x1] }
 0x27e   : > { %v3008_v15 = vshrl.u32 %v2592_v35, 16  ;;  %v3011_v34 = vshll.u32 %v2592_v35, 16  ;;  %v8964_v54 = vcombine.low %v2591_v42, %v2592_v35  ;;  %v2247_v33 = vor.u32 %v2246_v38, %v2243_v7  ;;  %v2364_v18 = vld [vmem:[#allocation2 + $0x100] sm:$0xe]  ;;  %v2365_v41 = vld [vmem:[#allocation2 + $0x108] sm:$0xe] }
 0x27f   : > { %v2234_v53 = vrot.slane %v2233_v17, 4  ;;  %v11812_v4 = vrot.slane %v2994_v22, 4  ;;  %v11814_v19 = vrot.slane %v2997_v25, 5  ;;  %v8915_v14 = vcombine.low %v11782_v57, %v11794_v16  ;;  %v2593_v22 = vld [vmem:[#allocation2 + $0x118] sm:$0xf] }
 0x280   : > { %5576 = vmatmul.mubr.bf16.gmra.mrb[80].mxu0 %v8947_v61  ;;  %v11816_v28 = vrot.slane %v3008_v15, 4  ;;  %v11818_v60 = vrot.slane %v3011_v34, 5  ;;  %v2255_v42 = vshrl.u32 %v11808_v40, 16  ;;  %v2248_v56 = vrot.slane %v2247_v33, 4 }
 0x281   : > { %14916 = vst [vmem:[#allocation43_spill] sm:$0xff] %v11812_v4  ;;  %14917 = vst [vmem:[#allocation44_spill] sm:$0xff] %v11814_v19  ;;  %v2239_v11 = vsel %vm11099_vm11, %v2234_v53, %v2238_v3  ;;  %5583 = vmatprep.mubr.bf16.mxu0 %v8964_v54  ;;  %v2258_v35 = vshll.u32 %v11808_v40, 16  ;;  %v2264_v7 = vshll.u32 %v1881_v8, 16  ;;  %v2269_v15 = vshrl.u32 %v11810_v5, 16 }
 0x282   : > { %14918 = vst [vmem:[#allocation45_spill] sm:$0xff] %v11816_v28  ;;  %14919 = vst [vmem:[#allocation46_spill] sm:$0xff] %v11818_v60  ;;  %v2257_v61 = vrot.slane %v2255_v42, 4  ;;  %v2272_v17 = vshll.u32 %v11810_v5, 16  ;;  %v2278_v38 = vshll.u32 %v1882_v29, 16  ;;  %v2253_v57 = vsel %vm11099_vm11, %v2248_v56, %v2252_v2 }
 0x283   : > { %v2260_v16 = vrot.slane %v2258_v35, 5  ;;  %v2266_v25 = vrot.slane %v2264_v7, 5  ;;  %v8833_v34 = vrot.slane %v2364_v18, 9  ;;  %v2594_v3 = vld [vmem:[#allocation2 + $0x120] sm:$0xf]  ;;  %v8931_v33 = vcombine.low %v2239_v11, %v2253_v57 }
 0x284   : > { %v2271_v54 = vrot.slane %v2269_v15, 4  ;;  %v2274_v53 = vrot.slane %v2272_v17, 5  ;;  %v2280_v60 = vrot.slane %v2278_v38, 5  ;;  %v2543_v19 = vrot.slane %v1881_v8, 5  ;;  %v11834_v56 = vld [vmem:[#allocation2 + $0x110] sm:$0xf] }
 0x285   : > { %v2261_v28 = vor.u32 %v2260_v16, %v2257_v61  ;;  %v8834_v42 = vrot.slane %v2365_v41, 9  ;;  %v2547_v4 = vrot.slane %v1882_v29, 5  ;;  %5414 = vmatprep.mubr.bf16.mxu1 %v8931_v33  ;;  %v3022_v26 = vshrl.u32 %v2593_v22, 16  ;;  %v11840_v41 = vld [vmem:[#allocation2 + $0x118] sm:$0xf] }
 0x286   : > { %v2275_v63 = vor.u32 %v2274_v53, %v2271_v54  ;;  %v3025_v30 = vshll.u32 %v2593_v22, 16  ;;  %v3036_v39 = vshrl.u32 %v2594_v3, 16  ;;  %5415 = vmatmul.mubr.bf16.gmra.mrb[48].mxu1 %v8915_v14  ;;  %v2544_v2 = vsel %vm11089_vm10, %v8833_v34, %v2543_v19  ;;  %v2367_v16 = vld [vmem:[#allocation2 + $0x118] sm:$0xe]  ;;  %v2595_v33 = vld [vmem:[#allocation2 + $0x128] sm:$0xf] }
 0x287   : > { %v2262_v32 = vrot.slane %v2261_v28, 4  ;;  %v2548_v18 = vsel %vm11089_vm10, %v8834_v42, %v2547_v4  ;;  %v3039_v11 = vshll.u32 %v2594_v3, 16  ;;  %v11836_v7 = vrot.slane %v3022_v26, 4  ;;  %v2366_v4 = vld [vmem:[#allocation2 + $0x110] sm:$0xe] }
 0x288   : > { %v2276_v35 = vrot.slane %v2275_v63, 4  ;;  %v8948_v8 = vcombine.low %v2544_v2, %v2548_v18  ;;  %v11838_v29 = vrot.slane %v3025_v30, 5  ;;  %v11844_v14 = vrot.slane %v3036_v39, 4  ;;  %v1883_v30 = vld [vmem:[#allocation2 + $0x114] sm:$0x1] }
 0x289   : > { %14920 = vst [vmem:[#allocation47_spill] sm:$0xff] %v11836_v7  ;;  %v2267_v28 = vsel %vm11099_vm11, %v2262_v32, %v2266_v25  ;;  %v11846_v19 = vrot.slane %v3039_v11, 5  ;;  %v8965_v61 = vcombine.low %v2593_v22, %v2594_v3  ;;  %v8916_v26 = vcombine.low %v11808_v40, %v11810_v5  ;;  %v1884_v63 = vld [vmem:[#allocation2 + $0x11c] sm:$0x1]  ;;  %v2596_v42 = vld [vmem:[#allocation2 + $0x130] sm:$0xf] }
 0x28a   : > { %14921 = vst [vmem:[#allocation48_spill] sm:$0xff] %v11838_v29  ;;  %14922 = vst [vmem:[#allocation49_spill] sm:$0xff] %v11844_v14  ;;  %v2281_v15 = vsel %vm11099_vm11, %v2276_v35, %v2280_v60  ;;  %5584 = vmatmul.mubr.bf16.gmra.mrb[84].mxu0 %v8948_v8  ;;  %v2283_v17 = vshrl.u32 %v11834_v56, 16  ;;  %v2286_v38 = vshll.u32 %v11834_v56, 16  ;;  %v2292_v39 = vshll.u32 %v1883_v30, 16 }
 0x28b   : > { %14923 = vst [vmem:[#allocation50_spill] sm:$0xff] %v11846_v19  ;;  %v8932_v32 = vcombine.low %v2267_v28, %v2281_v15  ;;  %5591 = vmatprep.mubr.bf16.mxu0 %v8965_v61  ;;  %v2297_v57 = vshrl.u32 %v11840_v41, 16  ;;  %v2300_v22 = vshll.u32 %v11840_v41, 16  ;;  %v2306_v34 = vshll.u32 %v1884_v63, 16  ;;  %v11902_v19 = vld [vmem:[#allocation2 + $0x24] sm:$0x1] }
 0x28c   : > { %v2285_v25 = vrot.slane %v2283_v17, 4  ;;  %v2288_v60 = vrot.slane %v2286_v38, 5  ;;  %v8835_v3 = vrot.slane %v2366_v4, 9  ;;  %v2294_v40 = vrot.slane %v2292_v39, 5  ;;  %v11860_v39 = vld [vmem:[#allocation2 + $0x120] sm:$0xf] }
 0x28d   : > { %5422 = vmatprep.mubr.bf16.mxu1 %v8932_v32  ;;  %v2299_v5 = vrot.slane %v2297_v57, 4  ;;  %v2302_v54 = vrot.slane %v2300_v22, 5  ;;  %v2551_v53 = vrot.slane %v1883_v30, 5  ;;  %v2308_v18 = vrot.slane %v2306_v34, 5  ;;  %14928 = vst [vmem:[#allocation55_spill] sm:$0xff] %v11902_v19 }
 0x28e   : > { %v2289_v2 = vor.u32 %v2288_v60, %v2285_v25  ;;  %v8836_v11 = vrot.slane %v2367_v16, 9  ;;  %v2555_v35 = vrot.slane %v1884_v63, 5  ;;  %5423 = vmatmul.mubr.bf16.gmra.mrb[52].mxu1 %v8916_v26  ;;  %v3050_v61 = vshrl.u32 %v2595_v33, 16  ;;  %v11866_v26 = vld [vmem:[#allocation2 + $0x128] sm:$0xf] }
 0x28f   : > { %v2303_v8 = vor.u32 %v2302_v54, %v2299_v5  ;;  %v2552_v28 = vsel %vm11089_vm10, %v8835_v3, %v2551_v53  ;;  %v3053_v15 = vshll.u32 %v2595_v33, 16  ;;  %v3064_v38 = vshrl.u32 %v2596_v42, 16  ;;  %v2368_v3 = vld [vmem:[#allocation2 + $0x120] sm:$0xe]  ;;  %v1885_v53 = vld [vmem:[#allocation2 + $0x124] sm:$0x1] }
 0x290   : > { %v2290_v17 = vrot.slane %v2289_v2, 4  ;;  %v2556_v4 = vsel %vm11089_vm10, %v8836_v11, %v2555_v35  ;;  %v3067_v32 = vshll.u32 %v2596_v42, 16  ;;  %v11862_v22 = vrot.slane %v3050_v61, 4  ;;  %v1886_v2 = vld [vmem:[#allocation2 + $0x12c] sm:$0x1] }
 0x291   : > { %v2304_v30 = vrot.slane %v2303_v8, 4  ;;  %v8949_v57 = vcombine.low %v2552_v28, %v2556_v4  ;;  %v11864_v63 = vrot.slane %v3053_v15, 5  ;;  %v11870_v25 = vrot.slane %v3064_v38, 4  ;;  %v11930_v7 = vld [vmem:[#allocation2 + $0x30] sm:$0xf] }
 0x292   : > { %14924 = vst [vmem:[#allocation51_spill] sm:$0xff] %v11862_v22  ;;  %v2295_v16 = vsel %vm11099_vm11, %v2290_v17, %v2294_v40  ;;  %v11872_v60 = vrot.slane %v3067_v32, 5  ;;  %v8966_v34 = vcombine.low %v2595_v33, %v2596_v42  ;;  %v8917_v54 = vcombine.low %v11834_v56, %v11840_v41  ;;  %v11880_v40 = vld [vmem:[#allocation2 + $0x10] sm:$0xf]  ;;  %v11884_v41 = vld [vmem:[#allocation2 + $0x18] sm:$0xf] }
 0x293   : > { %14925 = vst [vmem:[#allocation52_spill] sm:$0xff] %v11864_v63  ;;  %14926 = vst [vmem:[#allocation53_spill] sm:$0xff] %v11870_v25  ;;  %v2309_v5 = vsel %vm11099_vm11, %v2304_v30, %v2308_v18  ;;  %5592 = vmatmul.mubr.bf16.gmra.mrb[88].mxu0 %v8949_v57  ;;  %v2311_v11 = vshrl.u32 %v11860_v39, 16  ;;  %v2314_v35 = vshll.u32 %v11860_v39, 16  ;;  %v2320_v28 = vshll.u32 %v1885_v53, 16 }
 0x294   : > { %14927 = vst [vmem:[#allocation54_spill] sm:$0xff] %v11872_v60  ;;  %v8933_v8 = vcombine.low %v2295_v16, %v2309_v5  ;;  %5599 = vmatprep.mubr.bf16.mxu0 %v8966_v34  ;;  %v2325_v33 = vshrl.u32 %v11866_v26, 16  ;;  %v2328_v42 = vshll.u32 %v11866_v26, 16  ;;  %v2369_v18 = vld [vmem:[#allocation2 + $0x128] sm:$0xe]  ;;  %v2334_v17 = vshll.u32 %v1886_v2, 16 }
 0x295   : > { %v2313_v61 = vrot.slane %v2311_v11, 4  ;;  %v2316_v15 = vrot.slane %v2314_v35, 5  ;;  %v8837_v56 = vrot.slane %v2368_v3, 9  ;;  %v2322_v4 = vrot.slane %v2320_v28, 5  ;;  %v3334_v57 = vld [vmem:[#allocation2 + $0x14] sm:$0x1] }
 0x296   : > { %5430 = vmatprep.mubr.bf16.mxu1 %v8933_v8  ;;  %v2327_v38 = vrot.slane %v2325_v33, 4  ;;  %v2330_v32 = vrot.slane %v2328_v42, 5  ;;  %v2559_v30 = vrot.slane %v1885_v53, 5  ;;  %v2336_v34 = vrot.slane %v2334_v17, 5  ;;  %v3335_v35 = vld [vmem:[#allocation2 + $0x1c] sm:$0x1] }
 0x297   : > { %5431 = vmatmul.mubr.bf16.gmra.mrb[56].mxu1 %v8917_v54  ;;  %v2317_v16 = vor.u32 %v2316_v15, %v2313_v61  ;;  %v8838_v5 = vrot.slane %v2369_v18, 9  ;;  %v2563_v60 = vrot.slane %v1886_v2, 5  ;;  %v3367_v3 = vshrl.u32 %v11880_v40, 16  ;;  %v2597_v33 = vld [vmem:[#allocation2 + $0xc] sm:$0x1] }
 0x298   : > { %v2331_v25 = vor.u32 %v2330_v32, %v2327_v38  ;;  %v2560_v11 = vsel %vm11089_vm10, %v8837_v56, %v2559_v30  ;;  %v3370_v63 = vshll.u32 %v11880_v40, 16  ;;  %v3376_v53 = vshll.u32 %v3334_v57, 16  ;;  %v2598_v15 = vld [vmem:[#allocation2 + $0x14] sm:$0x1]  ;;  %v3077_v30 = vld [vmem:[#allocation2 + $0x8] sm:$0xe] }
 0x299   : > { %v2318_v8 = vrot.slane %v2317_v16, 4  ;;  %v2564_v28 = vsel %vm11089_vm10, %v8838_v5, %v2563_v60  ;;  %v3381_v54 = vshrl.u32 %v11884_v41, 16  ;;  %v3369_v2 = vrot.slane %v3367_v3, 4  ;;  %v3078_v5 = vld [vmem:[#allocation2 + $0x10] sm:$0xe] }
 0x29a   : > { %v2332_v42 = vrot.slane %v2331_v25, 4  ;;  %v8950_v18 = vcombine.low %v2560_v11, %v2564_v28  ;;  %v3372_v61 = vrot.slane %v3370_v63, 5  ;;  %v3378_v56 = vrot.slane %v3376_v53, 5 }
 0x29b   : > { %v2323_v17 = vsel %vm11099_vm11, %v2318_v8, %v2322_v4  ;;  %v3383_v38 = vrot.slane %v3381_v54, 4  ;;  %v3384_v32 = vshll.u32 %v11884_v41, 16  ;;  %v3390_v16 = vshll.u32 %v3335_v35, 16  ;;  %v11900_v4 = vld [vmem:[#allocation2 + $0x20] sm:$0xf] }
 0x29c   : > { %v2337_v60 = vsel %vm11099_vm11, %v2332_v42, %v2336_v34  ;;  %5600 = vmatmul.mubr.bf16.gmra.mrb[92].mxu0 %v8950_v18  ;;  %v3373_v57 = vor.u32 %v3372_v61, %v3369_v2  ;;  %v8918_v25 = vcombine.low %v11860_v39, %v11866_v26  ;;  %v2639_v3 = vshll.u32 %v2597_v33, 16  ;;  %v11904_v2 = vld [vmem:[#allocation2 + $0x28] sm:$0xf] }
 0x29d   : > { %v8934_v63 = vcombine.low %v2323_v17, %v2337_v60  ;;  %v3386_v11 = vrot.slane %v3384_v32, 5  ;;  %v2653_v28 = vshll.u32 %v2598_v15, 16  ;;  %v3392_v53 = vrot.slane %v3390_v16, 5  ;;  %v11912_v32 = vld [vmem:[#allocation2 + $0x2c] sm:$0x1] }
 0x29e   : > { %v3374_v8 = vrot.slane %v3373_v57, 4  ;;  %v8839_v54 = vrot.slane %v3077_v30, 9  ;;  %v3175_v22 = vrot.slane %v2597_v33, 5  ;;  %v2641_v42 = vrot.slane %v2639_v3, 5  ;;  %14929 = vst [vmem:[#allocation56_spill] sm:$0xff] %v11912_v32 }
 0x29f   : > { %5438 = vmatprep.mubr.bf16.mxu1 %v8934_v63  ;;  %v3387_v34 = vor.u32 %v3386_v11, %v3383_v38  ;;  %v2655_v35 = vrot.slane %v2653_v28, 5  ;;  %v8840_v18 = vrot.slane %v3078_v5, 9  ;;  %v3179_v61 = vrot.slane %v2598_v15, 5  ;;  %v11922_v16 = vld [vmem:[#allocation2 + $0x1c] sm:$0x1] }
 0x2a0   : > { %v3379_v39 = vsel %vm11099_vm11, %v3374_v8, %v3378_v56  ;;  %5439 = vmatmul.mubr.bf16.gmra.mrb[60].mxu1 %v8918_v25  ;;  %v3176_v26 = vsel %vm11089_vm10, %v8839_v54, %v3175_v22  ;;  %v8999_v33 = vcombine.low %v11880_v40, %v11884_v41  ;;  %v3395_v38 = vshrl.u32 %v11900_v4, 16  ;;  %v11926_v63 = vld [vmem:[#allocation2 + $0x24] sm:$0x1]  ;;  %v3079_v11 = vld [vmem:[#allocation2 + $0x18] sm:$0xe] }
 0x2a1   : > { %v3388_v17 = vrot.slane %v3387_v34, 4  ;;  %v3398_v30 = vshll.u32 %v11900_v4, 16  ;;  %v3404_v60 = vshll.u32 %v11902_v19, 16  ;;  %v3180_v56 = vsel %vm11089_vm10, %v8840_v18, %v3179_v61  ;;  %v3080_v34 = vld [vmem:[#allocation2 + $0x20] sm:$0xe] }
 0x2a2   : > { %v3409_v57 = vshrl.u32 %v11904_v2, 16  ;;  %v3412_v22 = vshll.u32 %v11904_v2, 16  ;;  %v3418_v15 = vshll.u32 %v11912_v32, 16  ;;  %v8983_v41 = vcombine.low %v3176_v26, %v3180_v56 }
 0x2a3   : > { %v3393_v40 = vsel %vm11099_vm11, %v3388_v17, %v3392_v53  ;;  %v3397_v25 = vrot.slane %v3395_v38, 4  ;;  %v3400_v5 = vrot.slane %v3398_v30, 5  ;;  %v3406_v28 = vrot.slane %v3404_v60, 5 }
 0x2a4   : > { %v9015_v3 = vcombine.low %v3379_v39, %v3393_v40  ;;  %v3411_v8 = vrot.slane %v3409_v57, 4  ;;  %v3414_v54 = vrot.slane %v3412_v22, 5  ;;  %5640 = vmatprep.mubr.bf16.mxu1 %v8983_v41  ;;  %v3420_v61 = vrot.slane %v3418_v15, 5  ;;  %v11939_v57 = vld [vmem:[#allocation2 + $0x38] sm:$0xf]  ;;  %v10183_v22 = vld [vmem:[#allocation8 + $0x208] sm:$0xff]  }
 0x2a5   : > { %v3401_v18 = vor.u32 %v3400_v5, %v3397_v25  ;;  %v2642_v26 = vsel %vm11099_vm11, %v11232_v46, %v2641_v42  ;;  %v2656_v39 = vsel %vm11099_vm11, %v11248_v59, %v2655_v35  ;;  %v8841_v17 = vrot.slane %v3079_v11, 9  ;;  %v3338_v42 = vld [vmem:[#allocation2 + $0x34] sm:$0x1]  ;;  %v10280_v11 = vld [vmem:[#allocation8 + $0x200] sm:$0xff]  }
 0x2a6   : > { %5801 = vmatprep.mubr.bf16.mxu0 %v9015_v3  ;;  %v3415_v53 = vor.u32 %v3414_v54, %v3411_v8  ;;  %v8967_v30 = vcombine.low %v2642_v26, %v2656_v39  ;;  %v3183_v60 = vrot.slane %v11922_v16, 5  ;;  %v8842_v56 = vrot.slane %v3080_v34, 9  ;;  %v10186_v26 = vld [vmem:[#allocation8 + $0x210] sm:$0xff]  }
 0x2a7   : > { %5802 = vmatmul.mubr.bf16.vlgmr.msra.gmra.mrb[96].mxu0 %v8999_v33  ;;  %v3402_v38 = vrot.slane %v3401_v18, 4  ;;  %v3187_v40 = vrot.slane %v11926_v63, 5  ;;  %v9000_v46 = vcombine.low %v11900_v4, %v11904_v2  ;;  %v3423_v41 = vshrl.u32 %v11930_v7, 16  ;;  %v3339_v2 = vld [vmem:[#allocation2 + $0x3c] sm:$0x1] }
 0x2a8   : > { %v3416_v15 = vrot.slane %v3415_v53, 4  ;;  %5641 = vmatmul.mubr.bf16.vlgmr.msra.gmra.mrb[64].mxu1 %v8967_v30  ;;  %v3184_v35 = vsel %vm11089_vm10, %v8841_v17, %v3183_v60  ;;  %v3426_v33 = vshll.u32 %v11930_v7, 16  ;;  %v3432_v25 = vshll.u32 %v3338_v42, 16  ;;  %v3081_v53 = vld [vmem:[#allocation2 + $0x28] sm:$0xe]  ;;  %v14932_v42 = vld [vmem:[#allocation22_spill] sm:$0xff] }
 0x2a9   : > { %v3407_v59 = vsel %vm11099_vm11, %v3402_v38, %v3406_v28  ;;  %9904 = vmatpush3.bf16.msra.mxu1 %v10280_v11  ;;  %v3188_v4 = vsel %vm11089_vm10, %v8842_v56, %v3187_v40  ;;  %v3425_v3 = vrot.slane %v3423_v41, 4  ;;  %v3437_v8 = vshrl.u32 %v11939_v57, 16  ;;  %v14930_v38 = vld [vmem:[#allocation20_spill] sm:$0xff]  ;;  %v11958_v60 = vld [vmem:[#allocation2 + $0x2c] sm:$0x1] }
 0x2aa   : > { %v3421_v5 = vsel %vm11099_vm11, %v3416_v15, %v3420_v61  ;;  %v8984_v54 = vcombine.low %v3184_v35, %v3188_v4  ;;  %v3428_v34 = vrot.slane %v3426_v33, 5  ;;  %v3434_v18 = vrot.slane %v3432_v25, 5  ;;  %9905 = vmatprep.subr.bf16.mxu1 %v10183_v22  ;;  %v14931_v40 = vld [vmem:[#allocation21_spill] sm:$0xff]  ;;  %v11964_v35 = vld [vmem:[#allocation2 + $0x34] sm:$0x1] }
 0x2ab   : > { %v9016_v28 = vcombine.low %v3407_v59, %v3421_v5  ;;  %v3439_v39 = vrot.slane %v3437_v8, 4  ;;  %v3440_v17 = vshll.u32 %v11939_v57, 16  ;;  %v3446_v61 = vshll.u32 %v3339_v2, 16  ;;  %v3082_v33 = vld [vmem:[#allocation2 + $0x30] sm:$0xe] }
 0x2ac   : > { %v2664_v30 = vor.u32 %v14930_v38, %v11251_v62  ;;  %5648 = vmatprep.mubr.bf16.mxu1 %v8984_v54  ;;  %v3429_v56 = vor.u32 %v3428_v34, %v3425_v3  ;;  %v2667_v15 = vshll.u32 %v11922_v16, 16  ;;  %v2678_v41 = vor.u32 %v14932_v42, %v14931_v40  ;;  %v10189_v16 = vld [vmem:[#allocation8 + $0x218] sm:$0xff]   ;;  %v11968_v38 = vld [vmem:[#allocation2 + $0x40] sm:$0xf]  ;;  %v3341_v40 = vld [vmem:[#allocation2 + $0x4c] sm:$0x1] }
 0x2ad   : > { %5809 = vmatprep.mubr.bf16.mxu0 %v9016_v28  ;;  %v2681_v59 = vshll.u32 %v11926_v63, 16  ;;  %v3442_v25 = vrot.slane %v3440_v17, 5  ;;  %v3448_v5 = vrot.slane %v3446_v61, 5  ;;  %v8843_v4 = vrot.slane %v3081_v53, 9  ;;  %9906 = vmatpush3.bf16.msra.mxu1 %v10183_v22 }
 0x2ae   : > { %v2665_v11 = vrot.slane %v2664_v30, 4  ;;  %v3430_v62 = vrot.slane %v3429_v56, 4  ;;  %v2669_v2 = vrot.slane %v2667_v15, 5  ;;  %v2679_v8 = vrot.slane %v2678_v41, 4  ;;  %9907 = vmatprep.subr.bf16.mxu1 %v10186_v26 }
 0x2af   : > { %5810 = vmatmul.mubr.bf16.gmra.mrb[100].mxu0 %v9000_v46  ;;  %v2683_v3 = vrot.slane %v2681_v59, 5  ;;  %v3443_v28 = vor.u32 %v3442_v25, %v3439_v39  ;;  %v3191_v54 = vrot.slane %v11958_v60, 5  ;;  %v8844_v34 = vrot.slane %v3082_v33, 9  ;;  %v11978_v39 = vld [vmem:[#allocation2 + $0x48] sm:$0xf] }
 0x2b0   : > { %v3195_v63 = vrot.slane %v11964_v35, 5  ;;  %v3435_v17 = vsel %vm11099_vm11, %v3430_v62, %v3434_v18  ;;  %v2670_v22 = vsel %vm11099_vm11, %v2665_v11, %v2669_v2  ;;  %v9001_v53 = vcombine.low %v11930_v7, %v11939_v57  ;;  %v3340_v18 = vld [vmem:[#allocation2 + $0x44] sm:$0x1]  ;;  %v11986_v57 = vpop.f32.mrb[32].mxu0 }
 0x2b1   : > { %v2684_v46 = vsel %vm11099_vm11, %v2679_v8, %v2683_v3  ;;  %v3444_v61 = vrot.slane %v3443_v28, 4  ;;  %v3192_v56 = vsel %vm11089_vm10, %v8843_v4, %v3191_v54  ;;  %9908 = vmatpush3.bf16.msra.mxu1 %v10186_v26  ;;  %v3451_v41 = vshrl.u32 %v11968_v38, 16  ;;  %v10192_v7 = vld [vmem:[#allocation8 + $0x220] sm:$0xff]   ;;  %v11992_v26 = vld [vmem:[#allocation2 + $0x3c] sm:$0x1]  ;;  %v11994_v2 = vpop.f32.mrb[33].mxu0 }
 0x2b2   : > { %v8968_v30 = vcombine.low %v2670_v22, %v2684_v46  ;;  %v3196_v15 = vsel %vm11089_vm10, %v8844_v34, %v3195_v63  ;;  %v3454_v59 = vshll.u32 %v11968_v38, 16  ;;  %v3460_v33 = vshll.u32 %v3340_v18, 16  ;;  %9909 = vmatprep.subr.bf16.mxu1 %v10189_v16  ;;  %v3083_v34 = vld [vmem:[#allocation2 + $0x38] sm:$0xe]  ;;  %v11996_v63 = vpop.f32.mrb[34].mxu0 }
 0x2b3   : > { %v8985_v42 = vcombine.low %v3192_v56, %v3196_v15  ;;  %v3449_v25 = vsel %vm11099_vm11, %v3444_v61, %v3448_v5  ;;  %v3465_v11 = vshrl.u32 %v11978_v39, 16  ;;  %v3468_v4 = vshll.u32 %v11978_v39, 16  ;;  %v14933_v61 = vld [vmem:[#allocation23_spill] sm:$0xff]  ;;  %v12000_v15 = vld [vmem:[#allocation2 + $0x44] sm:$0x1]  ;;  %v12002_v18 = vpop.f32.mrb[35].mxu0 }
 0x2b4   : > { %5649 = vmatmul.mubr.bf16.gmra.mrb[68].mxu1 %v8968_v30  ;;  %v3474_v62 = vshll.u32 %v3341_v40, 16  ;;  %v9017_v8 = vcombine.low %v3435_v17, %v3449_v25  ;;  %v3453_v3 = vrot.slane %v3451_v41, 4  ;;  %v3456_v28 = vrot.slane %v3454_v59, 5  ;;  %v14934_v30 = vld [vmem:[#allocation24_spill] sm:$0xff]  ;;  %v14936_v41 = vld [vmem:[#allocation26_spill] sm:$0xff] }
 0x2b5   : > { %5656 = vmatprep.mubr.bf16.mxu1 %v8985_v42  ;;  %v3462_v54 = vrot.slane %v3460_v33, 5  ;;  %v3467_v22 = vrot.slane %v3465_v11, 4  ;;  %v3470_v5 = vrot.slane %v3468_v4, 5  ;;  %v2692_v56 = vor.u32 %v14934_v30, %v14933_v61  ;;  %9910 = vmatpush3.bf16.msra.mxu1 %v10189_v16  ;;  %v14935_v42 = vld [vmem:[#allocation25_spill] sm:$0xff]  ;;  %v3084_v25 = vld [vmem:[#allocation2 + $0x40] sm:$0xe] }
 0x2b6   : > { %v3476_v46 = vrot.slane %v3474_v62, 5  ;;  %5817 = vmatprep.mubr.bf16.mxu0 %v9017_v8  ;;  %v3457_v17 = vor.u32 %v3456_v28, %v3453_v3  ;;  %v2695_v40 = vshll.u32 %v11958_v60, 16  ;;  %v2706_v59 = vor.u32 %v14936_v41, %v14935_v42  ;;  %9911 = vmatprep.subr.bf16.mxu1 %v10192_v7  ;;  %v10195_v11 = vld [vmem:[#allocation8 + $0x228] sm:$0xff]   ;;  %v12009_v28 = vld [vmem:[#allocation2 + $0x60] sm:$0xf] }
 0x2b7   : > { %v2709_v33 = vshll.u32 %v11964_v35, 16  ;;  %5818 = vmatmul.mubr.bf16.gmra.mrb[104].mxu0 %v9001_v53  ;;  %v3471_v4 = vor.u32 %v3470_v5, %v3467_v22  ;;  %v2693_v62 = vrot.slane %v2692_v56, 4  ;;  %v8845_v61 = vrot.slane %v3083_v34, 9  ;;  %v12022_v56 = vld [vmem:[#allocation2 + $0x68] sm:$0xf] }
 0x2b8   : > { %v3199_v16 = vrot.slane %v11992_v26, 5  ;;  %v3458_v30 = vrot.slane %v3457_v17, 4  ;;  %v2697_v29 = vrot.slane %v2695_v40, 5  ;;  %v2707_v8 = vrot.slane %v2706_v59, 4  ;;  %v3343_v59 = vld [vmem:[#allocation2 + $0x6c] sm:$0x1] }
 0x2b9   : > { %v2711_v3 = vrot.slane %v2709_v33, 5  ;;  %v3472_v60 = vrot.slane %v3471_v4, 4  ;;  %v8846_v35 = vrot.slane %v3084_v25, 9  ;;  %v3203_v41 = vrot.slane %v12000_v15, 5  ;;  %9912 = vmatpush3.bf16.msra.mxu1 %v10192_v7 }
 0x2ba   : > { %v3200_v42 = vsel %vm11089_vm10, %v8845_v61, %v3199_v16  ;;  %v3463_v53 = vsel %vm11099_vm11, %v3458_v30, %v3462_v54  ;;  %v2698_v34 = vsel %vm11099_vm11, %v2693_v62, %v2697_v29  ;;  %v9002_v5 = vcombine.low %v11968_v38, %v11978_v39  ;;  %9913 = vmatprep.subr.bf16.mxu1 %v10195_v11  ;;  %v3342_v54 = vld [vmem:[#allocation2 + $0x64] sm:$0x1]  ;;  %v12030_v38 = vld [vmem:[#allocation2 + $0x5c] sm:$0x1]  ;;  %v3085_v39 = vld [vmem:[#allocation2 + $0x58] sm:$0xe] }
 0x2bb   : > { %v2712_v22 = vsel %vm11099_vm11, %v2707_v8, %v2711_v3  ;;  %v3477_v17 = vsel %vm11099_vm11, %v3472_v60, %v3476_v46  ;;  %v3204_v7 = vsel %vm11089_vm10, %v8846_v35, %v3203_v41  ;;  %v3479_v29 = vshrl.u32 %v12009_v28, 16  ;;  %v10198_v61 = vld [vmem:[#allocation8 + $0x230] sm:$0xff]   ;;  %v3086_v3 = vld [vmem:[#allocation2 + $0x60] sm:$0xe]  ;;  %v12034_v60 = vpop.f32.mrb[36].mxu0 }
 0x2bc   : > { %v8969_v40 = vcombine.low %v2698_v34, %v2712_v22  ;;  %v9018_v33 = vcombine.low %v3463_v53, %v3477_v17  ;;  %v8986_v25 = vcombine.low %v3200_v42, %v3204_v7  ;;  %v3482_v4 = vshll.u32 %v12009_v28, 16  ;;  %v12039_v34 = vld [vmem:[#allocation2 + $0x64] sm:$0x1]  ;;  %v12041_v22 = vpop.f32.mrb[0].mxu1  ;;  %v12043_v17 = vpop.f32.mrb[37].mxu0 }
 0x2bd   : > { %v3488_v62 = vshll.u32 %v3342_v54, 16  ;;  %v3481_v16 = vrot.slane %v3479_v29, 4  ;;  %v3493_v46 = vshrl.u32 %v12022_v56, 16  ;;  %v3496_v30 = vshll.u32 %v12022_v56, 16  ;;  %9914 = vmatpush3.bf16.msra.mxu1 %v10195_v11  ;;  %v12047_v29 = vpop.f32.mrb[1].mxu1 }
 0x2be   : > { %5657 = vmatmul.mubr.bf16.gmra.mrb[72].mxu1 %v8969_v40  ;;  %v3502_v8 = vshll.u32 %v3343_v59, 16  ;;  %5825 = vmatprep.mubr.bf16.mxu0 %v9018_v33  ;;  %v3484_v42 = vrot.slane %v3482_v4, 5  ;;  %v2720_v41 = vor.u32 %v11343_v45, %v11336_v31  ;;  %v2723_v53 = vshll.u32 %v11992_v26, 16  ;;  %v12049_v33 = vpop.f32.mrb[38].mxu0  ;;  %v12052_v4 = vpop.f32.mrb[2].mxu1 }
 0x2bf   : > { %5664 = vmatprep.mubr.bf16.mxu1 %v8986_v25  ;;  %v3490_v35 = vrot.slane %v3488_v62, 5  ;;  %5826 = vmatmul.mubr.bf16.gmra.mrb[108].mxu0 %v9002_v5  ;;  %v3495_v40 = vrot.slane %v3493_v46, 4  ;;  %v3498_v7 = vrot.slane %v3496_v30, 5  ;;  %v2734_v59 = vor.u32 %v11353_v50, %v11345_v6  ;;  %v12054_v62 = vpop.f32.mrb[39].mxu0  ;;  %v10201_v5 = vld [vmem:[#allocation8 + $0x238] sm:$0xff]   ;;  %v12059_v11 = vpop.f32.mrb[3].mxu1 }
 0x2c0   : > { %v3504_v54 = vrot.slane %v3502_v8, 5  ;;  %v3485_v31 = vor.u32 %v3484_v42, %v3481_v16  ;;  %v2721_v45 = vrot.slane %v2720_v41, 4  ;;  %v2725_v26 = vrot.slane %v2723_v53, 5  ;;  %9915 = vmatprep.subr.bf16.mxu1 %v10198_v61  ;;  %v12057_v50 = vld [vmem:[#allocation2 + $0x70] sm:$0xf] }
 0x2c1   : > { %v2737_v25 = vshll.u32 %v12000_v15, 16  ;;  %v3499_v46 = vor.u32 %v3498_v7, %v3495_v40  ;;  %v2735_v30 = vrot.slane %v2734_v59, 4  ;;  %v8847_v8 = vrot.slane %v3085_v39, 9  ;;  %9916 = vmatpush3.bf16.msra.mxu1 %v10198_v61 }
 0x2c2   : > { %v3207_v6 = vrot.slane %v12030_v38, 5  ;;  %v3486_v16 = vrot.slane %v3485_v31, 4  ;;  %v2726_v42 = vsel %vm11099_vm11, %v2721_v45, %v2725_v26  ;;  %v8848_v41 = vrot.slane %v3086_v3, 9  ;;  %v12072_v31 = vld [vmem:[#allocation2 + $0x78] sm:$0xf]  ;;  %9917 = vmatprep.subr.bf16.mxu1 %v10201_v5 }
 0x2c3   : > { %v2739_v15 = vrot.slane %v2737_v25, 5  ;;  %v3500_v53 = vrot.slane %v3499_v46, 4  ;;  %v3211_v40 = vrot.slane %v12039_v34, 5  ;;  %v9003_v39 = vcombine.low %v12009_v28, %v12022_v56  ;;  %v3344_v45 = vld [vmem:[#allocation2 + $0x74] sm:$0x1] }
 0x2c4   : > { %v3208_v14 = vsel %vm11089_vm10, %v8847_v8, %v3207_v6  ;;  %v3491_v7 = vsel %vm11099_vm11, %v3486_v16, %v3490_v35  ;;  %v3507_v3 = vshrl.u32 %v12057_v50, 16  ;;  %v3510_v26 = vshll.u32 %v12057_v50, 16  ;;  %v3345_v56 = vld [vmem:[#allocation2 + $0x7c] sm:$0x1]  ;;  %v12080_v16 = vld [vmem:[#allocation2 + $0x6c] sm:$0x1] }
 0x2c5   : > { %v2740_v59 = vsel %vm11099_vm11, %v2735_v30, %v2739_v15  ;;  %v3505_v25 = vsel %vm11099_vm11, %v3500_v53, %v3504_v54  ;;  %v3212_v28 = vsel %vm11089_vm10, %v8848_v41, %v3211_v40  ;;  %v3516_v61 = vshll.u32 %v3344_v45, 16  ;;  %v12082_v15 = vpop.f32.mrb[4].mxu1  ;;  %v12086_v53 = vld [vmem:[#allocation2 + $0x74] sm:$0x1]  ;;  %v3087_v45 = vld [vmem:[#allocation2 + $0x68] sm:$0xe]  ;;  %9918 = vmatpush3.bf16.msra.mxu1 %v10201_v5 }
 0x2c6   : > { %v8970_v46 = vcombine.low %v2726_v42, %v2740_v59  ;;  %v9019_v35 = vcombine.low %v3491_v7, %v3505_v25  ;;  %v8987_v8 = vcombine.low %v3208_v14, %v3212_v28  ;;  %v3509_v30 = vrot.slane %v3507_v3, 4  ;;  %v12088_v41 = vpop.f32.mrb[5].mxu1  ;;  %v3088_v3 = vld [vmem:[#allocation2 + $0x70] sm:$0xe] }
 0x2c7   : > { %v3512_v6 = vrot.slane %v3510_v26, 5  ;;  %v3518_v32 = vrot.slane %v3516_v61, 5  ;;  %v3521_v19 = vshrl.u32 %v12072_v31, 16  ;;  %v3524_v54 = vshll.u32 %v12072_v31, 16  ;;  %v12095_v26 = vpop.f32.mrb[6].mxu1  ;;  %v12098_v61 = vpop.f32.mrb[40].mxu0 }
 0x2c8   : > { %5665 = vmatmul.mubr.bf16.gmra.mrb[76].mxu1 %v8970_v46  ;;  %v3530_v42 = vshll.u32 %v3345_v56, 16  ;;  %5833 = vmatprep.mubr.bf16.mxu0 %v9019_v35  ;;  %v2748_v40 = vor.u32 %v11378_v23, %v11376_v36  ;;  %v2751_v7 = vshll.u32 %v12030_v38, 16  ;;  %v2762_v59 = vor.u32 %v11395_v10, %v11380_v37  ;;  %v12100_v35 = vpop.f32.mrb[7].mxu1  ;;  %v12102_v37 = vpop.f32.mrb[41].mxu0 }
 0x2c9   : > { %5672 = vmatprep.mubr.bf16.mxu1 %v8987_v8  ;;  %v3513_v14 = vor.u32 %v3512_v6, %v3509_v30  ;;  %5834 = vmatmul.mubr.bf16.gmra.mrb[112].mxu0 %v9003_v39  ;;  %v3523_v25 = vrot.slane %v3521_v19, 4  ;;  %v3526_v46 = vrot.slane %v3524_v54, 5  ;;  %v2765_v56 = vshll.u32 %v12039_v34, 16  ;;  %v12105_v39 = vld [vmem:[#allocation2 + $0x80] sm:$0xf]  ;;  %v12107_v54 = vpop.f32.mrb[42].mxu0 }
 0x2ca   : > { %v3532_v28 = vrot.slane %v3530_v42, 5  ;;  %v2749_v23 = vrot.slane %v2748_v40, 4  ;;  %v2753_v38 = vrot.slane %v2751_v7, 5  ;;  %v2763_v8 = vrot.slane %v2762_v59, 4  ;;  %14937 = vst [vmem:[#allocation20_spill] sm:$0xff] %v12107_v54  ;;  %v12116_v7 = vpop.f32.mrb[43].mxu0 }
 0x2cb   : > { %v3514_v36 = vrot.slane %v3513_v14, 4  ;;  %v3527_v10 = vor.u32 %v3526_v46, %v3523_v25  ;;  %v2767_v30 = vrot.slane %v2765_v56, 5  ;;  %v8849_v6 = vrot.slane %v3087_v45, 9  ;;  %v12114_v40 = vld [vmem:[#allocation2 + $0x88] sm:$0xf]  ;;  %14938 = vst [vmem:[#allocation21_spill] sm:$0xff] %v12116_v7 }
 0x2cc   : > { %v3215_v19 = vrot.slane %v12080_v16, 5  ;;  %v2754_v5 = vsel %vm11099_vm11, %v2749_v23, %v2753_v38  ;;  %v8850_v42 = vrot.slane %v3088_v3, 9  ;;  %v3219_v14 = vrot.slane %v12086_v53, 5  ;;  %v3346_v56 = vld [vmem:[#allocation2 + $0x84] sm:$0x1]  ;;  %v12128_v38 = vpop.f32.mrb[8].mxu1 }
 0x2cd   : > { %v3519_v34 = vsel %vm11099_vm11, %v3514_v36, %v3518_v32  ;;  %v3528_v59 = vrot.slane %v3527_v10, 4  ;;  %v2768_v45 = vsel %vm11099_vm11, %v2763_v8, %v2767_v30  ;;  %v9004_v32 = vcombine.low %v12057_v50, %v12072_v31  ;;  %14939 = vst [vmem:[#allocation22_spill] sm:$0xff] %v12128_v38  ;;  %v3347_v30 = vld [vmem:[#allocation2 + $0x8c] sm:$0x1]  ;;  %v12133_v50 = vpop.f32.mrb[9].mxu1 }
 0x2ce   : > { %v3216_v25 = vsel %vm11089_vm10, %v8849_v6, %v3215_v19  ;;  %v8971_v46 = vcombine.low %v2754_v5, %v2768_v45  ;;  %v3220_v3 = vsel %vm11089_vm10, %v8850_v42, %v3219_v14  ;;  %v3535_v36 = vshrl.u32 %v12105_v39, 16  ;;  %14940 = vst [vmem:[#allocation23_spill] sm:$0xff] %v12133_v50  ;;  %v3089_v45 = vld [vmem:[#allocation2 + $0x78] sm:$0xe]  ;;  %v12136_v7 = vpop.f32.mrb[10].mxu1 }
 0x2cf   : > { %v3538_v23 = vshll.u32 %v12105_v39, 16  ;;  %v3533_v8 = vsel %vm11099_vm11, %v3528_v59, %v3532_v28  ;;  %v8988_v10 = vcombine.low %v3216_v25, %v3220_v3  ;;  %v3544_v6 = vshll.u32 %v3346_v56, 16  ;;  %14941 = vst [vmem:[#allocation24_spill] sm:$0xff] %v12136_v7  ;;  %v12140_v25 = vld [vmem:[#allocation2 + $0x7c] sm:$0x1]  ;;  %v12142_v3 = vpop.f32.mrb[11].mxu1 }
 0x2d0   : > { %v3549_v19 = vshrl.u32 %v12114_v40, 16  ;;  %v9020_v31 = vcombine.low %v3519_v34, %v3533_v8  ;;  %5673 = vmatmul.mubr.bf16.gmra.mrb[80].mxu1 %v8971_v46  ;;  %v3537_v5 = vrot.slane %v3535_v36, 4  ;;  %v3552_v14 = vshll.u32 %v12114_v40, 16  ;;  %14942 = vst [vmem:[#allocation25_spill] sm:$0xff] %v12142_v3  ;;  %v14943_v36 = vld [vmem:[#allocation27_spill] sm:$0xff] }
 0x2d1   : > { %v3540_v42 = vrot.slane %v3538_v23, 5  ;;  %5680 = vmatprep.mubr.bf16.mxu1 %v8988_v10  ;;  %v3546_v38 = vrot.slane %v3544_v6, 5  ;;  %v3558_v28 = vshll.u32 %v3347_v30, 16  ;;  %v2776_v59 = vor.u32 %v11458_v51, %v11454_v48  ;;  %v14944_v23 = vld [vmem:[#allocation28_spill] sm:$0xff] }
 0x2d2   : > { %v3551_v54 = vrot.slane %v3549_v19, 4  ;;  %5841 = vmatprep.mubr.bf16.mxu0 %v9020_v31  ;;  %v3554_v46 = vrot.slane %v3552_v14, 5  ;;  %v2779_v56 = vshll.u32 %v12080_v16, 16  ;;  %v2790_v8 = vor.u32 %v14944_v23, %v14943_v36  ;;  %v12147_v7 = vld [vmem:[#allocation2 + $0x84] sm:$0x1]  ;;  %v12154_v23 = vpop.f32.mrb[44].mxu0 }
 0x2d3   : > { %v3541_v34 = vor.u32 %v3540_v42, %v3537_v5  ;;  %v3090_v10 = vld [vmem:[#allocation2 + $0x80] sm:$0xe]  ;;  %5842 = vmatmul.mubr.bf16.gmra.mrb[116].mxu0 %v9004_v32  ;;  %v3560_v30 = vrot.slane %v3558_v28, 5  ;;  %v2777_v6 = vrot.slane %v2776_v59, 4  ;;  %v2793_v48 = vshll.u32 %v12086_v53, 16  ;;  %v12164_v59 = vpop.f32.mrb[45].mxu0 }
 0x2d4   : > { %v8851_v51 = vrot.slane %v3089_v45, 9  ;;  %v3555_v50 = vor.u32 %v3554_v46, %v3551_v54  ;;  %v2781_v3 = vrot.slane %v2779_v56, 5  ;;  %v2791_v31 = vrot.slane %v2790_v8, 4  ;;  %v12150_v5 = vld [vmem:[#allocation2 + $0x90] sm:$0xf]  ;;  %14945 = vst [vmem:[#allocation26_spill] sm:$0xff] %v12164_v59 }
 0x2d5   : > { %v3542_v19 = vrot.slane %v3541_v34, 4  ;;  %v2795_v42 = vrot.slane %v2793_v48, 5  ;;  %v3223_v16 = vrot.slane %v12140_v25, 5  ;;  %v8852_v14 = vrot.slane %v3090_v10, 9  ;;  %v12162_v45 = vld [vmem:[#allocation2 + $0x98] sm:$0xf] }
 0x2d6   : > { %v3227_v36 = vrot.slane %v12147_v7, 5  ;;  %v3556_v28 = vrot.slane %v3555_v50, 4  ;;  %v2782_v53 = vsel %vm11099_vm11, %v2777_v6, %v2781_v3  ;;  %v9005_v54 = vcombine.low %v12105_v39, %v12114_v40  ;;  %v12173_v56 = vpop.f32.mrb[46].mxu0  ;;  %v3348_v8 = vld [vmem:[#allocation2 + $0x94] sm:$0x1] }
 0x2d7   : > { %v3547_v32 = vsel %vm11099_vm11, %v3542_v19, %v3546_v38  ;;  %v2796_v34 = vsel %vm11099_vm11, %v2791_v31, %v2795_v42  ;;  %v3224_v46 = vsel %vm11089_vm10, %v8851_v51, %v3223_v16  ;;  %v3563_v50 = vshrl.u32 %v12150_v5, 16  ;;  %14946 = vst [vmem:[#allocation27_spill] sm:$0xff] %v12173_v56  ;;  %v3349_v10 = vld [vmem:[#allocation2 + $0x9c] sm:$0x1]  ;;  %v12178_v48 = vpop.f32.mrb[47].mxu0 }
 0x2d8   : > { %v3228_v38 = vsel %vm11089_vm10, %v8852_v14, %v3227_v36  ;;  %v3561_v39 = vsel %vm11099_vm11, %v3556_v28, %v3560_v30  ;;  %v8972_v40 = vcombine.low %v2782_v53, %v2796_v34  ;;  %v3566_v6 = vshll.u32 %v12150_v5, 16  ;;  %14947 = vst [vmem:[#allocation28_spill] sm:$0xff] %v12178_v48  ;;  %v12181_v16 = vld [vmem:[#allocation2 + $0x8c] sm:$0x1]  ;;  %v12186_v53 = vld [vmem:[#allocation2 + $0x94] sm:$0x1] }
 0x2d9   : > { %v8989_v3 = vcombine.low %v3224_v46, %v3228_v38  ;;  %v9021_v19 = vcombine.low %v3547_v32, %v3561_v39  ;;  %v3565_v51 = vrot.slane %v3563_v50, 4  ;;  %v3572_v31 = vshll.u32 %v3348_v8, 16  ;;  %v3091_v34 = vld [vmem:[#allocation2 + $0x88] sm:$0xe]  ;;  %v12191_v56 = vld [vmem:[#allocation2 + $0xb0] sm:$0xf] }
 0x2da   : > { %v3577_v42 = vshrl.u32 %v12162_v45, 16  ;;  %5681 = vmatmul.mubr.bf16.gmra.mrb[84].mxu1 %v8972_v40  ;;  %v3568_v14 = vrot.slane %v3566_v6, 5  ;;  %v3580_v36 = vshll.u32 %v12162_v45, 16  ;;  %v3586_v30 = vshll.u32 %v3349_v10, 16  ;;  %v14948_v50 = vld [vmem:[#allocation29_spill] sm:$0xff] }
 0x2db   : > { %v2804_v28 = vor.u32 %v11486_v44, %v11480_v24  ;;  %5849 = vmatprep.mubr.bf16.mxu0 %v9021_v19  ;;  %5688 = vmatprep.mubr.bf16.mxu1 %v8989_v3  ;;  %v3574_v32 = vrot.slane %v3572_v31, 5  ;;  %v2807_v38 = vshll.u32 %v12140_v25, 16  ;;  %v2818_v39 = vor.u32 %v14948_v50, %v11488_v13  ;;  %v3092_v40 = vld [vmem:[#allocation2 + $0x90] sm:$0xe]  ;;  %v12194_v31 = vpop.f32.mrb[12].mxu1 }
 0x2dc   : > { %v3579_v46 = vrot.slane %v3577_v42, 4  ;;  %5850 = vmatmul.mubr.bf16.gmra.mrb[120].mxu0 %v9005_v54  ;;  %v3569_v8 = vor.u32 %v3568_v14, %v3565_v51  ;;  %v3582_v6 = vrot.slane %v3580_v36, 5  ;;  %v3588_v10 = vrot.slane %v3586_v30, 5  ;;  %v12197_v50 = vpop.f32.mrb[13].mxu1 }
 0x2dd   : > { %v2805_v48 = vrot.slane %v2804_v28, 4  ;;  %v2809_v24 = vrot.slane %v2807_v38, 5  ;;  %v2819_v44 = vrot.slane %v2818_v39, 4  ;;  %v2821_v19 = vshll.u32 %v12147_v7, 16  ;;  %v12204_v7 = vld [vmem:[#allocation2 + $0xb8] sm:$0xf] }
 0x2de   : > { %v8853_v3 = vrot.slane %v3091_v34, 9  ;;  %v3570_v42 = vrot.slane %v3569_v8, 4  ;;  %v3583_v25 = vor.u32 %v3582_v6, %v3579_v46  ;;  %v3231_v59 = vrot.slane %v12181_v16, 5  ;;  %v12206_v30 = vpop.f32.mrb[14].mxu1  ;;  %v3350_v38 = vld [vmem:[#allocation2 + $0xb4] sm:$0x1] }
 0x2df   : > { %v8854_v13 = vrot.slane %v3092_v40, 9  ;;  %v2810_v54 = vsel %vm11099_vm11, %v2805_v48, %v2809_v24  ;;  %v2823_v51 = vrot.slane %v2821_v19, 5  ;;  %v3235_v14 = vrot.slane %v12186_v53, 5  ;;  %14949 = vst [vmem:[#allocation29_spill] sm:$0xff] %v12206_v30  ;;  %v12213_v39 = vpop.f32.mrb[15].mxu1 }
 0x2e0   : > { %v9006_v36 = vcombine.low %v12150_v5, %v12162_v45  ;;  %v3575_v28 = vsel %vm11099_vm11, %v3570_v42, %v3574_v32  ;;  %v3584_v34 = vrot.slane %v3583_v25, 4  ;;  %v3232_v46 = vsel %vm11089_vm10, %v8853_v3, %v3231_v59  ;;  %14950 = vst [vmem:[#allocation57_spill] sm:$0xff] %v12213_v39  ;;  %v3351_v59 = vld [vmem:[#allocation2 + $0xbc] sm:$0x1]  ;;  %v12223_v30 = vld [vmem:[#allocation2 + $0xac] sm:$0x1] }
 0x2e1   : > { %v3591_v48 = vshrl.u32 %v12191_v56, 16  ;;  %v2824_v40 = vsel %vm11099_vm11, %v2819_v44, %v2823_v51  ;;  %v3236_v5 = vsel %vm11089_vm10, %v8854_v13, %v3235_v14  ;;  %v3594_v45 = vshll.u32 %v12191_v56, 16  ;;  %v3093_v44 = vld [vmem:[#allocation2 + $0xa8] sm:$0xe] }
 0x2e2   : > { %v3600_v8 = vshll.u32 %v3350_v38, 16  ;;  %v3589_v32 = vsel %vm11099_vm11, %v3584_v34, %v3588_v10  ;;  %v8973_v6 = vcombine.low %v2810_v54, %v2824_v40  ;;  %v8990_v24 = vcombine.low %v3232_v46, %v3236_v5  ;;  %v12229_v54 = vld [vmem:[#allocation2 + $0xb4] sm:$0x1]  ;;  %v3094_v34 = vld [vmem:[#allocation2 + $0xb0] sm:$0xe] }
 0x2e3   : > { %v3593_v19 = vrot.slane %v3591_v48, 4  ;;  %v9022_v3 = vcombine.low %v3575_v28, %v3589_v32  ;;  %v3596_v42 = vrot.slane %v3594_v45, 5  ;;  %v3605_v39 = vshrl.u32 %v12204_v7, 16  ;;  %v12231_v28 = vpop.f32.mrb[48].mxu0  ;;  %v12236_v5 = vld [vmem:[#allocation2 + $0xc0] sm:$0xf] }
 0x2e4   : > { %v3602_v25 = vrot.slane %v3600_v8, 5  ;;  %5689 = vmatmul.mubr.bf16.gmra.mrb[88].mxu1 %v8973_v6  ;;  %v3608_v13 = vshll.u32 %v12204_v7, 16  ;;  %v3614_v51 = vshll.u32 %v3351_v59, 16  ;;  %v2832_v14 = vor.u32 %v11524_v21, %v11517_v1  ;;  %v12238_v45 = vpop.f32.mrb[49].mxu0 }
 0x2e5   : > { %v2835_v10 = vshll.u32 %v12181_v16, 16  ;;  %5857 = vmatprep.mubr.bf16.mxu0 %v9022_v3  ;;  %5696 = vmatprep.mubr.bf16.mxu1 %v8990_v24  ;;  %v3597_v46 = vor.u32 %v3596_v42, %v3593_v19  ;;  %v3607_v38 = vrot.slane %v3605_v39, 4  ;;  %v2846_v48 = vor.u32 %v11534_v49, %v11526_v9  ;;  %v12240_v32 = vpop.f32.mrb[50].mxu0 }
 0x2e6   : > { %v2849_v40 = vshll.u32 %v12186_v53, 16  ;;  %5858 = vmatmul.mubr.bf16.gmra.mrb[124].mxu0 %v9006_v36  ;;  %v3610_v1 = vrot.slane %v3608_v13, 5  ;;  %v3616_v21 = vrot.slane %v3614_v51, 5  ;;  %v2833_v16 = vrot.slane %v2832_v14, 4  ;;  %v12242_v19 = vpop.f32.mrb[51].mxu0 }
 0x2e7   : > { %v2837_v8 = vrot.slane %v2835_v10, 5  ;;  %v3598_v6 = vrot.slane %v3597_v46, 4  ;;  %v2847_v24 = vrot.slane %v2846_v48, 4  ;;  %v8855_v39 = vrot.slane %v3093_v44, 9  ;;  %v12247_v36 = vld [vmem:[#allocation2 + $0xc8] sm:$0xf] }
 0x2e8   : > { %v2851_v59 = vrot.slane %v2849_v40, 5  ;;  %v3611_v9 = vor.u32 %v3610_v1, %v3607_v38  ;;  %v3239_v53 = vrot.slane %v12223_v30, 5  ;;  %v8856_v3 = vrot.slane %v3094_v34, 9  ;;  %v3352_v38 = vld [vmem:[#allocation2 + $0xc4] sm:$0x1] }
 0x2e9   : > { %v2838_v49 = vsel %vm11099_vm11, %v2833_v16, %v2837_v8  ;;  %v3603_v42 = vsel %vm11099_vm11, %v3598_v6, %v3602_v25  ;;  %v3243_v51 = vrot.slane %v12229_v54, 5  ;;  %v9007_v44 = vcombine.low %v12191_v56, %v12204_v7  ;;  %v3095_v6 = vld [vmem:[#allocation2 + $0xb8] sm:$0xe] }
 0x2ea   : > { %v2852_v13 = vsel %vm11099_vm11, %v2847_v24, %v2851_v59  ;;  %v3612_v14 = vrot.slane %v3611_v9, 4  ;;  %v3240_v46 = vsel %vm11089_vm10, %v8855_v39, %v3239_v53  ;;  %v3619_v34 = vshrl.u32 %v12236_v5, 16  ;;  %v3353_v59 = vld [vmem:[#allocation2 + $0xcc] sm:$0x1] }
 0x2eb   : > { %v8974_v10 = vcombine.low %v2838_v49, %v2852_v13  ;;  %v3244_v48 = vsel %vm11089_vm10, %v8856_v3, %v3243_v51  ;;  %v3622_v25 = vshll.u32 %v12236_v5, 16  ;;  %v3628_v40 = vshll.u32 %v3352_v38, 16  ;;  %v12274_v38 = vld [vmem:[#allocation2 + $0xc4] sm:$0x1] }
 0x2ec   : > { %v3633_v1 = vshrl.u32 %v12247_v36, 16  ;;  %v3617_v16 = vsel %vm11099_vm11, %v3612_v14, %v3616_v21  ;;  %v8991_v56 = vcombine.low %v3240_v46, %v3244_v48  ;;  %v3621_v7 = vrot.slane %v3619_v34, 4  ;;  %v12269_v21 = vld [vmem:[#allocation2 + $0xbc] sm:$0x1]  ;;  %v3096_v34 = vld [vmem:[#allocation2 + $0xc0] sm:$0xe] }
 0x2ed   : > { %5697 = vmatmul.mubr.bf16.gmra.mrb[92].mxu1 %v8974_v10  ;;  %v3636_v8 = vshll.u32 %v12247_v36, 16  ;;  %v9023_v24 = vcombine.low %v3603_v42, %v3617_v16  ;;  %v3624_v39 = vrot.slane %v3622_v25, 5  ;;  %v3630_v9 = vrot.slane %v3628_v40, 5  ;;  %v14951_v10 = vld [vmem:[#allocation30_spill] sm:$0xff] }
 0x2ee   : > { %v3635_v49 = vrot.slane %v3633_v1, 4  ;;  %5704 = vmatprep.mubr.bf16.mxu1 %v8991_v56  ;;  %v3642_v3 = vshll.u32 %v3353_v59, 16  ;;  %v2860_v13 = vor.u32 %v11571_v20, %v11569_v12  ;;  %v2863_v51 = vshll.u32 %v12223_v30, 16 }
 0x2ef   : > { %v3638_v53 = vrot.slane %v3636_v8, 5  ;;  %5865 = vmatprep.mubr.bf16.mxu0 %v9023_v24  ;;  %v3625_v14 = vor.u32 %v3624_v39, %v3621_v7  ;;  %v2874_v46 = vor.u32 %v14951_v10, %v11573_v52  ;;  %v2877_v42 = vshll.u32 %v12229_v54, 16  ;;  %v12277_v7 = vld [vmem:[#allocation2 + $0xd0] sm:$0xf]  ;;  %v3355_v10 = vld [vmem:[#allocation2 + $0xdc] sm:$0x1] }
 0x2f0   : > { %v8857_v48 = vrot.slane %v3095_v6, 9  ;;  %5866 = vmatmul.mubr.bf16.gmra.mrb[128].mxu0 %v9007_v44  ;;  %v3644_v40 = vrot.slane %v3642_v3, 5  ;;  %v2861_v1 = vrot.slane %v2860_v13, 4  ;;  %v2865_v12 = vrot.slane %v2863_v51, 5  ;;  %v12282_v6 = vpop.f32.mrb[16].mxu1 }
 0x2f1   : > { %v3639_v25 = vor.u32 %v3638_v53, %v3635_v49  ;;  %v3626_v20 = vrot.slane %v3625_v14, 4  ;;  %v2875_v30 = vrot.slane %v2874_v46, 4  ;;  %v2879_v16 = vrot.slane %v2877_v42, 5  ;;  %v12292_v53 = vld [vmem:[#allocation2 + $0xd8] sm:$0xf]  ;;  %v12294_v3 = vpop.f32.mrb[17].mxu1 }
 0x2f2   : > { %v3247_v56 = vrot.slane %v12269_v21, 5  ;;  %v2866_v52 = vsel %vm11099_vm11, %v2861_v1, %v2865_v12  ;;  %v8858_v54 = vrot.slane %v3096_v34, 9  ;;  %v3251_v24 = vrot.slane %v12274_v38, 5  ;;  %v3354_v14 = vld [vmem:[#allocation2 + $0xd4] sm:$0x1]  ;;  %v12301_v42 = vpop.f32.mrb[18].mxu1 }
 0x2f3   : > { %v3640_v8 = vrot.slane %v3639_v25, 4  ;;  %v3631_v44 = vsel %vm11099_vm11, %v3626_v20, %v3630_v9  ;;  %v2880_v59 = vsel %vm11099_vm11, %v2875_v30, %v2879_v16  ;;  %v9008_v49 = vcombine.low %v12236_v5, %v12247_v36  ;;  %14952 = vst [vmem:[#allocation30_spill] sm:$0xff] %v12301_v42  ;;  %v12304_v25 = vld [vmem:[#allocation2 + $0xcc] sm:$0x1]  ;;  %v12306_v1 = vpop.f32.mrb[52].mxu0 }
 0x2f4   : > { %v3248_v39 = vsel %vm11089_vm10, %v8857_v48, %v3247_v56  ;;  %v8975_v51 = vcombine.low %v2866_v52, %v2880_v59  ;;  %v3252_v9 = vsel %vm11089_vm10, %v8858_v54, %v3251_v24  ;;  %v3647_v46 = vshrl.u32 %v12277_v7, 16  ;;  %v12312_v56 = vpop.f32.mrb[53].mxu0  ;;  %v14955_v54 = vld [vmem:[#allocation31_spill] sm:$0xff]  ;;  %v14956_v24 = vld [vmem:[#allocation32_spill] sm:$0xff]  ;;  %v3098_v42 = vld [vmem:[#allocation2 + $0xd0] sm:$0xe] }
 0x2f5   : > { %v3645_v13 = vsel %vm11099_vm11, %v3640_v8, %v3644_v40  ;;  %v8992_v48 = vcombine.low %v3248_v39, %v3252_v9  ;;  %v3650_v5 = vshll.u32 %v12277_v7, 16  ;;  %v3656_v36 = vshll.u32 %v3354_v14, 16  ;;  %v12308_v40 = vpop.f32.mrb[19].mxu1  ;;  %14954 = vst [vmem:[#allocation59_spill] sm:$0xff] %v12312_v56  ;;  %v3097_v39 = vld [vmem:[#allocation2 + $0xc8] sm:$0xe] }
 0x2f6   : > { %v9024_v34 = vcombine.low %v3631_v44, %v3645_v13  ;;  %14953 = vst [vmem:[#allocation58_spill] sm:$0xff] %v12308_v40  ;;  %5705 = vmatmul.mubr.bf16.gmra.mrb[96].mxu1 %v8975_v51  ;;  %v3649_v12 = vrot.slane %v3647_v46, 4  ;;  %v3661_v20 = vshrl.u32 %v12292_v53, 16  ;;  %v3664_v30 = vshll.u32 %v12292_v53, 16  ;;  %v12317_v13 = vpop.f32.mrb[54].mxu0  ;;  %v14958_v46 = vld [vmem:[#allocation33_spill] sm:$0xff] }
 0x2f7   : > { %v3670_v16 = vshll.u32 %v3355_v10, 16  ;;  %5712 = vmatprep.mubr.bf16.mxu1 %v8992_v48  ;;  %v3652_v8 = vrot.slane %v3650_v5, 5  ;;  %v3658_v52 = vrot.slane %v3656_v36, 5  ;;  %v2888_v44 = vor.u32 %v14956_v24, %v14955_v54  ;;  %14957 = vst [vmem:[#allocation31_spill] sm:$0xff] %v12317_v13  ;;  %v14959_v10 = vld [vmem:[#allocation34_spill] sm:$0xff] }
 0x2f8   : > { %5873 = vmatprep.mubr.bf16.mxu0 %v9024_v34  ;;  %v2891_v59 = vshll.u32 %v12269_v21, 16  ;;  %v3663_v51 = vrot.slane %v3661_v20, 4  ;;  %v3666_v9 = vrot.slane %v3664_v30, 5  ;;  %v2902_v40 = vor.u32 %v14959_v10, %v14958_v46  ;;  %v12321_v34 = vpop.f32.mrb[55].mxu0  ;;  %v12324_v24 = vld [vmem:[#allocation2 + $0xd4] sm:$0x1] }
 0x2f9   : > { %5874 = vmatmul.mubr.bf16.gmra.mrb[132].mxu0 %v9008_v49  ;;  %v3672_v14 = vrot.slane %v3670_v16, 5  ;;  %14960 = vst [vmem:[#allocation32_spill] sm:$0xff] %v12321_v34  ;;  %v3653_v48 = vor.u32 %v3652_v8, %v3649_v12  ;;  %v2889_v5 = vrot.slane %v2888_v44, 4  ;;  %v2905_v54 = vshll.u32 %v12274_v38, 16  ;;  %v12327_v20 = vld [vmem:[#allocation2 + $0xe0] sm:$0xf] }
 0x2fa   : > { %v2893_v36 = vrot.slane %v2891_v59, 5  ;;  %v3667_v21 = vor.u32 %v3666_v9, %v3663_v51  ;;  %v2903_v56 = vrot.slane %v2902_v40, 4  ;;  %v8859_v13 = vrot.slane %v3097_v39, 9  ;;  %v12329_v30 = vpop.f32.mrb[20].mxu1  ;;  %v12340_v51 = vld [vmem:[#allocation2 + $0xe8] sm:$0xf] }
 0x2fb   : > { %v3255_v49 = vrot.slane %v12304_v25, 5  ;;  %14961 = vst [vmem:[#allocation33_spill] sm:$0xff] %v12329_v30  ;;  %v3654_v16 = vrot.slane %v3653_v48, 4  ;;  %v2907_v12 = vrot.slane %v2905_v54, 5  ;;  %v8860_v8 = vrot.slane %v3098_v42, 9  ;;  %v12333_v44 = vpop.f32.mrb[21].mxu1 }
 0x2fc   : > { %v2894_v46 = vsel %vm11099_vm11, %v2889_v5, %v2893_v36  ;;  %14962 = vst [vmem:[#allocation34_spill] sm:$0xff] %v12333_v44  ;;  %v3668_v38 = vrot.slane %v3667_v21, 4  ;;  %v3259_v40 = vrot.slane %v12324_v24, 5  ;;  %v9009_v39 = vcombine.low %v12277_v7, %v12292_v53  ;;  %v12342_v9 = vpop.f32.mrb[22].mxu1  ;;  %v3356_v48 = vld [vmem:[#allocation2 + $0xe4] sm:$0x1] }
 0x2fd   : > { %v3256_v59 = vsel %vm11089_vm10, %v8859_v13, %v3255_v49  ;;  %14963 = vst [vmem:[#allocation60_spill] sm:$0xff] %v12342_v9  ;;  %v3659_v10 = vsel %vm11099_vm11, %v3654_v16, %v3658_v52  ;;  %v2908_v42 = vsel %vm11099_vm11, %v2903_v56, %v2907_v12  ;;  %v3675_v5 = vshrl.u32 %v12327_v20, 16  ;;  %v12350_v36 = vpop.f32.mrb[23].mxu1  ;;  %v3357_v16 = vld [vmem:[#allocation2 + $0xec] sm:$0x1]  ;;  %v12358_v34 = vpop.f32.mrb[56].mxu0 }
 0x2fe   : > { %v3678_v13 = vshll.u32 %v12327_v20, 16  ;;  %14964 = vst [vmem:[#allocation61_spill] sm:$0xff] %v12350_v36  ;;  %v3673_v7 = vsel %vm11099_vm11, %v3668_v38, %v3672_v14  ;;  %v8976_v53 = vcombine.low %v2894_v46, %v2908_v42  ;;  %v3260_v54 = vsel %vm11089_vm10, %v8860_v8, %v3259_v40  ;;  %v3099_v40 = vld [vmem:[#allocation2 + $0xd8] sm:$0xe] }
 0x2ff   : > { %v3684_v21 = vshll.u32 %v3356_v48, 16  ;;  %v9025_v49 = vcombine.low %v3659_v10, %v3673_v7  ;;  %v8993_v52 = vcombine.low %v3256_v59, %v3260_v54  ;;  %v3677_v9 = vrot.slane %v3675_v5, 4  ;;  %v12369_v59 = vld [vmem:[#allocation2 + $0xdc] sm:$0x1]  ;;  %v12371_v10 = vpop.f32.mrb[57].mxu0 }
 0x300   : > { %v3680_v56 = vrot.slane %v3678_v13, 5  ;;  %5713 = vmatmul.mubr.bf16.gmra.mrb[100].mxu1 %v8976_v53  ;;  %v3689_v44 = vshrl.u32 %v12340_v51, 16  ;;  %v3692_v30 = vshll.u32 %v12340_v51, 16  ;;  %v3698_v36 = vshll.u32 %v3357_v16, 16  ;;  %v12380_v53 = vld [vmem:[#allocation2 + $0xe4] sm:$0x1] }
 0x301   : > { %v3686_v12 = vrot.slane %v3684_v21, 5  ;;  %5881 = vmatprep.mubr.bf16.mxu0 %v9025_v49  ;;  %5720 = vmatprep.mubr.bf16.mxu1 %v8993_v52  ;;  %v12362_v46 = vadd.f32 %v11994_v2, %v11986_v57  ;;  %v12366_v8 = vadd.f32 %v12002_v18, %v11996_v63  ;;  %v2919_v38 = vshll.u32 %v12304_v25, 16  ;;  %v3100_v57 = vld [vmem:[#allocation2 + $0xe0] sm:$0xe]  ;;  %v12375_v2 = vpop.f32.mrb[58].mxu0 }
 0x302   : > { %v3681_v14 = vor.u32 %v3680_v56, %v3677_v9  ;;  %5882 = vmatmul.mubr.bf16.gmra.mrb[136].mxu0 %v9009_v39  ;;  %v3691_v42 = vrot.slane %v3689_v44, 4  ;;  %v3694_v48 = vrot.slane %v3692_v30, 5  ;;  %v3700_v5 = vrot.slane %v3698_v36, 5  ;;  %v14965_v18 = vld [vmem:[#allocation35_spill] sm:$0xff]  ;;  %v12382_v54 = vpop.f32.mrb[59].mxu0 }
 0x303   : > { %v2916_v9 = vor.u32 %v11711_v27, %v11709_v47  ;;  %v2921_v63 = vrot.slane %v2919_v38, 5  ;;  %v2930_v25 = vor.u32 %v14965_v18, %v11713_v43  ;;  %v2933_v7 = vshll.u32 %v12324_v24, 16  ;;  %v12385_v47 = vld [vmem:[#allocation2 + $0x100] sm:$0xf]  ;;  %v12389_v43 = vpop.f32.mrb[24].mxu1 }
 0x304   : > { %v3682_v13 = vrot.slane %v3681_v14, 4  ;;  %v3695_v44 = vor.u32 %v3694_v48, %v3691_v42  ;;  %v8861_v39 = vrot.slane %v3099_v40, 9  ;;  %v3263_v36 = vrot.slane %v12369_v59, 5  ;;  %v12396_v38 = vld [vmem:[#allocation2 + $0x108] sm:$0xf]  ;;  %v12398_v40 = vpop.f32.mrb[25].mxu1 }
 0x305   : > { %v2917_v30 = vrot.slane %v2916_v9, 4  ;;  %v2931_v21 = vrot.slane %v2930_v25, 4  ;;  %v2935_v49 = vrot.slane %v2933_v7, 5  ;;  %v8862_v52 = vrot.slane %v3100_v57, 9  ;;  %v12404_v48 = vld [vmem:[#allocation2 + $0x104] sm:$0x1] }
 0x306   : > { %v3687_v27 = vsel %vm11099_vm11, %v3682_v13, %v3686_v12  ;;  %v3696_v24 = vrot.slane %v3695_v44, 4  ;;  %v3264_v56 = vsel %vm11089_vm10, %v8861_v39, %v3263_v36  ;;  %v3267_v14 = vrot.slane %v12380_v53, 5  ;;  %14966 = vst [vmem:[#allocation35_spill] sm:$0xff] %v12404_v48  ;;  %v12408_v13 = vpop.f32.mrb[26].mxu1 }
 0x307   : > { %v2922_v16 = vsel %vm11099_vm11, %v2917_v30, %v2921_v63  ;;  %v2936_v12 = vsel %vm11099_vm11, %v2931_v21, %v2935_v49  ;;  %v9010_v42 = vcombine.low %v12327_v20, %v12340_v51  ;;  %v3703_v9 = vshrl.u32 %v12385_v47, 16  ;;  %v12415_v44 = vpop.f32.mrb[27].mxu1  ;;  %v12417_v30 = vld [vmem:[#allocation2 + $0x10c] sm:$0x1] }
 0x308   : > { %v3706_v57 = vshll.u32 %v12385_v47, 16  ;;  %v3701_v63 = vsel %vm11099_vm11, %v3696_v24, %v3700_v5  ;;  %v8977_v18 = vcombine.low %v2922_v16, %v2936_v12  ;;  %v3268_v25 = vsel %vm11089_vm10, %v8862_v52, %v3267_v14  ;;  %14967 = vst [vmem:[#allocation62_spill] sm:$0xff] %v12417_v30  ;;  %v12422_v16 = vld [vmem:[#allocation2 + $0xfc] sm:$0x1]  ;;  %v12433_v12 = vld [vmem:[#allocation2 + $0x104] sm:$0x1] }
 0x309   : > { %v3712_v7 = vshll.u32 %v12404_v48, 16  ;;  %v9026_v20 = vcombine.low %v3687_v27, %v3701_v63  ;;  %v8994_v51 = vcombine.low %v3264_v56, %v3268_v25  ;;  %v3705_v39 = vrot.slane %v3703_v9, 4  ;;  %v3101_v9 = vld [vmem:[#allocation2 + $0xf8] sm:$0xe] }
 0x30a   : > { %v3708_v36 = vrot.slane %v3706_v57, 5  ;;  %5721 = vmatmul.mubr.bf16.gmra.mrb[104].mxu1 %v8977_v18  ;;  %v3717_v49 = vshrl.u32 %v12396_v38, 16  ;;  %v3720_v5 = vshll.u32 %v12396_v38, 16  ;;  %v3726_v24 = vshll.u32 %v12417_v30, 16  ;;  %v10205_v30 = vld [vmem:[#allocation11 + $0x4] ss:$16 sps:$4 sm:$0xff]  }
 0x30b   : > { %v3714_v21 = vrot.slane %v3712_v7, 5  ;;  %5889 = vmatprep.mubr.bf16.mxu0 %v9026_v20  ;;  %5728 = vmatprep.mubr.bf16.mxu1 %v8994_v51  ;;  %v12426_v27 = vadd.f32 %v12047_v29, %v12041_v22  ;;  %v12430_v56 = vadd.f32 %v12043_v17, %v12034_v60  ;;  %v2947_v14 = vshll.u32 %v12369_v59, 16  ;;  %v3102_v7 = vld [vmem:[#allocation2 + $0x100] sm:$0xe]  ;;  %v12439_v22 = vpop.f32.mrb[60].mxu0 }
 0x30c   : > { %v3709_v52 = vor.u32 %v3708_v36, %v3705_v39  ;;  %5890 = vmatmul.mubr.bf16.gmra.mrb[140].mxu0 %v9010_v42  ;;  %v3719_v57 = vrot.slane %v3717_v49, 4  ;;  %v3722_v63 = vrot.slane %v3720_v5, 5  ;;  %v3728_v18 = vrot.slane %v3726_v24, 5  ;;  %v14970_v17 = vld [vmem:[#allocation36_spill] sm:$0xff]  ;;  %v12447_v42 = vld [vmem:[#allocation2 + $0x110] sm:$0xf]  ;;  %6409 = vmatprep.subr.bf16.mxu0 %v10205_v30 }
 0x30d   : > { %14968 = vst [vmem:[#allocation63_spill] sm:$0xff] %v12430_v56  ;;  %v12437_v25 = vadd.f32 %v12059_v11, %v12052_v4  ;;  %v12443_v60 = vadd.f32 %v12054_v62, %v12049_v33  ;;  %v2944_v59 = vor.u32 %v14970_v17, %v11763_v55  ;;  %v2949_v20 = vrot.slane %v2947_v14, 5  ;;  %v12449_v51 = vpop.f32.mrb[61].mxu0  ;;  %v14971_v36 = vld [vmem:[#allocation37_spill] sm:$0xff]  ;;  %v14972_v4 = vld [vmem:[#allocation38_spill] sm:$0xff] }
 0x30e   : > { %v3710_v29 = vrot.slane %v3709_v52, 4  ;;  %v3723_v39 = vor.u32 %v3722_v63, %v3719_v57  ;;  %v2958_v11 = vor.u32 %v14972_v4, %v14971_v36  ;;  %v2961_v49 = vshll.u32 %v12380_v53, 16  ;;  %v12454_v24 = vpop.f32.mrb[62].mxu0  ;;  %v10203_v52 = vld [vmem:[#allocation11] ss:$16 sps:$4 sm:$0xff]  }
 0x30f   : > { %14969 = vst [vmem:[#allocation64_spill] sm:$0xff] %v12443_v60  ;;  %v8863_v5 = vrot.slane %v3101_v9, 9  ;;  %v2945_v62 = vrot.slane %v2944_v59, 4  ;;  %v3271_v55 = vrot.slane %v12422_v16, 5  ;;  %v8864_v14 = vrot.slane %v3102_v7, 9  ;;  %v12459_v17 = vpop.f32.mrb[63].mxu0  ;;  %6410 = vmatpush1.bf16.msra.mxu0 %v10203_v52 }
 0x310   : > { %v3715_v33 = vsel %vm11099_vm11, %v3710_v29, %v3714_v21  ;;  %v3724_v57 = vrot.slane %v3723_v39, 4  ;;  %v2959_v63 = vrot.slane %v2958_v11, 4  ;;  %v2963_v48 = vrot.slane %v2961_v49, 5  ;;  %v12468_v29 = vld [vmem:[#allocation2 + $0x118] sm:$0xf] }
 0x311   : > { %v3275_v36 = vrot.slane %v12433_v12, 5  ;;  %v2950_v53 = vsel %vm11099_vm11, %v2945_v62, %v2949_v20  ;;  %v3272_v9 = vsel %vm11089_vm10, %v8863_v5, %v3271_v55  ;;  %v9011_v21 = vcombine.low %v12385_v47, %v12396_v38  ;;  %v12478_v38 = vld [vmem:[#allocation2 + $0x114] sm:$0x1]  ;;  %v12480_v62 = vld [vmem:[#allocation2 + $0x11c] sm:$0x1] }
 0x312   : > { %v3731_v7 = vshrl.u32 %v12447_v42, 16  ;;  %v3729_v59 = vsel %vm11099_vm11, %v3724_v57, %v3728_v18  ;;  %v2964_v39 = vsel %vm11099_vm11, %v2959_v63, %v2963_v48  ;;  %v3734_v4 = vshll.u32 %v12447_v42, 16  ;;  %14973 = vst [vmem:[#allocation36_spill] sm:$0xff] %v12478_v38  ;;  %14974 = vst [vmem:[#allocation37_spill] sm:$0xff] %v12480_v62  ;;  %v12498_v63 = vld [vmem:[#allocation2 + $0x10c] sm:$0x1] }
 0x313   : > { %v3276_v20 = vsel %vm11089_vm10, %v8864_v14, %v3275_v36  ;;  %v9027_v11 = vcombine.low %v3715_v33, %v3729_v59  ;;  %v8978_v49 = vcombine.low %v2950_v53, %v2964_v39  ;;  %v3740_v18 = vshll.u32 %v12478_v38, 16  ;;  %v3103_v59 = vld [vmem:[#allocation2 + $0x108] sm:$0xe] }
 0x314   : > { %v8995_v47 = vcombine.low %v3272_v9, %v3276_v20  ;;  %v3733_v5 = vrot.slane %v3731_v7, 4  ;;  %v3736_v30 = vrot.slane %v3734_v4, 5  ;;  %v3745_v55 = vshrl.u32 %v12468_v29, 16 }
 0x315   : > { %v3748_v48 = vshll.u32 %v12468_v29, 16  ;;  %5897 = vmatprep.mubr.bf16.mxu0 %v9027_v11  ;;  %5729 = vmatmul.mubr.bf16.gmra.mrb[108].mxu1 %v8978_v49  ;;  %v3754_v14 = vshll.u32 %v12480_v62, 16  ;;  %v12488_v52 = vadd.f32 %v12088_v41, %v12082_v15  ;;  %v12492_v33 = vadd.f32 %v12102_v37, %v12098_v61  ;;  %v14977_v15 = vld [vmem:[#allocation20_spill] sm:$0xff]  ;;  %v14978_v41 = vld [vmem:[#allocation21_spill] sm:$0xff]  ;;  %v14980_v61 = vld [vmem:[#allocation39_spill] sm:$0xff] }
 0x316   : > { %v12496_v57 = vadd.f32 %v12100_v35, %v12095_v26  ;;  %5736 = vmatprep.mubr.bf16.mxu1 %v8995_v47  ;;  %5898 = vmatmul.mubr.bf16.gmra.mrb[144].mxu0 %v9011_v21  ;;  %v3737_v36 = vor.u32 %v3736_v30, %v3733_v5  ;;  %v3742_v53 = vrot.slane %v3740_v18, 5  ;;  %v3747_v9 = vrot.slane %v3745_v55, 4  ;;  %v14981_v37 = vld [vmem:[#allocation40_spill] sm:$0xff]  ;;  %v14982_v49 = vld [vmem:[#allocation41_spill] sm:$0xff]  ;;  %v14983_v47 = vld [vmem:[#allocation42_spill] sm:$0xff] }
 0x317   : > { %14975 = vst [vmem:[#allocation38_spill] sm:$0xff] %v12492_v33  ;;  %v3750_v7 = vrot.slane %v3748_v48, 5  ;;  %v3756_v39 = vrot.slane %v3754_v14, 5  ;;  %v12502_v20 = vadd.f32 %v14978_v41, %v14977_v15  ;;  %v2972_v4 = vor.u32 %v14981_v37, %v14980_v61  ;;  %v12510_v30 = vld [vmem:[#allocation2 + $0x114] sm:$0x1] }
 0x318   : > { %14976 = vst [vmem:[#allocation65_spill] sm:$0xff] %v12496_v57  ;;  %v2975_v26 = vshll.u32 %v12422_v16, 16  ;;  %v3738_v35 = vrot.slane %v3737_v36, 4  ;;  %v2986_v21 = vor.u32 %v14983_v47, %v14982_v49  ;;  %v2989_v5 = vshll.u32 %v12433_v12, 16  ;;  %v3104_v18 = vld [vmem:[#allocation2 + $0x110] sm:$0xe] }
 0x319   : > { %14979 = vst [vmem:[#allocation20_spill] sm:$0xff] %v12502_v20  ;;  %v3751_v11 = vor.u32 %v3750_v7, %v3747_v9  ;;  %v2973_v55 = vrot.slane %v2972_v4, 4  ;;  %v8865_v14 = vrot.slane %v3103_v59, 9  ;;  %v3279_v15 = vrot.slane %v12498_v63, 5  ;;  %v12513_v41 = vld [vmem:[#allocation2 + $0x120] sm:$0xf] }
 0x31a   : > { %v2977_v48 = vrot.slane %v2975_v26, 5  ;;  %v3743_v16 = vsel %vm11099_vm11, %v3738_v35, %v3742_v53  ;;  %v2987_v9 = vrot.slane %v2986_v21, 4  ;;  %v2991_v7 = vrot.slane %v2989_v5, 5  ;;  %v12522_v59 = vld [vmem:[#allocation2 + $0x128] sm:$0xf]  ;;  %v12524_v26 = vpop.f32.mrb[28].mxu1 }
 0x31b   : > { %v3752_v36 = vrot.slane %v3751_v11, 4  ;;  %v3280_v12 = vsel %vm11089_vm10, %v8865_v14, %v3279_v15  ;;  %v8866_v37 = vrot.slane %v3104_v18, 9  ;;  %v3283_v4 = vrot.slane %v12510_v30, 5  ;;  %v12533_v47 = vpop.f32.mrb[29].mxu1  ;;  %v14987_v62 = vld [vmem:[#allocation26_spill] sm:$0xff] }
 0x31c   : > { %v2978_v61 = vsel %vm11099_vm11, %v2973_v55, %v2977_v48  ;;  %v2992_v53 = vsel %vm11099_vm11, %v2987_v9, %v2991_v7  ;;  %v9012_v35 = vcombine.low %v12447_v42, %v12468_v29  ;;  %v3759_v11 = vshrl.u32 %v12513_v41, 16  ;;  %v12537_v55 = vld [vmem:[#allocation2 + $0x124] sm:$0x1]  ;;  %v12539_v48 = vld [vmem:[#allocation2 + $0x12c] sm:$0x1]  ;;  %v12542_v14 = vpop.f32.mrb[30].mxu1 }
 0x31d   : > { %v3757_v49 = vsel %vm11099_vm11, %v3752_v36, %v3756_v39  ;;  %v8979_v5 = vcombine.low %v2978_v61, %v2992_v53  ;;  %v3284_v18 = vsel %vm11089_vm10, %v8866_v37, %v3283_v4  ;;  %v3762_v39 = vshll.u32 %v12513_v41, 16  ;;  %v12546_v9 = vld [vmem:[#allocation2 + $0x11c] sm:$0x1]  ;;  %v14984_v4 = vld [vmem:[#allocation22_spill] sm:$0xff] }
 0x31e   : > { %v9028_v21 = vcombine.low %v3743_v16, %v3757_v49  ;;  %v8996_v15 = vcombine.low %v3280_v12, %v3284_v18  ;;  %v3761_v36 = vrot.slane %v3759_v11, 4  ;;  %v3768_v42 = vshll.u32 %v12537_v55, 16  ;;  %v12548_v16 = vpop.f32.mrb[31].mxu1  ;;  %v14985_v49 = vld [vmem:[#allocation23_spill] sm:$0xff]  ;;  %v10206_v20 = vld [vmem:[#allocation11 + $0x20] ss:$16 sps:$4 sm:$0xff]  }
 0x31f   : > { %v3773_v29 = vshrl.u32 %v12522_v59, 16  ;;  %5737 = vmatmul.mubr.bf16.gmra.mrb[112].mxu1 %v8979_v5  ;;  %v3764_v7 = vrot.slane %v3762_v39, 5  ;;  %v3776_v61 = vshll.u32 %v12522_v59, 16  ;;  %v3782_v37 = vshll.u32 %v12539_v48, 16  ;;  %v3105_v12 = vld [vmem:[#allocation2 + $0x118] sm:$0xe] }
 0x320   : > { %5905 = vmatprep.mubr.bf16.mxu0 %v9028_v21  ;;  %v12554_v53 = vadd.f32 %v14985_v49, %v14984_v4  ;;  %5744 = vmatprep.mubr.bf16.mxu1 %v8996_v15  ;;  %v3770_v11 = vrot.slane %v3768_v42, 5  ;;  %v12558_v38 = vadd.f32 %v14987_v62, %v12154_v23  ;;  %v14989_v21 = vld [vmem:[#allocation24_spill] sm:$0xff]  ;;  %v14990_v5 = vld [vmem:[#allocation25_spill] sm:$0xff]  ;;  %v14992_v4 = vld [vmem:[#allocation27_spill] sm:$0xff]  ;;  %v12721_v0 = vadd.f32 %v12398_v40, %v12389_v43 }
 0x321   : > { %5906 = vmatmul.mubr.bf16.gmra.mrb[148].mxu0 %v9012_v35  ;;  %v3775_v18 = vrot.slane %v3773_v29, 4  ;;  %v12562_v39 = vadd.f32 %v14990_v5, %v14989_v21  ;;  %v10208_v33 = vld [vmem:[#allocation11 + $0x24] ss:$16 sps:$4 sm:$0xff]   ;;  %v3765_v60 = vor.u32 %v3764_v7, %v3761_v36  ;;  %v3778_v57 = vrot.slane %v3776_v61, 5  ;;  %v14995_v35 = vld [vmem:[#allocation43_spill] sm:$0xff]  ;;  %v14997_v23 = vld [vmem:[#allocation45_spill] sm:$0xff] }
 0x322   : > { %14986 = vst [vmem:[#allocation21_spill] sm:$0xff] %v12554_v53  ;;  %14988 = vst [vmem:[#allocation39_spill] sm:$0xff] %v12558_v38  ;;  %v3784_v56 = vrot.slane %v3782_v37, 5  ;;  %v14993_v49 = vld [vmem:[#allocation28_spill] sm:$0xff]  ;;  %v3003_v29 = vshll.u32 %v12498_v63, 16  ;;  %v14998_v62 = vld [vmem:[#allocation46_spill] sm:$0xff]  ;;  %6411 = vmatprep.subr.bf16.mxu0 %v10208_v33 }
 0x323   : > { %14991 = vst [vmem:[#allocation40_spill] sm:$0xff] %v12562_v39  ;;  %v12566_v53 = vadd.f32 %v14993_v49, %v14992_v4  ;;  %v14996_v15 = vld [vmem:[#allocation44_spill] sm:$0xff]  ;;  %v3014_v38 = vor.u32 %v14998_v62, %v14997_v23  ;;  %v3017_v21 = vshll.u32 %v12510_v30, 16  ;;  %v3766_v39 = vrot.slane %v3765_v60, 4  ;;  %6412 = vmatpush1.bf16.msra.mxu0 %v10206_v20  ;;  %v12577_v63 = vld [vmem:[#allocation2 + $0x130] sm:$0xf] }
 0x324   : > { %v3000_v42 = vor.u32 %v14996_v15, %v14995_v35  ;;  %v3106_v5 = vld [vmem:[#allocation2 + $0x120] sm:$0xe]  ;;  %v3779_v36 = vor.u32 %v3778_v57, %v3775_v18  ;;  %v12574_v7 = vld [vmem:[#allocation2 + $0x124] sm:$0x1]  ;;  %v8867_v61 = vrot.slane %v3105_v12, 9  ;;  %v3287_v37 = vrot.slane %v12546_v9, 5 }
 0x325   : > { %14994 = vst [vmem:[#allocation41_spill] sm:$0xff] %v12566_v53  ;;  %v3005_v49 = vrot.slane %v3003_v29, 5  ;;  %v3015_v35 = vrot.slane %v3014_v38, 4  ;;  %v3019_v15 = vrot.slane %v3017_v21, 5  ;;  %v3771_v23 = vsel %vm11099_vm11, %v3766_v39, %v3770_v11  ;;  %v12583_v57 = vld [vmem:[#allocation2 + $0x138] sm:$0xf] }
 0x326   : > { %v3001_v4 = vrot.slane %v3000_v42, 4  ;;  %v3780_v30 = vrot.slane %v3779_v36, 4  ;;  %v3288_v60 = vsel %vm11089_vm10, %v8867_v61, %v3287_v37  ;;  %v8868_v33 = vrot.slane %v3106_v5, 9  ;;  %v12585_v12 = vpop.f32.mrb[64].mxu0  ;;  %v12598_v62 = vld [vmem:[#allocation2 + $0x134] sm:$0x1] }
 0x327   : > { %v3020_v38 = vsel %vm11099_vm11, %v3015_v35, %v3019_v15  ;;  %v3291_v18 = vrot.slane %v12574_v7, 5  ;;  %v9013_v11 = vcombine.low %v12513_v41, %v12522_v59  ;;  %v12594_v39 = vpop.f32.mrb[65].mxu0  ;;  %v3787_v21 = vshrl.u32 %v12577_v63, 16 }
 0x328   : > { %v3006_v20 = vsel %vm11099_vm11, %v3001_v4, %v3005_v49  ;;  %v3785_v42 = vsel %vm11099_vm11, %v3780_v30, %v3784_v56  ;;  %v3790_v5 = vshll.u32 %v12577_v63, 16  ;;  %v12602_v36 = vpop.f32.mrb[66].mxu0  ;;  %v3796_v41 = vshll.u32 %v12598_v62, 16  ;;  %v12610_v49 = vld [vmem:[#allocation2 + $0x13c] sm:$0x1] }
 0x329   : > { %v8980_v29 = vcombine.low %v3006_v20, %v3020_v38  ;;  %v9029_v61 = vcombine.low %v3771_v23, %v3785_v42  ;;  %v3292_v37 = vsel %vm11089_vm10, %v8868_v33, %v3291_v18  ;;  %v3801_v59 = vshrl.u32 %v12583_v57, 16  ;;  %v12608_v4 = vpop.f32.mrb[67].mxu0 }
 0x32a   : > { %v8997_v56 = vcombine.low %v3288_v60, %v3292_v37  ;;  %v3789_v35 = vrot.slane %v3787_v21, 4  ;;  %v3792_v15 = vrot.slane %v3790_v5, 5  ;;  %v3804_v30 = vshll.u32 %v12583_v57, 16  ;;  %v15002_v21 = vld [vmem:[#allocation57_spill] sm:$0xff] }
 0x32b   : > { %5745 = vmatmul.mubr.bf16.gmra.mrb[116].mxu1 %v8980_v29  ;;  %5913 = vmatprep.mubr.bf16.mxu0 %v9029_v61  ;;  %v3798_v20 = vrot.slane %v3796_v41, 5  ;;  %v3803_v23 = vrot.slane %v3801_v59, 4  ;;  %v3810_v38 = vshll.u32 %v12610_v49, 16  ;;  %v12616_v33 = vadd.f32 %v12197_v50, %v12194_v31  ;;  %v15001_v29 = vld [vmem:[#allocation29_spill] sm:$0xff]  ;;  %v15005_v50 = vld [vmem:[#allocation47_spill] sm:$0xff] }
 0x32c   : > { %5752 = vmatprep.mubr.bf16.mxu1 %v8997_v56  ;;  %5914 = vmatmul.mubr.bf16.gmra.mrb[152].mxu0 %v9013_v11  ;;  %v3793_v18 = vor.u32 %v3792_v15, %v3789_v35  ;;  %v3806_v42 = vrot.slane %v3804_v30, 5  ;;  %v12620_v60 = vadd.f32 %v12238_v45, %v12231_v28  ;;  %v12624_v5 = vadd.f32 %v15002_v21, %v15001_v29  ;;  %v12626_v61 = vld [vmem:[#allocation2 + $0x12c] sm:$0x1]  ;;  %v3107_v37 = vld [vmem:[#allocation2 + $0x128] sm:$0xe]  ;;  %v15008_v15 = vld [vmem:[#allocation50_spill] sm:$0xff] }
 0x32d   : > { %14999 = vst [vmem:[#allocation42_spill] sm:$0xff] %v12616_v33  ;;  %v3812_v41 = vrot.slane %v3810_v38, 5  ;;  %v12630_v31 = vadd.f32 %v12242_v19, %v12240_v32  ;;  %v15006_v11 = vld [vmem:[#allocation48_spill] sm:$0xff]  ;;  %v3031_v56 = vshll.u32 %v12546_v9, 16  ;;  %v15007_v45 = vld [vmem:[#allocation49_spill] sm:$0xff]  ;;  %v3045_v29 = vshll.u32 %v12574_v7, 16 }
 0x32e   : > { %15000 = vst [vmem:[#allocation22_spill] sm:$0xff] %v12620_v60  ;;  %15003 = vst [vmem:[#allocation23_spill] sm:$0xff] %v12624_v5  ;;  %v3028_v59 = vor.u32 %v15006_v11, %v15005_v50  ;;  %v3794_v35 = vrot.slane %v3793_v18, 4  ;;  %v3807_v28 = vor.u32 %v3806_v42, %v3803_v23  ;;  %v3042_v30 = vor.u32 %v15008_v15, %v15007_v45  ;;  %v2628_v21 = vld [vmem:[#allocation2 + $0x134] sm:$0x1] }
 0x32f   : > { %15004 = vst [vmem:[#allocation26_spill] sm:$0xff] %v12630_v31  ;;  %v3108_v60 = vld [vmem:[#allocation2 + $0x130] sm:$0xe]  ;;  %v3033_v38 = vrot.slane %v3031_v56, 5  ;;  %v8869_v5 = vrot.slane %v3107_v37, 9  ;;  %v3295_v32 = vrot.slane %v12626_v61, 5  ;;  %v12655_v56 = vadd.f32 %v12294_v3, %v12282_v6 }
 0x330   : > { %v3029_v53 = vrot.slane %v3028_v59, 4  ;;  %v3799_v19 = vsel %vm11099_vm11, %v3794_v35, %v3798_v20  ;;  %v3808_v50 = vrot.slane %v3807_v28, 4  ;;  %v3043_v11 = vrot.slane %v3042_v30, 4  ;;  %v3815_v30 = vld [vmem:[#allocation2 + $0x18] sm:$0xe] }
 0x331   : > { %v3047_v9 = vrot.slane %v3045_v29, 5  ;;  %v3296_v18 = vsel %vm11089_vm10, %v8869_v5, %v3295_v32  ;;  %v8870_v7 = vrot.slane %v3108_v60, 9  ;;  %v3299_v42 = vrot.slane %v2628_v21, 5  ;;  %v12645_v45 = vpop.f32.mrb[32].mxu1  ;;  %15009 = vst [vmem:[#allocation24_spill] sm:$0xff] %v12655_v56  ;;  %v15015_v3 = vld [vmem:[#allocation31_spill] sm:$0xff] }
 0x332   : > { %v3034_v23 = vsel %vm11099_vm11, %v3029_v53, %v3033_v38  ;;  %v3813_v37 = vsel %vm11099_vm11, %v3808_v50, %v3812_v41  ;;  %v9014_v20 = vcombine.low %v12577_v63, %v12583_v57  ;;  %v3814_v53 = vld [vmem:[#allocation2 + $0x10] sm:$0xe]  ;;  %v12657_v35 = vpop.f32.mrb[33].mxu1  ;;  %v15010_v41 = vld [vmem:[#allocation59_spill] sm:$0xff]  ;;  %v15016_v32 = vld [vmem:[#allocation32_spill] sm:$0xff] }
 0x333   : > { %v3048_v59 = vsel %vm11099_vm11, %v3043_v11, %v3047_v9  ;;  %v9030_v60 = vcombine.low %v3799_v19, %v3813_v37  ;;  %v3300_v28 = vsel %vm11089_vm10, %v8870_v7, %v3299_v42  ;;  %v12663_v15 = vadd.f32 %v15010_v41, %v12306_v1  ;;  %v12665_v29 = vpop.f32.mrb[34].mxu1  ;;  %v15012_v57 = vld [vmem:[#allocation30_spill] sm:$0xff]  ;;  %v15018_v19 = vld [vmem:[#allocation51_spill] sm:$0xff]  ;;  %v15019_v11 = vld [vmem:[#allocation52_spill] sm:$0xff] }
 0x334   : > { %v8981_v5 = vcombine.low %v3034_v23, %v3048_v59  ;;  %v8998_v63 = vcombine.low %v3296_v18, %v3300_v28  ;;  %v15013_v38 = vld [vmem:[#allocation58_spill] sm:$0xff]  ;;  %v12673_v50 = vadd.f32 %v15016_v32, %v15015_v3  ;;  %v3056_v9 = vor.u32 %v15019_v11, %v15018_v19  ;;  %v12677_v23 = vpop.f32.mrb[68].mxu0  ;;  %v12679_v7 = vpop.f32.mrb[35].mxu1  ;;  %v15020_v37 = vld [vmem:[#allocation53_spill] sm:$0xff]  ;;  %v10282_v31 = vld [vmem:[#allocation2 + $0x1c] sm:$0x1] }
 0x335   : > { %15011 = vst [vmem:[#allocation25_spill] sm:$0xff] %v12663_v15  ;;  %v12669_v6 = vadd.f32 %v15013_v38, %v15012_v57  ;;  %v10209_v1 = vld [vmem:[#allocation11 + $0x40] ss:$16 sps:$4 sm:$0xff]   ;;  %v10211_v42 = vld [vmem:[#allocation11 + $0x44] ss:$16 sps:$4 sm:$0xff]   ;;  %5921 = vmatprep.mubr.bf16.mxu0 %v9030_v60  ;;  %v3059_v18 = vshll.u32 %v12626_v61, 16 }
 0x336   : > { %15017 = vst [vmem:[#allocation28_spill] sm:$0xff] %v12673_v50  ;;  %5753 = vmatmul.mubr.bf16.gmra.mrb[120].mxu1 %v8981_v5  ;;  %v15021_v59 = vld [vmem:[#allocation54_spill] sm:$0xff]  ;;  %v3073_v41 = vshll.u32 %v2628_v21, 16  ;;  %v8871_v57 = vrot.slane %v3814_v53, 9  ;;  %v3816_v38 = vld [vmem:[#allocation2 + $0x20] sm:$0xe]  ;;  %5922 = vmatmul.mubr.bf16.gmra.mrb[156].mxu0 %v9014_v20 }
 0x337   : > { %15014 = vst [vmem:[#allocation27_spill] sm:$0xff] %v12669_v6  ;;  %v3070_v28 = vor.u32 %v15021_v59, %v15020_v37  ;;  %v3817_v3 = vld [vmem:[#allocation2 + $0x28] sm:$0xe]  ;;  %v12684_v32 = vpop.f32.mrb[69].mxu0  ;;  %5760 = vmatprep.mubr.bf16.mxu1 %v8998_v63  ;;  %v3057_v19 = vrot.slane %v3056_v9, 4  ;;  %v8872_v15 = vrot.slane %v3815_v30, 9  ;;  %6413 = vmatprep.subr.bf16.mxu0 %v10211_v42  ;;  %v12701_v63 = vadd.f32 %v12371_v10, %v12358_v34 }
 0x338   : > { %v10281_v11 = vld [vmem:[#allocation2 + $0x14] sm:$0x1]  ;;  %v3916_v60 = vrot.slane %v10282_v31, 5  ;;  %v12686_v5 = vpop.f32.mrb[70].mxu0  ;;  %v3061_v61 = vrot.slane %v3059_v18, 5  ;;  %v3075_v56 = vrot.slane %v3073_v41, 5  ;;  %6414 = vmatpush1.bf16.msra.mxu0 %v10209_v1 }
 0x339   : > { %v3912_v50 = vrot.slane %v10281_v11, 5  ;;  %v3071_v6 = vrot.slane %v3070_v28, 4  ;;  %v15022_v37 = vld [vmem:[#allocation33_spill] sm:$0xff]  ;;  %v15023_v21 = vld [vmem:[#allocation34_spill] sm:$0xff]  ;;  %v12692_v33 = vpop.f32.mrb[71].mxu0  ;;  %v15024_v20 = vmov 0  }
 0x33a   : > { %v12690_v53 = vadd.f32 %v15023_v21, %v15022_v37  ;;  %v3818_v59 = vld [vmem:[#allocation2 + $0x30] sm:$0xe]  ;;  %6441 = vmatprep.mubr.bf16.mxu0 %v15024_v20  ;;  %v3917_v31 = vsel %vm11089_vm10, %v8872_v15, %v3916_v60  ;;  %v15025_v9 = vld [vmem:[#allocation60_spill] sm:$0xff]  ;;  %v3819_v41 = vld [vmem:[#allocation2 + $0x38] sm:$0xe]  ;;  %v3062_v42 = vsel %vm11099_vm11, %v3057_v19, %v3061_v61  ;;  %v12713_v15 = vadd.f32 %v12382_v54, %v12375_v2 }
 0x33b   : > { %v3913_v30 = vsel %vm11089_vm10, %v8871_v57, %v3912_v50  ;;  %v15026_v18 = vld [vmem:[#allocation61_spill] sm:$0xff]  ;;  %v3076_v11 = vsel %vm11099_vm11, %v3071_v6, %v3075_v56  ;;  %v12715_v57 = vpop.f32.mrb[36].mxu1  ;;  %v8873_v10 = vrot.slane %v3816_v38, 9  ;;  %v8874_v60 = vrot.slane %v3817_v3, 9  ;;  %v10283_v1 = vld [vmem:[#allocation2 + $0x34] sm:$0x1] }
 0x33c   : > { %v12705_v28 = vadd.f32 %v15026_v18, %v15025_v9  ;;  %v9031_v50 = vcombine.low %v3913_v30, %v3917_v31  ;;  %v8982_v34 = vcombine.low %v3062_v42, %v3076_v11  ;;  %v8875_v37 = vrot.slane %v3818_v59, 9  ;;  %v12717_v21 = vpop.f32.mrb[37].mxu1  ;;  %v10284_v19 = vld [vmem:[#allocation2 + $0x3c] sm:$0x1]  ;;  %v15029_v38 = vld [vmem:[#allocation56_spill] sm:$0xff] }
 0x33d   : > { %v3928_v9 = vrot.slane %v10283_v1, 5  ;;  %v8876_v18 = vrot.slane %v3819_v41, 9  ;;  %v3932_v61 = vrot.slane %v10284_v19, 5  ;;  %v12723_v56 = vpop.f32.mrb[38].mxu1  ;;  %v15027_v2 = vld [vmem:[#allocation55_spill] sm:$0xff]  ;;  %v15030_v3 = vrot.slane %v15029_v38, 5 }
 0x33e   : > { %v15028_v54 = vrot.slane %v15027_v2, 5  ;;  %v9563_v30 = vadd.f32 %v12449_v51, %v12439_v22  ;;  %v12737_v31 = vadd.f32 %v12415_v44, %v12408_v13  ;;  %v12739_v43 = vpop.f32.mrb[39].mxu1  ;;  %5761 = vmatmul.mubr.bf16.gmra.mrb[124].mxu1 %v8982_v34  ;;  %v9566_v41 = vadd.f32 %v12459_v17, %v12454_v24  ;;  %v3820_v42 = vld [vmem:[#allocation2 + $0x40] sm:$0xe]  ;;  %v3821_v11 = vld [vmem:[#allocation2 + $0x48] sm:$0xe] }
 0x33f   : > { %v3925_v59 = vsel %vm11089_vm10, %v8874_v60, %v15030_v3  ;;  %9919 = vmatprep.mubr.bf16.mxu1 %v9031_v50  ;;  %v3929_v60 = vsel %vm11089_vm10, %v8875_v37, %v3928_v9  ;;  %v3933_v22 = vsel %vm11089_vm10, %v8876_v18, %v3932_v61  ;;  %v3823_v51 = vld [vmem:[#allocation2 + $0x68] sm:$0xe]  ;;  %v9451_v13 = vadd.f32 %v12533_v47, %v12524_v26  ;;  %v10285_v1 = vld [vmem:[#allocation2 + $0x44] sm:$0x1]  ;;  %v10286_v9 = vld [vmem:[#allocation2 + $0x4c] sm:$0x1] }
 0x340   : > { %v3921_v6 = vsel %vm11089_vm10, %v8873_v10, %v15028_v54  ;;  %v3822_v10 = vld [vmem:[#allocation2 + $0x60] sm:$0xe]  ;;  %v9569_v44 = vadd.f32 %v12594_v39, %v12585_v12  ;;  %v8877_v34 = vrot.slane %v3820_v42, 9  ;;  %v3936_v24 = vrot.slane %v10285_v1, 5  ;;  %v10287_v2 = vld [vmem:[#allocation2 + $0x64] sm:$0x1] }
 0x341   : > { %v9032_v40 = vcombine.low %v3921_v6, %v3925_v59  ;;  %v9454_v17 = vadd.f32 %v12548_v16, %v12542_v14  ;;  %v9572_v50 = vadd.f32 %v12608_v4, %v12602_v36  ;;  %v8878_v37 = vrot.slane %v3821_v11, 9  ;;  %v10288_v54 = vld [vmem:[#allocation2 + $0x6c] sm:$0x1]  ;;  %v3824_v16 = vld [vmem:[#allocation2 + $0x70] sm:$0xe] }
 0x342   : > { %v3940_v19 = vrot.slane %v10286_v9, 5  ;;  %v8879_v18 = vrot.slane %v3822_v10, 9  ;;  %v12755_v61 = vadd.f32 %v9563_v30, %v9451_v13  ;;  %v3944_v26 = vrot.slane %v10287_v2, 5  ;;  %v3825_v42 = vld [vmem:[#allocation2 + $0x78] sm:$0xe] }
 0x343   : > { %v8880_v47 = vrot.slane %v3823_v51, 9  ;;  %v3948_v12 = vrot.slane %v10288_v54, 5  ;;  %v12757_v39 = vadd.f32 %v9566_v41, %v9454_v17  ;;  %v9579_v6 = vpop.f32.mrb[72].mxu0  ;;  %v9033_v38 = vcombine.low %v3929_v60, %v3933_v22  ;;  %v3829_v2 = vld [vmem:[#allocation2 + $0x98] sm:$0xe] }
 0x344   : > { %v9580_v3 = vpop.f32.mrb[73].mxu0  ;;  %v12759_v14 = vpop.f32.mrb[40].mxu1  ;;  %v9457_v36 = vadd.f32 %v12657_v35, %v12645_v45  ;;  %v9575_v4 = vadd.f32 %v12684_v32, %v12677_v23  ;;  %v3937_v41 = vsel %vm11089_vm10, %v8877_v34, %v3936_v24  ;;  %v9460_v11 = vadd.f32 %v12679_v7, %v12665_v29  ;;  %v3826_v32 = vld [vmem:[#allocation2 + $0x80] sm:$0xe]  ;;  %v10289_v29 = vld [vmem:[#allocation2 + $0x74] sm:$0x1] }
 0x345   : > { %v9582_v59 = vpop.f32.mrb[74].mxu0  ;;  %v12765_v30 = vpop.f32.mrb[41].mxu1  ;;  %v3941_v45 = vsel %vm11089_vm10, %v8878_v37, %v3940_v19  ;;  %v3945_v35 = vsel %vm11089_vm10, %v8879_v18, %v3944_v26  ;;  %v3949_v23 = vsel %vm11089_vm10, %v8880_v47, %v3948_v12  ;;  %v8881_v13 = vrot.slane %v3824_v16, 9  ;;  %v10290_v24 = vld [vmem:[#allocation2 + $0x7c] sm:$0x1] }
 0x346   : > { %9920 = vmatmul.mubr.bf16.vlgmr.msra.gmra.mrb[128].mxu1 %v9032_v40  ;;  %v9578_v40 = vadd.f32 %v12692_v33, %v12686_v5  ;;  %v9583_v10 = vpop.f32.mrb[75].mxu0  ;;  %v9470_v60 = vpop.f32.mrb[42].mxu1  ;;  %v12779_v22 = vadd.f32 %v9569_v44, %v9457_v36  ;;  %v3952_v7 = vrot.slane %v10289_v29, 5  ;;  %v12781_v34 = vadd.f32 %v9572_v50, %v9460_v11  ;;  %v10212_v33 = vld [vmem:[#allocation11 + $0x60] ss:$16 sps:$4 sm:$0xff]  }
 0x347   : > { %9923 = vmatprep.mubr.bf16.mxu1 %v9033_v38  ;;  %v9471_v51 = vpop.f32.mrb[43].mxu1  ;;  %v10214_v5 = vld [vmem:[#allocation11 + $0x64] ss:$16 sps:$4 sm:$0xff]   ;;  %v8882_v1 = vrot.slane %v3825_v42, 9  ;;  %v3956_v17 = vrot.slane %v10290_v24, 5  ;;  %v9034_v9 = vcombine.low %v3937_v41, %v3941_v45  ;;  %v9035_v19 = vcombine.low %v3945_v35, %v3949_v23 }
 0x348   : > { %v3827_v37 = vld [vmem:[#allocation2 + $0x88] sm:$0xe]  ;;  %v3828_v18 = vld [vmem:[#allocation2 + $0x90] sm:$0xe]  ;;  %v9463_v44 = vadd.f32 %v12717_v21, %v12715_v57  ;;  %v9581_v26 = vadd.f32 %v9580_v3, %v9579_v6  ;;  %6415 = vmatprep.subr.bf16.mxu0 %v10214_v5  ;;  %v8883_v47 = vrot.slane %v3826_v32, 9  ;;  %v9466_v38 = vadd.f32 %v12739_v43, %v12723_v56 }
 0x349   : > { %v10291_v54 = vld [vmem:[#allocation2 + $0x84] sm:$0x1]  ;;  %v3830_v50 = vld [vmem:[#allocation2 + $0xb0] sm:$0xe]  ;;  %v9584_v16 = vadd.f32 %v9583_v10, %v9582_v59  ;;  %6416 = vmatpush1.bf16.msra.mxu0 %v10212_v33  ;;  %v3953_v41 = vsel %vm11089_vm10, %v8881_v13, %v3952_v7  ;;  %v8884_v42 = vrot.slane %v3827_v37, 9  ;;  %v3957_v6 = vsel %vm11089_vm10, %v8882_v1, %v3956_v17 }
 0x34a   : > { %v3960_v12 = vrot.slane %v10291_v54, 5  ;;  %v10292_v11 = vld [vmem:[#allocation2 + $0x8c] sm:$0x1]  ;;  %v3831_v35 = vld [vmem:[#allocation2 + $0xb8] sm:$0xe]  ;;  %v12789_v57 = vadd.f32 %v9575_v4, %v9463_v44  ;;  %v8885_v3 = vrot.slane %v3828_v18, 9  ;;  %v12793_v43 = vadd.f32 %v9578_v40, %v9466_v38 }
 0x34b   : > { %v9585_v36 = vpop.f32.mrb[76].mxu0  ;;  %v3964_v45 = vrot.slane %v10292_v11, 5  ;;  %v10293_v23 = vld [vmem:[#allocation2 + $0x94] sm:$0x1]  ;;  %v8886_v10 = vrot.slane %v3829_v2, 9  ;;  %v8887_v29 = vrot.slane %v3830_v50, 9  ;;  %v9469_v1 = vadd.f32 %v12765_v30, %v12759_v14 }
 0x34c   : > { %v9586_v21 = vpop.f32.mrb[77].mxu0  ;;  %v3968_v56 = vrot.slane %v10293_v23, 5  ;;  %v10294_v32 = vld [vmem:[#allocation2 + $0x9c] sm:$0x1]  ;;  %v10295_v7 = vld [vmem:[#allocation2 + $0xb4] sm:$0x1]  ;;  %v3961_v40 = vsel %vm11089_vm10, %v8883_v47, %v3960_v12 }
 0x34d   : > { %v9588_v59 = vpop.f32.mrb[78].mxu0  ;;  %v3972_v13 = vrot.slane %v10294_v32, 5  ;;  %v3976_v33 = vrot.slane %v10295_v7, 5  ;;  %v8888_v5 = vrot.slane %v3831_v35, 9  ;;  %v10296_v24 = vld [vmem:[#allocation2 + $0xbc] sm:$0x1]  ;;  %v9587_v17 = vadd.f32 %v9586_v21, %v9585_v36 }
 0x34e   : > { %9924 = vmatmul.mubr.bf16.gmra.mrb[132].mxu1 %v9034_v9  ;;  %v9589_v4 = vpop.f32.mrb[79].mxu0  ;;  %v3980_v37 = vrot.slane %v10296_v24, 5  ;;  %v3965_v9 = vsel %vm11089_vm10, %v8884_v42, %v3964_v45  ;;  %v3832_v44 = vld [vmem:[#allocation2 + $0xc0] sm:$0xe]  ;;  %v12801_v54 = vadd.f32 %v9581_v26, %v9469_v1  ;;  %v12805_v38 = vsel %vm11089_vm10, %v8885_v3, %v3968_v56  ;;  %v3833_v30 = vld [vmem:[#allocation2 + $0xc8] sm:$0xe] }
 0x34f   : > { %9927 = vmatprep.mubr.bf16.mxu1 %v9035_v19  ;;  %v9472_v19 = vadd.f32 %v9471_v51, %v9470_v60  ;;  %v9590_v18 = vadd.f32 %v9589_v4, %v9588_v59  ;;  %v9473_v2 = vpop.f32.mrb[44].mxu1  ;;  %v12809_v14 = vsel %vm11089_vm10, %v8886_v10, %v3972_v13  ;;  %v9036_v36 = vcombine.low %v3953_v41, %v3957_v6  ;;  %v3834_v42 = vld [vmem:[#allocation2 + $0xd0] sm:$0xe]  ;;  %v3835_v11 = vld [vmem:[#allocation2 + $0xd8] sm:$0xe] }
 0x350   : > { %v9474_v50 = vpop.f32.mrb[45].mxu1  ;;  %v9037_v60 = vcombine.low %v3961_v40, %v3965_v9  ;;  %v12815_v51 = vsel %vm11089_vm10, %v8887_v29, %v3976_v33  ;;  %v12819_v26 = vsel %vm11089_vm10, %v8888_v5, %v3980_v37  ;;  %v8889_v21 = vrot.slane %v3832_v44, 9  ;;  %v10297_v3 = vld [vmem:[#allocation2 + $0xc4] sm:$0x1]  ;;  %v3842_v41 = vld [vmem:[#allocation2 + $0x120] sm:$0xe] }
 0x351   : > { %v12811_v47 = vadd.f32 %v9584_v16, %v9472_v19  ;;  %v9476_v12 = vpop.f32.mrb[46].mxu1  ;;  %v3984_v23 = vrot.slane %v10297_v3, 5  ;;  %v9475_v16 = vadd.f32 %v9474_v50, %v9473_v2  ;;  %v9038_v6 = vcombine.low %v12805_v38, %v12809_v14  ;;  %v10298_v32 = vld [vmem:[#allocation2 + $0xcc] sm:$0x1]  ;;  %v3843_v33 = vld [vmem:[#allocation2 + $0x128] sm:$0xe] }
 0x352   : > { %v9477_v35 = vpop.f32.mrb[47].mxu1  ;;  %v8890_v10 = vrot.slane %v3833_v30, 9  ;;  %v3988_v13 = vrot.slane %v10298_v32, 5  ;;  %v8891_v4 = vrot.slane %v3834_v42, 9  ;;  %v10299_v5 = vld [vmem:[#allocation2 + $0xd4] sm:$0x1]  ;;  %v9039_v19 = vcombine.low %v12815_v51, %v12819_v26 }
 0x353   : > { %v9591_v45 = vpop.f32.mrb[80].mxu0  ;;  %v9478_v59 = vadd.f32 %v9477_v35, %v9476_v12  ;;  %v3992_v24 = vrot.slane %v10299_v5, 5  ;;  %v12823_v37 = vadd.f32 %v9587_v17, %v9475_v16  ;;  %v3844_v9 = vld [vmem:[#allocation2 + $0x130] sm:$0xe]  ;;  %v8892_v2 = vrot.slane %v3835_v11, 9  ;;  %v15033_v5 = vld [vmem:[#allocation64_spill] sm:$0xff] }
 0x354   : > { %v9592_v56 = vpop.f32.mrb[81].mxu0  ;;  %v10300_v44 = vld [vmem:[#allocation2 + $0xdc] sm:$0x1]  ;;  %v3845_v14 = vld [vmem:[#allocation2 + $0x138] sm:$0xe]  ;;  %v12831_v30 = vsel %vm11089_vm10, %v8889_v21, %v3984_v23  ;;  %v8899_v12 = vrot.slane %v3842_v41, 9  ;;  %v12861_v23 = vadd.f32 %v12362_v46, %v12426_v27 }
 0x355   : > { %v9593_v29 = vadd.f32 %v9592_v56, %v9591_v45  ;;  %v9594_v7 = vpop.f32.mrb[82].mxu0  ;;  %v12825_v1 = vadd.f32 %v9590_v18, %v9478_v59  ;;  %v3996_v50 = vrot.slane %v10300_v44, 5  ;;  %v4024_v17 = vrot.slane %v12537_v55, 5  ;;  %v10217_v16 = vld [vmem:[#allocation11 + $0x84] ss:$16 sps:$4 sm:$0xff]   ;;  %v15031_v27 = vld [vmem:[#allocation63_spill] sm:$0xff] }
 0x356   : > { %9928 = vmatmul.mubr.bf16.gmra.mrb[136].mxu1 %v9036_v36  ;;  %v9595_v40 = vpop.f32.mrb[83].mxu0  ;;  %v8900_v36 = vrot.slane %v3843_v33, 9  ;;  %v12836_v18 = vsel %vm11089_vm10, %v8890_v10, %v3988_v13  ;;  %v8901_v51 = vrot.slane %v3844_v9, 9  ;;  %v4032_v26 = vrot.slane %v12598_v62, 5  ;;  %v10215_v32 = vld [vmem:[#allocation11 + $0x80] ss:$16 sps:$4 sm:$0xff]   ;;  %6417 = vmatprep.subr.bf16.mxu0 %v10217_v16 }
 0x357   : > { %9931 = vmatprep.mubr.bf16.mxu1 %v9037_v60  ;;  %v9596_v38 = vadd.f32 %v9595_v40, %v9594_v7  ;;  %v4028_v60 = vrot.slane %v12539_v48, 5  ;;  %v12842_v42 = vsel %vm11089_vm10, %v8891_v4, %v3992_v24  ;;  %v12846_v11 = vsel %vm11089_vm10, %v8899_v12, %v4024_v17  ;;  %v15032_v4 = vld [vmem:[#allocation65_spill] sm:$0xff]  ;;  %v15035_v9 = vld [vmem:[#allocation38_spill] sm:$0xff]  ;;  %v15036_v44 = vld [vmem:[#allocation40_spill] sm:$0xff]  ;;  %6418 = vmatpush1.bf16.msra.mxu0 %v10215_v32 }
 0x358   : > { %v8902_v55 = vrot.slane %v3845_v14, 9  ;;  %v4036_v35 = vrot.slane %v12610_v49, 5  ;;  %v3997_v21 = vsel %vm11089_vm10, %v8892_v2, %v3996_v50  ;;  %v12857_v3 = vsel %vm11089_vm10, %v8901_v51, %v4032_v26  ;;  %v15034_v40 = vld [vmem:[#allocation21_spill] sm:$0xff]  ;;  %v15037_v50 = vld [vmem:[#allocation20_spill] sm:$0xff]  ;;  %v15038_v12 = vld [vmem:[#allocation42_spill] sm:$0xff] }
 0x359   : > { %v9479_v45 = vpop.f32.mrb[48].mxu1  ;;  %v12853_v48 = vsel %vm11089_vm10, %v8900_v36, %v4028_v60  ;;  %v12871_v10 = vadd.f32 %v12366_v8, %v12437_v25  ;;  %v12877_v33 = vadd.f32 %v15031_v27, %v12488_v52  ;;  %v12881_v24 = vadd.f32 %v15033_v5, %v15032_v4  ;;  %v15039_v52 = vld [vmem:[#allocation39_spill] sm:$0xff] }
 0x35a   : > { %v9480_v62 = vpop.f32.mrb[49].mxu1  ;;  %v9045_v49 = vcombine.low %v12846_v11, %v12853_v48  ;;  %v12867_v41 = vsel %vm11089_vm10, %v8902_v55, %v4036_v35  ;;  %v12885_v2 = vadd.f32 %v15035_v9, %v15034_v40  ;;  %v12891_v14 = vadd.f32 %v15037_v50, %v15036_v44  ;;  %v3836_v36 = vld [vmem:[#allocation2 + $0xe0] sm:$0xe]  ;;  %v3839_v50 = vld [vmem:[#allocation2 + $0x108] sm:$0xe] }
 0x35b   : > { %v9481_v56 = vadd.f32 %v9480_v62, %v9479_v45  ;;  %v9482_v59 = vpop.f32.mrb[50].mxu1  ;;  %v9046_v46 = vcombine.low %v12857_v3, %v12867_v41  ;;  %v12895_v17 = vadd.f32 %v15039_v52, %v15038_v12  ;;  %v15040_v26 = vld [vmem:[#allocation23_spill] sm:$0xff]  ;;  %v15041_v45 = vld [vmem:[#allocation41_spill] sm:$0xff]  ;;  %v15047_v9 = vld [vmem:[#allocation28_spill] sm:$0xff]  ;;  %v12921_v44 = vadd.f32 %v12701_v63, %v12721_v0 }
 0x35c   : > { %v9483_v7 = vpop.f32.mrb[51].mxu1  ;;  %v12899_v55 = vadd.f32 %v15041_v45, %v15040_v26  ;;  %v15044_v62 = vld [vmem:[#allocation27_spill] sm:$0xff]  ;;  %v8893_v12 = vrot.slane %v3836_v36, 9  ;;  %v10227_v3 = vld [vmem:[#allocation11 + $0xc0] ss:$16 sps:$4 sm:$0xff]  }
 0x35d   : > { %v9597_v13 = vpop.f32.mrb[84].mxu0  ;;  %v12887_v8 = vadd.f32 %v9593_v29, %v9481_v56  ;;  %v15043_v29 = vld [vmem:[#allocation22_spill] sm:$0xff]  ;;  %v3838_v27 = vld [vmem:[#allocation2 + $0x100] sm:$0xe] }
 0x35e   : > { %9932 = vmatmul.mubr.bf16.gmra.mrb[140].mxu1 %v9038_v6  ;;  %v9598_v25 = vpop.f32.mrb[85].mxu0  ;;  %v9484_v6 = vadd.f32 %v9483_v7, %v9482_v59  ;;  %v15045_v56 = vld [vmem:[#allocation26_spill] sm:$0xff]  ;;  %v3837_v7 = vld [vmem:[#allocation2 + $0xe8] sm:$0xe]  ;;  %v8895_v0 = vrot.slane %v3838_v27, 9 }
 0x35f   : > { %9935 = vmatprep.mubr.bf16.mxu1 %v9039_v19  ;;  %v9599_v60 = vadd.f32 %v9598_v25, %v9597_v13  ;;  %v9600_v51 = vpop.f32.mrb[86].mxu0  ;;  %v15042_v19 = vld [vmem:[#allocation24_spill] sm:$0xff]  ;;  %v12907_v59 = vadd.f32 %v15045_v56, %v15044_v62  ;;  %v15046_v13 = vld [vmem:[#allocation25_spill] sm:$0xff]  ;;  %v12917_v25 = vadd.f32 %v15047_v9, %v12705_v28  ;;  %v8894_v45 = vrot.slane %v3837_v7, 9  ;;  %v15049_v56 = vld [vmem:[#allocation62_spill] sm:$0xff] }
 0x360   : > { %v12903_v35 = vadd.f32 %v15043_v29, %v15042_v19  ;;  %v12909_v4 = vadd.f32 %v9596_v38, %v9484_v6  ;;  %v9601_v5 = vpop.f32.mrb[87].mxu0  ;;  %v12913_v40 = vadd.f32 %v15046_v13, %v12690_v53  ;;  %v12925_v38 = vadd.f32 %v12713_v15, %v12737_v31  ;;  %v10301_v28 = vld [vmem:[#allocation2 + $0xe4] sm:$0x1]  ;;  %v10302_v19 = vld [vmem:[#allocation2 + $0xec] sm:$0x1]  ;;  %v15048_v29 = vld [vmem:[#allocation35_spill] sm:$0xff] }
 0x361   : > { %v9602_v16 = vadd.f32 %v9601_v5, %v9600_v51  ;;  %v9040_v6 = vcombine.low %v12831_v30, %v12836_v18  ;;  %v9041_v53 = vcombine.low %v12842_v42, %v3997_v21  ;;  %v9485_v52 = vpop.f32.mrb[52].mxu1  ;;  %v4000_v26 = vrot.slane %v10301_v28, 5  ;;  %v10229_v41 = vld [vmem:[#allocation11 + $0xc4] ss:$16 sps:$4 sm:$0xff]  }
 0x362   : > { %v4004_v63 = vrot.slane %v10302_v19, 5  ;;  %v9486_v32 = vpop.f32.mrb[53].mxu1  ;;  %v4008_v51 = vrot.slane %v15048_v29, 5  ;;  %v8896_v62 = vrot.slane %v3839_v50, 9  ;;  %v4012_v15 = vrot.slane %v15049_v56, 5 }
 0x363   : > { %v9487_v31 = vadd.f32 %v9486_v32, %v9485_v52  ;;  %v9488_v5 = vpop.f32.mrb[54].mxu1  ;;  %v4001_v36 = vsel %vm11089_vm10, %v8893_v12, %v4000_v26  ;;  %v3840_v50 = vld [vmem:[#allocation2 + $0x110] sm:$0xe]  ;;  %v3841_v52 = vld [vmem:[#allocation2 + $0x118] sm:$0xe] }
 0x364   : > { %v9489_v30 = vpop.f32.mrb[55].mxu1  ;;  %v4005_v7 = vsel %vm11089_vm10, %v8894_v45, %v4004_v63  ;;  %v4009_v13 = vsel %vm11089_vm10, %v8895_v0, %v4008_v51  ;;  %v4013_v9 = vsel %vm11089_vm10, %v8896_v62, %v4012_v15  ;;  %v8897_v29 = vrot.slane %v3840_v50, 9  ;;  %v15050_v63 = vld [vmem:[#allocation36_spill] sm:$0xff]  ;;  %v15051_v0 = vld [vmem:[#allocation37_spill] sm:$0xff] }
 0x365   : > { %v12932_v18 = vadd.f32 %v9599_v60, %v9487_v31  ;;  %v9490_v21 = vadd.f32 %v9489_v30, %v9488_v5  ;;  %v9042_v12 = vcombine.low %v4001_v36, %v4005_v7  ;;  %v9043_v26 = vcombine.low %v4009_v13, %v4013_v9  ;;  %v10221_v50 = vld [vmem:[#allocation11 + $0x8] ss:$16 sps:$4 sm:$0xff]  }
 0x366   : > { %9936 = vmatmul.mubr.bf16.gmra.mrb[144].mxu1 %v9040_v6  ;;  %v9603_v42 = vpop.f32.mrb[88].mxu0  ;;  %v4016_v56 = vrot.slane %v15050_v63, 5  ;;  %v8898_v31 = vrot.slane %v3841_v52, 9  ;;  %v4020_v51 = vrot.slane %v15051_v0, 5  ;;  %v10224_v0 = vld [vmem:[#allocation11 + $0x28] ss:$16 sps:$4 sm:$0xff]  }
 0x367   : > { %9939 = vmatprep.mubr.bf16.mxu1 %v9041_v53  ;;  %v9604_v27 = vpop.f32.mrb[89].mxu0  ;;  %v12942_v53 = vadd.f32 %v9602_v16, %v9490_v21  ;;  %v10218_v21 = vld [vmem:[#allocation11 + $0xa0] ss:$16 sps:$4 sm:$0xff]  }
 0x368   : > { %v9605_v6 = vadd.f32 %v9604_v27, %v9603_v42  ;;  %v9606_v60 = vpop.f32.mrb[90].mxu0  ;;  %v10220_v27 = vld [vmem:[#allocation11 + $0xa4] ss:$16 sps:$4 sm:$0xff]   ;;  %v4017_v36 = vsel %vm11089_vm10, %v8897_v29, %v4016_v56  ;;  %v4021_v7 = vsel %vm11089_vm10, %v8898_v31, %v4020_v51  ;;  %v10226_v51 = vld [vmem:[#allocation11 + $0x2c] ss:$16 sps:$4 sm:$0xff]  }
 0x369   : > { %v9607_v28 = vpop.f32.mrb[91].mxu0  ;;  %6419 = vmatprep.subr.bf16.mxu0 %v10220_v27 }
 0x36a   : > { %v9608_v19 = vadd.f32 %v9607_v28, %v9606_v60  ;;  %v9491_v32 = vpop.f32.mrb[56].mxu1  ;;  %v10223_v60 = vld [vmem:[#allocation11 + $0xc] ss:$16 sps:$4 sm:$0xff]   ;;  %6420 = vmatpush1.bf16.msra.mxu0 %v10218_v21 }
 0x36b   : > { %v9492_v45 = vpop.f32.mrb[57].mxu1  ;;  %6602 = vmatprep.subr.bf16.mxu1 %v10223_v60  ;;  %6421 = vmatprep.subr.bf16.mxu0 %v10229_v41 }
 0x36c   : > { %v9493_v5 = vadd.f32 %v9492_v45, %v9491_v32  ;;  %v9494_v62 = vpop.f32.mrb[58].mxu1  ;;  %v9044_v32 = vcombine.low %v4017_v36, %v4021_v7  ;;  %6603 = vmatpush1.bf16.msra.mxu1 %v10221_v50 }
 0x36d   : > { %v9495_v15 = vpop.f32.mrb[59].mxu1  ;;  %6604 = vmatprep.subr.bf16.mxu1 %v10226_v51 }
 0x36e   : > { %9940 = vmatmul.mubr.bf16.gmra.mrb[148].mxu1 %v9042_v12  ;;  %v12946_v16 = vadd.f32 %v9605_v6, %v9493_v5  ;;  %v9496_v30 = vadd.f32 %v9495_v15, %v9494_v62  ;;  %6422 = vmatpush1.bf16.msra.mxu0 %v10227_v3 }
 0x36f   : > { %9943 = vmatprep.mubr.bf16.mxu1 %v9043_v26  ;;  %v9609_v42 = vpop.f32.mrb[92].mxu0 }
 0x370   : > { %v9610_v13 = vpop.f32.mrb[93].mxu0  ;;  %v12952_v9 = vadd.f32 %v9608_v19, %v9496_v30  ;;  %6605 = vmatpush1.bf16.msra.mxu1 %v10224_v0 }
 0x371   : > { %v9611_v52 = vadd.f32 %v9610_v13, %v9609_v42  ;;  %v9612_v28 = vpop.f32.mrb[94].mxu0 }
 0x372   : > { %v9613_v6 = vpop.f32.mrb[95].mxu0 }
 0x373   : > { %v9614_v12 = vadd.f32 %v9613_v6, %v9612_v28  ;;  %v9497_v26 = vpop.f32.mrb[60].mxu1  ;;  %v10230_v6 = vld [vmem:[#allocation11 + $0x48] ss:$16 sps:$4 sm:$0xff]  }
 0x374   : > { %v9498_v45 = vpop.f32.mrb[61].mxu1 }
 0x375   : > { %v9499_v29 = vadd.f32 %v9498_v45, %v9497_v26  ;;  %v9500_v58 = vpop.f32.mrb[62].mxu1 }
 0x376   : > { %9944 = vmatmul.mubr.bf16.gmra.mrb[152].mxu1 %v9044_v32  ;;  %v9501_v19 = vpop.f32.mrb[63].mxu1  ;;  %v10232_v32 = vld [vmem:[#allocation11 + $0x4c] ss:$16 sps:$4 sm:$0xff]  }
 0x377   : > { %9947 = vmatprep.mubr.bf16.mxu1 %v9045_v49  ;;  %v12957_v63 = vadd.f32 %v9611_v52, %v9499_v29  ;;  %v9502_v56 = vadd.f32 %v9501_v19, %v9500_v58  ;;  %6606 = vmatprep.subr.bf16.mxu1 %v10232_v32 }
 0x378   : > { %6607 = vmatpush1.bf16.msra.mxu1 %v10230_v6 }
 0x379   : > { %v12959_v31 = vadd.f32 %v9614_v12, %v9502_v56 }
 0x37a   : > { %v9743_v5 = vpop.f32.mrb[96].mxu0 }
 0x37b   : > { %v9744_v62 = vpop.f32.mrb[97].mxu0  ;;  %v9631_v42 = vpop.f32.mrb[64].mxu1 }
 0x37c   : > { %v12961_v15 = vadd.f32 %v9744_v62, %v9743_v5  ;;  %v9746_v30 = vpop.f32.mrb[98].mxu0  ;;  %v9632_v48 = vpop.f32.mrb[65].mxu1 }
 0x37d   : > { %v9747_v11 = vpop.f32.mrb[99].mxu0  ;;  %v9633_v21 = vadd.f32 %v9632_v48, %v9631_v42  ;;  %v9634_v27 = vpop.f32.mrb[66].mxu1  ;;  %v10235_v48 = vld [vmem:[#allocation11 + $0x6c] ss:$16 sps:$4 sm:$0xff]  }
 0x37e   : > { %9948 = vmatmul.mubr.bf16.gmra.mrb[156].mxu1 %v9046_v46  ;;  %v12966_v49 = vadd.f32 %v9747_v11, %v9746_v30  ;;  %v9635_v36 = vpop.f32.mrb[67].mxu1  ;;  %v10233_v11 = vld [vmem:[#allocation11 + $0x68] ss:$16 sps:$4 sm:$0xff]   ;;  %6608 = vmatprep.subr.bf16.mxu1 %v10235_v48 }
 0x37f   : > { %6634 = vmatprep.mubr.bf16.mxu1 %v15024_v20  ;;  %v12970_v7 = vadd.f32 %v9633_v21, %v12861_v23  ;;  %v9636_v13 = vadd.f32 %v9635_v36, %v9634_v27  ;;  %6609 = vmatpush1.bf16.msra.mxu1 %v10233_v11 }
 0x381   : > { %v12973_v60 = vadd.f32 %v9636_v13, %v12871_v10 }
 0x382   : > { %v9749_v50 = vpop.f32.mrb[100].mxu0 }
 0x383   : > { %v9750_v52 = vpop.f32.mrb[101].mxu0 }
 0x384   : > { %v9751_v46 = vadd.f32 %v9750_v52, %v9749_v50  ;;  %v9752_v28 = vpop.f32.mrb[102].mxu0 }
 0x385   : > { %v9753_v12 = vpop.f32.mrb[103].mxu0 }
 0x386   : > { %v9754_v26 = vadd.f32 %v9753_v12, %v9752_v28  ;;  %v10236_v12 = vld [vmem:[#allocation11 + $0xe0] ss:$16 sps:$4 sm:$0xff]  }
 0x387   : > { %v9637_v45 = vpop.f32.mrb[68].mxu1 }
 0x388   : > { %v9638_v23 = vpop.f32.mrb[69].mxu1 }
 0x389   : > { %v9639_v29 = vadd.f32 %v9638_v23, %v9637_v45  ;;  %v9640_v58 = vpop.f32.mrb[70].mxu1  ;;  %v10238_v45 = vld [vmem:[#allocation11 + $0xe4] ss:$16 sps:$4 sm:$0xff]  }
 0x38a   : > { %v9641_v19 = vpop.f32.mrb[71].mxu1  ;;  %v9755_v56 = vpop.f32.mrb[104].mxu0  ;;  %6423 = vmatprep.subr.bf16.mxu0 %v10238_v45 }
 0x38b   : > { %v5651_v10 = vadd.f32 %v9639_v29, %v12877_v33  ;;  %v9642_v0 = vadd.f32 %v9641_v19, %v9640_v58  ;;  %v9756_v51 = vpop.f32.mrb[105].mxu0  ;;  %v10239_v19 = vld [vmem:[#allocation11 + $0x88] ss:$16 sps:$4 sm:$0xff]   ;;  %6424 = vmatpush1.bf16.msra.mxu0 %v10236_v12  ;;  %v10247_v12 = vld [vmem:[#allocation11 + $0xcc] ss:$16 sps:$4 sm:$0xff]  }
 0x38c   : > { %v12976_v5 = vadd.f32 %v9756_v51, %v9755_v56  ;;  %v9758_v30 = vpop.f32.mrb[106].mxu0  ;;  %v10241_v56 = vld [vmem:[#allocation11 + $0x8c] ss:$16 sps:$4 sm:$0xff]  }
 0x38d   : > { %v5654_v62 = vadd.f32 %v9642_v0, %v12881_v24  ;;  %v9759_v42 = vpop.f32.mrb[107].mxu0  ;;  %v12982_v23 = vadd.f32 %v9751_v46, %v5651_v10  ;;  %6610 = vmatprep.subr.bf16.mxu1 %v10241_v56 }
 0x38e   : > { %v12979_v21 = vadd.f32 %v9759_v42, %v9758_v30  ;;  %6611 = vmatpush1.bf16.msra.mxu1 %v10239_v19 }
 0x391   : > { %v9643_v27 = vpop.f32.mrb[72].mxu1 }
 0x392   : > { %v9644_v36 = vpop.f32.mrb[73].mxu1  ;;  %v9761_v50 = vpop.f32.mrb[108].mxu0 }
 0x393   : > { %v9645_v13 = vadd.f32 %v9644_v36, %v9643_v27  ;;  %v9646_v33 = vpop.f32.mrb[74].mxu1  ;;  %v9762_v52 = vpop.f32.mrb[109].mxu0 }
 0x394   : > { %v9647_v3 = vpop.f32.mrb[75].mxu1  ;;  %v9763_v28 = vadd.f32 %v9762_v52, %v9761_v50  ;;  %v9764_v24 = vpop.f32.mrb[110].mxu0  ;;  %v12990_v50 = vadd.f32 %v9754_v26, %v5654_v62 }
 0x395   : > { %v5659_v41 = vadd.f32 %v9645_v13, %v12885_v2  ;;  %v9648_v6 = vadd.f32 %v9647_v3, %v9646_v33  ;;  %v9765_v32 = vpop.f32.mrb[111].mxu0  ;;  %v10242_v3 = vld [vmem:[#allocation11 + $0xa8] ss:$16 sps:$4 sm:$0xff]  }
 0x396   : > { %v9766_v58 = vadd.f32 %v9765_v32, %v9764_v24  ;;  %v12995_v24 = vadd.f32 %v12966_v49, %v12973_v60  ;;  %v10245_v32 = vld [vmem:[#allocation11 + $0xc8] ss:$16 sps:$4 sm:$0xff]  }
 0x397   : > { %v5662_v29 = vadd.f32 %v9648_v6, %v12891_v14  ;;  %v12988_v14 = vadd.f32 %v12961_v15, %v12970_v7  ;;  %v10244_v6 = vld [vmem:[#allocation11 + $0xac] ss:$16 sps:$4 sm:$0xff]   ;;  %v13000_v19 = vadd.f32 %v12976_v5, %v5659_v41 }
 0x398   : > { %6612 = vmatprep.subr.bf16.mxu1 %v10244_v6 }
 0x399   : > { %6613 = vmatpush1.bf16.msra.mxu1 %v10242_v3 }
 0x39a   : > { %6614 = vmatprep.subr.bf16.mxu1 %v10247_v12 }
 0x39b   : > { %v9649_v0 = vpop.f32.mrb[76].mxu1 }
 0x39c   : > { %v9650_v51 = vpop.f32.mrb[77].mxu1  ;;  %v9767_v30 = vpop.f32.mrb[112].mxu0 }
 0x39d   : > { %v9651_v2 = vadd.f32 %v9650_v51, %v9649_v0  ;;  %v9652_v42 = vpop.f32.mrb[78].mxu1  ;;  %v9768_v11 = vpop.f32.mrb[113].mxu0  ;;  %6615 = vmatpush1.bf16.msra.mxu1 %v10245_v32 }
 0x39e   : > { %v9653_v48 = vpop.f32.mrb[79].mxu1  ;;  %v9769_v46 = vadd.f32 %v9768_v11, %v9767_v30  ;;  %v9770_v36 = vpop.f32.mrb[114].mxu0  ;;  %v10250_v30 = vld [vmem:[#allocation11 + $0xec] ss:$16 sps:$4 sm:$0xff]  }
 0x39f   : > { %v5667_v27 = vadd.f32 %v9651_v2, %v12895_v17  ;;  %v9654_v10 = vadd.f32 %v9653_v48, %v9652_v42  ;;  %v9771_v13 = vpop.f32.mrb[115].mxu0  ;;  %v13006_v42 = vadd.f32 %v12979_v21, %v5662_v29  ;;  %6616 = vmatprep.subr.bf16.mxu1 %v10250_v30 }
 0x3a0   : > { %v9772_v52 = vadd.f32 %v9771_v13, %v9770_v36 }
 0x3a1   : > { %v5670_v33 = vadd.f32 %v9654_v10, %v12899_v55  ;;  %v12997_v45 = vadd.f32 %v9763_v28, %v5667_v27  ;;  %v10248_v28 = vld [vmem:[#allocation11 + $0xe8] ss:$16 sps:$4 sm:$0xff]   ;;  %v10253_v27 = vld [vmem:[#allocation12 + $0x4] ss:$16 sps:$4 sm:$0xff]  }
 0x3a2   : > { %6617 = vmatpush1.bf16.msra.mxu1 %v10248_v28  ;;  %7191 = vmatprep.subr.bf16.mxu0 %v10253_v27 }
 0x3a3   : > { %v9655_v17 = vpop.f32.mrb[80].mxu1  ;;  %v13003_v0 = vadd.f32 %v9766_v58, %v5670_v33 }
 0x3a4   : > { %v9656_v15 = vpop.f32.mrb[81].mxu1 }
 0x3a5   : > { %v9657_v7 = vadd.f32 %v9656_v15, %v9655_v17  ;;  %v9658_v26 = vpop.f32.mrb[82].mxu1 }
 0x3a6   : > { %v9773_v62 = vpop.f32.mrb[116].mxu0  ;;  %v9659_v55 = vpop.f32.mrb[83].mxu1 }
 0x3a7   : > { %v5675_v56 = vadd.f32 %v9657_v7, %v12903_v35  ;;  %v9774_v49 = vpop.f32.mrb[117].mxu0  ;;  %v9660_v60 = vadd.f32 %v9659_v55, %v9658_v26 }
 0x3a8   : > { %v9775_v51 = vadd.f32 %v9774_v49, %v9773_v62  ;;  %v9776_v2 = vpop.f32.mrb[118].mxu0 }
 0x3a9   : > { %v5678_v11 = vadd.f32 %v9660_v60, %v12907_v59  ;;  %v9777_v48 = vpop.f32.mrb[119].mxu0  ;;  %v13009_v10 = vadd.f32 %v9769_v46, %v5675_v56 }
 0x3aa   : > { %v9778_v5 = vadd.f32 %v9777_v48, %v9776_v2 }
 0x3ab   : > { %v13011_v6 = vadd.f32 %v9772_v52, %v5678_v11  ;;  %v13019_v52 = vld [vmem:[#allocation12 + $0xc] ss:$16 sps:$4 sm:$0xff]  }
 0x3ac   : > { %9951 = vmatprep.subr.bf16.mxu1 %v13019_v52 }
 0x3ad   : > { %v9661_v35 = vpop.f32.mrb[84].mxu1 }
 0x3ae   : > { %v9662_v41 = vpop.f32.mrb[85].mxu1 }
 0x3af   : > { %v9663_v58 = vadd.f32 %v9662_v41, %v9661_v35  ;;  %v9779_v36 = vpop.f32.mrb[120].mxu0  ;;  %v9664_v13 = vpop.f32.mrb[86].mxu1 }
 0x3b0   : > { %v9780_v33 = vpop.f32.mrb[121].mxu0  ;;  %v9665_v3 = vpop.f32.mrb[87].mxu1 }
 0x3b1   : > { %v5683_v21 = vadd.f32 %v9663_v58, %v12913_v40  ;;  %v9781_v59 = vadd.f32 %v9780_v33, %v9779_v36  ;;  %v9666_v29 = vadd.f32 %v9665_v3, %v9664_v13  ;;  %v9782_v17 = vpop.f32.mrb[122].mxu0 }
 0x3b2   : > { %v9783_v32 = vpop.f32.mrb[123].mxu0 }
 0x3b3   : > { %v5686_v12 = vadd.f32 %v9666_v29, %v12917_v25  ;;  %v9784_v15 = vadd.f32 %v9783_v32, %v9782_v17  ;;  %v13015_v7 = vadd.f32 %v9775_v51, %v5683_v21 }
 0x3b5   : > { %v13017_v46 = vadd.f32 %v9778_v5, %v5686_v12 }
 0x3b7   : > { %v9667_v26 = vpop.f32.mrb[88].mxu1 }
 0x3b8   : > { %v9668_v62 = vpop.f32.mrb[89].mxu1 }
 0x3b9   : > { %v9669_v55 = vadd.f32 %v9668_v62, %v9667_v26  ;;  %v9785_v56 = vpop.f32.mrb[124].mxu0  ;;  %v9670_v49 = vpop.f32.mrb[90].mxu1 }
 0x3ba   : > { %v9786_v60 = vpop.f32.mrb[125].mxu0  ;;  %v9671_v40 = vpop.f32.mrb[91].mxu1 }
 0x3bb   : > { %v5691_v2 = vadd.f32 %v9669_v55, %v12921_v44  ;;  %v9787_v28 = vadd.f32 %v9786_v60, %v9785_v56  ;;  %v9672_v30 = vadd.f32 %v9671_v40, %v9670_v49  ;;  %v9788_v11 = vpop.f32.mrb[126].mxu0 }
 0x3bc   : > { %v9789_v25 = vpop.f32.mrb[127].mxu0 }
 0x3bd   : > { %v5694_v51 = vadd.f32 %v9672_v30, %v12925_v38  ;;  %v9790_v48 = vadd.f32 %v9789_v25, %v9788_v11  ;;  %v13024_v27 = vadd.f32 %v9781_v59, %v5691_v2 }
 0x3bf   : > { %v13026_v35 = vadd.f32 %v9784_v15, %v5694_v51 }
 0x3c0   : > { %v9673_v5 = vpop.f32.mrb[92].mxu1 }
 0x3c1   : > { %v9674_v41 = vpop.f32.mrb[93].mxu1 }
 0x3c2   : > { %v9675_v58 = vadd.f32 %v9674_v41, %v9673_v5  ;;  %v9676_v36 = vpop.f32.mrb[94].mxu1 }
 0x3c3   : > { %v9677_v13 = vpop.f32.mrb[95].mxu1  ;;  %v9791_v33 = vpop.f32.mrb[128].mxu0 }
 0x3c4   : > { %v5699_v44 = vadd.f32 %v9675_v58, %v12755_v61  ;;  %v9678_v3 = vadd.f32 %v9677_v13, %v9676_v36  ;;  %v9792_v21 = vpop.f32.mrb[129].mxu0 }
 0x3c5   : > { %v9793_v29 = vadd.f32 %v9792_v21, %v9791_v33  ;;  %v9794_v32 = vpop.f32.mrb[130].mxu0 }
 0x3c6   : > { %v5702_v17 = vadd.f32 %v9678_v3, %v12757_v39  ;;  %v13030_v38 = vadd.f32 %v9787_v28, %v5699_v44  ;;  %v9795_v59 = vpop.f32.mrb[131].mxu0 }
 0x3c7   : > { %v9796_v12 = vadd.f32 %v9795_v59, %v9794_v32 }
 0x3c8   : > { %v13032_v26 = vadd.f32 %v9790_v48, %v5702_v17 }
 0x3c9   : > { %v9679_v15 = vpop.f32.mrb[96].mxu1 }
 0x3ca   : > { %v9680_v62 = vpop.f32.mrb[97].mxu1 }
 0x3cb   : > { %v9681_v55 = vadd.f32 %v9680_v62, %v9679_v15  ;;  %v9682_v49 = vpop.f32.mrb[98].mxu1 }
 0x3cc   : > { %v9797_v56 = vpop.f32.mrb[132].mxu0  ;;  %v9683_v61 = vpop.f32.mrb[99].mxu1 }
 0x3cd   : > { %v9798_v60 = vpop.f32.mrb[133].mxu0  ;;  %v5707_v40 = vadd.f32 %v9681_v55, %v12779_v22  ;;  %v9684_v30 = vadd.f32 %v9683_v61, %v9682_v49 }
 0x3ce   : > { %v9799_v2 = vadd.f32 %v9798_v60, %v9797_v56  ;;  %v9800_v11 = vpop.f32.mrb[134].mxu0 }
 0x3cf   : > { %v9801_v39 = vpop.f32.mrb[135].mxu0  ;;  %v5710_v28 = vadd.f32 %v9684_v30, %v12781_v34  ;;  %v13036_v51 = vadd.f32 %v9793_v29, %v5707_v40 }
 0x3d0   : > { %v9802_v25 = vadd.f32 %v9801_v39, %v9800_v11 }
 0x3d1   : > { %v13038_v48 = vadd.f32 %v9796_v12, %v5710_v28 }
 0x3d3   : > { %v9685_v5 = vpop.f32.mrb[100].mxu1 }
 0x3d4   : > { %v9686_v41 = vpop.f32.mrb[101].mxu1 }
 0x3d5   : > { %v9687_v58 = vadd.f32 %v9686_v41, %v9685_v5  ;;  %v9803_v36 = vpop.f32.mrb[136].mxu0  ;;  %v9688_v13 = vpop.f32.mrb[102].mxu1 }
 0x3d6   : > { %v9804_v44 = vpop.f32.mrb[137].mxu0  ;;  %v9689_v33 = vpop.f32.mrb[103].mxu1 }
 0x3d7   : > { %v5715_v22 = vadd.f32 %v9687_v58, %v12789_v57  ;;  %v9805_v3 = vadd.f32 %v9804_v44, %v9803_v36  ;;  %v9690_v21 = vadd.f32 %v9689_v33, %v9688_v13  ;;  %v9806_v17 = vpop.f32.mrb[138].mxu0 }
 0x3d8   : > { %v9807_v32 = vpop.f32.mrb[139].mxu0 }
 0x3d9   : > { %v5718_v34 = vadd.f32 %v9690_v21, %v12793_v43  ;;  %v9808_v59 = vadd.f32 %v9807_v32, %v9806_v17  ;;  %v13042_v29 = vadd.f32 %v9799_v2, %v5715_v22 }
 0x3db   : > { %v13044_v12 = vadd.f32 %v9802_v25, %v5718_v34 }
 0x3dd   : > { %v9691_v15 = vpop.f32.mrb[104].mxu1 }
 0x3de   : > { %v9692_v62 = vpop.f32.mrb[105].mxu1 }
 0x3df   : > { %v9693_v55 = vadd.f32 %v9692_v62, %v9691_v15  ;;  %v9809_v56 = vpop.f32.mrb[140].mxu0  ;;  %v9694_v49 = vpop.f32.mrb[106].mxu1 }
 0x3e0   : > { %v9810_v60 = vpop.f32.mrb[141].mxu0  ;;  %v9695_v61 = vpop.f32.mrb[107].mxu1 }
 0x3e1   : > { %v5723_v57 = vadd.f32 %v9693_v55, %v12801_v54  ;;  %v9811_v40 = vadd.f32 %v9810_v60, %v9809_v56  ;;  %v9696_v30 = vadd.f32 %v9695_v61, %v9694_v49  ;;  %v9812_v11 = vpop.f32.mrb[142].mxu0 }
 0x3e2   : > { %v9813_v39 = vpop.f32.mrb[143].mxu0 }
 0x3e3   : > { %v5726_v43 = vadd.f32 %v9696_v30, %v12811_v47  ;;  %v9814_v28 = vadd.f32 %v9813_v39, %v9812_v11  ;;  %v13048_v2 = vadd.f32 %v9805_v3, %v5723_v57 }
 0x3e5   : > { %v13050_v25 = vadd.f32 %v9808_v59, %v5726_v43 }
 0x3e8   : > { %v9697_v5 = vpop.f32.mrb[108].mxu1 }
 0x3e9   : > { %v9698_v41 = vpop.f32.mrb[109].mxu1  ;;  %v9815_v58 = vpop.f32.mrb[144].mxu0 }
 0x3ea   : > { %v9699_v36 = vadd.f32 %v9698_v41, %v9697_v5  ;;  %v9700_v13 = vpop.f32.mrb[110].mxu1  ;;  %v9816_v44 = vpop.f32.mrb[145].mxu0 }
 0x3eb   : > { %v9817_v33 = vadd.f32 %v9816_v44, %v9815_v58  ;;  %v9701_v22 = vpop.f32.mrb[111].mxu1  ;;  %v9818_v54 = vpop.f32.mrb[146].mxu0 }
 0x3ec   : > { %v5731_v21 = vadd.f32 %v9699_v36, %v12823_v37  ;;  %v9702_v17 = vadd.f32 %v9701_v22, %v9700_v13  ;;  %v9819_v32 = vpop.f32.mrb[147].mxu0 }
 0x3ed   : > { %v9820_v34 = vadd.f32 %v9819_v32, %v9818_v54 }
 0x3ee   : > { %v5734_v47 = vadd.f32 %v9702_v17, %v12825_v1  ;;  %v13054_v3 = vadd.f32 %v9811_v40, %v5731_v21 }
 0x3f0   : > { %v13056_v59 = vadd.f32 %v9814_v28, %v5734_v47 }
 0x3f2   : > { %v9703_v15 = vpop.f32.mrb[112].mxu1 }
 0x3f3   : > { %v9704_v62 = vpop.f32.mrb[113].mxu1 }
 0x3f4   : > { %v9821_v55 = vpop.f32.mrb[148].mxu0  ;;  %v9705_v56 = vadd.f32 %v9704_v62, %v9703_v15  ;;  %v9706_v49 = vpop.f32.mrb[114].mxu1 }
 0x3f5   : > { %v9822_v60 = vpop.f32.mrb[149].mxu0  ;;  %v9707_v57 = vpop.f32.mrb[115].mxu1 }
 0x3f6   : > { %v9823_v61 = vadd.f32 %v9822_v60, %v9821_v55  ;;  %v9824_v30 = vpop.f32.mrb[150].mxu0  ;;  %v5739_v37 = vadd.f32 %v9705_v56, %v12887_v8  ;;  %v9708_v11 = vadd.f32 %v9707_v57, %v9706_v49 }
 0x3f7   : > { %v9825_v39 = vpop.f32.mrb[151].mxu0 }
 0x3f8   : > { %v9826_v43 = vadd.f32 %v9825_v39, %v9824_v30  ;;  %v5742_v1 = vadd.f32 %v9708_v11, %v12909_v4  ;;  %v13060_v40 = vadd.f32 %v9817_v33, %v5739_v37 }
 0x3fa   : > { %v13062_v28 = vadd.f32 %v9820_v34, %v5742_v1 }
 0x3fe   : > { %v9709_v5 = vpop.f32.mrb[116].mxu1 }
 0x3ff   : > { %v9710_v41 = vpop.f32.mrb[117].mxu1  ;;  %v9827_v36 = vpop.f32.mrb[152].mxu0 }
 0x400   : > { %v9711_v58 = vadd.f32 %v9710_v41, %v9709_v5  ;;  %v9712_v13 = vpop.f32.mrb[118].mxu1  ;;  %v9828_v44 = vpop.f32.mrb[153].mxu0 }
 0x401   : > { %v9713_v22 = vpop.f32.mrb[119].mxu1  ;;  %v9829_v21 = vadd.f32 %v9828_v44, %v9827_v36  ;;  %v9830_v17 = vpop.f32.mrb[154].mxu0 }
 0x402   : > { %v5747_v54 = vadd.f32 %v9711_v58, %v12932_v18  ;;  %v9714_v8 = vadd.f32 %v9713_v22, %v9712_v13  ;;  %v9831_v32 = vpop.f32.mrb[155].mxu0 }
 0x403   : > { %v9832_v4 = vadd.f32 %v9831_v32, %v9830_v17  ;;  %v13080_v17 = vld [vmem:[#allocation9] ss:$0 sm:$0xff] }
 0x404   : > { %v5750_v47 = vadd.f32 %v9714_v8, %v12942_v53  ;;  %v13066_v33 = vadd.f32 %v9823_v61, %v5747_v54 }
 0x406   : > { %v13068_v34 = vadd.f32 %v9826_v43, %v5750_v47  ;;  %v13088_v47 = vld [vmem:[%s14829_s6] ss:$0 sm:$0xff] }
 0x409   : > { %v9715_v15 = vpop.f32.mrb[120].mxu1  ;;  %v9833_v55 = vpop.f32.mrb[156].mxu0 }
 0x40a   : > { %v9716_v62 = vpop.f32.mrb[121].mxu1  ;;  %v9834_v60 = vpop.f32.mrb[157].mxu0 }
 0x40b   : > { %v9717_v56 = vadd.f32 %v9716_v62, %v9715_v15  ;;  %v9718_v49 = vpop.f32.mrb[122].mxu1  ;;  %v9835_v57 = vadd.f32 %v9834_v60, %v9833_v55  ;;  %v9836_v18 = vpop.f32.mrb[158].mxu0 }
 0x40c   : > { %v9719_v30 = vpop.f32.mrb[123].mxu1  ;;  %v9837_v39 = vpop.f32.mrb[159].mxu0 }
 0x40d   : > { %v5755_v37 = vadd.f32 %v9717_v56, %v12946_v16  ;;  %v9720_v11 = vadd.f32 %v9719_v30, %v9718_v49  ;;  %v9838_v1 = vadd.f32 %v9837_v39, %v9836_v18 }
 0x40f   : > { %v5758_v53 = vadd.f32 %v9720_v11, %v12952_v9  ;;  %v13072_v61 = vadd.f32 %v9829_v21, %v5755_v37 }
 0x411   : > { %v9721_v43 = vpop.f32.mrb[124].mxu1  ;;  %v13074_v5 = vadd.f32 %v9832_v4, %v5758_v53 }
 0x412   : > { %v9722_v41 = vpop.f32.mrb[125].mxu1 }
 0x413   : > { %v9723_v58 = vadd.f32 %v9722_v41, %v9721_v43  ;;  %v9724_v36 = vpop.f32.mrb[126].mxu1 }
 0x414   : > { %v9725_v13 = vpop.f32.mrb[127].mxu1 }
 0x415   : > { %v5763_v44 = vadd.f32 %v9723_v58, %v12957_v63  ;;  %v9726_v22 = vadd.f32 %v9725_v13, %v9724_v36  ;;  %v10251_v13 = vld [vmem:[#allocation12] ss:$16 sps:$4 sm:$0xff]  }
 0x417   : > { %v5766_v54 = vadd.f32 %v9726_v22, %v12959_v31  ;;  %v13078_v16 = vadd.f32 %v9835_v57, %v5763_v44 }
 0x419   : > { %v9921_v8 = vpop.f32.mrb[128].mxu1  ;;  %v13082_v9 = vadd.f32 %v9838_v1, %v5766_v54 }
 0x41a   : > { %v5973_v21 = vadd.f32 %v9921_v8, %v12982_v23  ;;  %v5964_v32 = vpop.f32.mrb[129].mxu1 }
 0x41b   : > { %v5965_v63 = vadd.f32 %v5964_v32, %v12988_v14  ;;  %v9922_v4 = vpop.f32.mrb[130].mxu1 }
 0x41c   : > { %v6100_v31 = vmul.f32 %v13080_v17, %v5973_v21  ;;  %v5976_v15 = vadd.f32 %v9922_v4, %v12990_v50  ;;  %v5967_v62 = vpop.f32.mrb[131].mxu1  ;;  %v13107_v21 = vld [vmem:[#allocation12 + $0x8] ss:$16 sps:$4 sm:$0xff]  }
 0x41d   : > { %v6098_v55 = vmul.f32 %v13080_v17, %v5965_v63  ;;  %v5968_v56 = vadd.f32 %v5967_v62, %v12995_v24  ;;  %v13111_v63 = vld [vmem:[#allocation12 + $0x2c] ss:$16 sps:$4 sm:$0xff]  }
 0x41e   : > { %v6139_v23 = vadd.f32 %v13088_v47, %v6100_v31  ;;  %v6101_v49 = vmul.f32 %v13080_v17, %v5976_v15 }
 0x41f   : > { %v6137_v60 = vadd.f32 %v13088_v47, %v6098_v55  ;;  %v6099_v57 = vmul.f32 %v13080_v17, %v5968_v56  ;;  %v13120_v55 = vld [vmem:[#allocation12 + $0x28] ss:$16 sps:$4 sm:$0xff]   ;;  %v10265_v56 = vld [vmem:[#allocation12 + $0x44] ss:$16 sps:$4 sm:$0xff]  }
 0x420   : > { %v6140_v14 = vadd.f32 %v13088_v47, %v6101_v49  ;;  %v6171_v37 = vmax.f32 %v6139_v23, 0.0 }
 0x421   : > { %v6138_v30 = vadd.f32 %v13088_v47, %v6099_v57  ;;  %v9925_v18 = vpop.f32.mrb[132].mxu1  ;;  %v6169_v1 = vmax.f32 %v6137_v60, 0.0 }
 0x422   : > { %v6172_v50 = vmax.f32 %v6140_v14, 0.0  ;;  %v5989_v11 = vadd.f32 %v9925_v18, %v12997_v45  ;;  %v5980_v39 = vpop.f32.mrb[133].mxu1  ;;  %v13124_v14 = vld [vmem:[#allocation12 + $0x4c] ss:$16 sps:$4 sm:$0xff]  }
 0x423   : > { %v6170_v24 = vmax.f32 %v6138_v30, 0.0  ;;  %v5981_v53 = vadd.f32 %v5980_v39, %v13000_v19  ;;  %v9926_v43 = vpop.f32.mrb[134].mxu1  ;;  %v10259_v19 = vld [vmem:[#allocation12 + $0x24] ss:$16 sps:$4 sm:$0xff]  }
 0x424   : > { %v6104_v41 = vmul.f32 %v13080_v17, %v5989_v11  ;;  %v5992_v58 = vadd.f32 %v9926_v43, %v13003_v0  ;;  %v5983_v36 = vpop.f32.mrb[135].mxu1  ;;  %v6202_v44 = vpack.c.bf16 %v6172_v50, %v6171_v37 }
 0x425   : > { %v6201_v22 = vpack.c.bf16 %v6170_v24, %v6169_v1  ;;  %v6102_v54 = vmul.f32 %v13080_v17, %v5981_v53  ;;  %v5984_v8 = vadd.f32 %v5983_v36, %v13006_v42  ;;  %v10257_v42 = vld [vmem:[#allocation12 + $0x20] ss:$16 sps:$4 sm:$0xff]  }
 0x426   : > { %v6143_v45 = vadd.f32 %v13088_v47, %v6104_v41  ;;  %v6105_v32 = vmul.f32 %v13080_v17, %v5992_v58  ;;  %v10263_v41 = vld [vmem:[#allocation12 + $0x40] ss:$16 sps:$4 sm:$0xff]   ;;  %v13134_v58 = vld [vmem:[#allocation12 + $0x48] ss:$16 sps:$4 sm:$0xff]  }
 0x427   : > { %v6141_v4 = vadd.f32 %v13088_v47, %v6102_v54  ;;  %v6103_v0 = vmul.f32 %v13080_v17, %v5984_v8  ;;  %6442 = vmatmul.mubr.bf16.vlgmr.msra.gmra.mrb[160].mxu0 %v6201_v22  ;;  %6635 = vmatmul.mubr.bf16.vlgmr.msra.gmra.mrb[160].mxu1 %v6201_v22 }
 0x428   : > { %v6144_v31 = vadd.f32 %v13088_v47, %v6105_v32  ;;  %7192 = vmatpush1.bf16.msra.mxu0 %v10251_v13  ;;  %6451 = vmatprep.mubr.bf16.mxu0 %v15024_v20  ;;  %v6175_v23 = vmax.f32 %v6143_v45, 0.0  ;;  %v13139_v13 = vld [vmem:[#allocation12 + $0x6c] ss:$16 sps:$4 sm:$0xff]   ;;  %v10269_v32 = vld [vmem:[#allocation12 + $0x60] ss:$16 sps:$4 sm:$0xff]  }
 0x429   : > { %v6142_v15 = vadd.f32 %v13088_v47, %v6103_v0  ;;  %v9929_v62 = vpop.f32.mrb[136].mxu1  ;;  %6644 = vmatprep.mubr.bf16.mxu1 %v15024_v20  ;;  %9955 = vmatpush1.bf16.msra.mxu1 %v13107_v21  ;;  %v6173_v30 = vmax.f32 %v6141_v4, 0.0 }
 0x42a   : > { %v6176_v49 = vmax.f32 %v6144_v31, 0.0  ;;  %v6005_v60 = vadd.f32 %v9929_v62, %v13015_v7  ;;  %v5996_v57 = vpop.f32.mrb[137].mxu1  ;;  %7193 = vmatprep.subr.bf16.mxu0 %v10259_v19  ;;  %9952 = vmatprep.subr.bf16.mxu1 %v13111_v63  ;;  %v13148_v19 = vld [vmem:[#allocation12 + $0x68] ss:$16 sps:$4 sm:$0xff]  }
 0x42b   : > { %v6174_v18 = vmax.f32 %v6142_v15, 0.0  ;;  %v5997_v37 = vadd.f32 %v5996_v57, %v13009_v10  ;;  %v9930_v50 = vpop.f32.mrb[138].mxu1 }
 0x42c   : > { %v6108_v11 = vmul.f32 %v13080_v17, %v6005_v60  ;;  %v6008_v39 = vadd.f32 %v9930_v50, %v13017_v46  ;;  %v5999_v1 = vpop.f32.mrb[139].mxu1  ;;  %v13129_v24 = vpack.c.bf16 %v6176_v49, %v6175_v23  ;;  %7194 = vmatpush1.bf16.msra.mxu0 %v10257_v42  ;;  %v10271_v46 = vld [vmem:[#allocation12 + $0x64] ss:$16 sps:$4 sm:$0xff]  }
 0x42d   : > { %v6106_v7 = vmul.f32 %v13080_v17, %v5997_v37  ;;  %v6000_v53 = vadd.f32 %v5999_v1, %v13011_v6  ;;  %v6203_v43 = vpack.c.bf16 %v6174_v18, %v6173_v30  ;;  %9956 = vmatpush1.bf16.msra.mxu1 %v13120_v55  ;;  %7195 = vmatprep.subr.bf16.mxu0 %v10265_v56 }
 0x42e   : > { %v6147_v10 = vadd.f32 %v13088_v47, %v6108_v11  ;;  %v6109_v36 = vmul.f32 %v13080_v17, %v6008_v39  ;;  %9953 = vmatprep.subr.bf16.mxu1 %v13124_v14 }
 0x42f   : > { %v6145_v22 = vadd.f32 %v13088_v47, %v6106_v7  ;;  %v6107_v6 = vmul.f32 %v13080_v17, %v6000_v53  ;;  %6452 = vmatmul.mubr.bf16.gmra.mrb[164].mxu0 %v6202_v44  ;;  %6645 = vmatmul.mubr.bf16.gmra.mrb[164].mxu1 %v6202_v44 }
 0x430   : > { %v6148_v54 = vadd.f32 %v13088_v47, %v6109_v36  ;;  %6461 = vmatprep.mubr.bf16.mxu0 %v15024_v20  ;;  %6654 = vmatprep.mubr.bf16.mxu1 %v15024_v20  ;;  %v6179_v4 = vmax.f32 %v6147_v10, 0.0 }
 0x431   : > { %v6146_v8 = vadd.f32 %v13088_v47, %v6107_v6  ;;  %v9933_v45 = vpop.f32.mrb[140].mxu1  ;;  %7196 = vmatpush1.bf16.msra.mxu0 %v10263_v41  ;;  %9957 = vmatpush1.bf16.msra.mxu1 %v13134_v58  ;;  %v6177_v42 = vmax.f32 %v6145_v22, 0.0 }
 0x432   : > { %v6180_v0 = vmax.f32 %v6148_v54, 0.0  ;;  %v6021_v31 = vadd.f32 %v9933_v45, %v13030_v38  ;;  %v6012_v44 = vpop.f32.mrb[141].mxu1  ;;  %7197 = vmatprep.subr.bf16.mxu0 %v10271_v46  ;;  %9954 = vmatprep.subr.bf16.mxu1 %v13139_v13 }
 0x433   : > { %v6178_v15 = vmax.f32 %v6146_v8, 0.0  ;;  %v6013_v62 = vadd.f32 %v6012_v44, %v13024_v27  ;;  %v9934_v56 = vpop.f32.mrb[142].mxu1 }
 0x434   : > { %v6112_v23 = vmul.f32 %v13080_v17, %v6021_v31  ;;  %v6024_v49 = vadd.f32 %v9934_v56, %v13032_v26  ;;  %v6015_v60 = vpop.f32.mrb[143].mxu1  ;;  %v13155_v57 = vpack.c.bf16 %v6180_v0, %v6179_v4 }
 0x435   : > { %v6110_v30 = vmul.f32 %v13080_v17, %v6013_v62  ;;  %v6016_v38 = vadd.f32 %v6015_v60, %v13026_v35  ;;  %v6205_v18 = vpack.c.bf16 %v6178_v15, %v6177_v42  ;;  %7198 = vmatpush1.bf16.msra.mxu0 %v10269_v32  ;;  %9958 = vmatpush1.bf16.msra.mxu1 %v13148_v19 }
 0x436   : > { %v6151_v37 = vadd.f32 %v13088_v47, %v6112_v23  ;;  %v6113_v27 = vmul.f32 %v13080_v17, %v6024_v49  ;;  %7384 = vmatprep.subr.bf16.mxu0 %v13019_v52 }
 0x437   : > { %v6149_v50 = vadd.f32 %v13088_v47, %v6110_v30  ;;  %v6111_v26 = vmul.f32 %v13080_v17, %v6016_v38  ;;  %6462 = vmatmul.mubr.bf16.gmra.mrb[168].mxu0 %v6203_v43  ;;  %6655 = vmatmul.mubr.bf16.gmra.mrb[168].mxu1 %v6203_v43 }
 0x438   : > { %v6152_v11 = vadd.f32 %v13088_v47, %v6113_v27  ;;  %6471 = vmatprep.mubr.bf16.mxu0 %v15024_v20  ;;  %6664 = vmatprep.mubr.bf16.mxu1 %v15024_v20  ;;  %v6183_v1 = vmax.f32 %v6151_v37, 0.0 }
 0x439   : > { %v6150_v35 = vadd.f32 %v13088_v47, %v6111_v26  ;;  %v9937_v39 = vpop.f32.mrb[144].mxu1  ;;  %v6181_v41 = vmax.f32 %v6149_v50, 0.0 }
 0x43a   : > { %v6184_v7 = vmax.f32 %v6152_v11, 0.0  ;;  %v6037_v53 = vadd.f32 %v9937_v39, %v13042_v29  ;;  %v6028_v52 = vpop.f32.mrb[145].mxu1 }
 0x43b   : > { %v6182_v10 = vmax.f32 %v6150_v35, 0.0  ;;  %v6029_v36 = vadd.f32 %v6028_v52, %v13036_v51  ;;  %v9938_v46 = vpop.f32.mrb[146].mxu1 }
 0x43c   : > { %v6116_v43 = vmul.f32 %v13080_v17, %v6037_v53  ;;  %v6040_v22 = vadd.f32 %v9938_v46, %v13044_v12  ;;  %v6031_v6 = vpop.f32.mrb[147].mxu1  ;;  %v13173_v54 = vpack.c.bf16 %v6184_v7, %v6183_v1 }
 0x43d   : > { %v6114_v8 = vmul.f32 %v13080_v17, %v6029_v36  ;;  %v6032_v45 = vadd.f32 %v6031_v6, %v13038_v48  ;;  %v13177_v32 = vpack.c.bf16 %v6182_v10, %v6181_v41 }
 0x43e   : > { %v6155_v29 = vadd.f32 %v13088_v47, %v6116_v43  ;;  %v6117_v4 = vmul.f32 %v13080_v17, %v6040_v22 }
 0x43f   : > { %v6153_v51 = vadd.f32 %v13088_v47, %v6114_v8  ;;  %v6115_v0 = vmul.f32 %v13080_v17, %v6032_v45  ;;  %6472 = vmatmul.mubr.bf16.gmra.mrb[172].mxu0 %v13129_v24  ;;  %6665 = vmatmul.mubr.bf16.gmra.mrb[172].mxu1 %v13129_v24 }
 0x440   : > { %v6156_v12 = vadd.f32 %v13088_v47, %v6117_v4  ;;  %6481 = vmatprep.mubr.bf16.mxu0 %v15024_v20  ;;  %6674 = vmatprep.mubr.bf16.mxu1 %v15024_v20  ;;  %v6187_v44 = vmax.f32 %v6155_v29, 0.0 }
 0x441   : > { %v6154_v48 = vadd.f32 %v13088_v47, %v6115_v0  ;;  %v9941_v31 = vpop.f32.mrb[148].mxu1  ;;  %v6185_v56 = vmax.f32 %v6153_v51, 0.0 }
 0x442   : > { %v6188_v42 = vmax.f32 %v6156_v12, 0.0  ;;  %v6053_v15 = vadd.f32 %v9941_v31, %v13054_v3  ;;  %v6044_v62 = vpop.f32.mrb[149].mxu1 }
 0x443   : > { %v6186_v23 = vmax.f32 %v6154_v48, 0.0  ;;  %v6045_v49 = vadd.f32 %v6044_v62, %v13048_v2  ;;  %v9942_v60 = vpop.f32.mrb[150].mxu1 }
 0x444   : > { %v6120_v24 = vmul.f32 %v13080_v17, %v6053_v15  ;;  %v6056_v30 = vadd.f32 %v9942_v60, %v13056_v59  ;;  %v6047_v38 = vpop.f32.mrb[151].mxu1  ;;  %v13193_v37 = vpack.c.bf16 %v6188_v42, %v6187_v44 }
 0x445   : > { %v6118_v27 = vmul.f32 %v13080_v17, %v6045_v49  ;;  %v6048_v50 = vadd.f32 %v6047_v38, %v13050_v25  ;;  %v13197_v26 = vpack.c.bf16 %v6186_v23, %v6185_v56 }
 0x446   : > { %v6159_v3 = vadd.f32 %v13088_v47, %v6120_v24  ;;  %v6121_v11 = vmul.f32 %v13080_v17, %v6056_v30 }
 0x447   : > { %v6157_v2 = vadd.f32 %v13088_v47, %v6118_v27  ;;  %v6119_v35 = vmul.f32 %v13080_v17, %v6048_v50  ;;  %6482 = vmatmul.mubr.bf16.gmra.mrb[176].mxu0 %v6205_v18  ;;  %6675 = vmatmul.mubr.bf16.gmra.mrb[176].mxu1 %v6205_v18 }
 0x448   : > { %v6160_v59 = vadd.f32 %v13088_v47, %v6121_v11  ;;  %6491 = vmatprep.mubr.bf16.mxu0 %v15024_v20  ;;  %6684 = vmatprep.mubr.bf16.mxu1 %v15024_v20  ;;  %v6191_v1 = vmax.f32 %v6159_v3, 0.0 }
 0x449   : > { %v6158_v25 = vadd.f32 %v13088_v47, %v6119_v35  ;;  %v9945_v39 = vpop.f32.mrb[152].mxu1  ;;  %v6189_v41 = vmax.f32 %v6157_v2, 0.0 }
 0x44a   : > { %v6192_v7 = vmax.f32 %v6160_v59, 0.0  ;;  %v6069_v53 = vadd.f32 %v9945_v39, %v13066_v33  ;;  %v6060_v52 = vpop.f32.mrb[153].mxu1 }
 0x44b   : > { %v6190_v10 = vmax.f32 %v6158_v25, 0.0  ;;  %v6061_v36 = vadd.f32 %v6060_v52, %v13060_v40  ;;  %v9946_v46 = vpop.f32.mrb[154].mxu1 }
 0x44c   : > { %v6124_v18 = vmul.f32 %v13080_v17, %v6069_v53  ;;  %v6072_v43 = vadd.f32 %v9946_v46, %v13068_v34  ;;  %v6063_v22 = vpop.f32.mrb[155].mxu1  ;;  %v6212_v6 = vpack.c.bf16 %v6192_v7, %v6191_v1 }
 0x44d   : > { %v6122_v8 = vmul.f32 %v13080_v17, %v6061_v36  ;;  %v6064_v45 = vadd.f32 %v6063_v22, %v13062_v28  ;;  %v6211_v29 = vpack.c.bf16 %v6190_v10, %v6189_v41  ;;  %v10315_v36 = vld [vmem:[%s10898_s30 + $0x60] sm:$0xff]  }
 0x44e   : > { %v6163_v4 = vadd.f32 %v13088_v47, %v6124_v18  ;;  %v6125_v33 = vmul.f32 %v13080_v17, %v6072_v43 }
 0x44f   : > { %v6161_v51 = vadd.f32 %v13088_v47, %v6122_v8  ;;  %v6123_v40 = vmul.f32 %v13080_v17, %v6064_v45  ;;  %6492 = vmatmul.mubr.bf16.gmra.mrb[180].mxu0 %v13155_v57  ;;  %6685 = vmatmul.mubr.bf16.gmra.mrb[180].mxu1 %v13155_v57 }
 0x450   : > { %v6164_v34 = vadd.f32 %v13088_v47, %v6125_v33  ;;  %6501 = vmatprep.mubr.bf16.mxu0 %v15024_v20  ;;  %6694 = vmatprep.mubr.bf16.mxu1 %v15024_v20  ;;  %v6195_v12 = vmax.f32 %v6163_v4, 0.0  ;;  %v10316_v4 = vld [vmem:[%s10898_s30 + $0x68] sm:$0xff]  }
 0x451   : > { %v6162_v28 = vadd.f32 %v13088_v47, %v6123_v40  ;;  %v9949_v0 = vpop.f32.mrb[156].mxu1  ;;  %v6193_v42 = vmax.f32 %v6161_v51, 0.0 }
 0x452   : > { %v6196_v48 = vmax.f32 %v6164_v34, 0.0  ;;  %v6085_v31 = vadd.f32 %v9949_v0, %v13078_v16  ;;  %v6076_v44 = vpop.f32.mrb[157].mxu1 }
 0x453   : > { %v6194_v15 = vmax.f32 %v6162_v28, 0.0  ;;  %v6077_v62 = vadd.f32 %v6076_v44, %v13072_v61  ;;  %v9950_v56 = vpop.f32.mrb[158].mxu1 }
 0x454   : > { %v6128_v57 = vmul.f32 %v13080_v17, %v6085_v31  ;;  %v6088_v23 = vadd.f32 %v9950_v56, %v13082_v9  ;;  %v6079_v49 = vpop.f32.mrb[159].mxu1  ;;  %v6214_v60 = vpack.c.bf16 %v6196_v48, %v6195_v12  ;;  %v10317_v31 = vld [vmem:[%s10898_s30 + $0x70] sm:$0xff]  }
 0x455   : > { %v6126_v24 = vmul.f32 %v13080_v17, %v6077_v62  ;;  %v6080_v30 = vadd.f32 %v6079_v49, %v13074_v5  ;;  %v6213_v38 = vpack.c.bf16 %v6194_v15, %v6193_v42 }
 0x456   : > { %v6167_v27 = vadd.f32 %v13088_v47, %v6128_v57  ;;  %v6129_v16 = vmul.f32 %v13080_v17, %v6088_v23 }
 0x457   : > { %v6165_v50 = vadd.f32 %v13088_v47, %v6126_v24  ;;  %v6127_v61 = vmul.f32 %v13080_v17, %v6080_v30  ;;  %6502 = vmatmul.mubr.bf16.gmra.mrb[184].mxu0 %v13177_v32  ;;  %6695 = vmatmul.mubr.bf16.gmra.mrb[184].mxu1 %v13177_v32  ;;  %v13264_v17 = vld [vmem:[%s10898_s30] sm:$0xff]   ;;  %v10313_v32 = vld [vmem:[%s10898_s30 + $0x50] sm:$0xff]  }
 0x458   : > { %v6168_v9 = vadd.f32 %v13088_v47, %v6129_v16  ;;  %6511 = vmatprep.mubr.bf16.mxu0 %v15024_v20  ;;  %6704 = vmatprep.mubr.bf16.mxu1 %v15024_v20  ;;  %v6199_v3 = vmax.f32 %v6167_v27, 0.0 }
 0x459   : > { %v6166_v5 = vadd.f32 %v13088_v47, %v6127_v61  ;;  %v6197_v2 = vmax.f32 %v6165_v50, 0.0  ;;  %v10304_v47 = vld [vmem:[%s10898_s30 + $0x8] sm:$0xff]  }
 0x45a   : > { %v6200_v11 = vmax.f32 %v6168_v9, 0.0 }
 0x45b   : > { %v6198_v35 = vmax.f32 %v6166_v5, 0.0 }
 0x45c   : > { %v6216_v59 = vpack.c.bf16 %v6200_v11, %v6199_v3 }
 0x45d   : > { %v6215_v25 = vpack.c.bf16 %v6198_v35, %v6197_v2 }
 0x45f   : > { %6512 = vmatmul.mubr.bf16.gmra.mrb[188].mxu0 %v13173_v54  ;;  %6705 = vmatmul.mubr.bf16.gmra.mrb[188].mxu1 %v13173_v54  ;;  %v10305_v54 = vld [vmem:[%s10898_s30 + $0x10] sm:$0xff]  }
 0x460   : > { %6521 = vmatprep.mubr.bf16.mxu0 %v15024_v20  ;;  %6714 = vmatprep.mubr.bf16.mxu1 %v15024_v20 }
 0x467   : > { %6522 = vmatmul.mubr.bf16.gmra.mrb[192].mxu0 %v13197_v26  ;;  %6715 = vmatmul.mubr.bf16.gmra.mrb[192].mxu1 %v13197_v26 }
 0x468   : > { %6531 = vmatprep.mubr.bf16.mxu0 %v15024_v20  ;;  %6724 = vmatprep.mubr.bf16.mxu1 %v15024_v20 }
 0x46f   : > { %6532 = vmatmul.mubr.bf16.gmra.mrb[196].mxu0 %v13193_v37  ;;  %6725 = vmatmul.mubr.bf16.gmra.mrb[196].mxu1 %v13193_v37  ;;  %v10314_v37 = vld [vmem:[%s10898_s30 + $0x58] sm:$0xff]  }
 0x470   : > { %6541 = vmatprep.mubr.bf16.mxu0 %v15024_v20  ;;  %6734 = vmatprep.mubr.bf16.mxu1 %v15024_v20 }
 0x477   : > { %6542 = vmatmul.mubr.bf16.gmra.mrb[200].mxu0 %v6211_v29  ;;  %6735 = vmatmul.mubr.bf16.gmra.mrb[200].mxu1 %v6211_v29 }
 0x478   : > { %6551 = vmatprep.mubr.bf16.mxu0 %v15024_v20  ;;  %6744 = vmatprep.mubr.bf16.mxu1 %v15024_v20 }
 0x47f   : > { %6552 = vmatmul.mubr.bf16.gmra.mrb[204].mxu0 %v6212_v6  ;;  %6745 = vmatmul.mubr.bf16.gmra.mrb[204].mxu1 %v6212_v6 }
 0x480   : > { %6561 = vmatprep.mubr.bf16.mxu0 %v15024_v20  ;;  %6754 = vmatprep.mubr.bf16.mxu1 %v15024_v20 }
 0x487   : > { %6562 = vmatmul.mubr.bf16.gmra.mrb[208].mxu0 %v6213_v38  ;;  %6755 = vmatmul.mubr.bf16.gmra.mrb[208].mxu1 %v6213_v38 }
 0x488   : > { %6571 = vmatprep.mubr.bf16.mxu0 %v15024_v20  ;;  %6764 = vmatprep.mubr.bf16.mxu1 %v15024_v20 }
 0x48f   : > { %6572 = vmatmul.mubr.bf16.gmra.mrb[212].mxu0 %v6214_v60  ;;  %6765 = vmatmul.mubr.bf16.gmra.mrb[212].mxu1 %v6214_v60  ;;  %v10318_v60 = vld [vmem:[%s10898_s30 + $0x78] sm:$0xff]  }
 0x490   : > { %6581 = vmatprep.mubr.bf16.mxu0 %v15024_v20  ;;  %6774 = vmatprep.mubr.bf16.mxu1 %v15024_v20 }
 0x497   : > { %6582 = vmatmul.mubr.bf16.gmra.mrb[216].mxu0 %v6215_v25  ;;  %6775 = vmatmul.mubr.bf16.gmra.mrb[216].mxu1 %v6215_v25 }
 0x498   : > { %6591 = vmatprep.mubr.bf16.mxu0 %v15024_v20  ;;  %6784 = vmatprep.mubr.bf16.mxu1 %v15024_v20 }
 0x49f   : > { %6592 = vmatmul.mubr.bf16.gmra.mrb[220].mxu0 %v6216_v59  ;;  %6785 = vmatmul.mubr.bf16.gmra.mrb[220].mxu1 %v6216_v59 }
 0x4a0   : > { %7223 = vmatprep.mubr.bf16.mxu0 %v15024_v20  ;;  %7426 = vmatprep.mubr.bf16.mxu1 %v15024_v20 }
 0x4a7   : > { %9169 = vmatmul.mubr.msk.bf16.vlgmr.msra.gmra.mrb[224].mxu0 %vm678_vm0, %v13264_v17  ;;  %9186 = vmatmul.mubr.msk.bf16.vlgmr.msra.gmra.mrb[224].mxu1 %vm678_vm0, %v10304_v47 }
 0x4a8   : > { %7385 = vmatpush1.bf16.msra.mxu0 %v13107_v21  ;;  %7233 = vmatprep.mubr.bf16.mxu0 %v15024_v20  ;;  %v10306_v21 = vld [vmem:[%s10898_s30 + $0x18] sm:$0xff]  }
 0x4a9   : > { %7436 = vmatprep.mubr.bf16.mxu1 %v15024_v20  ;;  %7386 = vmatprep.subr.bf16.mxu0 %v13111_v63  ;;  %v10307_v63 = vld [vmem:[%s10898_s30 + $0x20] sm:$0xff]  }
 0x4ac   : > { %7387 = vmatpush1.bf16.msra.mxu0 %v13120_v55  ;;  %v10308_v55 = vld [vmem:[%s10898_s30 + $0x28] sm:$0xff]  }
 0x4ad   : > { %7388 = vmatprep.subr.bf16.mxu0 %v13124_v14  ;;  %v10309_v14 = vld [vmem:[%s10898_s30 + $0x30] sm:$0xff]  }
 0x4af   : > { %9170 = vmatmul.mubr.msk.bf16.gmra.mrb[228].mxu0 %vm678_vm0, %v10304_v47  ;;  %9187 = vmatmul.mubr.msk.bf16.gmra.mrb[228].mxu1 %vm678_vm0, %v10305_v54 }
 0x4b0   : > { %7243 = vmatprep.mubr.bf16.mxu0 %v15024_v20  ;;  %7446 = vmatprep.mubr.bf16.mxu1 %v15024_v20 }
 0x4b1   : > { %7389 = vmatpush1.bf16.msra.mxu0 %v13134_v58  ;;  %v10310_v58 = vld [vmem:[%s10898_s30 + $0x38] sm:$0xff]  }
 0x4b2   : > { %7390 = vmatprep.subr.bf16.mxu0 %v13139_v13  ;;  %v10311_v13 = vld [vmem:[%s10898_s30 + $0x40] sm:$0xff]  }
 0x4b5   : > { %7391 = vmatpush1.bf16.msra.mxu0 %v13148_v19  ;;  %v10312_v19 = vld [vmem:[%s10898_s30 + $0x48] sm:$0xff]   ;;  %s8736_s30 = sshll.u32 %s10894_s9, 9 }
 0x4b6   : > { %s14257_s23 = scalar_lea.vmem [#allocation14], %s8736_s30 }
 0x4b7   : > { %9171 = vmatmul.mubr.msk.bf16.gmra.mrb[232].mxu0 %vm678_vm0, %v10305_v54  ;;  %9188 = vmatmul.mubr.msk.bf16.gmra.mrb[232].mxu1 %vm678_vm0, %v10306_v21  ;;  %s8596_s22 = sshll.u32 %s14257_s23, 4  ;;  %s14778_s22 = int_to_ptr.vmem [resolvable:$true] %s8596_s22 }
 0x4b8   : > { %7253 = vmatprep.mubr.bf16.mxu0 %v15024_v20  ;;  %7456 = vmatprep.mubr.bf16.mxu1 %v15024_v20  ;;  %s10489_s15 = scalar_lea.vmem %s14778_s22, 8192 }
 0x4b9   : > { %p10490_p7 = scmp.ne.s32.totalorder %s14778_s22, %s10489_s15 }
 0x4bb   : > { %p10491_p12 = pnand %p10490_p7, %p15327_p4 }
 0x4bd   : > { %p10492_p1 = pneg %p10491_p12 }
 0x4bf   : > { %9172 = vmatmul.mubr.msk.bf16.gmra.mrb[236].mxu0 %vm678_vm0, %v10306_v21  ;;  %9189 = vmatmul.mubr.msk.bf16.gmra.mrb[236].mxu1 %vm678_vm0, %v10307_v63 }
 0x4c0   : > { %7263 = vmatprep.mubr.bf16.mxu0 %v15024_v20  ;;  %7466 = vmatprep.mubr.bf16.mxu1 %v15024_v20 }
 0x4c7   : > { %9173 = vmatmul.mubr.msk.bf16.gmra.mrb[240].mxu0 %vm678_vm0, %v10307_v63  ;;  %9190 = vmatmul.mubr.msk.bf16.gmra.mrb[240].mxu1 %vm678_vm0, %v10308_v55 }
 0x4c8   : > { %7273 = vmatprep.mubr.bf16.mxu0 %v15024_v20  ;;  %7476 = vmatprep.mubr.bf16.mxu1 %v15024_v20 }
 0x4cf   : > { %9174 = vmatmul.mubr.msk.bf16.gmra.mrb[244].mxu0 %vm678_vm0, %v10308_v55  ;;  %9191 = vmatmul.mubr.msk.bf16.gmra.mrb[244].mxu1 %vm678_vm0, %v10309_v14 }
 0x4d0   : > { %7283 = vmatprep.mubr.bf16.mxu0 %v15024_v20  ;;  %7486 = vmatprep.mubr.bf16.mxu1 %v15024_v20 }
 0x4d7   : > { %9175 = vmatmul.mubr.msk.bf16.gmra.mrb[248].mxu0 %vm678_vm0, %v10309_v14  ;;  %9192 = vmatmul.mubr.msk.bf16.gmra.mrb[248].mxu1 %vm678_vm0, %v10310_v58 }
 0x4d8   : > { %7293 = vmatprep.mubr.bf16.mxu0 %v15024_v20  ;;  %7496 = vmatprep.mubr.bf16.mxu1 %v15024_v20 }
 0x4df   : > { %9176 = vmatmul.mubr.msk.bf16.gmra.mrb[252].mxu0 %vm678_vm0, %v10310_v58  ;;  %9193 = vmatmul.mubr.msk.bf16.gmra.mrb[252].mxu1 %vm678_vm0, %v10311_v13 }
 0x4e0   : > { %7303 = vmatprep.mubr.bf16.mxu0 %v15024_v20  ;;  %7506 = vmatprep.mubr.bf16.mxu1 %v15024_v20 }
 0x4e7   : > { %9177 = vmatmul.mubr.msk.bf16.gmra.mrb[0].mxu0 %vm678_vm0, %v10311_v13  ;;  %9194 = vmatmul.mubr.msk.bf16.gmra.mrb[0].mxu1 %vm678_vm0, %v10312_v19 }
 0x4e8   : > { %7313 = vmatprep.mubr.bf16.mxu0 %v15024_v20  ;;  %7516 = vmatprep.mubr.bf16.mxu1 %v15024_v20 }
 0x4ef   : > { %9178 = vmatmul.mubr.msk.bf16.gmra.mrb[4].mxu0 %vm678_vm0, %v10312_v19  ;;  %9195 = vmatmul.mubr.msk.bf16.gmra.mrb[4].mxu1 %vm678_vm0, %v10313_v32 }
 0x4f0   : > { %7323 = vmatprep.mubr.bf16.mxu0 %v15024_v20  ;;  %7526 = vmatprep.mubr.bf16.mxu1 %v15024_v20 }
 0x4f7   : > { %9179 = vmatmul.mubr.msk.bf16.gmra.mrb[8].mxu0 %vm678_vm0, %v10313_v32  ;;  %9196 = vmatmul.mubr.msk.bf16.gmra.mrb[8].mxu1 %vm678_vm0, %v10314_v37 }
 0x4f8   : > { %7333 = vmatprep.mubr.bf16.mxu0 %v15024_v20  ;;  %7536 = vmatprep.mubr.bf16.mxu1 %v15024_v20 }
 0x4fa   : > { %v13329_v26 = vpop.f32.mrb[160].mxu0  ;;  %v13331_v39 = vpop.f32.mrb[160].mxu1 }
 0x4fb   : > { %v13333_v1 = vpop.f32.mrb[161].mxu0  ;;  %v13335_v7 = vpop.f32.mrb[161].mxu1 }
 0x4fc   : > { %v13337_v53 = vpop.f32.mrb[162].mxu0  ;;  %v13339_v52 = vpop.f32.mrb[162].mxu1 }
 0x4fd   : > { %v13341_v41 = vpop.f32.mrb[163].mxu0  ;;  %v13343_v10 = vpop.f32.mrb[163].mxu1 }
 0x4ff   : > { %9180 = vmatmul.mubr.msk.bf16.gmra.mrb[12].mxu0 %vm678_vm0, %v10314_v37  ;;  %9197 = vmatmul.mubr.msk.bf16.gmra.mrb[12].mxu1 %vm678_vm0, %v10315_v36 }
 0x500   : > { %7343 = vmatprep.mubr.bf16.mxu0 %v15024_v20  ;;  %7546 = vmatprep.mubr.bf16.mxu1 %v15024_v20 }
 0x502   : > { %v13350_v46 = vpop.f32.mrb[164].mxu0  ;;  %v13352_v18 = vpop.f32.mrb[164].mxu1 }
 0x503   : > { %v13354_v43 = vpop.f32.mrb[165].mxu0  ;;  %v13356_v22 = vpop.f32.mrb[165].mxu1 }
 0x504   : > { %v13358_v6 = vpop.f32.mrb[166].mxu0  ;;  %v13360_v8 = vpop.f32.mrb[166].mxu1 }
 0x505   : > { %v13362_v45 = vpop.f32.mrb[167].mxu0  ;;  %v13364_v29 = vpop.f32.mrb[167].mxu1 }
 0x507   : > { %9181 = vmatmul.mubr.msk.bf16.gmra.mrb[16].mxu0 %vm678_vm0, %v10315_v36  ;;  %9198 = vmatmul.mubr.msk.bf16.gmra.mrb[16].mxu1 %vm678_vm0, %v10316_v4  ;;  %v6795_v36 = vld [vmem:[%s15067_s16] sm:$0xf]  ;;  %s9370_s16 = sshll.u32 %s10674_s14, 13  ;;  %s10580_s14 = smov [#allocation14]  }
 0x508   : > { %7353 = vmatprep.mubr.bf16.mxu0 %v15024_v20  ;;  %7556 = vmatprep.mubr.bf16.mxu1 %v15024_v20  ;;  %s14776_s8 = scalar_lea.hbm %s15326_s17, %s9370_s16  ;;  %s10493_s19 = sshll.u32 %s10580_s14, 4  ;;  %s10494_s19 = int_to_ptr.vmem [resolvable:$false] %s10493_s19 }
 0x509   : > { %p10496_p13 = scmp.lt.s32.totalorder %s14778_s22, %s10494_s19 }
 0x50a   : > { %v13371_v33 = vpop.f32.mrb[168].mxu0  ;;  %v13373_v51 = vpop.f32.mrb[168].mxu1 }
 0x50b   : > { %v13375_v40 = vpop.f32.mrb[169].mxu0  ;;  %v13377_v34 = vpop.f32.mrb[169].mxu1 }
 0x50c   : > { %v13379_v28 = vpop.f32.mrb[170].mxu0  ;;  %v13381_v0 = vpop.f32.mrb[170].mxu1 }
 0x50d   : > { %v13383_v12 = vpop.f32.mrb[171].mxu0  ;;  %v13385_v48 = vpop.f32.mrb[171].mxu1 }
 0x50f   : > { %9182 = vmatmul.mubr.msk.bf16.gmra.mrb[20].mxu0 %vm678_vm0, %v10316_v4  ;;  %9199 = vmatmul.mubr.msk.bf16.gmra.mrb[20].mxu1 %vm678_vm0, %v10317_v31 }
 0x510   : > { %7363 = vmatprep.mubr.bf16.mxu0 %v15024_v20  ;;  %7566 = vmatprep.mubr.bf16.mxu1 %v15024_v20 }
 0x512   : > { %v13392_v44 = vpop.f32.mrb[172].mxu0  ;;  %v13394_v42 = vpop.f32.mrb[172].mxu1 }
 0x513   : > { %v13396_v15 = vpop.f32.mrb[173].mxu0  ;;  %v13398_v62 = vpop.f32.mrb[173].mxu1 }
 0x514   : > { %v13400_v56 = vpop.f32.mrb[174].mxu0  ;;  %v13402_v57 = vpop.f32.mrb[174].mxu1 }
 0x515   : > { %v13404_v23 = vpop.f32.mrb[175].mxu0  ;;  %v13406_v49 = vpop.f32.mrb[175].mxu1 }
 0x517   : > { %9183 = vmatmul.mubr.msk.bf16.gmra.mrb[24].mxu0 %vm678_vm0, %v10317_v31  ;;  %9200 = vmatmul.mubr.msk.bf16.gmra.mrb[24].mxu1 %vm678_vm0, %v10318_v60 }
 0x518   : > { %7373 = vmatprep.mubr.bf16.mxu0 %v15024_v20 }
 0x51a   : > { %v13412_v24 = vpop.f32.mrb[176].mxu0  ;;  %v13414_v30 = vpop.f32.mrb[176].mxu1 }
 0x51b   : > { %v13416_v38 = vpop.f32.mrb[177].mxu0  ;;  %v13418_v27 = vpop.f32.mrb[177].mxu1 }
 0x51c   : > { %v13420_v16 = vpop.f32.mrb[178].mxu0  ;;  %v13422_v50 = vpop.f32.mrb[178].mxu1 }
 0x51d   : > { %v13424_v61 = vpop.f32.mrb[179].mxu0  ;;  %v13426_v9 = vpop.f32.mrb[179].mxu1 }
 0x51f   : > { %9184 = vmatmul.mubr.msk.bf16.gmra.mrb[28].mxu0 %vm678_vm0, %v10318_v60 }
 0x520   : > { %7416 = vmatprep.mubr.bf16.mxu0 %v15024_v20  ;;  %v6797_v20 = vlaneseq }
 0x522   : > { %v13430_v5 = vpop.f32.mrb[180].mxu0  ;;  %v13432_v3 = vpop.f32.mrb[180].mxu1  ;;  %v6798_v14 = vshrl.u32 %v6797_v20, 7 }
 0x523   : > { %15052 = vst [vmem:[#allocation43_spill] sm:$0xff] %v13432_v3  ;;  %v13434_v11 = vpop.f32.mrb[181].mxu0  ;;  %v13436_v2 = vpop.f32.mrb[181].mxu1 }
 0x524   : > { %15053 = vst [vmem:[#allocation44_spill] sm:$0xff] %v13434_v11  ;;  %15054 = vst [vmem:[#allocation45_spill] sm:$0xff] %v13436_v2  ;;  %v13438_v35 = vpop.f32.mrb[182].mxu0  ;;  %v13440_v59 = vpop.f32.mrb[182].mxu1  ;;  %v6799_v37 = vsub.s32 0, %v6798_v14  ;;  %v6803_v4 = vsub.s32 1, %v6798_v14 }
 0x525   : > { %15055 = vst [vmem:[#allocation46_spill] sm:$0xff] %v13438_v35  ;;  %15056 = vst [vmem:[#allocation29_spill] sm:$0xff] %v13440_v59  ;;  %v13442_v25 = vpop.f32.mrb[183].mxu0  ;;  %v13444_v47 = vpop.f32.mrb[183].mxu1  ;;  %v13471_v20 = vsub.s32 3, %v6798_v14 }
 0x526   : > { %15057 = vst [vmem:[#allocation57_spill] sm:$0xff] %v13442_v25  ;;  %15058 = vst [vmem:[#allocation47_spill] sm:$0xff] %v13444_v47  ;;  %v7577_v47 = vld [vmem:[%s15078_s21] sm:$0xf]  ;;  %s8582_s21 = scalar_lea.sflag [#allocation5], %s10894_s9 }
 0x527   : > { %9185 = vmatmul.mubr.msk.bf16.vlgmr.msra.gmra.mrb[32].mxu0 %vm678_vm0, %v13264_v17  ;;  %v6807_v17 = vsub.s32 2, %v6798_v14  ;;  %v13530_v11 = vrot.slane %v7577_v47, %v6799_v37 }
 0x529   : > { %15084 = vst [vmem:[#allocation21_spill] sm:$0xff] %v13530_v11 }
 0x52a   : > { %v13448_v54 = vpop.f32.mrb[184].mxu0  ;;  %v13450_v21 = vpop.f32.mrb[184].mxu1 }
 0x52b   : > { %15059 = vst [vmem:[#allocation48_spill] sm:$0xff] %v13448_v54  ;;  %15060 = vst [vmem:[#allocation49_spill] sm:$0xff] %v13450_v21  ;;  %v13452_v63 = vpop.f32.mrb[185].mxu0  ;;  %v13454_v55 = vpop.f32.mrb[185].mxu1  ;;  %v13488_v21 = vrot.slane %v6795_v36, %v6803_v4 }
 0x52c   : > { %15061 = vst [vmem:[#allocation50_spill] sm:$0xff] %v13452_v63  ;;  %15062 = vst [vmem:[#allocation59_spill] sm:$0xff] %v13454_v55  ;;  %v13456_v58 = vpop.f32.mrb[186].mxu0  ;;  %v13458_v13 = vpop.f32.mrb[186].mxu1 }
 0x52d   : > { %15063 = vst [vmem:[#allocation30_spill] sm:$0xff] %v13456_v58  ;;  %15064 = vst [vmem:[#allocation58_spill] sm:$0xff] %v13458_v13  ;;  %v13460_v19 = vpop.f32.mrb[187].mxu0  ;;  %v13462_v32 = vpop.f32.mrb[187].mxu1 }
 0x52e   : > { %15065 = vst [vmem:[#allocation31_spill] sm:$0xff] %v13460_v19  ;;  %15066 = vst [vmem:[#allocation32_spill] sm:$0xff] %v13462_v32  ;;  %v13477_v19 = vrot.slane %v6795_v36, %v6799_v37  ;;  %v13479_v32 = vrot.slane %v6795_v36, %v6807_v17 }
 0x530   : > { %v6821_v35 = vmul.f32 %v13477_v19, %v13337_v53  ;;  %v13551_v11 = vmul.f32 %v13479_v32, %v13339_v52  ;;  %v6829_v52 = vmul.f32 %v13477_v19, %v13358_v6 }
 0x532   : > { %v13467_v31 = vpop.f32.mrb[188].mxu0  ;;  %v13469_v60 = vpop.f32.mrb[188].mxu1  ;;  %15088 = vst [vmem:[#allocation42_spill] sm:$0xff] %v13551_v11  ;;  %v6831_v11 = vmul.f32 %v13479_v32, %v13360_v8  ;;  %v13586_v8 = vrot.slane %v7577_v47, %v6807_v17 }
 0x533   : > { %15068 = vst [vmem:[#allocation51_spill] sm:$0xff] %v13467_v31  ;;  %15069 = vst [vmem:[#allocation52_spill] sm:$0xff] %v13469_v60  ;;  %v13473_v58 = vpop.f32.mrb[189].mxu0  ;;  %v13475_v13 = vpop.f32.mrb[189].mxu1  ;;  %v6945_v31 = vld [vmem:[%s15074_s13] sm:$0xf] }
 0x534   : > { %15070 = vst [vmem:[#allocation53_spill] sm:$0xff] %v13473_v58  ;;  %15071 = vst [vmem:[#allocation54_spill] sm:$0xff] %v13475_v13  ;;  %v13481_v55 = vpop.f32.mrb[190].mxu0  ;;  %v13483_v63 = vpop.f32.mrb[190].mxu1  ;;  %v13495_v13 = vrot.slane %v6795_v36, %v13471_v20  ;;  %v6817_v58 = vmul.f32 %v13477_v19, %v13329_v26  ;;  %v13499_v54 = vrot.slane %v6945_v31, %v6799_v37  ;;  %v7727_v26 = vld [vmem:[%s15079_s12] sm:$0xf] }
 0x535   : > { %15072 = vst [vmem:[#allocation33_spill] sm:$0xff] %v13481_v55  ;;  %15073 = vst [vmem:[#allocation34_spill] sm:$0xff] %v13483_v63  ;;  %v13490_v14 = vpop.f32.mrb[191].mxu0  ;;  %v13492_v60 = vpop.f32.mrb[191].mxu1  ;;  %v6819_v63 = vmul.f32 %v13479_v32, %v13331_v39  ;;  %v13503_v55 = vrot.slane %v6945_v31, %v6807_v17  ;;  %v13522_v59 = vrot.slane %v6945_v31, %v13471_v20  ;;  %s10495_s12 = scalar_lea.vmem %s10494_s19, 16384 }
 0x536   : > { %15075 = vst [vmem:[#allocation60_spill] sm:$0xff] %v13490_v14  ;;  %15076 = vst [vmem:[#allocation61_spill] sm:$0xff] %v13492_v60  ;;  %v6818_v60 = vmul.f32 %v13488_v21, %v13333_v1  ;;  %v13510_v14 = vrot.slane %v6945_v31, %v6803_v4  ;;  %v6820_v39 = vmul.f32 %v13495_v13, %v13335_v7  ;;  %p10497_p0 = scmp.lt.s32.totalorder %s10495_s12, %s10489_s15 }
 0x537   : > { %15077 = vst [vmem:[#allocation55_spill] sm:$0xff] %v13503_v55  ;;  %15082 = vst [vmem:[#allocation65_spill] sm:$0xff] %v13522_v59  ;;  %v13533_v3 = vadd.f32 %v13499_v54, %v6817_v58  ;;  %v6822_v7 = vmul.f32 %v13488_v21, %v13341_v41  ;;  %v13544_v53 = vrot.slane %v7727_v26, %v6799_v37 }
 0x538   : > { %v6827_v58 = vmul.f32 %v13479_v32, %v13352_v18  ;;  %v6826_v37 = vmul.f32 %v13488_v21, %v13354_v43  ;;  %v13573_v18 = vadd.f32 %v13499_v54, %v6821_v35  ;;  %v6830_v43 = vmul.f32 %v13488_v21, %v13362_v45  ;;  %p10498_p2 = por %p10497_p0, %p10496_p13 }
 0x539   : > { %15085 = vst [vmem:[#allocation38_spill] sm:$0xff] %v13533_v3  ;;  %v6832_v6 = vmul.f32 %v13495_v13, %v13364_v29  ;;  %v13607_v29 = vadd.f32 %v13499_v54, %v6829_v52 }
 0x53a   : > { %v13515_v36 = vpop.f32.mrb[192].mxu0  ;;  %v13517_v25 = vpop.f32.mrb[192].mxu1  ;;  %15090 = vst [vmem:[#allocation23_spill] sm:$0xff] %v13573_v18  ;;  %v13601_v45 = vadd.f32 %v13510_v14, %v6826_v37  ;;  %v6835_v37 = vmul.f32 %v13479_v32, %v13373_v51  ;;  %v13642_v51 = vrot.slane %v7727_v26, %v13471_v20  ;;  %p10499_p8 = pnand %p10498_p2, %p10492_p1 }
 0x53b   : > { %15080 = vst [vmem:[#allocation56_spill] sm:$0xff] %v13515_v36  ;;  %15081 = vst [vmem:[#allocation63_spill] sm:$0xff] %v13517_v25  ;;  %v13526_v1 = vpop.f32.mrb[193].mxu0  ;;  %v13528_v2 = vpop.f32.mrb[193].mxu1  ;;  %v13536_v25 = vadd.f32 %v13503_v55, %v6819_v63  ;;  %v6825_v63 = vmul.f32 %v13477_v19, %v13350_v46  ;;  %v13570_v46 = vadd.f32 %v13522_v59, %v6820_v39 }
 0x53c   : > { %15083 = vst [vmem:[#allocation64_spill] sm:$0xff] %v13526_v1  ;;  %v13540_v31 = vpop.f32.mrb[194].mxu0  ;;  %v13542_v36 = vpop.f32.mrb[194].mxu1  ;;  %v13547_v1 = vadd.f32 %v13510_v14, %v6818_v60  ;;  %v6828_v60 = vmul.f32 %v13495_v13, %v13356_v22  ;;  %v13582_v22 = vadd.f32 %v13510_v14, %v6822_v7  ;;  %v13588_v39 = vrot.slane %v7727_v26, %v6807_v17 }
 0x53d   : > { %15086 = vst [vmem:[#allocation40_spill] sm:$0xff] %v13536_v25  ;;  %v13557_v41 = vpop.f32.mrb[195].mxu0  ;;  %v13559_v25 = vpop.f32.mrb[195].mxu1  ;;  %15089 = vst [vmem:[#allocation39_spill] sm:$0xff] %v13570_v46  ;;  %v13591_v35 = vadd.f32 %v13499_v54, %v6825_v63  ;;  %v13594_v46 = vadd.f32 %v13503_v55, %v6827_v58  ;;  %v13610_v17 = vadd.f32 %v13503_v55, %v6831_v11 }
 0x53e   : > { %15087 = vst [vmem:[#allocation20_spill] sm:$0xff] %v13547_v1  ;;  %v13577_v1 = vmul.f32 %v13495_v13, %v13343_v10  ;;  %15092 = vst [vmem:[#allocation24_spill] sm:$0xff] %v13582_v22  ;;  %v13596_v10 = vrot.slane %v7577_v47, %v6803_v4  ;;  %v13604_v7 = vadd.f32 %v13522_v59, %v6828_v60 }
 0x53f   : > { %15093 = vst [vmem:[#allocation22_spill] sm:$0xff] %v13591_v35  ;;  %15094 = vst [vmem:[#allocation27_spill] sm:$0xff] %v13594_v46  ;;  %v13617_v35 = vadd.f32 %v13510_v14, %v6830_v43  ;;  %v13628_v11 = vrot.slane %v7577_v47, %v13471_v20  ;;  %v6834_v43 = vmul.f32 %v13488_v21, %v13375_v40  ;;  %v15155_v46 = vld [vmem:[#allocation33_spill] sm:$0xff] }
 0x540   : > { %15091 = vst [vmem:[#allocation41_spill] sm:$0xff] %v13577_v1  ;;  %v13598_v1 = vrot.slane %v7727_v26, %v6803_v4  ;;  %15096 = vst [vmem:[#allocation25_spill] sm:$0xff] %v13601_v45  ;;  %v6833_v4 = vmul.f32 %v13477_v19, %v13371_v33  ;;  %v6837_v47 = vmul.f32 %v13477_v19, %v13379_v28 }
 0x541   : > { %15097 = vst [vmem:[#allocation28_spill] sm:$0xff] %v13604_v7  ;;  %15098 = vst [vmem:[#allocation35_spill] sm:$0xff] %v13607_v29  ;;  %v13631_v29 = vadd.f32 %v13522_v59, %v6832_v6  ;;  %v6839_v6 = vmul.f32 %v13479_v32, %v13381_v0  ;;  %v6840_v40 = vmul.f32 %v13495_v13, %v13385_v48 }
 0x542   : > { %15095 = vst [vmem:[#allocation26_spill] sm:$0xff] %v13598_v1  ;;  %15099 = vst [vmem:[#allocation62_spill] sm:$0xff] %v13610_v17  ;;  %v13612_v63 = vpop.f32.mrb[196].mxu0  ;;  %v13614_v58 = vpop.f32.mrb[196].mxu1  ;;  %v6841_v20 = vmul.f32 %v13477_v19, %v13392_v44  ;;  %v6843_v26 = vmul.f32 %v13479_v32, %v13394_v42  ;;  %v6842_v28 = vmul.f32 %v13488_v21, %v13396_v15  ;;  %v15158_v1 = vld [vmem:[#allocation60_spill] sm:$0xff] }
 0x543   : > { %15100 = vst [vmem:[#allocation36_spill] sm:$0xff] %v13617_v35  ;;  %v13623_v60 = vpop.f32.mrb[197].mxu0  ;;  %v13625_v52 = vpop.f32.mrb[197].mxu1  ;;  %15101 = vst [vmem:[#allocation37_spill] sm:$0xff] %v13631_v29  ;;  %v6836_v35 = vmul.f32 %v13495_v13, %v13377_v34  ;;  %v6838_v29 = vmul.f32 %v13488_v21, %v13383_v12  ;;  %v6844_v0 = vmul.f32 %v13495_v13, %v13398_v62 }
 0x544   : > { %v13637_v33 = vpop.f32.mrb[198].mxu0  ;;  %v13639_v45 = vpop.f32.mrb[198].mxu1  ;;  %15102 = vst [vmem:[#allocation66_spill] sm:$0xff] %v13642_v51  ;;  %v13665_v12 = vadd.f32 %v13499_v54, %v6833_v4  ;;  %v13668_v48 = vadd.f32 %v13503_v55, %v6835_v37  ;;  %v6845_v17 = vmul.f32 %v13477_v19, %v13400_v56  ;;  %v6847_v44 = vmul.f32 %v13479_v32, %v13402_v57  ;;  %v15156_v51 = vld [vmem:[#allocation34_spill] sm:$0xff] }
 0x545   : > { %v13652_v34 = vpop.f32.mrb[199].mxu0  ;;  %v13654_v22 = vpop.f32.mrb[199].mxu1  ;;  %v13675_v42 = vadd.f32 %v13510_v14, %v6834_v43  ;;  %v13678_v15 = vadd.f32 %v13522_v59, %v6836_v35  ;;  %v6846_v62 = vmul.f32 %v13488_v21, %v13404_v23  ;;  %v6848_v4 = vmul.f32 %v13495_v13, %v13406_v49 }
 0x546   : > { %15103 = vst [vmem:[#allocation67_spill] sm:$0xff] %v13665_v12  ;;  %15104 = vst [vmem:[#allocation68_spill] sm:$0xff] %v13668_v48  ;;  %v13685_v37 = vadd.f32 %v13499_v54, %v6837_v47  ;;  %v13688_v56 = vadd.f32 %v13503_v55, %v6839_v6  ;;  %v13691_v57 = vadd.f32 %v13510_v14, %v6838_v29 }
 0x547   : > { %15105 = vst [vmem:[#allocation69_spill] sm:$0xff] %v13675_v42  ;;  %15106 = vst [vmem:[#allocation70_spill] sm:$0xff] %v13678_v15  ;;  %v13694_v43 = vadd.f32 %v13522_v59, %v6840_v40  ;;  %v13697_v35 = vadd.f32 %v13499_v54, %v6841_v20  ;;  %v13700_v23 = vadd.f32 %v13503_v55, %v6843_v26  ;;  %v15151_v15 = vld [vmem:[#allocation52_spill] sm:$0xff] }
 0x548   : > { %15107 = vst [vmem:[#allocation71_spill] sm:$0xff] %v13685_v37  ;;  %15108 = vst [vmem:[#allocation72_spill] sm:$0xff] %v13688_v56  ;;  %v13703_v49 = vadd.f32 %v13510_v14, %v6842_v28  ;;  %v13706_v47 = vadd.f32 %v13522_v59, %v6844_v0  ;;  %v13713_v29 = vadd.f32 %v13499_v54, %v6845_v17  ;;  %v15128_v56 = vld [vmem:[#allocation57_spill] sm:$0xff] }
 0x549   : > { %15109 = vst [vmem:[#allocation73_spill] sm:$0xff] %v13691_v57  ;;  %15110 = vst [vmem:[#allocation74_spill] sm:$0xff] %v13694_v43  ;;  %v13716_v40 = vadd.f32 %v13503_v55, %v6847_v44  ;;  %v6849_v20 = vmul.f32 %v13477_v19, %v13412_v24  ;;  %v6851_v26 = vmul.f32 %v13479_v32, %v13414_v30  ;;  %v15119_v57 = vld [vmem:[#allocation43_spill] sm:$0xff]  ;;  %v15125_v43 = vld [vmem:[#allocation29_spill] sm:$0xff] }
 0x54a   : > { %15111 = vst [vmem:[#allocation75_spill] sm:$0xff] %v13697_v35  ;;  %15112 = vst [vmem:[#allocation76_spill] sm:$0xff] %v13700_v23  ;;  %v13708_v6 = vpop.f32.mrb[200].mxu0  ;;  %v13710_v37 = vpop.f32.mrb[200].mxu1  ;;  %v13730_v35 = vadd.f32 %v13522_v59, %v6848_v4  ;;  %v6850_v17 = vmul.f32 %v13488_v21, %v13416_v38  ;;  %v6852_v44 = vmul.f32 %v13495_v13, %v13418_v27  ;;  %v15124_v23 = vld [vmem:[#allocation46_spill] sm:$0xff] }
 0x54b   : > { %15113 = vst [vmem:[#allocation77_spill] sm:$0xff] %v13703_v49  ;;  %15114 = vst [vmem:[#allocation78_spill] sm:$0xff] %v13706_v47  ;;  %v13722_v28 = vpop.f32.mrb[201].mxu0  ;;  %v13724_v0 = vpop.f32.mrb[201].mxu1  ;;  %v13727_v49 = vadd.f32 %v13510_v14, %v6846_v62  ;;  %v6853_v30 = vmul.f32 %v13477_v19, %v13420_v16  ;;  %v6855_v62 = vmul.f32 %v13479_v32, %v13422_v50  ;;  %v15120_v16 = vld [vmem:[#allocation44_spill] sm:$0xff]  ;;  %v15121_v50 = vld [vmem:[#allocation45_spill] sm:$0xff] }
 0x54c   : > { %15115 = vst [vmem:[#allocation79_spill] sm:$0xff] %v13713_v29  ;;  %15116 = vst [vmem:[#allocation80_spill] sm:$0xff] %v13716_v40  ;;  %v13736_v24 = vpop.f32.mrb[202].mxu0  ;;  %v13738_v29 = vpop.f32.mrb[202].mxu1  ;;  %v6854_v4 = vmul.f32 %v13488_v21, %v13424_v61  ;;  %v6857_v27 = vmul.f32 %v13477_v19, %v13430_v5  ;;  %v6859_v40 = vmul.f32 %v13479_v32, %v15119_v57 }
 0x54d   : > { %15117 = vst [vmem:[#allocation81_spill] sm:$0xff] %v13727_v49  ;;  %15118 = vst [vmem:[#allocation82_spill] sm:$0xff] %v13730_v35  ;;  %v6856_v49 = vmul.f32 %v13495_v13, %v13426_v9  ;;  %v13748_v38 = vpop.f32.mrb[203].mxu0  ;;  %v13750_v35 = vpop.f32.mrb[203].mxu1  ;;  %v6858_v47 = vmul.f32 %v13488_v21, %v15120_v16  ;;  %v6860_v42 = vmul.f32 %v13495_v13, %v15121_v50 }
 0x54e   : > { %v13761_v61 = vadd.f32 %v13499_v54, %v6849_v20  ;;  %v13764_v9 = vadd.f32 %v13503_v55, %v6851_v26  ;;  %v6861_v12 = vmul.f32 %v13477_v19, %v15124_v23  ;;  %v6863_v5 = vmul.f32 %v13479_v32, %v15125_v43  ;;  %v15129_v20 = vld [vmem:[#allocation47_spill] sm:$0xff] }
 0x54f   : > { %v13771_v57 = vadd.f32 %v13510_v14, %v6850_v17  ;;  %v13774_v16 = vadd.f32 %v13522_v59, %v6852_v44  ;;  %v6862_v50 = vmul.f32 %v13488_v21, %v15128_v56  ;;  %v13781_v26 = vadd.f32 %v13499_v54, %v6853_v30 }
 0x550   : > { %15122 = vst [vmem:[#allocation43_spill] sm:$0xff] %v13761_v61  ;;  %15123 = vst [vmem:[#allocation44_spill] sm:$0xff] %v13764_v9  ;;  %v6864_v61 = vmul.f32 %v13495_v13, %v15129_v20  ;;  %v13784_v23 = vadd.f32 %v13503_v55, %v6855_v62  ;;  %v13787_v43 = vadd.f32 %v13510_v14, %v6854_v4 }
 0x551   : > { %15126 = vst [vmem:[#allocation45_spill] sm:$0xff] %v13771_v57  ;;  %15127 = vst [vmem:[#allocation46_spill] sm:$0xff] %v13774_v16  ;;  %v13790_v17 = vadd.f32 %v13522_v59, %v6856_v49  ;;  %v13793_v44 = vadd.f32 %v13499_v54, %v6857_v27  ;;  %v13796_v56 = vadd.f32 %v13503_v55, %v6859_v40  ;;  %v15140_v27 = vld [vmem:[#allocation48_spill] sm:$0xff] }
 0x552   : > { %15130 = vst [vmem:[#allocation29_spill] sm:$0xff] %v13781_v26  ;;  %15131 = vst [vmem:[#allocation57_spill] sm:$0xff] %v13784_v23  ;;  %v13799_v20 = vadd.f32 %v13510_v14, %v6858_v47  ;;  %v13802_v30 = vadd.f32 %v13522_v59, %v6860_v42  ;;  %v13804_v62 = vpop.f32.mrb[204].mxu0  ;;  %v13806_v26 = vpop.f32.mrb[204].mxu1  ;;  %v13809_v4 = vadd.f32 %v13499_v54, %v6861_v12  ;;  %v15144_v12 = vld [vmem:[#allocation50_spill] sm:$0xff] }
 0x553   : > { %15132 = vst [vmem:[#allocation47_spill] sm:$0xff] %v13787_v43  ;;  %15133 = vst [vmem:[#allocation83_spill] sm:$0xff] %v13790_v17  ;;  %v13812_v49 = vadd.f32 %v13503_v55, %v6863_v5  ;;  %v6865_v40 = vmul.f32 %v13477_v19, %v15140_v27  ;;  %v13820_v42 = vpop.f32.mrb[205].mxu1  ;;  %v13823_v43 = vadd.f32 %v13510_v14, %v6862_v50  ;;  %v15147_v17 = vld [vmem:[#allocation58_spill] sm:$0xff] }
 0x554   : > { %15134 = vst [vmem:[#allocation84_spill] sm:$0xff] %v13793_v44  ;;  %15135 = vst [vmem:[#allocation85_spill] sm:$0xff] %v13796_v56  ;;  %v15141_v44 = vld [vmem:[#allocation49_spill] sm:$0xff]  ;;  %v6866_v5 = vmul.f32 %v13488_v21, %v15144_v12  ;;  %v13834_v57 = vpop.f32.mrb[206].mxu1  ;;  %v6871_v50 = vmul.f32 %v13479_v32, %v15147_v17  ;;  %v6875_v48 = vmul.f32 %v13479_v32, %v15151_v15  ;;  %v15153_v17 = vld [vmem:[#allocation54_spill] sm:$0xff] }
 0x555   : > { %15136 = vst [vmem:[#allocation86_spill] sm:$0xff] %v13799_v20  ;;  %15137 = vst [vmem:[#allocation87_spill] sm:$0xff] %v13802_v30  ;;  %v6867_v47 = vmul.f32 %v13479_v32, %v15141_v44  ;;  %v13818_v20 = vpop.f32.mrb[205].mxu0  ;;  %v13826_v30 = vadd.f32 %v13522_v59, %v6864_v61  ;;  %v15146_v44 = vld [vmem:[#allocation30_spill] sm:$0xff]  ;;  %v13846_v16 = vpop.f32.mrb[207].mxu1  ;;  %v6876_v7 = vmul.f32 %v13495_v13, %v15153_v17 }
 0x556   : > { %15138 = vst [vmem:[#allocation88_spill] sm:$0xff] %v13809_v4  ;;  %15139 = vst [vmem:[#allocation89_spill] sm:$0xff] %v13812_v49  ;;  %v15145_v4 = vld [vmem:[#allocation59_spill] sm:$0xff]  ;;  %v13832_v27 = vpop.f32.mrb[206].mxu0  ;;  %v6869_v56 = vmul.f32 %v13477_v19, %v15146_v44  ;;  %v15152_v44 = vld [vmem:[#allocation53_spill] sm:$0xff]  ;;  %v6877_v3 = vmul.f32 %v13477_v19, %v15155_v46  ;;  %v13867_v15 = vadd.f32 %v13510_v14, %v6866_v5 }
 0x557   : > { %15142 = vst [vmem:[#allocation48_spill] sm:$0xff] %v13823_v43  ;;  %15143 = vst [vmem:[#allocation49_spill] sm:$0xff] %v13826_v30  ;;  %v6868_v49 = vmul.f32 %v13495_v13, %v15145_v4  ;;  %v15148_v43 = vld [vmem:[#allocation31_spill] sm:$0xff]  ;;  %v15149_v30 = vld [vmem:[#allocation32_spill] sm:$0xff]  ;;  %v13844_v12 = vpop.f32.mrb[207].mxu0  ;;  %v6874_v18 = vmul.f32 %v13488_v21, %v15152_v44  ;;  %v6878_v17 = vmul.f32 %v13488_v21, %v15158_v1 }
 0x558   : > { %v6870_v61 = vmul.f32 %v13488_v21, %v15148_v43  ;;  %v6872_v23 = vmul.f32 %v13495_v13, %v15149_v30  ;;  %v15150_v4 = vld [vmem:[#allocation51_spill] sm:$0xff]  ;;  %v13857_v43 = vadd.f32 %v13499_v54, %v6865_v40  ;;  %v13860_v30 = vadd.f32 %v13503_v55, %v6867_v47  ;;  %15157 = vst [vmem:[#allocation59_spill] sm:$0xff] %v13867_v15  ;;  %v15159_v40 = vld [vmem:[#allocation61_spill] sm:$0xff] }
 0x559   : > { %v6873_v9 = vmul.f32 %v13477_v19, %v15150_v4  ;;  %v6879_v4 = vmul.f32 %v13479_v32, %v15156_v51  ;;  %v13870_v44 = vadd.f32 %v13522_v59, %v6868_v49  ;;  %v13877_v47 = vadd.f32 %v13499_v54, %v6869_v56 }
 0x55a   : > { %15154 = vst [vmem:[#allocation50_spill] sm:$0xff] %v13857_v43  ;;  %v6880_v43 = vmul.f32 %v13495_v13, %v15159_v40  ;;  %v13880_v46 = vadd.f32 %v13503_v55, %v6871_v50  ;;  %v13883_v51 = vadd.f32 %v13510_v14, %v6870_v61  ;;  %v13886_v5 = vadd.f32 %v13522_v59, %v6872_v23  ;;  %v13900_v50 = vpop.f32.mrb[208].mxu0 }
 0x55b   : > { %15160 = vst [vmem:[#allocation30_spill] sm:$0xff] %v13877_v47  ;;  %v13889_v49 = vadd.f32 %v13499_v54, %v6873_v9  ;;  %v13892_v1 = vadd.f32 %v13503_v55, %v6875_v48  ;;  %v13895_v40 = vadd.f32 %v13510_v14, %v6874_v18  ;;  %v13898_v56 = vadd.f32 %v13522_v59, %v6876_v7  ;;  %v13902_v47 = vpop.f32.mrb[208].mxu1  ;;  %v15168_v9 = vld [vmem:[#allocation56_spill] sm:$0xff] }
 0x55c   : > { %15161 = vst [vmem:[#allocation58_spill] sm:$0xff] %v13883_v51  ;;  %v13905_v61 = vadd.f32 %v13499_v54, %v6877_v3  ;;  %v13908_v23 = vadd.f32 %v13503_v55, %v6879_v4  ;;  %v6881_v48 = vmul.f32 %v13477_v19, %v15168_v9  ;;  %v13916_v7 = vpop.f32.mrb[209].mxu1  ;;  %v13919_v51 = vadd.f32 %v13510_v14, %v6878_v17  ;;  %v15172_v3 = vld [vmem:[#allocation64_spill] sm:$0xff] }
 0x55d   : > { %15162 = vst [vmem:[#allocation31_spill] sm:$0xff] %v13889_v49  ;;  %15163 = vst [vmem:[#allocation32_spill] sm:$0xff] %v13892_v1  ;;  %v15169_v49 = vld [vmem:[#allocation63_spill] sm:$0xff]  ;;  %v6882_v4 = vmul.f32 %v13488_v21, %v15172_v3  ;;  %v6887_v17 = vmul.f32 %v13479_v32, %v13542_v36  ;;  %v6891_v15 = vmul.f32 %v13479_v32, %v13614_v58 }
 0x55e   : > { %15164 = vst [vmem:[#allocation51_spill] sm:$0xff] %v13895_v40  ;;  %15165 = vst [vmem:[#allocation52_spill] sm:$0xff] %v13898_v56  ;;  %v6883_v18 = vmul.f32 %v13479_v32, %v15169_v49  ;;  %v13914_v40 = vpop.f32.mrb[209].mxu0  ;;  %v13922_v56 = vadd.f32 %v13522_v59, %v6880_v43  ;;  %v6885_v49 = vmul.f32 %v13477_v19, %v13540_v31 }
 0x55f   : > { %15166 = vst [vmem:[#allocation53_spill] sm:$0xff] %v13905_v61  ;;  %15167 = vst [vmem:[#allocation54_spill] sm:$0xff] %v13908_v23  ;;  %v6884_v61 = vmul.f32 %v13495_v13, %v13528_v2  ;;  %v13928_v9 = vpop.f32.mrb[210].mxu0  ;;  %v13930_v23 = vpop.f32.mrb[210].mxu1  ;;  %v6886_v43 = vmul.f32 %v13488_v21, %v13557_v41  ;;  %v6889_v2 = vmul.f32 %v13477_v19, %v13612_v63 }
 0x560   : > { %15170 = vst [vmem:[#allocation33_spill] sm:$0xff] %v13919_v51  ;;  %15171 = vst [vmem:[#allocation34_spill] sm:$0xff] %v13922_v56  ;;  %v6888_v51 = vmul.f32 %v13495_v13, %v13559_v25  ;;  %v13940_v3 = vpop.f32.mrb[211].mxu0  ;;  %v13942_v56 = vpop.f32.mrb[211].mxu1  ;;  %v6890_v31 = vmul.f32 %v13488_v21, %v13623_v60  ;;  %v6892_v36 = vmul.f32 %v13495_v13, %v13625_v52 }
 0x561   : > { %v13953_v41 = vadd.f32 %v13499_v54, %v6881_v48  ;;  %v13956_v25 = vadd.f32 %v13503_v55, %v6883_v18  ;;  %v6893_v1 = vmul.f32 %v13477_v19, %v13637_v33  ;;  %v6895_v63 = vmul.f32 %v13479_v32, %v13639_v45 }
 0x562   : > { %v13963_v58 = vadd.f32 %v13510_v14, %v6882_v4  ;;  %v13966_v60 = vadd.f32 %v13522_v59, %v6884_v61  ;;  %v6894_v52 = vmul.f32 %v13488_v21, %v13652_v34  ;;  %v6896_v48 = vmul.f32 %v13495_v13, %v13654_v22 }
 0x563   : > { %v13973_v18 = vadd.f32 %v13499_v54, %v6885_v49  ;;  %v13976_v33 = vadd.f32 %v13503_v55, %v6887_v17  ;;  %v13979_v45 = vadd.f32 %v13510_v14, %v6886_v43  ;;  %v13982_v4 = vadd.f32 %v13522_v59, %v6888_v51  ;;  %v6573_v17 = vpop.f32.mrb[212].mxu0 }
 0x564   : > { %v13985_v61 = vadd.f32 %v13499_v54, %v6889_v2  ;;  %v13988_v34 = vadd.f32 %v13503_v55, %v6891_v15  ;;  %v13991_v22 = vadd.f32 %v13510_v14, %v6890_v31  ;;  %v13994_v49 = vadd.f32 %v13522_v59, %v6892_v36 }
 0x565   : > { %15173 = vst [vmem:[#allocation60_spill] sm:$0xff] %v13973_v18  ;;  %15174 = vst [vmem:[#allocation61_spill] sm:$0xff] %v13979_v45  ;;  %v6766_v18 = vpop.f32.mrb[212].mxu1  ;;  %v13997_v43 = vadd.f32 %v13499_v54, %v6893_v1  ;;  %v14000_v51 = vadd.f32 %v13503_v55, %v6895_v63  ;;  %v6897_v2 = vmul.f32 %v13477_v19, %v13708_v6 }
 0x566   : > { %15175 = vst [vmem:[#allocation56_spill] sm:$0xff] %v13985_v61  ;;  %15176 = vst [vmem:[#allocation63_spill] sm:$0xff] %v13991_v22  ;;  %v6899_v15 = vmul.f32 %v13479_v32, %v13710_v37  ;;  %v6575_v61 = vpop.f32.mrb[213].mxu0  ;;  %v6768_v31 = vpop.f32.mrb[213].mxu1  ;;  %v14007_v22 = vadd.f32 %v13510_v14, %v6894_v52  ;;  %v14010_v36 = vadd.f32 %v13522_v59, %v6896_v48 }
 0x567   : > { %15177 = vst [vmem:[#allocation64_spill] sm:$0xff] %v13997_v43  ;;  %15178 = vst [vmem:[#allocation90_spill] sm:$0xff] %v14000_v51  ;;  %v6898_v1 = vmul.f32 %v13488_v21, %v13722_v28  ;;  %v6900_v63 = vmul.f32 %v13495_v13, %v13724_v0  ;;  %v6577_v43 = vpop.f32.mrb[214].mxu0  ;;  %v6770_v45 = vpop.f32.mrb[214].mxu1  ;;  %v6901_v6 = vmul.f32 %v13477_v19, %v13736_v24 }
 0x568   : > { %15179 = vst [vmem:[#allocation91_spill] sm:$0xff] %v14007_v22  ;;  %15180 = vst [vmem:[#allocation92_spill] sm:$0xff] %v14010_v36  ;;  %v6903_v37 = vmul.f32 %v13479_v32, %v13738_v29  ;;  %v6902_v52 = vmul.f32 %v13488_v21, %v13748_v38  ;;  %v6904_v48 = vmul.f32 %v13495_v13, %v13750_v35  ;;  %v6579_v22 = vpop.f32.mrb[215].mxu0  ;;  %v6772_v36 = vpop.f32.mrb[215].mxu1 }
 0x569   : > { %v6905_v28 = vmul.f32 %v13477_v19, %v13804_v62  ;;  %v6907_v0 = vmul.f32 %v13479_v32, %v13806_v26  ;;  %v6906_v24 = vmul.f32 %v13488_v21, %v13818_v20  ;;  %v6908_v29 = vmul.f32 %v13495_v13, %v13820_v42 }
 0x56a   : > { %v14033_v51 = vadd.f32 %v13499_v54, %v6897_v2  ;;  %v14036_v38 = vadd.f32 %v13503_v55, %v6899_v15  ;;  %v6909_v35 = vmul.f32 %v13477_v19, %v13832_v27  ;;  %v6911_v62 = vmul.f32 %v13479_v32, %v13834_v57 }
 0x56b   : > { %v14043_v26 = vadd.f32 %v13510_v14, %v6898_v1  ;;  %v14046_v20 = vadd.f32 %v13522_v59, %v6900_v63  ;;  %v6910_v42 = vmul.f32 %v13488_v21, %v13844_v12  ;;  %v6912_v2 = vmul.f32 %v13495_v13, %v13846_v16 }
 0x56c   : > { %v14053_v15 = vadd.f32 %v13499_v54, %v6901_v6  ;;  %v14056_v27 = vadd.f32 %v13503_v55, %v6903_v37  ;;  %v14059_v57 = vadd.f32 %v13510_v14, %v6902_v52  ;;  %v14062_v1 = vadd.f32 %v13522_v59, %v6904_v48  ;;  %v6583_v37 = vpop.f32.mrb[216].mxu0 }
 0x56d   : > { %15181 = vst [vmem:[#allocation93_spill] sm:$0xff] %v14043_v26  ;;  %v14065_v63 = vadd.f32 %v13499_v54, %v6905_v28  ;;  %v14068_v12 = vadd.f32 %v13503_v55, %v6907_v0  ;;  %v14071_v16 = vadd.f32 %v13510_v14, %v6906_v24  ;;  %v14074_v6 = vadd.f32 %v13522_v59, %v6908_v29 }
 0x56e   : > { %15182 = vst [vmem:[#allocation94_spill] sm:$0xff] %v14053_v15  ;;  %15183 = vst [vmem:[#allocation95_spill] sm:$0xff] %v14059_v57  ;;  %v6776_v15 = vpop.f32.mrb[216].mxu1  ;;  %v14077_v52 = vadd.f32 %v13499_v54, %v6909_v35  ;;  %v14080_v48 = vadd.f32 %v13503_v55, %v6911_v62  ;;  %v6913_v28 = vmul.f32 %v13477_v19, %v13900_v50 }
 0x56f   : > { %15184 = vst [vmem:[#allocation96_spill] sm:$0xff] %v14065_v63  ;;  %15185 = vst [vmem:[#allocation97_spill] sm:$0xff] %v14071_v16  ;;  %v6915_v0 = vmul.f32 %v13479_v32, %v13902_v47  ;;  %v6585_v63 = vpop.f32.mrb[217].mxu0  ;;  %v6778_v24 = vpop.f32.mrb[217].mxu1  ;;  %v14087_v16 = vadd.f32 %v13510_v14, %v6910_v42  ;;  %v14090_v29 = vadd.f32 %v13522_v59, %v6912_v2 }
 0x570   : > { %15186 = vst [vmem:[#allocation98_spill] sm:$0xff] %v14074_v6  ;;  %15187 = vst [vmem:[#allocation99_spill] sm:$0xff] %v14077_v52  ;;  %v6914_v35 = vmul.f32 %v13488_v21, %v13914_v40  ;;  %v6916_v62 = vmul.f32 %v13495_v13, %v13916_v7  ;;  %v6587_v52 = vpop.f32.mrb[218].mxu0  ;;  %v6780_v57 = vpop.f32.mrb[218].mxu1  ;;  %v6917_v50 = vmul.f32 %v13477_v19, %v13928_v9 }
 0x571   : > { %15188 = vst [vmem:[#allocation100_spill] sm:$0xff] %v14080_v48  ;;  %15189 = vst [vmem:[#allocation101_spill] sm:$0xff] %v14087_v16  ;;  %v6919_v47 = vmul.f32 %v13479_v32, %v13930_v23  ;;  %v6918_v42 = vmul.f32 %v13488_v21, %v13940_v3  ;;  %v6920_v2 = vmul.f32 %v13495_v13, %v13942_v56  ;;  %v6589_v16 = vpop.f32.mrb[219].mxu0 }
 0x572   : > { %15190 = vst [vmem:[#allocation102_spill] sm:$0xff] %v14090_v29  ;;  %v6782_v29 = vpop.f32.mrb[219].mxu1  ;;  %v6921_v40 = vmul.f32 %v13477_v19, %v6573_v17  ;;  %v6923_v7 = vmul.f32 %v13479_v32, %v6766_v18  ;;  %v6922_v48 = vmul.f32 %v13488_v21, %v6575_v61  ;;  %v6924_v6 = vmul.f32 %v13495_v13, %v6768_v31 }
 0x573   : > { %v14109_v9 = vadd.f32 %v13499_v54, %v6913_v28  ;;  %v14112_v23 = vadd.f32 %v13503_v55, %v6915_v0  ;;  %v6925_v3 = vmul.f32 %v13477_v19, %v6577_v43  ;;  %v6927_v56 = vmul.f32 %v13479_v32, %v6770_v45 }
 0x574   : > { %v14117_v26 = vadd.f32 %v13510_v14, %v6914_v35  ;;  %v14120_v17 = vadd.f32 %v13522_v59, %v6916_v62  ;;  %v6926_v18 = vmul.f32 %v13488_v21, %v6579_v22  ;;  %v6928_v61 = vmul.f32 %v13495_v13, %v6772_v36  ;;  %v6593_v62 = vpop.f32.mrb[220].mxu0 }
 0x575   : > { %v14125_v31 = vadd.f32 %v13499_v54, %v6917_v50  ;;  %v14128_v28 = vadd.f32 %v13503_v55, %v6919_v47  ;;  %v14131_v43 = vadd.f32 %v13510_v14, %v6918_v42  ;;  %v14134_v45 = vadd.f32 %v13522_v59, %v6920_v2  ;;  %v6786_v50 = vpop.f32.mrb[220].mxu1 }
 0x576   : > { %15191 = vst [vmem:[#allocation103_spill] sm:$0xff] %v14117_v26  ;;  %v14137_v0 = vadd.f32 %v13499_v54, %v6921_v40  ;;  %v14140_v35 = vadd.f32 %v13503_v55, %v6923_v7  ;;  %v14143_v22 = vadd.f32 %v13510_v14, %v6922_v48  ;;  %v14146_v36 = vadd.f32 %v13522_v59, %v6924_v6  ;;  %v6595_v7 = vpop.f32.mrb[221].mxu0 }
 0x577   : > { %15192 = vst [vmem:[#allocation104_spill] sm:$0xff] %v14125_v31  ;;  %15193 = vst [vmem:[#allocation105_spill] sm:$0xff] %v14131_v43  ;;  %v14149_v47 = vadd.f32 %v13499_v54, %v6925_v3  ;;  %v14152_v42 = vadd.f32 %v13503_v55, %v6927_v56  ;;  %v6929_v2 = vmul.f32 %v13477_v19, %v6583_v37 }
 0x578   : > { %15194 = vst [vmem:[#allocation106_spill] sm:$0xff] %v14137_v0  ;;  %15195 = vst [vmem:[#allocation107_spill] sm:$0xff] %v14143_v22  ;;  %v6931_v40 = vmul.f32 %v13479_v32, %v6776_v15  ;;  %v6788_v0 = vpop.f32.mrb[221].mxu1  ;;  %v14157_v48 = vadd.f32 %v13510_v14, %v6926_v18  ;;  %v14160_v6 = vadd.f32 %v13522_v59, %v6928_v61 }
 0x579   : > { %15196 = vst [vmem:[#allocation108_spill] sm:$0xff] %v14146_v36  ;;  %15197 = vst [vmem:[#allocation109_spill] sm:$0xff] %v14149_v47  ;;  %v6930_v22 = vmul.f32 %v13488_v21, %v6585_v63  ;;  %v6932_v3 = vmul.f32 %v13495_v13, %v6778_v24  ;;  %v6597_v47 = vpop.f32.mrb[222].mxu0  ;;  %v6790_v43 = vpop.f32.mrb[222].mxu1  ;;  %v6933_v56 = vmul.f32 %v13477_v19, %v6587_v52 }
 0x57a   : > { %15198 = vst [vmem:[#allocation110_spill] sm:$0xff] %v14152_v42  ;;  %15199 = vst [vmem:[#allocation111_spill] sm:$0xff] %v14157_v48  ;;  %v6935_v37 = vmul.f32 %v13479_v32, %v6780_v57  ;;  %v6934_v15 = vmul.f32 %v13488_v21, %v6589_v16  ;;  %v6936_v42 = vmul.f32 %v13495_v13, %v6782_v29  ;;  %v6599_v31 = vpop.f32.mrb[223].mxu0  ;;  %v6792_v18 = vpop.f32.mrb[223].mxu1 }
 0x57b   : > { %15200 = vst [vmem:[#allocation112_spill] sm:$0xff] %v14160_v6  ;;  %v6937_v48 = vmul.f32 %v13477_v19, %v6593_v62  ;;  %v6939_v61 = vmul.f32 %v13479_v32, %v6786_v50  ;;  %v6938_v63 = vmul.f32 %v13488_v21, %v6595_v7  ;;  %v6940_v24 = vmul.f32 %v13495_v13, %v6788_v0 }
 0x57c   : > { %v14173_v6 = vadd.f32 %v13499_v54, %v6929_v2  ;;  %v14176_v52 = vadd.f32 %v13503_v55, %v6931_v40  ;;  %v6941_v57 = vmul.f32 %v13477_v19, %v6597_v47  ;;  %v6943_v16 = vmul.f32 %v13479_v32, %v6790_v43  ;;  %v7428_v47 = vpop.f32.mrb[224].mxu1 }
 0x57d   : > { %v14181_v29 = vadd.f32 %v13510_v14, %v6930_v22  ;;  %v14184_v62 = vadd.f32 %v13522_v59, %v6932_v3  ;;  %v6942_v50 = vmul.f32 %v13488_v21, %v6599_v31  ;;  %v6944_v0 = vmul.f32 %v13495_v13, %v6792_v18  ;;  %v7225_v31 = vpop.f32.mrb[224].mxu0  ;;  %v15215_v3 = vld [vmem:[#allocation21_spill] sm:$0xff] }
 0x57e   : > { %15201 = vst [vmem:[#allocation113_spill] sm:$0xff] %v14173_v6  ;;  %15202 = vst [vmem:[#allocation114_spill] sm:$0xff] %v14176_v52  ;;  %v14189_v2 = vadd.f32 %v13499_v54, %v6933_v56  ;;  %v14192_v40 = vadd.f32 %v13503_v55, %v6935_v37  ;;  %v14195_v19 = vadd.f32 %v13510_v14, %v6934_v15  ;;  %v7227_v37 = vpop.f32.mrb[225].mxu0  ;;  %v7430_v15 = vpop.f32.mrb[225].mxu1 }
 0x57f   : > { %15203 = vst [vmem:[#allocation115_spill] sm:$0xff] %v14181_v29  ;;  %15204 = vst [vmem:[#allocation116_spill] sm:$0xff] %v14184_v62  ;;  %v14198_v32 = vadd.f32 %v13522_v59, %v6936_v42  ;;  %v14201_v43 = vadd.f32 %v13499_v54, %v6937_v48  ;;  %v14204_v22 = vadd.f32 %v13503_v55, %v6939_v61  ;;  %v15245_v62 = vld [vmem:[#allocation44_spill] sm:$0xff] }
 0x580   : > { %15205 = vst [vmem:[#allocation117_spill] sm:$0xff] %v14189_v2  ;;  %15206 = vst [vmem:[#allocation118_spill] sm:$0xff] %v14192_v40  ;;  %v14207_v21 = vadd.f32 %v13510_v14, %v6938_v63  ;;  %v14210_v13 = vadd.f32 %v13522_v59, %v6940_v24  ;;  %v14213_v7 = vadd.f32 %v13499_v54, %v6941_v57  ;;  %v7229_v24 = vpop.f32.mrb[226].mxu0  ;;  %v7432_v57 = vpop.f32.mrb[226].mxu1 }
 0x581   : > { %15207 = vst [vmem:[#allocation119_spill] sm:$0xff] %v14195_v19  ;;  %15208 = vst [vmem:[#allocation120_spill] sm:$0xff] %v14198_v32  ;;  %v14216_v42 = vadd.f32 %v13503_v55, %v6943_v16  ;;  %v7599_v48 = vmul.f32 %v15215_v3, %v7225_v31  ;;  %v7609_v56 = vmul.f32 %v13586_v8, %v7428_v47 }
 0x582   : > { %15209 = vst [vmem:[#allocation121_spill] sm:$0xff] %v14201_v43  ;;  %15210 = vst [vmem:[#allocation122_spill] sm:$0xff] %v14204_v22  ;;  %v14221_v18 = vadd.f32 %v13510_v14, %v6942_v50  ;;  %v14224_v61 = vadd.f32 %v13522_v59, %v6944_v0  ;;  %v7600_v63 = vmul.f32 %v13596_v10, %v7227_v37  ;;  %v7231_v14 = vpop.f32.mrb[227].mxu0  ;;  %v7434_v50 = vpop.f32.mrb[227].mxu1  ;;  %v15219_v59 = vld [vmem:[#allocation66_spill] sm:$0xff] }
 0x583   : > { %15211 = vst [vmem:[#allocation123_spill] sm:$0xff] %v14207_v21  ;;  %15212 = vst [vmem:[#allocation124_spill] sm:$0xff] %v14210_v13  ;;  %v7610_v54 = vmul.f32 %v13628_v11, %v7430_v15  ;;  %v7749_v16 = vadd.f32 %v13544_v53, %v7599_v48  ;;  %v7759_v31 = vadd.f32 %v13588_v39, %v7609_v56  ;;  %v15220_v21 = vld [vmem:[#allocation38_spill] sm:$0xff]  ;;  %v7235_v32 = vpop.f32.mrb[228].mxu0 }
 0x584   : > { %15213 = vst [vmem:[#allocation125_spill] sm:$0xff] %v14213_v7  ;;  %15214 = vst [vmem:[#allocation126_spill] sm:$0xff] %v14216_v42  ;;  %v7603_v47 = vmul.f32 %v15215_v3, %v7229_v24  ;;  %v7613_v55 = vmul.f32 %v13586_v8, %v7432_v57  ;;  %v7604_v37 = vmul.f32 %v13596_v10, %v7231_v14  ;;  %v15222_v57 = vld [vmem:[#allocation20_spill] sm:$0xff] }
 0x585   : > { %15216 = vst [vmem:[#allocation21_spill] sm:$0xff] %v14221_v18  ;;  %15217 = vst [vmem:[#allocation127_spill] sm:$0xff] %v14224_v61  ;;  %v15218_v18 = vld [vmem:[#allocation26_spill] sm:$0xff]  ;;  %v7760_v7 = vadd.f32 %v15219_v59, %v7610_v54  ;;  %v7614_v15 = vmul.f32 %v13628_v11, %v7434_v50  ;;  %v7877_v43 = vadd.f32 %v7749_v16, %v15220_v21  ;;  %v15221_v61 = vld [vmem:[#allocation27_spill] sm:$0xff] }
 0x586   : > { %v7750_v0 = vadd.f32 %v15218_v18, %v7600_v63  ;;  %v7887_v48 = vadd.f32 %v7759_v31, %v15221_v61  ;;  %v7753_v56 = vadd.f32 %v13544_v53, %v7603_v47  ;;  %v7763_v24 = vadd.f32 %v13588_v39, %v7613_v55  ;;  %v15223_v42 = vld [vmem:[#allocation28_spill] sm:$0xff]  ;;  %v15224_v50 = vld [vmem:[#allocation23_spill] sm:$0xff]  ;;  %v15225_v21 = vld [vmem:[#allocation62_spill] sm:$0xff] }
 0x587   : > { %v7888_v2 = vadd.f32 %v7760_v7, %v15223_v42  ;;  %v7754_v63 = vadd.f32 %v15218_v18, %v7604_v37  ;;  %v7764_v54 = vadd.f32 %v15219_v59, %v7614_v15  ;;  %v8005_v14 = vmax.f32 %v7877_v43, 0.0  ;;  %v15226_v47 = vld [vmem:[#allocation24_spill] sm:$0xff]  ;;  %v15227_v55 = vld [vmem:[#allocation37_spill] sm:$0xff]  ;;  %v7237_v37 = vpop.f32.mrb[229].mxu0 }
 0x588   : > { %v7878_v19 = vadd.f32 %v7750_v0, %v15222_v57  ;;  %v8015_v13 = vmax.f32 %v7887_v48, 0.0  ;;  %v7881_v29 = vadd.f32 %v7753_v56, %v15224_v50  ;;  %v7891_v16 = vadd.f32 %v7763_v24, %v15225_v21  ;;  %v7438_v0 = vpop.f32.mrb[228].mxu1 }
 0x589   : > { %v8016_v31 = vmax.f32 %v7888_v2, 0.0  ;;  %v7882_v22 = vadd.f32 %v7754_v63, %v15226_v47  ;;  %v7892_v6 = vadd.f32 %v7764_v54, %v15227_v55  ;;  %v7607_v42 = vmul.f32 %v15215_v3, %v7235_v32  ;;  %v7440_v15 = vpop.f32.mrb[229].mxu1  ;;  %v7239_v2 = vpop.f32.mrb[230].mxu0  ;;  %v15229_v47 = vld [vmem:[#allocation68_spill] sm:$0xff] }
 0x58a   : > { %v8006_v61 = vmax.f32 %v7878_v19, 0.0  ;;  %v8009_v57 = vmax.f32 %v7881_v29, 0.0  ;;  %v8019_v7 = vmax.f32 %v7891_v16, 0.0  ;;  %v7617_v43 = vmul.f32 %v13586_v8, %v7438_v0  ;;  %v7442_v50 = vpop.f32.mrb[230].mxu1  ;;  %v7241_v32 = vpop.f32.mrb[231].mxu0 }
 0x58b   : > { %v9310_v56 = vpack.c.bf16 %v8016_v31, %v8015_v13  ;;  %v8010_v24 = vmax.f32 %v7882_v22, 0.0  ;;  %v8020_v19 = vmax.f32 %v7892_v6, 0.0  ;;  %v7757_v63 = vadd.f32 %v13544_v53, %v7607_v42  ;;  %v7444_v16 = vpop.f32.mrb[231].mxu1 }
 0x58c   : > { %v9305_v48 = vpack.c.bf16 %v8006_v61, %v8005_v14  ;;  %v7767_v54 = vadd.f32 %v13588_v39, %v7617_v43  ;;  %v7608_v29 = vmul.f32 %v13596_v10, %v7237_v37  ;;  %v7618_v21 = vmul.f32 %v13628_v11, %v7440_v15  ;;  %v15228_v61 = vld [vmem:[#allocation22_spill] sm:$0xff] }
 0x58d   : > { %8522 = vst [vmem:[%s14257_s23 + $0x28] sm:$0xff] %v9310_v56  ;;  %v9307_v6 = vpack.c.bf16 %v8010_v24, %v8009_v57  ;;  %v9312_v22 = vpack.c.bf16 %v8020_v19, %v8019_v7  ;;  %v7611_v13 = vmul.f32 %v15215_v3, %v7239_v2  ;;  %v7621_v14 = vmul.f32 %v13586_v8, %v7442_v50  ;;  %v15230_v56 = vld [vmem:[#allocation25_spill] sm:$0xff]  ;;  %v15231_v19 = vld [vmem:[#allocation70_spill] sm:$0xff]  ;;  %v15232_v50 = vld [vmem:[#allocation35_spill] sm:$0xff] }
 0x58e   : > { %8517 = vst [vmem:[%s14257_s23] sm:$0xff] %v9305_v48  ;;  %v7885_v31 = vadd.f32 %v7757_v63, %v15228_v61  ;;  %v7895_v55 = vadd.f32 %v7767_v54, %v15229_v47  ;;  %v7758_v0 = vadd.f32 %v15218_v18, %v7608_v29  ;;  %v7768_v42 = vadd.f32 %v15219_v59, %v7618_v21  ;;  %v15233_v54 = vld [vmem:[#allocation72_spill] sm:$0xff] }
 0x58f   : > { %8519 = vst [vmem:[%s14257_s23 + $0x10] sm:$0xff] %v9307_v6  ;;  %8524 = vst [vmem:[%s14257_s23 + $0x38] sm:$0xff] %v9312_v22  ;;  %v7761_v43 = vadd.f32 %v13544_v53, %v7611_v13  ;;  %v7771_v37 = vadd.f32 %v13588_v39, %v7621_v14  ;;  %v7612_v57 = vmul.f32 %v13596_v10, %v7241_v32  ;;  %v7245_v22 = vpop.f32.mrb[232].mxu0  ;;  %v7448_v13 = vpop.f32.mrb[232].mxu1 }
 0x590   : > { %v7622_v7 = vmul.f32 %v13628_v11, %v7444_v16  ;;  %v8013_v15 = vmax.f32 %v7885_v31, 0.0  ;;  %v8023_v48 = vmax.f32 %v7895_v55, 0.0  ;;  %v7886_v24 = vadd.f32 %v7758_v0, %v15230_v56  ;;  %v7247_v31 = vpop.f32.mrb[233].mxu0  ;;  %v7450_v47 = vpop.f32.mrb[233].mxu1 }
 0x591   : > { %v7896_v2 = vadd.f32 %v7768_v42, %v15231_v19  ;;  %v7889_v63 = vadd.f32 %v7761_v43, %v15232_v50  ;;  %v7899_v29 = vadd.f32 %v7771_v37, %v15233_v54  ;;  %v7762_v21 = vadd.f32 %v15218_v18, %v7612_v57  ;;  %v15234_v42 = vld [vmem:[#allocation36_spill] sm:$0xff]  ;;  %v15235_v37 = vld [vmem:[#allocation74_spill] sm:$0xff]  ;;  %v7249_v56 = vpop.f32.mrb[234].mxu0 }
 0x592   : > { %v7772_v6 = vadd.f32 %v15219_v59, %v7622_v7  ;;  %v8014_v14 = vmax.f32 %v7886_v24, 0.0  ;;  %v7615_v16 = vmul.f32 %v15215_v3, %v7245_v22  ;;  %v7625_v61 = vmul.f32 %v13586_v8, %v7448_v13  ;;  %v7452_v7 = vpop.f32.mrb[234].mxu1  ;;  %v7251_v54 = vpop.f32.mrb[235].mxu0 }
 0x593   : > { %v8024_v32 = vmax.f32 %v7896_v2, 0.0  ;;  %v8017_v55 = vmax.f32 %v7889_v63, 0.0  ;;  %v8027_v0 = vmax.f32 %v7899_v29, 0.0  ;;  %v7890_v43 = vadd.f32 %v7762_v21, %v15234_v42  ;;  %v7454_v22 = vpop.f32.mrb[235].mxu1  ;;  %v15236_v21 = vld [vmem:[#allocation67_spill] sm:$0xff] }
 0x594   : > { %v7900_v57 = vadd.f32 %v7772_v6, %v15235_v37  ;;  %v9309_v19 = vpack.c.bf16 %v8014_v14, %v8013_v15  ;;  %v7765_v24 = vadd.f32 %v13544_v53, %v7615_v16  ;;  %v7775_v2 = vadd.f32 %v13588_v39, %v7625_v61  ;;  %v15237_v15 = vld [vmem:[#allocation76_spill] sm:$0xff] }
 0x595   : > { %v9314_v50 = vpack.c.bf16 %v8024_v32, %v8023_v48  ;;  %v8018_v13 = vmax.f32 %v7890_v43, 0.0  ;;  %v7616_v63 = vmul.f32 %v13596_v10, %v7247_v31  ;;  %v7626_v29 = vmul.f32 %v13628_v11, %v7450_v47 }
 0x596   : > { %v8028_v40 = vmax.f32 %v7900_v57, 0.0  ;;  %8521 = vst [vmem:[%s14257_s23 + $0x20] sm:$0xff] %v9309_v19  ;;  %v7893_v6 = vadd.f32 %v7765_v24, %v15236_v21  ;;  %v7903_v48 = vadd.f32 %v7775_v2, %v15237_v15  ;;  %v7619_v14 = vmul.f32 %v15215_v3, %v7249_v56  ;;  %v15238_v19 = vld [vmem:[#allocation69_spill] sm:$0xff]  ;;  %v15239_v24 = vld [vmem:[#allocation78_spill] sm:$0xff]  ;;  %v15240_v2 = vld [vmem:[#allocation71_spill] sm:$0xff] }
 0x597   : > { %8526 = vst [vmem:[%s14257_s23 + $0x48] sm:$0xff] %v9314_v50  ;;  %v7629_v32 = vmul.f32 %v13586_v8, %v7452_v7  ;;  %v9311_v16 = vpack.c.bf16 %v8018_v13, %v8017_v55  ;;  %v7766_v42 = vadd.f32 %v15218_v18, %v7616_v63  ;;  %v7776_v31 = vadd.f32 %v15219_v59, %v7626_v29  ;;  %v7255_v55 = vpop.f32.mrb[236].mxu0  ;;  %v15241_v63 = vld [vmem:[#allocation80_spill] sm:$0xff] }
 0x598   : > { %v9316_v61 = vpack.c.bf16 %v8028_v40, %v8027_v0  ;;  %v8021_v43 = vmax.f32 %v7893_v6, 0.0  ;;  %v8031_v37 = vmax.f32 %v7903_v48, 0.0  ;;  %v7769_v47 = vadd.f32 %v13544_v53, %v7619_v14  ;;  %v7458_v0 = vpop.f32.mrb[236].mxu1  ;;  %v7257_v15 = vpop.f32.mrb[237].mxu0 }
 0x599   : > { %v7779_v57 = vadd.f32 %v13588_v39, %v7629_v32  ;;  %8523 = vst [vmem:[%s14257_s23 + $0x30] sm:$0xff] %v9311_v16  ;;  %v7894_v50 = vadd.f32 %v7766_v42, %v15238_v19  ;;  %v7904_v56 = vadd.f32 %v7776_v31, %v15239_v24  ;;  %v7620_v7 = vmul.f32 %v13596_v10, %v7251_v54  ;;  %v7460_v48 = vpop.f32.mrb[237].mxu1 }
 0x59a   : > { %8528 = vst [vmem:[%s14257_s23 + $0x58] sm:$0xff] %v9316_v61  ;;  %v7630_v40 = vmul.f32 %v13628_v11, %v7454_v22  ;;  %v7897_v13 = vadd.f32 %v7769_v47, %v15240_v2  ;;  %v7623_v21 = vmul.f32 %v15215_v3, %v7255_v55  ;;  %v7633_v6 = vmul.f32 %v13586_v8, %v7458_v0  ;;  %v7259_v61 = vpop.f32.mrb[238].mxu0  ;;  %v7462_v22 = vpop.f32.mrb[238].mxu1  ;;  %v15243_v2 = vld [vmem:[#allocation82_spill] sm:$0xff] }
 0x59b   : > { %v7907_v29 = vadd.f32 %v7779_v57, %v15241_v63  ;;  %v8022_v14 = vmax.f32 %v7894_v50, 0.0  ;;  %v8032_v32 = vmax.f32 %v7904_v56, 0.0  ;;  %v7770_v16 = vadd.f32 %v15218_v18, %v7620_v7  ;;  %v7261_v19 = vpop.f32.mrb[239].mxu0  ;;  %v7464_v24 = vpop.f32.mrb[239].mxu1  ;;  %v15242_v50 = vld [vmem:[#allocation73_spill] sm:$0xff]  ;;  %v15244_v63 = vld [vmem:[#allocation75_spill] sm:$0xff] }
 0x59c   : > { %v7780_v54 = vadd.f32 %v15219_v59, %v7630_v40  ;;  %v8025_v42 = vmax.f32 %v7897_v13, 0.0  ;;  %v7773_v47 = vadd.f32 %v13544_v53, %v7623_v21  ;;  %v7783_v57 = vadd.f32 %v13588_v39, %v7633_v6 }
 0x59d   : > { %v8035_v31 = vmax.f32 %v7907_v29, 0.0  ;;  %v9313_v55 = vpack.c.bf16 %v8022_v14, %v8021_v43  ;;  %v9318_v0 = vpack.c.bf16 %v8032_v32, %v8031_v37  ;;  %v7898_v56 = vadd.f32 %v7770_v16, %v15242_v50 }
 0x59e   : > { %v7908_v7 = vadd.f32 %v7780_v54, %v15243_v2  ;;  %v7901_v40 = vadd.f32 %v7773_v47, %v15244_v63  ;;  %v7911_v52 = vadd.f32 %v7783_v57, %v15245_v62  ;;  %v7624_v36 = vmul.f32 %v13596_v10, %v7257_v15  ;;  %v7265_v47 = vpop.f32.mrb[240].mxu0  ;;  %v7468_v57 = vpop.f32.mrb[240].mxu1  ;;  %v15249_v2 = vld [vmem:[#allocation57_spill] sm:$0xff] }
 0x59f   : > { %v7634_v13 = vmul.f32 %v13628_v11, %v7460_v48  ;;  %8525 = vst [vmem:[%s14257_s23 + $0x40] sm:$0xff] %v9313_v55  ;;  %8530 = vst [vmem:[%s14257_s23 + $0x68] sm:$0xff] %v9318_v0  ;;  %v8026_v29 = vmax.f32 %v7898_v56, 0.0  ;;  %v7627_v6 = vmul.f32 %v15215_v3, %v7259_v61  ;;  %v7637_v43 = vmul.f32 %v13586_v8, %v7462_v22  ;;  %v15246_v55 = vld [vmem:[#allocation77_spill] sm:$0xff]  ;;  %v15247_v0 = vld [vmem:[#allocation46_spill] sm:$0xff]  ;;  %v7267_v56 = vpop.f32.mrb[241].mxu0 }
 0x5a0   : > { %v8036_v21 = vmax.f32 %v7908_v7, 0.0  ;;  %v8029_v37 = vmax.f32 %v7901_v40, 0.0  ;;  %v8039_v14 = vmax.f32 %v7911_v52, 0.0  ;;  %v7774_v32 = vadd.f32 %v15218_v18, %v7624_v36  ;;  %v7470_v36 = vpop.f32.mrb[241].mxu1 }
 0x5a1   : > { %v7784_v62 = vadd.f32 %v15219_v59, %v7634_v13  ;;  %v9315_v16 = vpack.c.bf16 %v8026_v29, %v8025_v42  ;;  %v7777_v48 = vadd.f32 %v13544_v53, %v7627_v6  ;;  %v7787_v54 = vadd.f32 %v13588_v39, %v7637_v43  ;;  %v15248_v42 = vld [vmem:[#allocation79_spill] sm:$0xff]  ;;  %v7269_v13 = vpop.f32.mrb[242].mxu0  ;;  %v7472_v29 = vpop.f32.mrb[242].mxu1 }
 0x5a2   : > { %v9320_v15 = vpack.c.bf16 %v8036_v21, %v8035_v31  ;;  %v7902_v61 = vadd.f32 %v7774_v32, %v15246_v55  ;;  %v7628_v50 = vmul.f32 %v13596_v10, %v7261_v19  ;;  %v7638_v52 = vmul.f32 %v13628_v11, %v7464_v24  ;;  %v7271_v43 = vpop.f32.mrb[243].mxu0  ;;  %v7474_v32 = vpop.f32.mrb[243].mxu1 }
 0x5a3   : > { %v7912_v22 = vadd.f32 %v7784_v62, %v15247_v0  ;;  %8527 = vst [vmem:[%s14257_s23 + $0x50] sm:$0xff] %v9315_v16  ;;  %v7905_v31 = vadd.f32 %v7777_v48, %v15248_v42  ;;  %v7915_v7 = vadd.f32 %v7787_v54, %v15249_v2  ;;  %v7631_v63 = vmul.f32 %v15215_v3, %v7265_v47  ;;  %v15253_v42 = vld [vmem:[#allocation85_spill] sm:$0xff] }
 0x5a4   : > { %8532 = vst [vmem:[%s14257_s23 + $0x78] sm:$0xff] %v9320_v15  ;;  %v7641_v40 = vmul.f32 %v13586_v8, %v7468_v57  ;;  %v8030_v21 = vmax.f32 %v7902_v61, 0.0  ;;  %v7778_v19 = vadd.f32 %v15218_v18, %v7628_v50  ;;  %v7788_v24 = vadd.f32 %v15219_v59, %v7638_v52  ;;  %v15250_v57 = vld [vmem:[#allocation81_spill] sm:$0xff]  ;;  %v15251_v61 = vld [vmem:[#allocation83_spill] sm:$0xff] }
 0x5a5   : > { %v8040_v6 = vmax.f32 %v7912_v22, 0.0  ;;  %v8033_v62 = vmax.f32 %v7905_v31, 0.0  ;;  %v8043_v16 = vmax.f32 %v7915_v7, 0.0  ;;  %v7781_v15 = vadd.f32 %v13544_v53, %v7631_v63  ;;  %v15252_v22 = vld [vmem:[#allocation43_spill] sm:$0xff] }
 0x5a6   : > { %v7791_v48 = vadd.f32 %v13588_v39, %v7641_v40  ;;  %v9317_v54 = vpack.c.bf16 %v8030_v21, %v8029_v37  ;;  %v7906_v55 = vadd.f32 %v7778_v19, %v15250_v57  ;;  %v7916_v0 = vadd.f32 %v7788_v24, %v15251_v61  ;;  %v7275_v19 = vpop.f32.mrb[244].mxu0  ;;  %v15255_v57 = vld [vmem:[#allocation87_spill] sm:$0xff] }
 0x5a7   : > { %v9322_v47 = vpack.c.bf16 %v8040_v6, %v8039_v14  ;;  %v7909_v50 = vadd.f32 %v7781_v15, %v15252_v22  ;;  %v7632_v52 = vmul.f32 %v13596_v10, %v7267_v56  ;;  %v7642_v26 = vmul.f32 %v13628_v11, %v7470_v36  ;;  %v7478_v56 = vpop.f32.mrb[244].mxu1 }
 0x5a8   : > { %v7919_v2 = vadd.f32 %v7791_v48, %v15253_v42  ;;  %8529 = vst [vmem:[%s14257_s23 + $0x60] sm:$0xff] %v9317_v54  ;;  %v8034_v31 = vmax.f32 %v7906_v55, 0.0  ;;  %v8044_v7 = vmax.f32 %v7916_v0, 0.0  ;;  %v7635_v63 = vmul.f32 %v15215_v3, %v7269_v13  ;;  %v7277_v54 = vpop.f32.mrb[245].mxu0  ;;  %v7480_v13 = vpop.f32.mrb[245].mxu1 }
 0x5a9   : > { %8534 = vst [vmem:[%s14257_s23 + $0x88] sm:$0xff] %v9322_v47  ;;  %v7645_v37 = vmul.f32 %v13586_v8, %v7472_v29  ;;  %v8037_v14 = vmax.f32 %v7909_v50, 0.0  ;;  %v7782_v21 = vadd.f32 %v15218_v18, %v7632_v52  ;;  %v7792_v6 = vadd.f32 %v15219_v59, %v7642_v26  ;;  %v15254_v47 = vld [vmem:[#allocation45_spill] sm:$0xff]  ;;  %v7279_v26 = vpop.f32.mrb[246].mxu0  ;;  %v7482_v22 = vpop.f32.mrb[246].mxu1 }
 0x5aa   : > { %v8047_v40 = vmax.f32 %v7919_v2, 0.0  ;;  %v9319_v24 = vpack.c.bf16 %v8034_v31, %v8033_v62  ;;  %v9324_v36 = vpack.c.bf16 %v8044_v7, %v8043_v16  ;;  %v7785_v15 = vadd.f32 %v13544_v53, %v7635_v63  ;;  %v15256_v62 = vld [vmem:[#allocation29_spill] sm:$0xff]  ;;  %v7281_v31 = vpop.f32.mrb[247].mxu0  ;;  %v7484_v7 = vpop.f32.mrb[247].mxu1 }
 0x5ab   : > { %v7795_v48 = vadd.f32 %v13588_v39, %v7645_v37  ;;  %v7910_v29 = vadd.f32 %v7782_v21, %v15254_v47  ;;  %v7920_v55 = vadd.f32 %v7792_v6, %v15255_v57  ;;  %v7636_v61 = vmul.f32 %v13596_v10, %v7271_v43  ;;  %v15257_v50 = vld [vmem:[#allocation89_spill] sm:$0xff] }
 0x5ac   : > { %v7646_v0 = vmul.f32 %v13628_v11, %v7474_v32  ;;  %8531 = vst [vmem:[%s14257_s23 + $0x70] sm:$0xff] %v9319_v24  ;;  %8536 = vst [vmem:[%s14257_s23 + $0x98] sm:$0xff] %v9324_v36  ;;  %v7913_v16 = vadd.f32 %v7785_v15, %v15256_v62  ;;  %v7639_v2 = vmul.f32 %v15215_v3, %v7275_v19  ;;  %v15259_v47 = vld [vmem:[#allocation49_spill] sm:$0xff] }
 0x5ad   : > { %v7923_v42 = vadd.f32 %v7795_v48, %v15257_v50  ;;  %v7649_v52 = vmul.f32 %v13586_v8, %v7478_v56  ;;  %v8038_v63 = vmax.f32 %v7910_v29, 0.0  ;;  %v8048_v37 = vmax.f32 %v7920_v55, 0.0  ;;  %v15258_v48 = vld [vmem:[#allocation47_spill] sm:$0xff]  ;;  %v15260_v29 = vld [vmem:[#allocation84_spill] sm:$0xff] }
 0x5ae   : > { %v7786_v43 = vadd.f32 %v15218_v18, %v7636_v61  ;;  %v7796_v32 = vadd.f32 %v15219_v59, %v7646_v0  ;;  %v8041_v21 = vmax.f32 %v7913_v16, 0.0  ;;  %v7789_v24 = vadd.f32 %v13544_v53, %v7639_v2  ;;  %v7488_v2 = vpop.f32.mrb[248].mxu1 }
 0x5af   : > { %v8051_v6 = vmax.f32 %v7923_v42, 0.0  ;;  %v7799_v36 = vadd.f32 %v13588_v39, %v7649_v52  ;;  %v9321_v15 = vpack.c.bf16 %v8038_v63, %v8037_v14  ;;  %v9326_v19 = vpack.c.bf16 %v8048_v37, %v8047_v40  ;;  %v7285_v40 = vpop.f32.mrb[248].mxu0 }
 0x5b0   : > { %v7914_v56 = vadd.f32 %v7786_v43, %v15258_v48  ;;  %v7924_v57 = vadd.f32 %v7796_v32, %v15259_v47  ;;  %v7917_v62 = vadd.f32 %v7789_v24, %v15260_v29  ;;  %v7640_v61 = vmul.f32 %v13596_v10, %v7277_v54  ;;  %v7287_v54 = vpop.f32.mrb[249].mxu0 }
 0x5b1   : > { %v7927_v55 = vadd.f32 %v7799_v36, %v13860_v30  ;;  %v7650_v0 = vmul.f32 %v13628_v11, %v7480_v13  ;;  %8533 = vst [vmem:[%s14257_s23 + $0x80] sm:$0xff] %v9321_v15  ;;  %8538 = vst [vmem:[%s14257_s23 + $0xa8] sm:$0xff] %v9326_v19  ;;  %v7643_v42 = vmul.f32 %v15215_v3, %v7279_v26  ;;  %v7490_v13 = vpop.f32.mrb[249].mxu1  ;;  %v7289_v36 = vpop.f32.mrb[250].mxu0  ;;  %v15261_v15 = vld [vmem:[#allocation86_spill] sm:$0xff] }
 0x5b2   : > { %v8042_v16 = vmax.f32 %v7914_v56, 0.0  ;;  %v8052_v50 = vmax.f32 %v7924_v57, 0.0  ;;  %v7653_v14 = vmul.f32 %v13586_v8, %v7482_v22  ;;  %v8045_v52 = vmax.f32 %v7917_v62, 0.0  ;;  %v7492_v22 = vpop.f32.mrb[250].mxu1  ;;  %v7291_v57 = vpop.f32.mrb[251].mxu0 }
 0x5b3   : > { %v8055_v63 = vmax.f32 %v7927_v55, 0.0  ;;  %v7790_v37 = vadd.f32 %v15218_v18, %v7640_v61  ;;  %v7800_v30 = vadd.f32 %v15219_v59, %v7650_v0  ;;  %v7793_v24 = vadd.f32 %v13544_v53, %v7643_v42  ;;  %v7494_v29 = vpop.f32.mrb[251].mxu1 }
 0x5b4   : > { %v9323_v43 = vpack.c.bf16 %v8042_v16, %v8041_v21  ;;  %v9328_v32 = vpack.c.bf16 %v8052_v50, %v8051_v6  ;;  %v7803_v26 = vadd.f32 %v13588_v39, %v7653_v14  ;;  %v7644_v56 = vmul.f32 %v13596_v10, %v7281_v31  ;;  %v15262_v21 = vld [vmem:[#allocation88_spill] sm:$0xff] }
 0x5b5   : > { %v7918_v19 = vadd.f32 %v7790_v37, %v15261_v15  ;;  %v7928_v48 = vadd.f32 %v7800_v30, %v13870_v44  ;;  %v7654_v47 = vmul.f32 %v13628_v11, %v7484_v7  ;;  %v7921_v6 = vadd.f32 %v7793_v24, %v15262_v21  ;;  %v15263_v30 = vld [vmem:[#allocation48_spill] sm:$0xff] }
 0x5b6   : > { %8535 = vst [vmem:[%s14257_s23 + $0x90] sm:$0xff] %v9323_v43  ;;  %8540 = vst [vmem:[%s14257_s23 + $0xb8] sm:$0xff] %v9328_v32  ;;  %v7931_v62 = vadd.f32 %v7803_v26, %v13880_v46  ;;  %v7647_v55 = vmul.f32 %v15215_v3, %v7285_v40  ;;  %v7657_v61 = vmul.f32 %v13586_v8, %v7488_v2  ;;  %v15264_v43 = vld [vmem:[#allocation50_spill] sm:$0xff]  ;;  %v15265_v24 = vld [vmem:[#allocation32_spill] sm:$0xff] }
 0x5b7   : > { %v8046_v0 = vmax.f32 %v7918_v19, 0.0  ;;  %v8056_v16 = vmax.f32 %v7928_v48, 0.0  ;;  %v7794_v44 = vadd.f32 %v15218_v18, %v7644_v56  ;;  %v7804_v31 = vadd.f32 %v15219_v59, %v7654_v47  ;;  %v7295_v48 = vpop.f32.mrb[252].mxu0  ;;  %v7498_v56 = vpop.f32.mrb[252].mxu1 }
 0x5b8   : > { %v8049_v7 = vmax.f32 %v7921_v6, 0.0  ;;  %v8059_v50 = vmax.f32 %v7931_v62, 0.0  ;;  %v7797_v42 = vadd.f32 %v13544_v53, %v7647_v55  ;;  %v7807_v14 = vadd.f32 %v13588_v39, %v7657_v61  ;;  %v7297_v6 = vpop.f32.mrb[253].mxu0 }
 0x5b9   : > { %v9325_v37 = vpack.c.bf16 %v8046_v0, %v8045_v52  ;;  %v9330_v46 = vpack.c.bf16 %v8056_v16, %v8055_v63  ;;  %v7922_v40 = vadd.f32 %v7794_v44, %v15263_v30  ;;  %v7932_v2 = vadd.f32 %v7804_v31, %v13886_v5  ;;  %v7500_v5 = vpop.f32.mrb[253].mxu1  ;;  %v7299_v61 = vpop.f32.mrb[254].mxu0 }
 0x5ba   : > { %v7925_v32 = vadd.f32 %v7797_v42, %v15264_v43  ;;  %v7935_v26 = vadd.f32 %v7807_v14, %v15265_v24  ;;  %v7648_v15 = vmul.f32 %v13596_v10, %v7287_v54  ;;  %v7658_v19 = vmul.f32 %v13628_v11, %v7490_v13  ;;  %v7502_v0 = vpop.f32.mrb[254].mxu1  ;;  %v7301_v42 = vpop.f32.mrb[255].mxu0  ;;  %v15266_v14 = vld [vmem:[#allocation59_spill] sm:$0xff]  ;;  %v15268_v43 = vld [vmem:[#allocation30_spill] sm:$0xff] }
 0x5bb   : > { %8537 = vst [vmem:[%s14257_s23 + $0xa0] sm:$0xff] %v9325_v37  ;;  %8542 = vst [vmem:[%s14257_s23 + $0xc8] sm:$0xff] %v9330_v46  ;;  %v8050_v47 = vmax.f32 %v7922_v40, 0.0  ;;  %v8060_v21 = vmax.f32 %v7932_v2, 0.0  ;;  %v7651_v52 = vmul.f32 %v15215_v3, %v7289_v36  ;;  %v7661_v63 = vmul.f32 %v13586_v8, %v7492_v22  ;;  %v7504_v22 = vpop.f32.mrb[255].mxu1  ;;  %v15267_v46 = vld [vmem:[#allocation52_spill] sm:$0xff] }
 0x5bc   : > { %v8053_v62 = vmax.f32 %v7925_v32, 0.0  ;;  %v8063_v55 = vmax.f32 %v7935_v26, 0.0  ;;  %v7798_v54 = vadd.f32 %v15218_v18, %v7648_v15  ;;  %v7808_v13 = vadd.f32 %v15219_v59, %v7658_v19 }
 0x5bd   : > { %v9327_v16 = vpack.c.bf16 %v8050_v47, %v8049_v7  ;;  %v9332_v44 = vpack.c.bf16 %v8060_v21, %v8059_v50  ;;  %v7801_v31 = vadd.f32 %v13544_v53, %v7651_v52  ;;  %v7811_v36 = vadd.f32 %v13588_v39, %v7661_v63  ;;  %v15269_v7 = vld [vmem:[#allocation54_spill] sm:$0xff] }
 0x5be   : > { %v7926_v37 = vadd.f32 %v7798_v54, %v15266_v14  ;;  %v7936_v30 = vadd.f32 %v7808_v13, %v15267_v46  ;;  %v7652_v40 = vmul.f32 %v13596_v10, %v7291_v57  ;;  %v7662_v2 = vmul.f32 %v13628_v11, %v7494_v29  ;;  %v15272_v14 = vld [vmem:[#allocation31_spill] sm:$0xff] }
 0x5bf   : > { %8539 = vst [vmem:[%s14257_s23 + $0xb0] sm:$0xff] %v9327_v16  ;;  %8544 = vst [vmem:[%s14257_s23 + $0xd8] sm:$0xff] %v9332_v44  ;;  %v7929_v32 = vadd.f32 %v7801_v31, %v15268_v43  ;;  %v7939_v50 = vadd.f32 %v7811_v36, %v15269_v7  ;;  %v7655_v24 = vmul.f32 %v15215_v3, %v7295_v48  ;;  %v15270_v16 = vld [vmem:[#allocation58_spill] sm:$0xff]  ;;  %v7305_v31 = vpop.f32.mrb[0].mxu0  ;;  %v7508_v36 = vpop.f32.mrb[0].mxu1 }
 0x5c0   : > { %v7665_v26 = vmul.f32 %v13586_v8, %v7498_v56  ;;  %v8054_v15 = vmax.f32 %v7926_v37, 0.0  ;;  %v8064_v19 = vmax.f32 %v7936_v30, 0.0  ;;  %v7802_v47 = vadd.f32 %v15218_v18, %v7652_v40  ;;  %v15271_v44 = vld [vmem:[#allocation34_spill] sm:$0xff]  ;;  %v7510_v43 = vpop.f32.mrb[1].mxu1 }
 0x5c1   : > { %v7812_v21 = vadd.f32 %v15219_v59, %v7662_v2  ;;  %v8057_v52 = vmax.f32 %v7929_v32, 0.0  ;;  %v8067_v57 = vmax.f32 %v7939_v50, 0.0  ;;  %v7805_v29 = vadd.f32 %v13544_v53, %v7655_v24  ;;  %v7307_v2 = vpop.f32.mrb[1].mxu0  ;;  %v7512_v24 = vpop.f32.mrb[2].mxu1 }
 0x5c2   : > { %v7815_v63 = vadd.f32 %v13588_v39, %v7665_v26  ;;  %v9329_v54 = vpack.c.bf16 %v8054_v15, %v8053_v62  ;;  %v9334_v13 = vpack.c.bf16 %v8064_v19, %v8063_v55  ;;  %v7930_v48 = vadd.f32 %v7802_v47, %v15270_v16  ;;  %v7309_v50 = vpop.f32.mrb[2].mxu0  ;;  %v7514_v19 = vpop.f32.mrb[3].mxu1 }
 0x5c3   : > { %v7940_v56 = vadd.f32 %v7812_v21, %v15271_v44  ;;  %v7933_v37 = vadd.f32 %v7805_v29, %v15272_v14  ;;  %v7656_v30 = vmul.f32 %v13596_v10, %v7297_v6  ;;  %v7666_v40 = vmul.f32 %v13628_v11, %v7500_v5  ;;  %v7311_v15 = vpop.f32.mrb[3].mxu0 }
 0x5c4   : > { %v7943_v46 = vadd.f32 %v7815_v63, %v13956_v25  ;;  %8541 = vst [vmem:[%s14257_s23 + $0xc0] sm:$0xff] %v9329_v54  ;;  %8546 = vst [vmem:[%s14257_s23 + $0xe8] sm:$0xff] %v9334_v13  ;;  %v8058_v62 = vmax.f32 %v7930_v48, 0.0  ;;  %v7659_v32 = vmul.f32 %v15215_v3, %v7299_v61  ;;  %v7669_v7 = vmul.f32 %v13586_v8, %v7502_v0  ;;  %v15273_v63 = vld [vmem:[#allocation51_spill] sm:$0xff]  ;;  %v15274_v48 = vld [vmem:[#allocation53_spill] sm:$0xff] }
 0x5c5   : > { %v8068_v55 = vmax.f32 %v7940_v56, 0.0  ;;  %v8061_v26 = vmax.f32 %v7933_v37, 0.0  ;;  %v7806_v6 = vadd.f32 %v15218_v18, %v7656_v30  ;;  %v7816_v5 = vadd.f32 %v15219_v59, %v7666_v40 }
 0x5c6   : > { %v8071_v25 = vmax.f32 %v7943_v46, 0.0  ;;  %v9331_v47 = vpack.c.bf16 %v8058_v62, %v8057_v52  ;;  %v7809_v29 = vadd.f32 %v13544_v53, %v7659_v32  ;;  %v7819_v61 = vadd.f32 %v13588_v39, %v7669_v7  ;;  %v7315_v62 = vpop.f32.mrb[4].mxu0  ;;  %v15275_v32 = vld [vmem:[#allocation33_spill] sm:$0xff] }
 0x5c7   : > { %v9336_v21 = vpack.c.bf16 %v8068_v55, %v8067_v57  ;;  %v7934_v0 = vadd.f32 %v7806_v6, %v15273_v63  ;;  %v7944_v54 = vadd.f32 %v7816_v5, %v13966_v60  ;;  %v7660_v13 = vmul.f32 %v13596_v10, %v7301_v42  ;;  %v7317_v6 = vpop.f32.mrb[5].mxu0 }
 0x5c8   : > { %v7670_v16 = vmul.f32 %v13628_v11, %v7504_v22  ;;  %8543 = vst [vmem:[%s14257_s23 + $0xd0] sm:$0xff] %v9331_v47  ;;  %v7937_v44 = vadd.f32 %v7809_v29, %v15274_v48  ;;  %v7947_v56 = vadd.f32 %v7819_v61, %v13976_v33  ;;  %v7663_v52 = vmul.f32 %v15215_v3, %v7305_v31  ;;  %v7518_v33 = vpop.f32.mrb[4].mxu1  ;;  %v7319_v63 = vpop.f32.mrb[6].mxu0 }
 0x5c9   : > { %8548 = vst [vmem:[%s14257_s23 + $0xf8] sm:$0xff] %v9336_v21  ;;  %v7673_v57 = vmul.f32 %v13586_v8, %v7508_v36  ;;  %v8062_v14 = vmax.f32 %v7934_v0, 0.0  ;;  %v8072_v37 = vmax.f32 %v7944_v54, 0.0  ;;  %v7810_v46 = vadd.f32 %v15218_v18, %v7660_v13  ;;  %v7520_v5 = vpop.f32.mrb[5].mxu1  ;;  %v7321_v13 = vpop.f32.mrb[7].mxu0 }
 0x5ca   : > { %v7820_v60 = vadd.f32 %v15219_v59, %v7670_v16  ;;  %v8065_v30 = vmax.f32 %v7937_v44, 0.0  ;;  %v8075_v42 = vmax.f32 %v7947_v56, 0.0  ;;  %v7813_v22 = vadd.f32 %v13544_v53, %v7663_v52  ;;  %v7522_v0 = vpop.f32.mrb[6].mxu1 }
 0x5cb   : > { %v7823_v40 = vadd.f32 %v13588_v39, %v7673_v57  ;;  %v9333_v55 = vpack.c.bf16 %v8062_v14, %v8061_v26  ;;  %v9338_v31 = vpack.c.bf16 %v8072_v37, %v8071_v25  ;;  %v7938_v36 = vadd.f32 %v7810_v46, %v15275_v32  ;;  %v15276_v37 = vld [vmem:[#allocation60_spill] sm:$0xff] }
 0x5cc   : > { %v7948_v7 = vadd.f32 %v7820_v60, %v13982_v4  ;;  %v7941_v47 = vadd.f32 %v7813_v22, %v13953_v41  ;;  %v7664_v29 = vmul.f32 %v13596_v10, %v7307_v2  ;;  %v7674_v61 = vmul.f32 %v13628_v11, %v7510_v43  ;;  %v7524_v41 = vpop.f32.mrb[7].mxu1  ;;  %v15277_v60 = vld [vmem:[#allocation90_spill] sm:$0xff] }
 0x5cd   : > { %v7951_v21 = vadd.f32 %v7823_v40, %v13988_v34  ;;  %8545 = vst [vmem:[%s14257_s23 + $0xe0] sm:$0xff] %v9333_v55  ;;  %8550 = vst [vmem:[%s14257_s23 + $0x108] sm:$0xff] %v9338_v31  ;;  %v8066_v26 = vmax.f32 %v7938_v36, 0.0  ;;  %v7667_v54 = vmul.f32 %v15215_v3, %v7309_v50  ;;  %v7677_v4 = vmul.f32 %v13586_v8, %v7512_v24  ;;  %v7325_v31 = vpop.f32.mrb[8].mxu0 }
 0x5ce   : > { %v8076_v25 = vmax.f32 %v7948_v7, 0.0  ;;  %v8069_v16 = vmax.f32 %v7941_v47, 0.0  ;;  %v7814_v2 = vadd.f32 %v15218_v18, %v7664_v29  ;;  %v7824_v43 = vadd.f32 %v15219_v59, %v7674_v61  ;;  %v7327_v47 = vpop.f32.mrb[9].mxu0  ;;  %v15278_v29 = vld [vmem:[#allocation61_spill] sm:$0xff] }
 0x5cf   : > { %v8079_v34 = vmax.f32 %v7951_v21, 0.0  ;;  %v9335_v48 = vpack.c.bf16 %v8066_v26, %v8065_v30  ;;  %v7817_v56 = vadd.f32 %v13544_v53, %v7667_v54  ;;  %v7827_v52 = vadd.f32 %v13588_v39, %v7677_v4  ;;  %v15279_v26 = vld [vmem:[#allocation92_spill] sm:$0xff]  ;;  %v7329_v54 = vpop.f32.mrb[10].mxu0 }
 0x5d0   : > { %v9340_v44 = vpack.c.bf16 %v8076_v25, %v8075_v42  ;;  %v7942_v50 = vadd.f32 %v7814_v2, %v13963_v58  ;;  %v7952_v57 = vadd.f32 %v7824_v43, %v13994_v49  ;;  %v7668_v24 = vmul.f32 %v13596_v10, %v7311_v15  ;;  %v7528_v15 = vpop.f32.mrb[8].mxu1  ;;  %v15280_v2 = vld [vmem:[#allocation56_spill] sm:$0xff] }
 0x5d1   : > { %v7678_v14 = vmul.f32 %v13628_v11, %v7514_v19  ;;  %8547 = vst [vmem:[%s14257_s23 + $0xf0] sm:$0xff] %v9335_v48  ;;  %v7945_v46 = vadd.f32 %v7817_v56, %v15276_v37  ;;  %v7955_v22 = vadd.f32 %v7827_v52, %v15277_v60  ;;  %v7671_v30 = vmul.f32 %v15215_v3, %v7315_v62  ;;  %v7530_v62 = vpop.f32.mrb[9].mxu1  ;;  %v14485_v52 = vpop.f32.mrb[11].mxu0 }
 0x5d2   : > { %8552 = vst [vmem:[%s14257_s23 + $0x118] sm:$0xff] %v9340_v44  ;;  %v7681_v42 = vmul.f32 %v13586_v8, %v7518_v33  ;;  %v8070_v40 = vmax.f32 %v7942_v50, 0.0  ;;  %v8080_v55 = vmax.f32 %v7952_v57, 0.0  ;;  %v7818_v58 = vadd.f32 %v15218_v18, %v7668_v24  ;;  %v7532_v4 = vpop.f32.mrb[10].mxu1 }
 0x5d3   : > { %v7828_v49 = vadd.f32 %v15219_v59, %v7678_v14  ;;  %v8073_v32 = vmax.f32 %v7945_v46, 0.0  ;;  %v8083_v19 = vmax.f32 %v7955_v22, 0.0  ;;  %v7821_v36 = vadd.f32 %v13544_v53, %v7671_v30  ;;  %v14487_v50 = vpop.f32.mrb[11].mxu1  ;;  %v15281_v30 = vld [vmem:[#allocation63_spill] sm:$0xff] }
 0x5d4   : > { %v7831_v7 = vadd.f32 %v13588_v39, %v7681_v42  ;;  %v9337_v21 = vpack.c.bf16 %v8070_v40, %v8069_v16  ;;  %v9342_v33 = vpack.c.bf16 %v8080_v55, %v8079_v34  ;;  %v7946_v61 = vadd.f32 %v7818_v58, %v15278_v29  ;;  %v15282_v55 = vld [vmem:[#allocation64_spill] sm:$0xff] }
 0x5d5   : > { %v7956_v25 = vadd.f32 %v7828_v49, %v15279_v26  ;;  %v7949_v43 = vadd.f32 %v7821_v36, %v15280_v2  ;;  %v7672_v44 = vmul.f32 %v13596_v10, %v7317_v6  ;;  %v7682_v56 = vmul.f32 %v13628_v11, %v7520_v5  ;;  %v7335_v36 = vpop.f32.mrb[12].mxu0 }
 0x5d6   : > { %v7959_v48 = vadd.f32 %v7831_v7, %v14036_v38  ;;  %8549 = vst [vmem:[%s14257_s23 + $0x100] sm:$0xff] %v9337_v21  ;;  %8554 = vst [vmem:[%s14257_s23 + $0x128] sm:$0xff] %v9342_v33  ;;  %v8074_v16 = vmax.f32 %v7946_v61, 0.0  ;;  %v7675_v57 = vmul.f32 %v15215_v3, %v7319_v63  ;;  %v7685_v24 = vmul.f32 %v13586_v8, %v7522_v0  ;;  %v7538_v7 = vpop.f32.mrb[12].mxu1  ;;  %v14509_v29 = vpop.f32.mrb[13].mxu0 }
 0x5d7   : > { %v8084_v34 = vmax.f32 %v7956_v25, 0.0  ;;  %v8077_v14 = vmax.f32 %v7949_v43, 0.0  ;;  %v7822_v6 = vadd.f32 %v15218_v18, %v7672_v44  ;;  %v7832_v5 = vadd.f32 %v15219_v59, %v7682_v56 }
 0x5d8   : > { %v8087_v38 = vmax.f32 %v7959_v48, 0.0  ;;  %v9339_v37 = vpack.c.bf16 %v8074_v16, %v8073_v32  ;;  %v7825_v60 = vadd.f32 %v13544_v53, %v7675_v57  ;;  %v7835_v22 = vadd.f32 %v13588_v39, %v7685_v24  ;;  %v15283_v48 = vld [vmem:[#allocation91_spill] sm:$0xff] }
 0x5d9   : > { %v9344_v46 = vpack.c.bf16 %v8084_v34, %v8083_v19  ;;  %v7950_v42 = vadd.f32 %v7822_v6, %v15281_v30  ;;  %v7960_v40 = vadd.f32 %v7832_v5, %v14046_v20  ;;  %v7676_v63 = vmul.f32 %v13596_v10, %v7321_v13 }
 0x5da   : > { %v7686_v0 = vmul.f32 %v13628_v11, %v7524_v41  ;;  %8551 = vst [vmem:[%s14257_s23 + $0x110] sm:$0xff] %v9339_v37  ;;  %v7953_v58 = vadd.f32 %v7825_v60, %v15282_v55  ;;  %v7963_v49 = vadd.f32 %v7835_v22, %v14056_v27  ;;  %v7679_v32 = vmul.f32 %v15215_v3, %v7325_v31  ;;  %v14511_v41 = vpop.f32.mrb[13].mxu1 }
 0x5db   : > { %8556 = vst [vmem:[%s14257_s23 + $0x138] sm:$0xff] %v9344_v46  ;;  %v7689_v19 = vmul.f32 %v13586_v8, %v7528_v15  ;;  %v8078_v21 = vmax.f32 %v7950_v42, 0.0  ;;  %v8088_v33 = vmax.f32 %v7960_v40, 0.0  ;;  %v7826_v20 = vadd.f32 %v15218_v18, %v7676_v63  ;;  %v14515_v15 = vpop.f32.mrb[14].mxu0  ;;  %v14517_v25 = vpop.f32.mrb[14].mxu1  ;;  %v15284_v42 = vld [vmem:[#allocation93_spill] sm:$0xff] }
 0x5dc   : > { %v7836_v13 = vadd.f32 %v15219_v59, %v7686_v0  ;;  %v8081_v61 = vmax.f32 %v7953_v58, 0.0  ;;  %v8091_v26 = vmax.f32 %v7963_v49, 0.0  ;;  %v7829_v27 = vadd.f32 %v13544_v53, %v7679_v32  ;;  %v14521_v16 = vpop.f32.mrb[15].mxu0  ;;  %v14523_v34 = vpop.f32.mrb[15].mxu1  ;;  %v15285_v63 = vld [vmem:[#allocation98_spill] sm:$0xff] }
 0x5dd   : > { %v7839_v31 = vadd.f32 %v13588_v39, %v7689_v19  ;;  %v9341_v2 = vpack.c.bf16 %v8078_v21, %v8077_v14  ;;  %v9346_v43 = vpack.c.bf16 %v8088_v33, %v8087_v38  ;;  %v7954_v44 = vadd.f32 %v7826_v20, %v15283_v48  ;;  %v7345_v55 = vpop.f32.mrb[16].mxu0  ;;  %v7548_v58 = vpop.f32.mrb[16].mxu1  ;;  %v15286_v49 = vld [vmem:[#allocation94_spill] sm:$0xff]  ;;  %v15287_v19 = vld [vmem:[#allocation100_spill] sm:$0xff] }
 0x5de   : > { %v7964_v56 = vadd.f32 %v7836_v13, %v14062_v1  ;;  %v7957_v57 = vadd.f32 %v7829_v27, %v14033_v51  ;;  %v7680_v6 = vmul.f32 %v13596_v10, %v7327_v47  ;;  %v7690_v5 = vmul.f32 %v13628_v11, %v7530_v62  ;;  %v14549_v13 = vpop.f32.mrb[17].mxu0 }
 0x5df   : > { %v7967_v24 = vadd.f32 %v7839_v31, %v14068_v12  ;;  %8553 = vst [vmem:[%s14257_s23 + $0x120] sm:$0xff] %v9341_v2  ;;  %8558 = vst [vmem:[%s14257_s23 + $0x148] sm:$0xff] %v9346_v43  ;;  %v8082_v14 = vmax.f32 %v7954_v44, 0.0  ;;  %v7683_v37 = vmul.f32 %v15215_v3, %v7329_v54  ;;  %v7693_v1 = vmul.f32 %v13586_v8, %v7532_v4  ;;  %v14555_v31 = vpop.f32.mrb[18].mxu0 }
 0x5e0   : > { %v8092_v38 = vmax.f32 %v7964_v56, 0.0  ;;  %v8085_v46 = vmax.f32 %v7957_v57, 0.0  ;;  %v7830_v51 = vadd.f32 %v15218_v18, %v7680_v6  ;;  %v7840_v12 = vadd.f32 %v15219_v59, %v7690_v5  ;;  %v14561_v44 = vpop.f32.mrb[19].mxu0  ;;  %v15288_v6 = vld [vmem:[#allocation95_spill] sm:$0xff] }
 0x5e1   : > { %v8095_v60 = vmax.f32 %v7967_v24, 0.0  ;;  %v9343_v22 = vpack.c.bf16 %v8082_v14, %v8081_v61  ;;  %v7833_v62 = vadd.f32 %v13544_v53, %v7683_v37  ;;  %v7843_v30 = vadd.f32 %v13588_v39, %v7693_v1  ;;  %v14551_v61 = vpop.f32.mrb[17].mxu1  ;;  %v15289_v14 = vld [vmem:[#allocation102_spill] sm:$0xff]  ;;  %v15290_v37 = vld [vmem:[#allocation96_spill] sm:$0xff] }
 0x5e2   : > { %v9348_v47 = vpack.c.bf16 %v8092_v38, %v8091_v26  ;;  %v7958_v40 = vadd.f32 %v7830_v51, %v15284_v42  ;;  %v7968_v54 = vadd.f32 %v7840_v12, %v15285_v63  ;;  %v7684_v4 = vmul.f32 %v13596_v10, %v14485_v52  ;;  %v14557_v2 = vpop.f32.mrb[18].mxu1 }
 0x5e3   : > { %v7694_v0 = vmul.f32 %v13628_v11, %v14487_v50  ;;  %8555 = vst [vmem:[%s14257_s23 + $0x130] sm:$0xff] %v9343_v22  ;;  %v7961_v32 = vadd.f32 %v7833_v62, %v15286_v49  ;;  %v7971_v21 = vadd.f32 %v7843_v30, %v15287_v19  ;;  %v7687_v33 = vmul.f32 %v15215_v3, %v7335_v36  ;;  %v14563_v56 = vpop.f32.mrb[19].mxu1 }
 0x5e4   : > { %8560 = vst [vmem:[%s14257_s23 + $0x158] sm:$0xff] %v9348_v47  ;;  %v7697_v20 = vmul.f32 %v13586_v8, %v7538_v7  ;;  %v8086_v52 = vmax.f32 %v7958_v40, 0.0  ;;  %v8096_v26 = vmax.f32 %v7968_v54, 0.0  ;;  %v7834_v50 = vadd.f32 %v15218_v18, %v7684_v4  ;;  %v7355_v4 = vpop.f32.mrb[20].mxu0 }
 0x5e5   : > { %v7844_v27 = vadd.f32 %v15219_v59, %v7694_v0  ;;  %v8089_v43 = vmax.f32 %v7961_v32, 0.0  ;;  %v8099_v36 = vmax.f32 %v7971_v21, 0.0  ;;  %v7837_v7 = vadd.f32 %v13544_v53, %v7687_v33  ;;  %v7558_v0 = vpop.f32.mrb[20].mxu1  ;;  %v14589_v21 = vpop.f32.mrb[21].mxu0 }
 0x5e6   : > { %v7847_v48 = vadd.f32 %v13588_v39, %v7697_v20  ;;  %v9345_v57 = vpack.c.bf16 %v8086_v52, %v8085_v46  ;;  %v9350_v24 = vpack.c.bf16 %v8096_v26, %v8095_v60  ;;  %v7962_v5 = vadd.f32 %v7834_v50, %v15288_v6  ;;  %v14591_v33 = vpop.f32.mrb[21].mxu1  ;;  %v15292_v20 = vld [vmem:[#allocation99_spill] sm:$0xff] }
 0x5e7   : > { %v7972_v38 = vadd.f32 %v7844_v27, %v15289_v14  ;;  %v7965_v1 = vadd.f32 %v7837_v7, %v15290_v37  ;;  %v7688_v12 = vmul.f32 %v13596_v10, %v14509_v29  ;;  %v7698_v22 = vmul.f32 %v13628_v11, %v14511_v41  ;;  %v14599_v27 = vpop.f32.mrb[22].mxu0  ;;  %v15293_v14 = vld [vmem:[#allocation101_spill] sm:$0xff] }
 0x5e8   : > { %v7975_v51 = vadd.f32 %v7847_v48, %v14112_v23  ;;  %8557 = vst [vmem:[%s14257_s23 + $0x140] sm:$0xff] %v9345_v57  ;;  %8562 = vst [vmem:[%s14257_s23 + $0x168] sm:$0xff] %v9350_v24  ;;  %v8090_v47 = vmax.f32 %v7962_v5, 0.0  ;;  %v7691_v46 = vmul.f32 %v15215_v3, %v14515_v15  ;;  %v7701_v60 = vmul.f32 %v13586_v8, %v14517_v25  ;;  %v15291_v15 = vld [vmem:[#allocation97_spill] sm:$0xff]  ;;  %v14605_v48 = vpop.f32.mrb[23].mxu0 }
 0x5e9   : > { %v8100_v62 = vmax.f32 %v7972_v38, 0.0  ;;  %v8093_v30 = vmax.f32 %v7965_v1, 0.0  ;;  %v7838_v23 = vadd.f32 %v15218_v18, %v7688_v12  ;;  %v7848_v29 = vadd.f32 %v15219_v59, %v7698_v22 }
 0x5ea   : > { %v8103_v42 = vmax.f32 %v7975_v51, 0.0  ;;  %v9347_v40 = vpack.c.bf16 %v8090_v47, %v8089_v43  ;;  %v7841_v63 = vadd.f32 %v13544_v53, %v7691_v46  ;;  %v7851_v54 = vadd.f32 %v13588_v39, %v7701_v60 }
 0x5eb   : > { %v9352_v41 = vpack.c.bf16 %v8100_v62, %v8099_v36  ;;  %v7966_v49 = vadd.f32 %v7838_v23, %v15291_v15  ;;  %v7976_v25 = vadd.f32 %v7848_v29, %v14120_v17  ;;  %v7692_v32 = vmul.f32 %v13596_v10, %v14521_v16  ;;  %v14601_v16 = vpop.f32.mrb[22].mxu1 }
 0x5ec   : > { %v7702_v19 = vmul.f32 %v13628_v11, %v14523_v34  ;;  %8559 = vst [vmem:[%s14257_s23 + $0x150] sm:$0xff] %v9347_v40  ;;  %v7969_v52 = vadd.f32 %v7841_v63, %v15292_v20  ;;  %v7979_v26 = vadd.f32 %v7851_v54, %v14128_v28  ;;  %v7695_v50 = vmul.f32 %v15215_v3, %v7345_v55  ;;  %v14607_v57 = vpop.f32.mrb[23].mxu1  ;;  %v15295_v54 = vld [vmem:[#allocation108_spill] sm:$0xff] }
 0x5ed   : > { %8564 = vst [vmem:[%s14257_s23 + $0x178] sm:$0xff] %v9352_v41  ;;  %v7705_v17 = vmul.f32 %v13586_v8, %v7548_v58  ;;  %v8094_v43 = vmax.f32 %v7966_v49, 0.0  ;;  %v8104_v34 = vmax.f32 %v7976_v25, 0.0  ;;  %v7842_v36 = vadd.f32 %v15218_v18, %v7692_v32  ;;  %v15294_v41 = vld [vmem:[#allocation103_spill] sm:$0xff]  ;;  %v15296_v20 = vld [vmem:[#allocation104_spill] sm:$0xff] }
 0x5ee   : > { %v7852_v7 = vadd.f32 %v15219_v59, %v7702_v19  ;;  %v8097_v28 = vmax.f32 %v7969_v52, 0.0  ;;  %v8107_v55 = vmax.f32 %v7979_v26, 0.0  ;;  %v7845_v58 = vadd.f32 %v13544_v53, %v7695_v50  ;;  %v15297_v26 = vld [vmem:[#allocation110_spill] sm:$0xff] }
 0x5ef   : > { %v7855_v24 = vadd.f32 %v13588_v39, %v7705_v17  ;;  %v9349_v6 = vpack.c.bf16 %v8094_v43, %v8093_v30  ;;  %v9354_v5 = vpack.c.bf16 %v8104_v34, %v8103_v42  ;;  %v7970_v38 = vadd.f32 %v7842_v36, %v15293_v14  ;;  %v14627_v30 = vpop.f32.mrb[24].mxu0 }
 0x5f0   : > { %v7980_v37 = vadd.f32 %v7852_v7, %v14134_v45  ;;  %v7973_v1 = vadd.f32 %v7845_v58, %v14109_v9  ;;  %v7696_v12 = vmul.f32 %v13596_v10, %v14549_v13  ;;  %v7706_v22 = vmul.f32 %v13628_v11, %v14551_v61  ;;  %v14629_v61 = vpop.f32.mrb[24].mxu1  ;;  %v14633_v40 = vpop.f32.mrb[25].mxu0 }
 0x5f1   : > { %v7983_v51 = vadd.f32 %v7855_v24, %v14140_v35  ;;  %8561 = vst [vmem:[%s14257_s23 + $0x160] sm:$0xff] %v9349_v6  ;;  %8566 = vst [vmem:[%s14257_s23 + $0x188] sm:$0xff] %v9354_v5  ;;  %v8098_v47 = vmax.f32 %v7970_v38, 0.0  ;;  %v7699_v46 = vmul.f32 %v15215_v3, %v14555_v31  ;;  %v7709_v45 = vmul.f32 %v13586_v8, %v14557_v2  ;;  %v14635_v2 = vpop.f32.mrb[25].mxu1  ;;  %v14643_v32 = vpop.f32.mrb[26].mxu0  ;;  %v15298_v5 = vld [vmem:[#allocation105_spill] sm:$0xff] }
 0x5f2   : > { %v8108_v62 = vmax.f32 %v7980_v37, 0.0  ;;  %v8101_v60 = vmax.f32 %v7973_v1, 0.0  ;;  %v7846_v35 = vadd.f32 %v15218_v18, %v7696_v12  ;;  %v7856_v13 = vadd.f32 %v15219_v59, %v7706_v22  ;;  %v14645_v19 = vpop.f32.mrb[26].mxu1  ;;  %v14653_v34 = vpop.f32.mrb[27].mxu0  ;;  %v15299_v38 = vld [vmem:[#allocation112_spill] sm:$0xff]  ;;  %v15300_v1 = vld [vmem:[#allocation106_spill] sm:$0xff] }
 0x5f3   : > { %v8111_v9 = vmax.f32 %v7983_v51, 0.0  ;;  %v9351_v42 = vpack.c.bf16 %v8098_v47, %v8097_v28  ;;  %v7849_v29 = vadd.f32 %v13544_v53, %v7699_v46  ;;  %v7859_v31 = vadd.f32 %v13588_v39, %v7709_v45  ;;  %v15301_v12 = vld [vmem:[#allocation114_spill] sm:$0xff] }
 0x5f4   : > { %v9356_v23 = vpack.c.bf16 %v8108_v62, %v8107_v55  ;;  %v7974_v63 = vadd.f32 %v7846_v35, %v15294_v41  ;;  %v7984_v15 = vadd.f32 %v7856_v13, %v15295_v54  ;;  %v7700_v49 = vmul.f32 %v13596_v10, %v14561_v44  ;;  %v14655_v44 = vpop.f32.mrb[27].mxu1  ;;  %v14675_v35 = vpop.f32.mrb[28].mxu0 }
 0x5f5   : > { %v7710_v25 = vmul.f32 %v13628_v11, %v14563_v56  ;;  %8563 = vst [vmem:[%s14257_s23 + $0x170] sm:$0xff] %v9351_v42  ;;  %v7977_v52 = vadd.f32 %v7849_v29, %v15296_v20  ;;  %v7987_v50 = vadd.f32 %v7859_v31, %v15297_v26  ;;  %v7703_v17 = vmul.f32 %v15215_v3, %v7355_v4  ;;  %v15304_v26 = vld [vmem:[#allocation109_spill] sm:$0xff] }
 0x5f6   : > { %8568 = vst [vmem:[%s14257_s23 + $0x198] sm:$0xff] %v9356_v23  ;;  %v7713_v43 = vmul.f32 %v13586_v8, %v7558_v0  ;;  %v8102_v36 = vmax.f32 %v7974_v63, 0.0  ;;  %v8112_v56 = vmax.f32 %v7984_v15, 0.0  ;;  %v7850_v7 = vadd.f32 %v15218_v18, %v7700_v49  ;;  %v7377_v23 = vpop.f32.mrb[29].mxu0  ;;  %v15303_v15 = vld [vmem:[#allocation116_spill] sm:$0xff] }
 0x5f7   : > { %v7860_v28 = vadd.f32 %v15219_v59, %v7710_v25  ;;  %v8105_v55 = vmax.f32 %v7977_v52, 0.0  ;;  %v8115_v58 = vmax.f32 %v7987_v50, 0.0  ;;  %v7853_v24 = vadd.f32 %v13544_v53, %v7703_v17  ;;  %v14681_v63 = vpop.f32.mrb[30].mxu0  ;;  %v15305_v17 = vld [vmem:[#allocation118_spill] sm:$0xff] }
 0x5f8   : > { %v7863_v4 = vadd.f32 %v13588_v39, %v7713_v43  ;;  %v9353_v6 = vpack.c.bf16 %v8102_v36, %v8101_v60  ;;  %v9358_v0 = vpack.c.bf16 %v8112_v56, %v8111_v9  ;;  %v7978_v14 = vadd.f32 %v7850_v7, %v15298_v5  ;;  %v14689_v52 = vpop.f32.mrb[31].mxu0 }
 0x5f9   : > { %v7988_v37 = vadd.f32 %v7860_v28, %v15299_v38  ;;  %v7981_v51 = vadd.f32 %v7853_v24, %v15300_v1  ;;  %v7704_v47 = vmul.f32 %v13596_v10, %v14589_v21  ;;  %v7714_v62 = vmul.f32 %v13628_v11, %v14591_v33  ;;  %v15308_v38 = vld [vmem:[#allocation113_spill] sm:$0xff]  ;;  %v15309_v1 = vld [vmem:[#allocation122_spill] sm:$0xff] }
 0x5fa   : > { %v7991_v22 = vadd.f32 %v7863_v4, %v15301_v12  ;;  %8565 = vst [vmem:[%s14257_s23 + $0x180] sm:$0xff] %v9353_v6  ;;  %8570 = vst [vmem:[%s14257_s23 + $0x1a8] sm:$0xff] %v9358_v0  ;;  %v8106_v46 = vmax.f32 %v7978_v14, 0.0  ;;  %v7707_v60 = vmul.f32 %v15215_v3, %v14599_v27  ;;  %v7717_v9 = vmul.f32 %v13586_v8, %v14601_v16  ;;  %v15302_v16 = vld [vmem:[#allocation107_spill] sm:$0xff]  ;;  %v15307_v14 = vld [vmem:[#allocation120_spill] sm:$0xff] }
 0x5fb   : > { %v8116_v45 = vmax.f32 %v7988_v37, 0.0  ;;  %v8109_v13 = vmax.f32 %v7981_v51, 0.0  ;;  %v7854_v21 = vadd.f32 %v15218_v18, %v7704_v47  ;;  %v7864_v33 = vadd.f32 %v15219_v59, %v7714_v62  ;;  %v7418_v47 = vpop.f32.mrb[32].mxu0 }
 0x5fc   : > { %v8119_v42 = vmax.f32 %v7991_v22, 0.0  ;;  %v9355_v29 = vpack.c.bf16 %v8106_v46, %v8105_v55  ;;  %v7857_v41 = vadd.f32 %v13544_v53, %v7707_v60  ;;  %v7867_v27 = vadd.f32 %v13588_v39, %v7717_v9  ;;  %v7420_v9 = vpop.f32.mrb[33].mxu0 }
 0x5fd   : > { %v9360_v31 = vpack.c.bf16 %v8116_v45, %v8115_v58  ;;  %v7982_v54 = vadd.f32 %v7854_v21, %v15302_v16  ;;  %v7992_v49 = vadd.f32 %v7864_v33, %v15303_v15  ;;  %v7708_v25 = vmul.f32 %v13596_v10, %v14605_v48  ;;  %v7422_v21 = vpop.f32.mrb[34].mxu0 }
 0x5fe   : > { %v7718_v20 = vmul.f32 %v13628_v11, %v14607_v57  ;;  %8567 = vst [vmem:[%s14257_s23 + $0x190] sm:$0xff] %v9355_v29  ;;  %v7985_v50 = vadd.f32 %v7857_v41, %v15304_v26  ;;  %v7995_v43 = vadd.f32 %v7867_v27, %v15305_v17  ;;  %v7711_v36 = vmul.f32 %v15215_v3, %v14627_v30  ;;  %v15306_v30 = vld [vmem:[#allocation111_spill] sm:$0xff]  ;;  %v15313_v26 = vld [vmem:[#allocation126_spill] sm:$0xff] }
 0x5ff   : > { %8572 = vst [vmem:[%s14257_s23 + $0x1b8] sm:$0xff] %v9360_v31  ;;  %v7721_v56 = vmul.f32 %v13586_v8, %v14629_v61  ;;  %v8110_v7 = vmax.f32 %v7982_v54, 0.0  ;;  %v8120_v28 = vmax.f32 %v7992_v49, 0.0  ;;  %v7858_v48 = vadd.f32 %v15218_v18, %v7708_v25  ;;  %v15310_v27 = vld [vmem:[#allocation115_spill] sm:$0xff]  ;;  %v15312_v25 = vld [vmem:[#allocation117_spill] sm:$0xff] }
 0x600   : > { %v7868_v57 = vadd.f32 %v15219_v59, %v7718_v20  ;;  %v8113_v55 = vmax.f32 %v7985_v50, 0.0  ;;  %v8123_v58 = vmax.f32 %v7995_v43, 0.0  ;;  %v7861_v24 = vadd.f32 %v13544_v53, %v7711_v36 }
 0x601   : > { %v7871_v4 = vadd.f32 %v13588_v39, %v7721_v56  ;;  %v9357_v6 = vpack.c.bf16 %v8110_v7, %v8109_v13  ;;  %v9362_v0 = vpack.c.bf16 %v8120_v28, %v8119_v42  ;;  %v7986_v5 = vadd.f32 %v7858_v48, %v15306_v30  ;;  %v15317_v30 = vld [vmem:[#allocation123_spill] sm:$0xff] }
 0x602   : > { %v7996_v61 = vadd.f32 %v7868_v57, %v15307_v14  ;;  %v7989_v37 = vadd.f32 %v7861_v24, %v15308_v38  ;;  %v7712_v12 = vmul.f32 %v13596_v10, %v14633_v40  ;;  %v7722_v22 = vmul.f32 %v13628_v11, %v14635_v2  ;;  %v15314_v24 = vld [vmem:[#allocation119_spill] sm:$0xff] }
 0x603   : > { %v7999_v51 = vadd.f32 %v7871_v4, %v15309_v1  ;;  %8569 = vst [vmem:[%s14257_s23 + $0x1a0] sm:$0xff] %v9357_v6  ;;  %8574 = vst [vmem:[%s14257_s23 + $0x1c8] sm:$0xff] %v9362_v0  ;;  %v8114_v62 = vmax.f32 %v7986_v5, 0.0  ;;  %v7715_v45 = vmul.f32 %v15215_v3, %v14643_v32  ;;  %v7725_v60 = vmul.f32 %v13586_v8, %v14645_v19  ;;  %v7424_v32 = vpop.f32.mrb[35].mxu0  ;;  %v15311_v19 = vld [vmem:[#allocation124_spill] sm:$0xff]  ;;  %v15315_v4 = vld [vmem:[#allocation127_spill] sm:$0xff] }
 0x604   : > { %v8124_v46 = vmax.f32 %v7996_v61, 0.0  ;;  %v8117_v13 = vmax.f32 %v7989_v37, 0.0  ;;  %v7862_v40 = vadd.f32 %v15218_v18, %v7712_v12  ;;  %v7872_v2 = vadd.f32 %v15219_v59, %v7722_v22  ;;  %v15316_v6 = vld [vmem:[#allocation121_spill] sm:$0xff] }
 0x605   : > { %v8127_v42 = vmax.f32 %v7999_v51, 0.0  ;;  %v9359_v33 = vpack.c.bf16 %v8114_v62, %v8113_v55  ;;  %v7865_v31 = vadd.f32 %v13544_v53, %v7715_v45  ;;  %v7875_v41 = vadd.f32 %v13588_v39, %v7725_v60  ;;  %v15318_v60 = vld [vmem:[#allocation125_spill] sm:$0xff] }
 0x606   : > { %v9364_v29 = vpack.c.bf16 %v8124_v46, %v8123_v58  ;;  %v7990_v16 = vadd.f32 %v7862_v40, %v15310_v27  ;;  %v8000_v54 = vadd.f32 %v7872_v2, %v15311_v19  ;;  %v7716_v15 = vmul.f32 %v13596_v10, %v14653_v34  ;;  %v15320_v40 = vld [vmem:[#allocation40_spill] sm:$0xff]  ;;  %v15321_v2 = vld [vmem:[#allocation39_spill] sm:$0xff]  ;;  %v15325_v19 = vld [vmem:[#allocation65_spill] sm:$0xff] }
 0x607   : > { %v7726_v49 = vmul.f32 %v13628_v11, %v14655_v44  ;;  %8571 = vst [vmem:[%s14257_s23 + $0x1b0] sm:$0xff] %v9359_v33  ;;  %v7993_v20 = vadd.f32 %v7865_v31, %v15312_v25  ;;  %v8003_v50 = vadd.f32 %v7875_v41, %v15313_v26  ;;  %v7719_v17 = vmul.f32 %v15215_v3, %v14675_v35  ;;  %v15323_v31 = vld [vmem:[#allocation55_spill] sm:$0xff] }
 0x608   : > { %8576 = vst [vmem:[%s14257_s23 + $0x1d8] sm:$0xff] %v9364_v29  ;;  %v7720_v43 = vmul.f32 %v13596_v10, %v7377_v23  ;;  %v8118_v36 = vmax.f32 %v7990_v16, 0.0  ;;  %v8128_v56 = vmax.f32 %v8000_v54, 0.0  ;;  %v7866_v34 = vadd.f32 %v15218_v18, %v7716_v15  ;;  %v15322_v29 = vld [vmem:[#allocation42_spill] sm:$0xff] }
 0x609   : > { %v7876_v7 = vadd.f32 %v15219_v59, %v7726_v49  ;;  %v8121_v44 = vmax.f32 %v7993_v20, 0.0  ;;  %v8131_v28 = vmax.f32 %v8003_v50, 0.0  ;;  %v7869_v48 = vadd.f32 %v13544_v53, %v7719_v17 }
 0x60a   : > { %v7870_v57 = vadd.f32 %v15218_v18, %v7720_v43  ;;  %v9361_v55 = vpack.c.bf16 %v8118_v36, %v8117_v13  ;;  %v9366_v58 = vpack.c.bf16 %v8128_v56, %v8127_v42  ;;  %v7994_v35 = vadd.f32 %v7866_v34, %v15314_v24  ;;  %v15319_v42 = vld [vmem:[#allocation21_spill] sm:$0xff] }
 0x60b   : > { %v8004_v23 = vadd.f32 %v7876_v7, %v15315_v4  ;;  %v7997_v0 = vadd.f32 %v7869_v48, %v15316_v6  ;;  %v7723_v14 = vmul.f32 %v15215_v3, %v14681_v63  ;;  %v7724_v61 = vmul.f32 %v13596_v10, %v14689_v52 }
 0x60c   : > { %v7998_v5 = vadd.f32 %v7870_v57, %v15317_v30  ;;  %8573 = vst [vmem:[%s14257_s23 + $0x1c0] sm:$0xff] %v9361_v55  ;;  %8578 = vst [vmem:[%s14257_s23 + $0x1e8] sm:$0xff] %v9366_v58  ;;  %v8122_v38 = vmax.f32 %v7994_v35, 0.0  ;;  %v7601_v1 = vmul.f32 %v13586_v8, %v7418_v47  ;;  %v7602_v51 = vmul.f32 %v13628_v11, %v7420_v9 }
 0x60d   : > { %v8132_v37 = vmax.f32 %v8004_v23, 0.0  ;;  %v8125_v12 = vmax.f32 %v7997_v0, 0.0  ;;  %v7873_v62 = vadd.f32 %v13544_v53, %v7723_v14  ;;  %v7874_v3 = vadd.f32 %v15218_v18, %v7724_v61 }
 0x60e   : > { %v8126_v22 = vmax.f32 %v7998_v5, 0.0  ;;  %v9363_v63 = vpack.c.bf16 %v8122_v38, %v8121_v44  ;;  %v7751_v10 = vadd.f32 %v13588_v39, %v7601_v1  ;;  %v7752_v52 = vadd.f32 %v15219_v59, %v7602_v51 }
 0x60f   : > { %v9368_v46 = vpack.c.bf16 %v8132_v37, %v8131_v28  ;;  %v8001_v13 = vadd.f32 %v7873_v62, %v15318_v60  ;;  %v8002_v47 = vadd.f32 %v7874_v3, %v15319_v42  ;;  %v7605_v9 = vmul.f32 %v13586_v8, %v7422_v21  ;;  %v15324_v21 = vld [vmem:[#allocation41_spill] sm:$0xff] }
 0x610   : > { %v9365_v45 = vpack.c.bf16 %v8126_v22, %v8125_v12  ;;  %8575 = vst [vmem:[%s14257_s23 + $0x1d0] sm:$0xff] %v9363_v63  ;;  %v7879_v53 = vadd.f32 %v7751_v10, %v15320_v40  ;;  %v7880_v18 = vadd.f32 %v7752_v52, %v15321_v2  ;;  %v7606_v33 = vmul.f32 %v13628_v11, %v7424_v32 }
 0x611   : > { %8580 = vst [vmem:[%s14257_s23 + $0x1f8] sm:$0xff] %v9368_v46  ;;  %v6973_v41 = vadd.f32 %v15323_v31, %v15322_v29  ;;  %v8129_v27 = vmax.f32 %v8001_v13, 0.0  ;;  %v8130_v16 = vmax.f32 %v8002_v47, 0.0  ;;  %v7755_v8 = vadd.f32 %v13588_v39, %v7605_v9 }
 0x612   : > { %8577 = vst [vmem:[%s14257_s23 + $0x1e0] sm:$0xff] %v9365_v45  ;;  %v6974_v54 = vadd.f32 %v15325_v19, %v15324_v21  ;;  %v8007_v15 = vmax.f32 %v7879_v53, 0.0  ;;  %v8008_v49 = vmax.f32 %v7880_v18, 0.0  ;;  %v7756_v25 = vadd.f32 %v15219_v59, %v7606_v33 }
 0x613   : > { %v9367_v11 = vpack.c.bf16 %v8130_v16, %v8129_v27  ;;  %v7883_v32 = vadd.f32 %v7755_v8, %v6973_v41 }
 0x614   : > { %v9306_v20 = vpack.c.bf16 %v8008_v49, %v8007_v15  ;;  %v7884_v26 = vadd.f32 %v7756_v25, %v6974_v54 }
 0x615   : > { %8579 = vst [vmem:[%s14257_s23 + $0x1f0] sm:$0xff] %v9367_v11  ;;  %v8011_v50 = vmax.f32 %v7883_v32, 0.0 }
 0x616   : > { %8518 = vst [vmem:[%s14257_s23 + $0x8] sm:$0xff] %v9306_v20  ;;  %v8012_v39 = vmax.f32 %v7884_v26, 0.0 }
 0x618   : > { %v9308_v59 = vpack.c.bf16 %v8012_v39, %v8011_v50 }
 0x61a   : > { %8520 = vst [vmem:[%s14257_s23 + $0x18] sm:$0xff] %v9308_v59 }
 0x61b   : > { %10502 = shalt.err (!%p10499_p8)
}
 0x61c   : > { %s10503_s30 = scalar_lea.hbm %s14776_s8, 8192  ;;  %s10507_s20 = scalar_lea.hbm %s15326_s17, 16384 }
 0x61d   : > { %p10504_p6 = scmp.ne.s32.totalorder %s14776_s8, %s10503_s30  ;;  %p10508_p3 = scmp.lt.u32.totalorder %s14776_s8, %s15326_s17 }
 0x61e   : > { %p10509_p5 = scmp.lt.u32.totalorder %s10507_s20, %s10503_s30  ;;  %p10511_p7 = scmp.lt.u32.totalorder %s10503_s30, %s14776_s8 }
 0x61f   : > { %p10505_p10 = pnand %p10504_p6, %p15327_p4 }
 0x620   : > { %p10510_p9 = por %p10509_p5, %p10508_p3 }
 0x621   : > { %p10506_p11 = pneg %p10505_p10 }
 0x622   : > { %p10512_p12 = por %p10511_p7, %p10510_p9 }
 0x624   : > { %p10513_p1 = pnand %p10512_p12, %p10506_p11 }
 0x626   : > { %10516 = shalt.err (!%p10513_p1)
}
 0x627   : > { %s10581_s15 = smov 256   ;;  %s10582_s19 = smov 16  }
 0x628   : > { %9981 = dma.vmem_to_hbm [thread:$0]  (%p15327_p4), %s14778_s22, 8192, %s14776_s8, %s8582_s21, %s10581_s15, %s10581_s15, %s10582_s19  }
 0x629 PF: > { %s8611_s12 = sand.u32 1, %s10555_s25   ;;  %p15328_p13 = scmp.ne.s32.totalorder %s14867_s29, 0 }
 0x62a   : > { %p15329_p0 = scmp.ge.s32.totalorder %s10567_s28, 2  ;;  %s8612_s30 = scalar_lea.sflag [#allocation5], %s8611_s12 }
 0x62c   : > { %p10004_p2 = pnand %p15329_p0, %p15328_p13 }
 0x62e   : > { %10550 = dma.done.wait (!%p10004_p2), %s8612_s30, 8192  }
 0x62f   : > { %10552 = vsyncadd (!%p10004_p2), %s8612_s30, 4294959104  ;;  %p29_p8 = scmp.ge.s32.totalorder %s10818_s18, 4   ;;  %s15330_s25 = smov %s10559_s26 }
 0x630   : > { %s15331_s26 = smov %s10563_s27  ;;  %s15332_s27 = smov %s10830_s24 }
 0x631   : > { %s15333_s28 = smov %s10818_s18  ;;  %31 = sbr.rel (!%p29_p8) target bundleno = 14 (0xe), region = 140 }
 0x638   :  { %8617 = vsyncpa [#allocation4], 1 }
 0x639   :  { %8619 = vsyncpa [#allocation4 + $0x1], 1 }
 0x63a   :  { %8620 = vsyncpa [#allocation7], 1 }
 0x63b   :  { %8621 = vsyncpa [#allocation10], 1 }
 0x63c   :  { %8622 = vsyncpa [#allocation13], 1 }
 0x63d   :  { %8623 = vsyncpa [#allocation5], 1 }
 0x63e   :  { %8625 = vsyncpa [#allocation5 + $0x1], 1 }

</bundles_post_ra>
